<compile_context>
chip_gen: v7x
topology: tpu7x:2x2x1
jax: 0.10.0
libtpu: 0.0.40
codegen_flags: <defaults>
</compile_context>

<pallas_src>
import functools

import jax
import jax.numpy as jnp
from jax.experimental import pallas as pl
from jax.experimental.pallas import tpu as pltpu

nc = 3        # output image channels
ngf = 64      # generator feature maps
nz = 100      # latent dim
K = 4         # conv-transpose kernel size
EPS = 1e-5    # BatchNorm eps (PyTorch default)

LANE = 128                         # lane width
M_ALIGN = 16                       # bf16 sublane packing for matmul M dims
SUB_ALIGN = 16                     # sublane pad for the small-co transposed LHS
BLOCK_BUDGET = 4 * 1024 * 1024     # per-operand VMEM block budget (bytes)
VMEM_LIMIT = 32 * 1024 * 1024      # explicit scoped-VMEM limit (v5e/v6e/v7x safe)

CHANS = [nz, ngf * 8, ngf * 4, ngf * 2, ngf, nc]


# ----------------------------- helpers (glue) -----------------------------

def _pad_axis(x, mult, axis):
    p = (-x.shape[axis]) % mult
    if p == 0:
        return x
    pads = [(0, 0)] * x.ndim
    pads[axis] = (0, p)
    return jnp.pad(x, pads)


def _pad_vec(v, n):
    return jnp.pad(v, (0, n - v.shape[0]))


def _pick_tile(dim, align, unit_bytes, budget, min_splits=1):
    """Largest tile t dividing `dim` (multiple of `align`) whose footprint
    t*unit_bytes fits `budget` and yields at least `min_splits` blocks.
    Halving search; padded dims here are powers-of-two-friendly."""
    t = dim
    while (t > align and t % 2 == 0 and (t // 2) % align == 0
           and (t * unit_bytes > budget or dim // t < min_splits)):
        t //= 2
    return t


# ----------------------- fused matmul Pallas kernels -----------------------

def _mm_kernel(a_ref, b_ref, o_ref, *, act):
    y = jnp.dot(a_ref[0], b_ref[0], preferred_element_type=jnp.float32)
    if act == "tanh":
        y = jnp.tanh(y)             # EUP slot: essentially free next to the matmul
    o_ref[0] = y.astype(o_ref.dtype)


def _mm_stats_kernel(a_ref, b_ref, o_ref, sum_ref, sq_ref):
    # grid = (phase, col-block j, row-block i); i innermost so the per-(phase, j)
    # stats blocks stay VMEM-resident and accumulate across row blocks.
    @pl.when(pl.program_id(2) == 0)
    def _():
        sum_ref[...] = jnp.zeros_like(sum_ref)
        sq_ref[...] = jnp.zeros_like(sq_ref)

    y = jnp.dot(a_ref[0], b_ref[0], preferred_element_type=jnp.float32)
    o_ref[0] = y.astype(o_ref.dtype)                             # bf16 activation
    sum_ref[...] += jnp.sum(y, axis=0, keepdims=True)[None]      # f32 pre-cast
    sq_ref[...] += jnp.sum(y * y, axis=0, keepdims=True)[None]


def _choose_mm_tiles(m, kd, n, out_bytes, p):
    # RHS block (kd x tn, bf16, double-buffered) dominates; pick tn first and
    # force >= 2 column blocks when the phase axis cannot feed v7x's 2 cores.
    tn = _pick_tile(n, LANE, kd * 2 * 2, BLOCK_BUDGET,
                    min_splits=1 if p > 1 else 2)
    per_row = (kd * 2 + tn * out_bytes) * 2      # LHS + output, double-buffered
    tm = _pick_tile(m, 8, per_row, BLOCK_BUDGET)
    return tm, tn


def pallas_matmul(a, b, *, act=None, with_stats=False, out_dtype=jnp.float32):
    """Batched (per-phase) full-K matmul with optional fused tanh / column stats.

    a: (P, M, Kd) bf16, b: (P, Kd, N) bf16; M % 8 == 0, Kd % 128 == 0,
    N % 128 == 0, padding exactly zero.  Returns y[P,M,N] in `out_dtype`
    (+ colsum/colsq[P,1,N] f32 when with_stats).
    """
    p, m, kd = a.shape
    _, _, n = b.shape
    tm, tn = _choose_mm_tiles(m, kd, n, jnp.dtype(out_dtype).itemsize, p)
    grid = (p, n // tn, m // tm)
    in_specs = [pl.BlockSpec((1, tm, kd), lambda pp, j, i: (pp, i, 0)),
                pl.BlockSpec((1, kd, tn), lambda pp, j, i: (pp, 0, j))]
    cparams = pltpu.CompilerParams(
        dimension_semantics=("parallel", "parallel", "arbitrary"),
        vmem_limit_bytes=VMEM_LIMIT)
    if with_stats:
        return pl.pallas_call(
            _mm_stats_kernel,
            out_shape=(jax.ShapeDtypeStruct((p, m, n), out_dtype),
                       jax.ShapeDtypeStruct((p, 1, n), jnp.float32),
                       jax.ShapeDtypeStruct((p, 1, n), jnp.float32)),
            grid_spec=pltpu.PrefetchScalarGridSpec(
                num_scalar_prefetch=0, grid=grid, in_specs=in_specs,
                out_specs=(pl.BlockSpec((1, tm, tn), lambda pp, j, i: (pp, i, j)),
                           pl.BlockSpec((1, 1, tn), lambda pp, j, i: (pp, 0, j)),
                           pl.BlockSpec((1, 1, tn), lambda pp, j, i: (pp, 0, j)))),
            compiler_params=cparams,
        )(a, b)
    return pl.pallas_call(
        functools.partial(_mm_kernel, act=act),
        out_shape=jax.ShapeDtypeStruct((p, m, n), out_dtype),
        grid_spec=pltpu.PrefetchScalarGridSpec(
            num_scalar_prefetch=0, grid=grid, in_specs=in_specs,
            out_specs=pl.BlockSpec((1, tm, tn), lambda pp, j, i: (pp, i, j))),
        compiler_params=cparams,
    )(a, b)


# ----------------------- fused BN scale/shift + ReLU -----------------------

def _bn_relu_kernel(y_ref, s_ref, b_ref, o_ref):
    # bf16 in / bf16 out, affine + ReLU in f32 (v5e has no bf16 VPU path).
    y = y_ref[...].astype(jnp.float32)
    o_ref[...] = jnp.maximum(y * s_ref[...] + b_ref[...], 0.0).astype(o_ref.dtype)


def pallas_bn_relu(y, scale, shift, out_dtype=jnp.bfloat16):
    m, n = y.shape
    per_row = (n * (y.dtype.itemsize + jnp.dtype(out_dtype).itemsize) + 8 * n) * 2
    tm = _pick_tile(m, 8, per_row, BLOCK_BUDGET, min_splits=2)   # >=2 blocks (v7x)
    grid = (m // tm, 1)
    return pl.pallas_call(
        _bn_relu_kernel,
        out_shape=jax.ShapeDtypeStruct((m, n), out_dtype),
        grid_spec=pltpu.PrefetchScalarGridSpec(
            num_scalar_prefetch=0, grid=grid,
            in_specs=[pl.BlockSpec((tm, n), lambda i, j: (i, j)),
                      pl.BlockSpec((1, n), lambda i, j: (0, j)),
                      pl.BlockSpec((1, n), lambda i, j: (0, j))],
            out_specs=pl.BlockSpec((tm, n), lambda i, j: (i, j))),
        compiler_params=pltpu.CompilerParams(
            dimension_semantics=("parallel", "parallel"),
            vmem_limit_bytes=VMEM_LIMIT),
    )(y, scale.reshape(1, -1), shift.reshape(1, -1))


# ------------------------ layer lowering (JAX glue) ------------------------

def _bn_scale_shift(colsum, colsq, count, gamma, beta, npad):
    s = jnp.sum(colsum, axis=(0, 1))
    q = jnp.sum(colsq, axis=(0, 1))
    mean = s / count
    var = q / count - mean * mean          # biased variance (PyTorch train mode)
    scale = _pad_vec(gamma, npad) * jax.lax.rsqrt(var + EPS)
    shift = _pad_vec(beta, npad) - mean * scale
    return scale, shift


def _phase_im2col(x_nhwc):
    """Sub-pixel (phase) decomposition of ConvTranspose2d(k=4, s=2, p=1):
    output phase (r, s) is a stride-1 2x2 conv of the 1-padded input with the
    sub-kernel w[:, :, 3-r-2*dr, 3-s-2*ds]; rows = (n, h, w), cols = (tap, ci)."""
    n, h, wd, ci = x_nhwc.shape
    xp = jnp.pad(x_nhwc.astype(jnp.bfloat16), ((0, 0), (1, 1), (1, 1), (0, 0)))
    a_list = []
    for r in range(2):
        for s in range(2):
            taps = [xp[:, r + dr:r + dr + h, s + ds:s + ds + wd, :]
                    for dr in range(2) for ds in range(2)]
            a_list.append(jnp.stack(taps, axis=3).reshape(n * h * wd, 4 * ci))
    a = jnp.stack(a_list, 0)                                     # (4, M, 4ci)
    return _pad_axis(_pad_axis(a, LANE, 2), M_ALIGN, 1)


def _phase_to_nhwc(y, n, h, wd, co):
    """Interleave the 4 phase outputs (pixel shuffle) back to NHWC."""
    y = y[:, :n * h * wd, :co].reshape(2, 2, n, h, wd, co)
    return jnp.transpose(y, (2, 3, 0, 4, 1, 5)).reshape(n, 2 * h, 2 * wd, co)


def layer0_bn_relu(x_nchw, b0, gamma, beta):
    """ConvTranspose2d(nz, 8*ngf, 4, 1, 0) on a 1x1 input, + train BN + ReLU."""
    n = x_nchw.shape[0]
    co = CHANS[1]
    a = x_nchw.reshape(n, nz).astype(jnp.bfloat16)
    a = _pad_axis(_pad_axis(a, LANE, 1), M_ALIGN, 0)[None]       # (1, Mp, 128)
    y, cs, cq = pallas_matmul(a, b0, with_stats=True, out_dtype=jnp.bfloat16)
    npad = y.shape[2]

    # fold the 16 spatial column groups into per-channel BN stats
    s16 = jnp.sum(cs, axis=(0, 1))[:K * K * co].reshape(K * K, co).sum(0)
    q16 = jnp.sum(cq, axis=(0, 1))[:K * K * co].reshape(K * K, co).sum(0)
    count = n * K * K
    mean = s16 / count
    var = q16 / count - mean * mean
    scale = gamma * jax.lax.rsqrt(var + EPS)
    shift = beta - mean * scale
    scale_c = _pad_vec(jnp.tile(scale, K * K), npad)
    shift_c = _pad_vec(jnp.tile(shift, K * K), npad)

    out = pallas_bn_relu(y[0], scale_c, shift_c)                 # bf16
    return out[:n, :K * K * co].reshape(n, K, K, co)             # NHWC (N,4,4,co)


def layer_s2_bn_relu(x_nhwc, b, gamma, beta):
    """ConvTranspose2d(ci, co, 4, 2, 1) + train BN + ReLU via phase matmul."""
    n, h, wd, _ = x_nhwc.shape
    co = gamma.shape[0]
    a = _phase_im2col(x_nhwc)                                    # (4, Mp, 4ci)
    y, cs, cq = pallas_matmul(a, b, with_stats=True, out_dtype=jnp.bfloat16)
    p, mp, npad = y.shape
    scale, shift = _bn_scale_shift(cs, cq, n * 2 * h * 2 * wd, gamma, beta, npad)
    yr = pallas_bn_relu(y.reshape(p * mp, npad), scale, shift)   # bf16
    return _phase_to_nhwc(yr.reshape(p, mp, npad), n, h, wd, co)


def layer_final_tanh(x_nhwc, bT, co):
    """ConvTranspose2d(ngf, nc, 4, 2, 1) + Tanh, computed TRANSPOSED:
    y^T(P, co, M) = B^T(P, co, 4ci) @ A^T(P, 4ci, M) so the tiny co sits on
    sublanes and the big M = N*H*W axis is lane-dense; result is already
    channel-major for the NCHW output."""
    n, h, wd, ci = x_nhwc.shape
    xp = jnp.pad(x_nhwc.astype(jnp.bfloat16), ((0, 0), (1, 1), (1, 1), (0, 0)))
    xpt = jnp.transpose(xp, (3, 0, 1, 2))                        # (ci, n, h+2, w+2)
    at_list = []
    for r in range(2):
        for s in range(2):
            taps = [xpt[:, :, r + dr:r + dr + h, s + ds:s + ds + wd]
                    for dr in range(2) for ds in range(2)]
            at_list.append(jnp.stack(taps, 0).reshape(4 * ci, n * h * wd))
    at = jnp.stack(at_list, 0)                                   # (4, 4ci, M)
    at = _pad_axis(_pad_axis(at, LANE, 1), LANE, 2)

    yT = pallas_matmul(bT, at, act="tanh", with_stats=False,
                       out_dtype=jnp.float32)                    # (4, co_pad, Mp)
    yT = yT[:, :co, :n * h * wd].reshape(2, 2, co, n, h, wd)
    # (r, s, c, n, iy, ix) -> (n, c, iy, r, ix, s) -> NCHW
    return jnp.transpose(yT, (3, 2, 4, 0, 5, 1)).reshape(n, co, 2 * h, 2 * wd)


# ------------------------------- parameters -------------------------------

def init_params(key):
    keys = jax.random.split(key, 9)
    params = {}
    for i in range(5):
        params[f"w{i}"] = 0.02 * jax.random.normal(
            keys[i], (CHANS[i], CHANS[i + 1], K, K), jnp.float32)
    for i in range(4):
        params[f"gamma{i}"] = 1.0 + 0.02 * jax.random.normal(
            keys[5 + i], (CHANS[i + 1],), jnp.float32)
        params[f"beta{i}"] = jnp.zeros((CHANS[i + 1],), jnp.float32)
    return params


def prepack_weights(params):
    """One-time weight packing (transpose / sub-kernel build / zero-pad / bf16)."""
    packed = {}
    # layer 0: plain (nz, 4*4*co) matmul RHS; columns ordered (kh, kw, co).
    b0 = jnp.transpose(params["w0"], (0, 2, 3, 1)).reshape(nz, K * K * CHANS[1])
    packed["b0"] = _pad_axis(b0, LANE, 0).astype(jnp.bfloat16)[None]

    # layers 1-4: per-phase 2x2 sub-kernels -> (4, 4*ci, co) matmul RHS.
    for i in range(1, 5):
        w = params[f"w{i}"]
        ci, co = w.shape[0], w.shape[1]
        wt = jnp.transpose(w, (2, 3, 0, 1))                      # (kh, kw, ci, co)
        blist = []
        for r in range(2):
            for s in range(2):
                sub = jnp.stack(
                    [jnp.stack([wt[3 - r, 3 - s], wt[3 - r, 1 - s]], axis=0),
                     jnp.stack([wt[1 - r, 3 - s], wt[1 - r, 1 - s]], axis=0)],
                    axis=0)                                      # (dr, ds, ci, co)
                blist.append(sub.reshape(4 * ci, co))
        b = jnp.stack(blist, 0)                                  # (4, 4ci, co)
        if i < 4:
            packed[f"b{i}"] = _pad_axis(_pad_axis(b, LANE, 1),
                                        LANE, 2).astype(jnp.bfloat16)
        else:
            # final layer runs transposed: B^T = (4, co_pad, 4ci), co 3 -> 16.
            bT = jnp.transpose(b, (0, 2, 1))
            packed["b4T"] = _pad_axis(_pad_axis(bT, SUB_ALIGN, 1),
                                      LANE, 2).astype(jnp.bfloat16)

    for i in range(4):
        packed[f"gamma{i}"] = params[f"gamma{i}"].astype(jnp.float32)
        packed[f"beta{i}"] = params[f"beta{i}"].astype(jnp.float32)
    return packed


# ------------------------------- generator --------------------------------

def generator_forward(packed, x_nchw):
    # NCHW latent in (PyTorch interface); NHWC internally; NCHW image out.
    x = layer0_bn_relu(x_nchw.astype(jnp.float32),
                       packed["b0"], packed["gamma0"], packed["beta0"])
    for i in range(1, 4):
        x = layer_s2_bn_relu(x, packed[f"b{i}"],
                             packed[f"gamma{i}"], packed[f"beta{i}"])
    return layer_final_tanh(x, packed["b4T"], nc)


if __name__ == "__main__":
    key = jax.random.PRNGKey(0)
    pkey, xkey = jax.random.split(key)
    params = init_params(pkey)
    packed = prepack_weights(params)          # hoisted out of the forward pass

    # DCGAN generator input: latent vector as (N, nz, 1, 1)
    x = jax.random.normal(xkey, (2, nz, 1, 1), jnp.float32)

    fwd = jax.jit(generator_forward)
    out = jax.block_until_ready(fwd(packed, x))

    assert out.shape == (2, nc, 64, 64), out.shape
    assert bool(jnp.all(jnp.isfinite(out)))
    assert bool(jnp.all(jnp.abs(out) <= 1.0))  # tanh output range
    print("KERNEL_OK")
</pallas_src>

<mosaic_0001>
module attributes {stable_mosaic.version = 11 : i64} {
  func.func @_mm_stats_kernel(%arg0: i32, %arg1: i32, %arg2: i32, %arg3: memref<1x16x128xbf16, #tpu.memory_space<vmem>>, %arg4: memref<1x128x4096xbf16, #tpu.memory_space<vmem>>, %arg5: memref<1x16x4096xbf16, #tpu.memory_space<vmem>>, %arg6: memref<1x1x4096xf32, #tpu.memory_space<vmem>>, %arg7: memref<1x1x4096xf32, #tpu.memory_space<vmem>>) attributes {dimension_semantics = [#tpu.dimension_semantics<parallel>, #tpu.dimension_semantics<parallel>, #tpu.dimension_semantics<arbitrary>], iteration_bounds = array<i64: 1, 2, 1>, scalar_prefetch = 0 : i64, scratch_operands = 0 : i64, tpu.core_type = #tpu.core_type<tc>, window_params = [{transform_indices = @transform_0, window_bounds = array<i64: 1, 16, 128>}, {transform_indices = @transform_1, window_bounds = array<i64: 1, 128, 4096>}, {transform_indices = @transform_2, window_bounds = array<i64: 1, 16, 4096>}, {transform_indices = @transform_3, window_bounds = array<i64: 1, 1, 4096>}, {transform_indices = @transform_4, window_bounds = array<i64: 1, 1, 4096>}]} {
    %c0_i32 = arith.constant 0 : i32
    %0 = arith.cmpi eq, %arg2, %c0_i32 : i32
    %1 = arith.extui %0 : i1 to i32
    %c0_i32_0 = arith.constant 0 : i32
    %2 = arith.cmpi ne, %1, %c0_i32_0 : i32
    scf.if %2 {
      %cst_23 = arith.constant 0.000000e+00 : f32
      %25 = vector.broadcast %cst_23 : f32 to vector<1x1x4096xf32>
      %c0_24 = arith.constant 0 : index
      %c0_25 = arith.constant 0 : index
      %c0_26 = arith.constant 0 : index
      %26 = vector.load %arg6[%c0_24, %c0_25, %c0_26] : memref<1x1x4096xf32, #tpu.memory_space<vmem>>, vector<1x1x4096xf32>
      tpu.vector_store %arg6[%c0_24, %c0_25, %c0_26], %25 {strides = array<i32>} : memref<1x1x4096xf32, #tpu.memory_space<vmem>>, vector<1x1x4096xf32>,
      %cst_27 = arith.constant 0.000000e+00 : f32
      %27 = vector.broadcast %cst_27 : f32 to vector<1x1x4096xf32>
      %c0_28 = arith.constant 0 : index
      %c0_29 = arith.constant 0 : index
      %c0_30 = arith.constant 0 : index
      %28 = vector.load %arg7[%c0_28, %c0_29, %c0_30] : memref<1x1x4096xf32, #tpu.memory_space<vmem>>, vector<1x1x4096xf32>
      tpu.vector_store %arg7[%c0_28, %c0_29, %c0_30], %27 {strides = array<i32>} : memref<1x1x4096xf32, #tpu.memory_space<vmem>>, vector<1x1x4096xf32>,
    } else {
    }
    %c0 = arith.constant 0 : index
    %c0_1 = arith.constant 0 : index
    %c0_2 = arith.constant 0 : index
    %3 = vector.load %arg3[%c0, %c0_1, %c0_2] : memref<1x16x128xbf16, #tpu.memory_space<vmem>>, vector<1x16x128xbf16>
    %4 = vector.shape_cast %3 : vector<1x16x128xbf16> to vector<16x128xbf16>
    %c0_3 = arith.constant 0 : index
    %c0_4 = arith.constant 0 : index
    %c0_5 = arith.constant 0 : index
    %5 = vector.load %arg4[%c0_3, %c0_4, %c0_5] : memref<1x128x4096xbf16, #tpu.memory_space<vmem>>, vector<1x128x4096xbf16>
    %6 = vector.shape_cast %5 : vector<1x128x4096xbf16> to vector<128x4096xbf16>
    %cst = arith.constant dense<0.000000e+00> : vector<16x4096xf32>
    %7 = tpu.matmul %4, %6, %cst {dimension_numbers = #tpu.dot_dimension_numbers<[1], [0], [0], [1], [0, 0, 1, 1], [], []>} : vector<16x128xbf16>, vector<128x4096xbf16>, vector<16x4096xf32> -> vector<16x4096xf32>
    %8 = arith.truncf %7 : vector<16x4096xf32> to vector<16x4096xbf16>
    %c0_6 = arith.constant 0 : index
    %c0_7 = arith.constant 0 : index
    %c0_8 = arith.constant 0 : index
    %9 = vector.load %arg5[%c0_6, %c0_7, %c0_8] : memref<1x16x4096xbf16, #tpu.memory_space<vmem>>, vector<1x16x4096xbf16>
    %10 = vector.shape_cast %9 : vector<1x16x4096xbf16> to vector<16x4096xbf16>
    %11 = vector.shape_cast %8 : vector<16x4096xbf16> to vector<1x16x4096xbf16>
    tpu.vector_store %arg5[%c0_6, %c0_7, %c0_8], %11 {strides = array<i32>} : memref<1x16x4096xbf16, #tpu.memory_space<vmem>>, vector<1x16x4096xbf16>,
    %c0_9 = arith.constant 0 : index
    %c0_10 = arith.constant 0 : index
    %c0_11 = arith.constant 0 : index
    %12 = vector.load %arg6[%c0_9, %c0_10, %c0_11] : memref<1x1x4096xf32, #tpu.memory_space<vmem>>, vector<1x1x4096xf32>
    %cst_12 = arith.constant dense<0.000000e+00> : vector<4096xf32>
    %13 = vector.multi_reduction <add>, %7, %cst_12 [0] : vector<16x4096xf32> to vector<4096xf32>
    %14 = vector.shape_cast %13 : vector<4096xf32> to vector<1x4096xf32>
    %15 = vector.shape_cast %14 : vector<1x4096xf32> to vector<1x1x4096xf32>
    %16 = arith.addf %12, %15 : vector<1x1x4096xf32>
    %c0_13 = arith.constant 0 : index
    %c0_14 = arith.constant 0 : index
    %c0_15 = arith.constant 0 : index
    %17 = vector.load %arg6[%c0_13, %c0_14, %c0_15] : memref<1x1x4096xf32, #tpu.memory_space<vmem>>, vector<1x1x4096xf32>
    tpu.vector_store %arg6[%c0_13, %c0_14, %c0_15], %16 {strides = array<i32>} : memref<1x1x4096xf32, #tpu.memory_space<vmem>>, vector<1x1x4096xf32>,
    %c0_16 = arith.constant 0 : index
    %c0_17 = arith.constant 0 : index
    %c0_18 = arith.constant 0 : index
    %18 = vector.load %arg7[%c0_16, %c0_17, %c0_18] : memref<1x1x4096xf32, #tpu.memory_space<vmem>>, vector<1x1x4096xf32>
    %19 = arith.mulf %7, %7 : vector<16x4096xf32>
    %cst_19 = arith.constant dense<0.000000e+00> : vector<4096xf32>
    %20 = vector.multi_reduction <add>, %19, %cst_19 [0] : vector<16x4096xf32> to vector<4096xf32>
    %21 = vector.shape_cast %20 : vector<4096xf32> to vector<1x4096xf32>
    %22 = vector.shape_cast %21 : vector<1x4096xf32> to vector<1x1x4096xf32>
    %23 = arith.addf %18, %22 : vector<1x1x4096xf32>
    %c0_20 = arith.constant 0 : index
    %c0_21 = arith.constant 0 : index
    %c0_22 = arith.constant 0 : index
    %24 = vector.load %arg7[%c0_20, %c0_21, %c0_22] : memref<1x1x4096xf32, #tpu.memory_space<vmem>>, vector<1x1x4096xf32>
    tpu.vector_store %arg7[%c0_20, %c0_21, %c0_22], %23 {strides = array<i32>} : memref<1x1x4096xf32, #tpu.memory_space<vmem>>, vector<1x1x4096xf32>,
    return
  }
  func.func @transform_0(%arg0: i32, %arg1: i32, %arg2: i32) -> (i32, i32, i32) {
    %c0_i32 = arith.constant 0 : i32
    %c0_i32_0 = arith.constant 0 : i32
    return %arg0, %arg2, %c0_i32 : i32, i32, i32
  }
  func.func @transform_1(%arg0: i32, %arg1: i32, %arg2: i32) -> (i32, i32, i32) {
    %c0_i32 = arith.constant 0 : i32
    %c0_i32_0 = arith.constant 0 : i32
    return %arg0, %c0_i32, %arg1 : i32, i32, i32
  }
  func.func @transform_2(%arg0: i32, %arg1: i32, %arg2: i32) -> (i32, i32, i32) {
    %c0_i32 = arith.constant 0 : i32
    return %arg0, %arg2, %arg1 : i32, i32, i32
  }
  func.func @transform_3(%arg0: i32, %arg1: i32, %arg2: i32) -> (i32, i32, i32) {
    %c0_i32 = arith.constant 0 : i32
    %c0_i32_0 = arith.constant 0 : i32
    return %arg0, %c0_i32, %arg1 : i32, i32, i32
  }
  func.func @transform_4(%arg0: i32, %arg1: i32, %arg2: i32) -> (i32, i32, i32) {
    %c0_i32 = arith.constant 0 : i32
    %c0_i32_0 = arith.constant 0 : i32
    return %arg0, %c0_i32, %arg1 : i32, i32, i32
  }
}

module attributes {stable_mosaic.version = 11 : i64} {
  func.func @_bn_relu_kernel(%arg0: i32, %arg1: i32, %arg2: memref<8x8192xbf16, #tpu.memory_space<vmem>>, %arg3: memref<1x8192xf32, #tpu.memory_space<vmem>>, %arg4: memref<1x8192xf32, #tpu.memory_space<vmem>>, %arg5: memref<8x8192xbf16, #tpu.memory_space<vmem>>) attributes {dimension_semantics = [#tpu.dimension_semantics<parallel>, #tpu.dimension_semantics<parallel>], iteration_bounds = array<i64: 2, 1>, scalar_prefetch = 0 : i64, scratch_operands = 0 : i64, tpu.core_type = #tpu.core_type<tc>, window_params = [{transform_indices = @transform_0, window_bounds = array<i64: 8, 8192>}, {transform_indices = @transform_1, window_bounds = array<i64: 1, 8192>}, {transform_indices = @transform_2, window_bounds = array<i64: 1, 8192>}, {transform_indices = @transform_3, window_bounds = array<i64: 8, 8192>}]} {
    %c0 = arith.constant 0 : index
    %c0_0 = arith.constant 0 : index
    %0 = vector.load %arg2[%c0, %c0_0] : memref<8x8192xbf16, #tpu.memory_space<vmem>>, vector<8x8192xbf16>
    %1 = arith.extf %0 : vector<8x8192xbf16> to vector<8x8192xf32>
    %c0_1 = arith.constant 0 : index
    %c0_2 = arith.constant 0 : index
    %2 = vector.load %arg3[%c0_1, %c0_2] : memref<1x8192xf32, #tpu.memory_space<vmem>>, vector<1x8192xf32>
    %3 = vector.broadcast %2 : vector<1x8192xf32> to vector<8x8192xf32>
    %4 = arith.mulf %1, %3 : vector<8x8192xf32>
    %c0_3 = arith.constant 0 : index
    %c0_4 = arith.constant 0 : index
    %5 = vector.load %arg4[%c0_3, %c0_4] : memref<1x8192xf32, #tpu.memory_space<vmem>>, vector<1x8192xf32>
    %6 = vector.broadcast %5 : vector<1x8192xf32> to vector<8x8192xf32>
    %7 = arith.addf %4, %6 : vector<8x8192xf32>
    %cst = arith.constant 0.000000e+00 : f32
    %8 = vector.broadcast %cst : f32 to vector<8x8192xf32>
    %9 = arith.maximumf %7, %8 : vector<8x8192xf32>
    %10 = arith.truncf %9 : vector<8x8192xf32> to vector<8x8192xbf16>
    %c0_5 = arith.constant 0 : index
    %c0_6 = arith.constant 0 : index
    %11 = vector.load %arg5[%c0_5, %c0_6] : memref<8x8192xbf16, #tpu.memory_space<vmem>>, vector<8x8192xbf16>
    tpu.vector_store %arg5[%c0_5, %c0_6], %10 {strides = array<i32>} : memref<8x8192xbf16, #tpu.memory_space<vmem>>, vector<8x8192xbf16>,
    return
  }
  func.func @transform_0(%arg0: i32, %arg1: i32) -> (i32, i32) {
    %c0_i32 = arith.constant 0 : i32
    return %arg0, %arg1 : i32, i32
  }
  func.func @transform_1(%arg0: i32, %arg1: i32) -> (i32, i32) {
    %c0_i32 = arith.constant 0 : i32
    %c0_i32_0 = arith.constant 0 : i32
    return %c0_i32, %arg1 : i32, i32
  }
  func.func @transform_2(%arg0: i32, %arg1: i32) -> (i32, i32) {
    %c0_i32 = arith.constant 0 : i32
    %c0_i32_0 = arith.constant 0 : i32
    return %c0_i32, %arg1 : i32, i32
  }
  func.func @transform_3(%arg0: i32, %arg1: i32) -> (i32, i32) {
    %c0_i32 = arith.constant 0 : i32
    return %arg0, %arg1 : i32, i32
  }
}

module attributes {stable_mosaic.version = 11 : i64} {
  func.func @_mm_stats_kernel(%arg0: i32, %arg1: i32, %arg2: i32, %arg3: memref<1x32x2048xbf16, #tpu.memory_space<vmem>>, %arg4: memref<1x2048x256xbf16, #tpu.memory_space<vmem>>, %arg5: memref<1x32x256xbf16, #tpu.memory_space<vmem>>, %arg6: memref<1x1x256xf32, #tpu.memory_space<vmem>>, %arg7: memref<1x1x256xf32, #tpu.memory_space<vmem>>) attributes {dimension_semantics = [#tpu.dimension_semantics<parallel>, #tpu.dimension_semantics<parallel>, #tpu.dimension_semantics<arbitrary>], iteration_bounds = array<i64: 4, 1, 1>, scalar_prefetch = 0 : i64, scratch_operands = 0 : i64, tpu.core_type = #tpu.core_type<tc>, window_params = [{transform_indices = @transform_0, window_bounds = array<i64: 1, 32, 2048>}, {transform_indices = @transform_1, window_bounds = array<i64: 1, 2048, 256>}, {transform_indices = @transform_2, window_bounds = array<i64: 1, 32, 256>}, {transform_indices = @transform_3, window_bounds = array<i64: 1, 1, 256>}, {transform_indices = @transform_4, window_bounds = array<i64: 1, 1, 256>}]} {
    %c0_i32 = arith.constant 0 : i32
    %0 = arith.cmpi eq, %arg2, %c0_i32 : i32
    %1 = arith.extui %0 : i1 to i32
    %c0_i32_0 = arith.constant 0 : i32
    %2 = arith.cmpi ne, %1, %c0_i32_0 : i32
    scf.if %2 {
      %cst_23 = arith.constant 0.000000e+00 : f32
      %25 = vector.broadcast %cst_23 : f32 to vector<1x1x256xf32>
      %c0_24 = arith.constant 0 : index
      %c0_25 = arith.constant 0 : index
      %c0_26 = arith.constant 0 : index
      %26 = vector.load %arg6[%c0_24, %c0_25, %c0_26] : memref<1x1x256xf32, #tpu.memory_space<vmem>>, vector<1x1x256xf32>
      tpu.vector_store %arg6[%c0_24, %c0_25, %c0_26], %25 {strides = array<i32>} : memref<1x1x256xf32, #tpu.memory_space<vmem>>, vector<1x1x256xf32>,
      %cst_27 = arith.constant 0.000000e+00 : f32
      %27 = vector.broadcast %cst_27 : f32 to vector<1x1x256xf32>
      %c0_28 = arith.constant 0 : index
      %c0_29 = arith.constant 0 : index
      %c0_30 = arith.constant 0 : index
      %28 = vector.load %arg7[%c0_28, %c0_29, %c0_30] : memref<1x1x256xf32, #tpu.memory_space<vmem>>, vector<1x1x256xf32>
      tpu.vector_store %arg7[%c0_28, %c0_29, %c0_30], %27 {strides = array<i32>} : memref<1x1x256xf32, #tpu.memory_space<vmem>>, vector<1x1x256xf32>,
    } else {
    }
    %c0 = arith.constant 0 : index
    %c0_1 = arith.constant 0 : index
    %c0_2 = arith.constant 0 : index
    %3 = vector.load %arg3[%c0, %c0_1, %c0_2] : memref<1x32x2048xbf16, #tpu.memory_space<vmem>>, vector<1x32x2048xbf16>
    %4 = vector.shape_cast %3 : vector<1x32x2048xbf16> to vector<32x2048xbf16>
    %c0_3 = arith.constant 0 : index
    %c0_4 = arith.constant 0 : index
    %c0_5 = arith.constant 0 : index
    %5 = vector.load %arg4[%c0_3, %c0_4, %c0_5] : memref<1x2048x256xbf16, #tpu.memory_space<vmem>>, vector<1x2048x256xbf16>
    %6 = vector.shape_cast %5 : vector<1x2048x256xbf16> to vector<2048x256xbf16>
    %cst = arith.constant dense<0.000000e+00> : vector<32x256xf32>
    %7 = tpu.matmul %4, %6, %cst {dimension_numbers = #tpu.dot_dimension_numbers<[1], [0], [0], [1], [0, 0, 1, 1], [], []>} : vector<32x2048xbf16>, vector<2048x256xbf16>, vector<32x256xf32> -> vector<32x256xf32>
    %8 = arith.truncf %7 : vector<32x256xf32> to vector<32x256xbf16>
    %c0_6 = arith.constant 0 : index
    %c0_7 = arith.constant 0 : index
    %c0_8 = arith.constant 0 : index
    %9 = vector.load %arg5[%c0_6, %c0_7, %c0_8] : memref<1x32x256xbf16, #tpu.memory_space<vmem>>, vector<1x32x256xbf16>
    %10 = vector.shape_cast %9 : vector<1x32x256xbf16> to vector<32x256xbf16>
    %11 = vector.shape_cast %8 : vector<32x256xbf16> to vector<1x32x256xbf16>
    tpu.vector_store %arg5[%c0_6, %c0_7, %c0_8], %11 {strides = array<i32>} : memref<1x32x256xbf16, #tpu.memory_space<vmem>>, vector<1x32x256xbf16>,
    %c0_9 = arith.constant 0 : index
    %c0_10 = arith.constant 0 : index
    %c0_11 = arith.constant 0 : index
    %12 = vector.load %arg6[%c0_9, %c0_10, %c0_11] : memref<1x1x256xf32, #tpu.memory_space<vmem>>, vector<1x1x256xf32>
    %cst_12 = arith.constant dense<0.000000e+00> : vector<256xf32>
    %13 = vector.multi_reduction <add>, %7, %cst_12 [0] : vector<32x256xf32> to vector<256xf32>
    %14 = vector.shape_cast %13 : vector<256xf32> to vector<1x256xf32>
    %15 = vector.shape_cast %14 : vector<1x256xf32> to vector<1x1x256xf32>
    %16 = arith.addf %12, %15 : vector<1x1x256xf32>
    %c0_13 = arith.constant 0 : index
    %c0_14 = arith.constant 0 : index
    %c0_15 = arith.constant 0 : index
    %17 = vector.load %arg6[%c0_13, %c0_14, %c0_15] : memref<1x1x256xf32, #tpu.memory_space<vmem>>, vector<1x1x256xf32>
    tpu.vector_store %arg6[%c0_13, %c0_14, %c0_15], %16 {strides = array<i32>} : memref<1x1x256xf32, #tpu.memory_space<vmem>>, vector<1x1x256xf32>,
    %c0_16 = arith.constant 0 : index
    %c0_17 = arith.constant 0 : index
    %c0_18 = arith.constant 0 : index
    %18 = vector.load %arg7[%c0_16, %c0_17, %c0_18] : memref<1x1x256xf32, #tpu.memory_space<vmem>>, vector<1x1x256xf32>
    %19 = arith.mulf %7, %7 : vector<32x256xf32>
    %cst_19 = arith.constant dense<0.000000e+00> : vector<256xf32>
    %20 = vector.multi_reduction <add>, %19, %cst_19 [0] : vector<32x256xf32> to vector<256xf32>
    %21 = vector.shape_cast %20 : vector<256xf32> to vector<1x256xf32>
    %22 = vector.shape_cast %21 : vector<1x256xf32> to vector<1x1x256xf32>
    %23 = arith.addf %18, %22 : vector<1x1x256xf32>
    %c0_20 = arith.constant 0 : index
    %c0_21 = arith.constant 0 : index
    %c0_22 = arith.constant 0 : index
    %24 = vector.load %arg7[%c0_20, %c0_21, %c0_22] : memref<1x1x256xf32, #tpu.memory_space<vmem>>, vector<1x1x256xf32>
    tpu.vector_store %arg7[%c0_20, %c0_21, %c0_22], %23 {strides = array<i32>} : memref<1x1x256xf32, #tpu.memory_space<vmem>>, vector<1x1x256xf32>,
    return
  }
  func.func @transform_0(%arg0: i32, %arg1: i32, %arg2: i32) -> (i32, i32, i32) {
    %c0_i32 = arith.constant 0 : i32
    %c0_i32_0 = arith.constant 0 : i32
    return %arg0, %arg2, %c0_i32 : i32, i32, i32
  }
  func.func @transform_1(%arg0: i32, %arg1: i32, %arg2: i32) -> (i32, i32, i32) {
    %c0_i32 = arith.constant 0 : i32
    %c0_i32_0 = arith.constant 0 : i32
    return %arg0, %c0_i32, %arg1 : i32, i32, i32
  }
  func.func @transform_2(%arg0: i32, %arg1: i32, %arg2: i32) -> (i32, i32, i32) {
    %c0_i32 = arith.constant 0 : i32
    return %arg0, %arg2, %arg1 : i32, i32, i32
  }
  func.func @transform_3(%arg0: i32, %arg1: i32, %arg2: i32) -> (i32, i32, i32) {
    %c0_i32 = arith.constant 0 : i32
    %c0_i32_0 = arith.constant 0 : i32
    return %arg0, %c0_i32, %arg1 : i32, i32, i32
  }
  func.func @transform_4(%arg0: i32, %arg1: i32, %arg2: i32) -> (i32, i32, i32) {
    %c0_i32 = arith.constant 0 : i32
    %c0_i32_0 = arith.constant 0 : i32
    return %arg0, %c0_i32, %arg1 : i32, i32, i32
  }
}

module attributes {stable_mosaic.version = 11 : i64} {
  func.func @_bn_relu_kernel(%arg0: i32, %arg1: i32, %arg2: memref<64x256xbf16, #tpu.memory_space<vmem>>, %arg3: memref<1x256xf32, #tpu.memory_space<vmem>>, %arg4: memref<1x256xf32, #tpu.memory_space<vmem>>, %arg5: memref<64x256xbf16, #tpu.memory_space<vmem>>) attributes {dimension_semantics = [#tpu.dimension_semantics<parallel>, #tpu.dimension_semantics<parallel>], iteration_bounds = array<i64: 2, 1>, scalar_prefetch = 0 : i64, scratch_operands = 0 : i64, tpu.core_type = #tpu.core_type<tc>, window_params = [{transform_indices = @transform_0, window_bounds = array<i64: 64, 256>}, {transform_indices = @transform_1, window_bounds = array<i64: 1, 256>}, {transform_indices = @transform_2, window_bounds = array<i64: 1, 256>}, {transform_indices = @transform_3, window_bounds = array<i64: 64, 256>}]} {
    %c0 = arith.constant 0 : index
    %c0_0 = arith.constant 0 : index
    %0 = vector.load %arg2[%c0, %c0_0] : memref<64x256xbf16, #tpu.memory_space<vmem>>, vector<64x256xbf16>
    %1 = arith.extf %0 : vector<64x256xbf16> to vector<64x256xf32>
    %c0_1 = arith.constant 0 : index
    %c0_2 = arith.constant 0 : index
    %2 = vector.load %arg3[%c0_1, %c0_2] : memref<1x256xf32, #tpu.memory_space<vmem>>, vector<1x256xf32>
    %3 = vector.broadcast %2 : vector<1x256xf32> to vector<64x256xf32>
    %4 = arith.mulf %1, %3 : vector<64x256xf32>
    %c0_3 = arith.constant 0 : index
    %c0_4 = arith.constant 0 : index
    %5 = vector.load %arg4[%c0_3, %c0_4] : memref<1x256xf32, #tpu.memory_space<vmem>>, vector<1x256xf32>
    %6 = vector.broadcast %5 : vector<1x256xf32> to vector<64x256xf32>
    %7 = arith.addf %4, %6 : vector<64x256xf32>
    %cst = arith.constant 0.000000e+00 : f32
    %8 = vector.broadcast %cst : f32 to vector<64x256xf32>
    %9 = arith.maximumf %7, %8 : vector<64x256xf32>
    %10 = arith.truncf %9 : vector<64x256xf32> to vector<64x256xbf16>
    %c0_5 = arith.constant 0 : index
    %c0_6 = arith.constant 0 : index
    %11 = vector.load %arg5[%c0_5, %c0_6] : memref<64x256xbf16, #tpu.memory_space<vmem>>, vector<64x256xbf16>
    tpu.vector_store %arg5[%c0_5, %c0_6], %10 {strides = array<i32>} : memref<64x256xbf16, #tpu.memory_space<vmem>>, vector<64x256xbf16>,
    return
  }
  func.func @transform_0(%arg0: i32, %arg1: i32) -> (i32, i32) {
    %c0_i32 = arith.constant 0 : i32
    return %arg0, %arg1 : i32, i32
  }
  func.func @transform_1(%arg0: i32, %arg1: i32) -> (i32, i32) {
    %c0_i32 = arith.constant 0 : i32
    %c0_i32_0 = arith.constant 0 : i32
    return %c0_i32, %arg1 : i32, i32
  }
  func.func @transform_2(%arg0: i32, %arg1: i32) -> (i32, i32) {
    %c0_i32 = arith.constant 0 : i32
    %c0_i32_0 = arith.constant 0 : i32
    return %c0_i32, %arg1 : i32, i32
  }
  func.func @transform_3(%arg0: i32, %arg1: i32) -> (i32, i32) {
    %c0_i32 = arith.constant 0 : i32
    return %arg0, %arg1 : i32, i32
  }
}

module attributes {stable_mosaic.version = 11 : i64} {
  func.func @_mm_stats_kernel(%arg0: i32, %arg1: i32, %arg2: i32, %arg3: memref<1x128x1024xbf16, #tpu.memory_space<vmem>>, %arg4: memref<1x1024x128xbf16, #tpu.memory_space<vmem>>, %arg5: memref<1x128x128xbf16, #tpu.memory_space<vmem>>, %arg6: memref<1x1x128xf32, #tpu.memory_space<vmem>>, %arg7: memref<1x1x128xf32, #tpu.memory_space<vmem>>) attributes {dimension_semantics = [#tpu.dimension_semantics<parallel>, #tpu.dimension_semantics<parallel>, #tpu.dimension_semantics<arbitrary>], iteration_bounds = array<i64: 4, 1, 1>, scalar_prefetch = 0 : i64, scratch_operands = 0 : i64, tpu.core_type = #tpu.core_type<tc>, window_params = [{transform_indices = @transform_0, window_bounds = array<i64: 1, 128, 1024>}, {transform_indices = @transform_1, window_bounds = array<i64: 1, 1024, 128>}, {transform_indices = @transform_2, window_bounds = array<i64: 1, 128, 128>}, {transform_indices = @transform_3, window_bounds = array<i64: 1, 1, 128>}, {transform_indices = @transform_4, window_bounds = array<i64: 1, 1, 128>}]} {
    %c0_i32 = arith.constant 0 : i32
    %0 = arith.cmpi eq, %arg2, %c0_i32 : i32
    %1 = arith.extui %0 : i1 to i32
    %c0_i32_0 = arith.constant 0 : i32
    %2 = arith.cmpi ne, %1, %c0_i32_0 : i32
    scf.if %2 {
      %cst_23 = arith.constant 0.000000e+00 : f32
      %25 = vector.broadcast %cst_23 : f32 to vector<1x1x128xf32>
      %c0_24 = arith.constant 0 : index
      %c0_25 = arith.constant 0 : index
      %c0_26 = arith.constant 0 : index
      %26 = vector.load %arg6[%c0_24, %c0_25, %c0_26] : memref<1x1x128xf32, #tpu.memory_space<vmem>>, vector<1x1x128xf32>
      tpu.vector_store %arg6[%c0_24, %c0_25, %c0_26], %25 {strides = array<i32>} : memref<1x1x128xf32, #tpu.memory_space<vmem>>, vector<1x1x128xf32>,
      %cst_27 = arith.constant 0.000000e+00 : f32
      %27 = vector.broadcast %cst_27 : f32 to vector<1x1x128xf32>
      %c0_28 = arith.constant 0 : index
      %c0_29 = arith.constant 0 : index
      %c0_30 = arith.constant 0 : index
      %28 = vector.load %arg7[%c0_28, %c0_29, %c0_30] : memref<1x1x128xf32, #tpu.memory_space<vmem>>, vector<1x1x128xf32>
      tpu.vector_store %arg7[%c0_28, %c0_29, %c0_30], %27 {strides = array<i32>} : memref<1x1x128xf32, #tpu.memory_space<vmem>>, vector<1x1x128xf32>,
    } else {
    }
    %c0 = arith.constant 0 : index
    %c0_1 = arith.constant 0 : index
    %c0_2 = arith.constant 0 : index
    %3 = vector.load %arg3[%c0, %c0_1, %c0_2] : memref<1x128x1024xbf16, #tpu.memory_space<vmem>>, vector<1x128x1024xbf16>
    %4 = vector.shape_cast %3 : vector<1x128x1024xbf16> to vector<128x1024xbf16>
    %c0_3 = arith.constant 0 : index
    %c0_4 = arith.constant 0 : index
    %c0_5 = arith.constant 0 : index
    %5 = vector.load %arg4[%c0_3, %c0_4, %c0_5] : memref<1x1024x128xbf16, #tpu.memory_space<vmem>>, vector<1x1024x128xbf16>
    %6 = vector.shape_cast %5 : vector<1x1024x128xbf16> to vector<1024x128xbf16>
    %cst = arith.constant dense<0.000000e+00> : vector<128x128xf32>
    %7 = tpu.matmul %4, %6, %cst {dimension_numbers = #tpu.dot_dimension_numbers<[1], [0], [0], [1], [0, 0, 1, 1], [], []>} : vector<128x1024xbf16>, vector<1024x128xbf16>, vector<128x128xf32> -> vector<128x128xf32>
    %8 = arith.truncf %7 : vector<128x128xf32> to vector<128x128xbf16>
    %c0_6 = arith.constant 0 : index
    %c0_7 = arith.constant 0 : index
    %c0_8 = arith.constant 0 : index
    %9 = vector.load %arg5[%c0_6, %c0_7, %c0_8] : memref<1x128x128xbf16, #tpu.memory_space<vmem>>, vector<1x128x128xbf16>
    %10 = vector.shape_cast %9 : vector<1x128x128xbf16> to vector<128x128xbf16>
    %11 = vector.shape_cast %8 : vector<128x128xbf16> to vector<1x128x128xbf16>
    tpu.vector_store %arg5[%c0_6, %c0_7, %c0_8], %11 {strides = array<i32>} : memref<1x128x128xbf16, #tpu.memory_space<vmem>>, vector<1x128x128xbf16>,
    %c0_9 = arith.constant 0 : index
    %c0_10 = arith.constant 0 : index
    %c0_11 = arith.constant 0 : index
    %12 = vector.load %arg6[%c0_9, %c0_10, %c0_11] : memref<1x1x128xf32, #tpu.memory_space<vmem>>, vector<1x1x128xf32>
    %cst_12 = arith.constant dense<0.000000e+00> : vector<128xf32>
    %13 = vector.multi_reduction <add>, %7, %cst_12 [0] : vector<128x128xf32> to vector<128xf32>
    %14 = vector.shape_cast %13 : vector<128xf32> to vector<1x128xf32>
    %15 = vector.shape_cast %14 : vector<1x128xf32> to vector<1x1x128xf32>
    %16 = arith.addf %12, %15 : vector<1x1x128xf32>
    %c0_13 = arith.constant 0 : index
    %c0_14 = arith.constant 0 : index
    %c0_15 = arith.constant 0 : index
    %17 = vector.load %arg6[%c0_13, %c0_14, %c0_15] : memref<1x1x128xf32, #tpu.memory_space<vmem>>, vector<1x1x128xf32>
    tpu.vector_store %arg6[%c0_13, %c0_14, %c0_15], %16 {strides = array<i32>} : memref<1x1x128xf32, #tpu.memory_space<vmem>>, vector<1x1x128xf32>,
    %c0_16 = arith.constant 0 : index
    %c0_17 = arith.constant 0 : index
    %c0_18 = arith.constant 0 : index
    %18 = vector.load %arg7[%c0_16, %c0_17, %c0_18] : memref<1x1x128xf32, #tpu.memory_space<vmem>>, vector<1x1x128xf32>
    %19 = arith.mulf %7, %7 : vector<128x128xf32>
    %cst_19 = arith.constant dense<0.000000e+00> : vector<128xf32>
    %20 = vector.multi_reduction <add>, %19, %cst_19 [0] : vector<128x128xf32> to vector<128xf32>
    %21 = vector.shape_cast %20 : vector<128xf32> to vector<1x128xf32>
    %22 = vector.shape_cast %21 : vector<1x128xf32> to vector<1x1x128xf32>
    %23 = arith.addf %18, %22 : vector<1x1x128xf32>
    %c0_20 = arith.constant 0 : index
    %c0_21 = arith.constant 0 : index
    %c0_22 = arith.constant 0 : index
    %24 = vector.load %arg7[%c0_20, %c0_21, %c0_22] : memref<1x1x128xf32, #tpu.memory_space<vmem>>, vector<1x1x128xf32>
    tpu.vector_store %arg7[%c0_20, %c0_21, %c0_22], %23 {strides = array<i32>} : memref<1x1x128xf32, #tpu.memory_space<vmem>>, vector<1x1x128xf32>,
    return
  }
  func.func @transform_0(%arg0: i32, %arg1: i32, %arg2: i32) -> (i32, i32, i32) {
    %c0_i32 = arith.constant 0 : i32
    %c0_i32_0 = arith.constant 0 : i32
    return %arg0, %arg2, %c0_i32 : i32, i32, i32
  }
  func.func @transform_1(%arg0: i32, %arg1: i32, %arg2: i32) -> (i32, i32, i32) {
    %c0_i32 = arith.constant 0 : i32
    %c0_i32_0 = arith.constant 0 : i32
    return %arg0, %c0_i32, %arg1 : i32, i32, i32
  }
  func.func @transform_2(%arg0: i32, %arg1: i32, %arg2: i32) -> (i32, i32, i32) {
    %c0_i32 = arith.constant 0 : i32
    return %arg0, %arg2, %arg1 : i32, i32, i32
  }
  func.func @transform_3(%arg0: i32, %arg1: i32, %arg2: i32) -> (i32, i32, i32) {
    %c0_i32 = arith.constant 0 : i32
    %c0_i32_0 = arith.constant 0 : i32
    return %arg0, %c0_i32, %arg1 : i32, i32, i32
  }
  func.func @transform_4(%arg0: i32, %arg1: i32, %arg2: i32) -> (i32, i32, i32) {
    %c0_i32 = arith.constant 0 : i32
    %c0_i32_0 = arith.constant 0 : i32
    return %arg0, %c0_i32, %arg1 : i32, i32, i32
  }
}

module attributes {stable_mosaic.version = 11 : i64} {
  func.func @_bn_relu_kernel(%arg0: i32, %arg1: i32, %arg2: memref<256x128xbf16, #tpu.memory_space<vmem>>, %arg3: memref<1x128xf32, #tpu.memory_space<vmem>>, %arg4: memref<1x128xf32, #tpu.memory_space<vmem>>, %arg5: memref<256x128xbf16, #tpu.memory_space<vmem>>) attributes {dimension_semantics = [#tpu.dimension_semantics<parallel>, #tpu.dimension_semantics<parallel>], iteration_bounds = array<i64: 2, 1>, scalar_prefetch = 0 : i64, scratch_operands = 0 : i64, tpu.core_type = #tpu.core_type<tc>, window_params = [{transform_indices = @transform_0, window_bounds = array<i64: 256, 128>}, {transform_indices = @transform_1, window_bounds = array<i64: 1, 128>}, {transform_indices = @transform_2, window_bounds = array<i64: 1, 128>}, {transform_indices = @transform_3, window_bounds = array<i64: 256, 128>}]} {
    %c0 = arith.constant 0 : index
    %c0_0 = arith.constant 0 : index
    %0 = vector.load %arg2[%c0, %c0_0] : memref<256x128xbf16, #tpu.memory_space<vmem>>, vector<256x128xbf16>
    %1 = arith.extf %0 : vector<256x128xbf16> to vector<256x128xf32>
    %c0_1 = arith.constant 0 : index
    %c0_2 = arith.constant 0 : index
    %2 = vector.load %arg3[%c0_1, %c0_2] : memref<1x128xf32, #tpu.memory_space<vmem>>, vector<1x128xf32>
    %3 = vector.broadcast %2 : vector<1x128xf32> to vector<256x128xf32>
    %4 = arith.mulf %1, %3 : vector<256x128xf32>
    %c0_3 = arith.constant 0 : index
    %c0_4 = arith.constant 0 : index
    %5 = vector.load %arg4[%c0_3, %c0_4] : memref<1x128xf32, #tpu.memory_space<vmem>>, vector<1x128xf32>
    %6 = vector.broadcast %5 : vector<1x128xf32> to vector<256x128xf32>
    %7 = arith.addf %4, %6 : vector<256x128xf32>
    %cst = arith.constant 0.000000e+00 : f32
    %8 = vector.broadcast %cst : f32 to vector<256x128xf32>
    %9 = arith.maximumf %7, %8 : vector<256x128xf32>
    %10 = arith.truncf %9 : vector<256x128xf32> to vector<256x128xbf16>
    %c0_5 = arith.constant 0 : index
    %c0_6 = arith.constant 0 : index
    %11 = vector.load %arg5[%c0_5, %c0_6] : memref<256x128xbf16, #tpu.memory_space<vmem>>, vector<256x128xbf16>
    tpu.vector_store %arg5[%c0_5, %c0_6], %10 {strides = array<i32>} : memref<256x128xbf16, #tpu.memory_space<vmem>>, vector<256x128xbf16>,
    return
  }
  func.func @transform_0(%arg0: i32, %arg1: i32) -> (i32, i32) {
    %c0_i32 = arith.constant 0 : i32
    return %arg0, %arg1 : i32, i32
  }
  func.func @transform_1(%arg0: i32, %arg1: i32) -> (i32, i32) {
    %c0_i32 = arith.constant 0 : i32
    %c0_i32_0 = arith.constant 0 : i32
    return %c0_i32, %arg1 : i32, i32
  }
  func.func @transform_2(%arg0: i32, %arg1: i32) -> (i32, i32) {
    %c0_i32 = arith.constant 0 : i32
    %c0_i32_0 = arith.constant 0 : i32
    return %c0_i32, %arg1 : i32, i32
  }
  func.func @transform_3(%arg0: i32, %arg1: i32) -> (i32, i32) {
    %c0_i32 = arith.constant 0 : i32
    return %arg0, %arg1 : i32, i32
  }
}

module attributes {stable_mosaic.version = 11 : i64} {
  func.func @_mm_stats_kernel(%arg0: i32, %arg1: i32, %arg2: i32, %arg3: memref<1x512x512xbf16, #tpu.memory_space<vmem>>, %arg4: memref<1x512x128xbf16, #tpu.memory_space<vmem>>, %arg5: memref<1x512x128xbf16, #tpu.memory_space<vmem>>, %arg6: memref<1x1x128xf32, #tpu.memory_space<vmem>>, %arg7: memref<1x1x128xf32, #tpu.memory_space<vmem>>) attributes {dimension_semantics = [#tpu.dimension_semantics<parallel>, #tpu.dimension_semantics<parallel>, #tpu.dimension_semantics<arbitrary>], iteration_bounds = array<i64: 4, 1, 1>, scalar_prefetch = 0 : i64, scratch_operands = 0 : i64, tpu.core_type = #tpu.core_type<tc>, window_params = [{transform_indices = @transform_0, window_bounds = array<i64: 1, 512, 512>}, {transform_indices = @transform_1, window_bounds = array<i64: 1, 512, 128>}, {transform_indices = @transform_2, window_bounds = array<i64: 1, 512, 128>}, {transform_indices = @transform_3, window_bounds = array<i64: 1, 1, 128>}, {transform_indices = @transform_4, window_bounds = array<i64: 1, 1, 128>}]} {
    %c0_i32 = arith.constant 0 : i32
    %0 = arith.cmpi eq, %arg2, %c0_i32 : i32
    %1 = arith.extui %0 : i1 to i32
    %c0_i32_0 = arith.constant 0 : i32
    %2 = arith.cmpi ne, %1, %c0_i32_0 : i32
    scf.if %2 {
      %cst_23 = arith.constant 0.000000e+00 : f32
      %25 = vector.broadcast %cst_23 : f32 to vector<1x1x128xf32>
      %c0_24 = arith.constant 0 : index
      %c0_25 = arith.constant 0 : index
      %c0_26 = arith.constant 0 : index
      %26 = vector.load %arg6[%c0_24, %c0_25, %c0_26] : memref<1x1x128xf32, #tpu.memory_space<vmem>>, vector<1x1x128xf32>
      tpu.vector_store %arg6[%c0_24, %c0_25, %c0_26], %25 {strides = array<i32>} : memref<1x1x128xf32, #tpu.memory_space<vmem>>, vector<1x1x128xf32>,
      %cst_27 = arith.constant 0.000000e+00 : f32
      %27 = vector.broadcast %cst_27 : f32 to vector<1x1x128xf32>
      %c0_28 = arith.constant 0 : index
      %c0_29 = arith.constant 0 : index
      %c0_30 = arith.constant 0 : index
      %28 = vector.load %arg7[%c0_28, %c0_29, %c0_30] : memref<1x1x128xf32, #tpu.memory_space<vmem>>, vector<1x1x128xf32>
      tpu.vector_store %arg7[%c0_28, %c0_29, %c0_30], %27 {strides = array<i32>} : memref<1x1x128xf32, #tpu.memory_space<vmem>>, vector<1x1x128xf32>,
    } else {
    }
    %c0 = arith.constant 0 : index
    %c0_1 = arith.constant 0 : index
    %c0_2 = arith.constant 0 : index
    %3 = vector.load %arg3[%c0, %c0_1, %c0_2] : memref<1x512x512xbf16, #tpu.memory_space<vmem>>, vector<1x512x512xbf16>
    %4 = vector.shape_cast %3 : vector<1x512x512xbf16> to vector<512x512xbf16>
    %c0_3 = arith.constant 0 : index
    %c0_4 = arith.constant 0 : index
    %c0_5 = arith.constant 0 : index
    %5 = vector.load %arg4[%c0_3, %c0_4, %c0_5] : memref<1x512x128xbf16, #tpu.memory_space<vmem>>, vector<1x512x128xbf16>
    %6 = vector.shape_cast %5 : vector<1x512x128xbf16> to vector<512x128xbf16>
    %cst = arith.constant dense<0.000000e+00> : vector<512x128xf32>
    %7 = tpu.matmul %4, %6, %cst {dimension_numbers = #tpu.dot_dimension_numbers<[1], [0], [0], [1], [0, 0, 1, 1], [], []>} : vector<512x512xbf16>, vector<512x128xbf16>, vector<512x128xf32> -> vector<512x128xf32>
    %8 = arith.truncf %7 : vector<512x128xf32> to vector<512x128xbf16>
    %c0_6 = arith.constant 0 : index
    %c0_7 = arith.constant 0 : index
    %c0_8 = arith.constant 0 : index
    %9 = vector.load %arg5[%c0_6, %c0_7, %c0_8] : memref<1x512x128xbf16, #tpu.memory_space<vmem>>, vector<1x512x128xbf16>
    %10 = vector.shape_cast %9 : vector<1x512x128xbf16> to vector<512x128xbf16>
    %11 = vector.shape_cast %8 : vector<512x128xbf16> to vector<1x512x128xbf16>
    tpu.vector_store %arg5[%c0_6, %c0_7, %c0_8], %11 {strides = array<i32>} : memref<1x512x128xbf16, #tpu.memory_space<vmem>>, vector<1x512x128xbf16>,
    %c0_9 = arith.constant 0 : index
    %c0_10 = arith.constant 0 : index
    %c0_11 = arith.constant 0 : index
    %12 = vector.load %arg6[%c0_9, %c0_10, %c0_11] : memref<1x1x128xf32, #tpu.memory_space<vmem>>, vector<1x1x128xf32>
    %cst_12 = arith.constant dense<0.000000e+00> : vector<128xf32>
    %13 = vector.multi_reduction <add>, %7, %cst_12 [0] : vector<512x128xf32> to vector<128xf32>
    %14 = vector.shape_cast %13 : vector<128xf32> to vector<1x128xf32>
    %15 = vector.shape_cast %14 : vector<1x128xf32> to vector<1x1x128xf32>
    %16 = arith.addf %12, %15 : vector<1x1x128xf32>
    %c0_13 = arith.constant 0 : index
    %c0_14 = arith.constant 0 : index
    %c0_15 = arith.constant 0 : index
    %17 = vector.load %arg6[%c0_13, %c0_14, %c0_15] : memref<1x1x128xf32, #tpu.memory_space<vmem>>, vector<1x1x128xf32>
    tpu.vector_store %arg6[%c0_13, %c0_14, %c0_15], %16 {strides = array<i32>} : memref<1x1x128xf32, #tpu.memory_space<vmem>>, vector<1x1x128xf32>,
    %c0_16 = arith.constant 0 : index
    %c0_17 = arith.constant 0 : index
    %c0_18 = arith.constant 0 : index
    %18 = vector.load %arg7[%c0_16, %c0_17, %c0_18] : memref<1x1x128xf32, #tpu.memory_space<vmem>>, vector<1x1x128xf32>
    %19 = arith.mulf %7, %7 : vector<512x128xf32>
    %cst_19 = arith.constant dense<0.000000e+00> : vector<128xf32>
    %20 = vector.multi_reduction <add>, %19, %cst_19 [0] : vector<512x128xf32> to vector<128xf32>
    %21 = vector.shape_cast %20 : vector<128xf32> to vector<1x128xf32>
    %22 = vector.shape_cast %21 : vector<1x128xf32> to vector<1x1x128xf32>
    %23 = arith.addf %18, %22 : vector<1x1x128xf32>
    %c0_20 = arith.constant 0 : index
    %c0_21 = arith.constant 0 : index
    %c0_22 = arith.constant 0 : index
    %24 = vector.load %arg7[%c0_20, %c0_21, %c0_22] : memref<1x1x128xf32, #tpu.memory_space<vmem>>, vector<1x1x128xf32>
    tpu.vector_store %arg7[%c0_20, %c0_21, %c0_22], %23 {strides = array<i32>} : memref<1x1x128xf32, #tpu.memory_space<vmem>>, vector<1x1x128xf32>,
    return
  }
  func.func @transform_0(%arg0: i32, %arg1: i32, %arg2: i32) -> (i32, i32, i32) {
    %c0_i32 = arith.constant 0 : i32
    %c0_i32_0 = arith.constant 0 : i32
    return %arg0, %arg2, %c0_i32 : i32, i32, i32
  }
  func.func @transform_1(%arg0: i32, %arg1: i32, %arg2: i32) -> (i32, i32, i32) {
    %c0_i32 = arith.constant 0 : i32
    %c0_i32_0 = arith.constant 0 : i32
    return %arg0, %c0_i32, %arg1 : i32, i32, i32
  }
  func.func @transform_2(%arg0: i32, %arg1: i32, %arg2: i32) -> (i32, i32, i32) {
    %c0_i32 = arith.constant 0 : i32
    return %arg0, %arg2, %arg1 : i32, i32, i32
  }
  func.func @transform_3(%arg0: i32, %arg1: i32, %arg2: i32) -> (i32, i32, i32) {
    %c0_i32 = arith.constant 0 : i32
    %c0_i32_0 = arith.constant 0 : i32
    return %arg0, %c0_i32, %arg1 : i32, i32, i32
  }
  func.func @transform_4(%arg0: i32, %arg1: i32, %arg2: i32) -> (i32, i32, i32) {
    %c0_i32 = arith.constant 0 : i32
    %c0_i32_0 = arith.constant 0 : i32
    return %arg0, %c0_i32, %arg1 : i32, i32, i32
  }
}

module attributes {stable_mosaic.version = 11 : i64} {
  func.func @_bn_relu_kernel(%arg0: i32, %arg1: i32, %arg2: memref<1024x128xbf16, #tpu.memory_space<vmem>>, %arg3: memref<1x128xf32, #tpu.memory_space<vmem>>, %arg4: memref<1x128xf32, #tpu.memory_space<vmem>>, %arg5: memref<1024x128xbf16, #tpu.memory_space<vmem>>) attributes {dimension_semantics = [#tpu.dimension_semantics<parallel>, #tpu.dimension_semantics<parallel>], iteration_bounds = array<i64: 2, 1>, scalar_prefetch = 0 : i64, scratch_operands = 0 : i64, tpu.core_type = #tpu.core_type<tc>, window_params = [{transform_indices = @transform_0, window_bounds = array<i64: 1024, 128>}, {transform_indices = @transform_1, window_bounds = array<i64: 1, 128>}, {transform_indices = @transform_2, window_bounds = array<i64: 1, 128>}, {transform_indices = @transform_3, window_bounds = array<i64: 1024, 128>}]} {
    %c0 = arith.constant 0 : index
    %c0_0 = arith.constant 0 : index
    %0 = vector.load %arg2[%c0, %c0_0] : memref<1024x128xbf16, #tpu.memory_space<vmem>>, vector<1024x128xbf16>
    %1 = arith.extf %0 : vector<1024x128xbf16> to vector<1024x128xf32>
    %c0_1 = arith.constant 0 : index
    %c0_2 = arith.constant 0 : index
    %2 = vector.load %arg3[%c0_1, %c0_2] : memref<1x128xf32, #tpu.memory_space<vmem>>, vector<1x128xf32>
    %3 = vector.broadcast %2 : vector<1x128xf32> to vector<1024x128xf32>
    %4 = arith.mulf %1, %3 : vector<1024x128xf32>
    %c0_3 = arith.constant 0 : index
    %c0_4 = arith.constant 0 : index
    %5 = vector.load %arg4[%c0_3, %c0_4] : memref<1x128xf32, #tpu.memory_space<vmem>>, vector<1x128xf32>
    %6 = vector.broadcast %5 : vector<1x128xf32> to vector<1024x128xf32>
    %7 = arith.addf %4, %6 : vector<1024x128xf32>
    %cst = arith.constant 0.000000e+00 : f32
    %8 = vector.broadcast %cst : f32 to vector<1024x128xf32>
    %9 = arith.maximumf %7, %8 : vector<1024x128xf32>
    %10 = arith.truncf %9 : vector<1024x128xf32> to vector<1024x128xbf16>
    %c0_5 = arith.constant 0 : index
    %c0_6 = arith.constant 0 : index
    %11 = vector.load %arg5[%c0_5, %c0_6] : memref<1024x128xbf16, #tpu.memory_space<vmem>>, vector<1024x128xbf16>
    tpu.vector_store %arg5[%c0_5, %c0_6], %10 {strides = array<i32>} : memref<1024x128xbf16, #tpu.memory_space<vmem>>, vector<1024x128xbf16>,
    return
  }
  func.func @transform_0(%arg0: i32, %arg1: i32) -> (i32, i32) {
    %c0_i32 = arith.constant 0 : i32
    return %arg0, %arg1 : i32, i32
  }
  func.func @transform_1(%arg0: i32, %arg1: i32) -> (i32, i32) {
    %c0_i32 = arith.constant 0 : i32
    %c0_i32_0 = arith.constant 0 : i32
    return %c0_i32, %arg1 : i32, i32
  }
  func.func @transform_2(%arg0: i32, %arg1: i32) -> (i32, i32) {
    %c0_i32 = arith.constant 0 : i32
    %c0_i32_0 = arith.constant 0 : i32
    return %c0_i32, %arg1 : i32, i32
  }
  func.func @transform_3(%arg0: i32, %arg1: i32) -> (i32, i32) {
    %c0_i32 = arith.constant 0 : i32
    return %arg0, %arg1 : i32, i32
  }
}

module attributes {stable_mosaic.version = 11 : i64} {
  func.func @_mm_kernel(%arg0: i32, %arg1: i32, %arg2: i32, %arg3: memref<1x16x256xbf16, #tpu.memory_space<vmem>>, %arg4: memref<1x256x2048xbf16, #tpu.memory_space<vmem>>, %arg5: memref<1x16x2048xf32, #tpu.memory_space<vmem>>) attributes {dimension_semantics = [#tpu.dimension_semantics<parallel>, #tpu.dimension_semantics<parallel>, #tpu.dimension_semantics<arbitrary>], iteration_bounds = array<i64: 4, 1, 1>, scalar_prefetch = 0 : i64, scratch_operands = 0 : i64, tpu.core_type = #tpu.core_type<tc>, window_params = [{transform_indices = @transform_0, window_bounds = array<i64: 1, 16, 256>}, {transform_indices = @transform_1, window_bounds = array<i64: 1, 256, 2048>}, {transform_indices = @transform_2, window_bounds = array<i64: 1, 16, 2048>}]} {
    %c0 = arith.constant 0 : index
    %c0_0 = arith.constant 0 : index
    %c0_1 = arith.constant 0 : index
    %0 = vector.load %arg3[%c0, %c0_0, %c0_1] : memref<1x16x256xbf16, #tpu.memory_space<vmem>>, vector<1x16x256xbf16>
    %1 = vector.shape_cast %0 : vector<1x16x256xbf16> to vector<16x256xbf16>
    %c0_2 = arith.constant 0 : index
    %c0_3 = arith.constant 0 : index
    %c0_4 = arith.constant 0 : index
    %2 = vector.load %arg4[%c0_2, %c0_3, %c0_4] : memref<1x256x2048xbf16, #tpu.memory_space<vmem>>, vector<1x256x2048xbf16>
    %3 = vector.shape_cast %2 : vector<1x256x2048xbf16> to vector<256x2048xbf16>
    %cst = arith.constant dense<0.000000e+00> : vector<16x2048xf32>
    %4 = tpu.matmul %1, %3, %cst {dimension_numbers = #tpu.dot_dimension_numbers<[1], [0], [0], [1], [0, 0, 1, 1], [], []>} : vector<16x256xbf16>, vector<256x2048xbf16>, vector<16x2048xf32> -> vector<16x2048xf32>
    %5 = math.tanh %4 : vector<16x2048xf32>
    %c0_5 = arith.constant 0 : index
    %c0_6 = arith.constant 0 : index
    %c0_7 = arith.constant 0 : index
    %6 = vector.load %arg5[%c0_5, %c0_6, %c0_7] : memref<1x16x2048xf32, #tpu.memory_space<vmem>>, vector<1x16x2048xf32>
    %7 = vector.shape_cast %6 : vector<1x16x2048xf32> to vector<16x2048xf32>
    %8 = vector.shape_cast %5 : vector<16x2048xf32> to vector<1x16x2048xf32>
    tpu.vector_store %arg5[%c0_5, %c0_6, %c0_7], %8 {strides = array<i32>} : memref<1x16x2048xf32, #tpu.memory_space<vmem>>, vector<1x16x2048xf32>,
    return
  }
  func.func @transform_0(%arg0: i32, %arg1: i32, %arg2: i32) -> (i32, i32, i32) {
    %c0_i32 = arith.constant 0 : i32
    %c0_i32_0 = arith.constant 0 : i32
    return %arg0, %arg2, %c0_i32 : i32, i32, i32
  }
  func.func @transform_1(%arg0: i32, %arg1: i32, %arg2: i32) -> (i32, i32, i32) {
    %c0_i32 = arith.constant 0 : i32
    %c0_i32_0 = arith.constant 0 : i32
    return %arg0, %c0_i32, %arg1 : i32, i32, i32
  }
  func.func @transform_2(%arg0: i32, %arg1: i32, %arg2: i32) -> (i32, i32, i32) {
    %c0_i32 = arith.constant 0 : i32
    return %arg0, %arg2, %arg1 : i32, i32, i32
  }
}

</mosaic_0001>

<bundles_post_ra>
// kernel: generator_forward.10
= control target key start
LH: loop header
LB: loop body
LE: loop exit
PB: predicated region body
PF: predicated region fallthrough
CT: control target
= control target key end

     0   :  { %s1754_s12 = smov 0   ;;  %s1756_s13 = smov 0   ;;  %s2214_s0 = inlined_call_operand.vmem [shape: bf16[16,8192], index: 0, kind: input, shape index: {}]   ;;  %s2215_s1 = inlined_call_operand.vmem [shape: f32[1,8192], index: 1, kind: input, shape index: {}]   ;;  %s2216_s2 = inlined_call_operand.vmem [shape: f32[1,8192], index: 2, kind: input, shape index: {}]   ;;  %s2217_s3 = inlined_call_operand.vmem [shape: bf16[16,8192], index: 3, kind: output, shape index: {}]  }
   0x1   :  { %s1758_s14 = smov 0  }
   0x2 LB: > { %s25_s15 = sadd.s32 1, %s1728_s13  ;;  %p1613_p0 = scmp.ge.s32.totalorder %s1732_s14, 1  ;;  %s1732_s14 = sphi %s1758_s14, %s13_s14   ;;  %s1728_s13 = sphi %s1756_s13, %s2219_s13   ;;  %s1724_s12 = sphi %s1754_s12, %s2218_s12  }
   0x3   : > { %p27_p1 = scmp.ge.s32.totalorder %s25_s15, 2  ;;  %p178_p2 = scmp.lt.s32.totalorder %s1732_s14, 3 }
   0x5   : > { %s2221_s15 = smov (%p27_p1, %s25_s15), 0  ;;  %p179_p3 = pnand %p1613_p0, %p178_p2 }
   0x6   : > { %p219_p4 = scmp.lt.s32.totalorder (!%p179_p3), %s1724_s12, 1  ;;  %v360_v0 = vlaneseq (!%p179_p3)  ;;  %v1777_v2 = vld [vmem:[%s2215_s1] sm:$0xff] (!%p179_p3)  ;;  %v1853_v57 = vld [vmem:[%s2215_s1 + $0x8] sm:$0xff] (!%p179_p3) }
   0x7   : > { %182 = sbr.rel (%p179_p3) target bundleno = 125 (0x7d), region = 32  ;;  %v1782_v3 = vld [vmem:[%s2216_s2] sm:$0xff] (!%p179_p3)  ;;  %v1858_v58 = vld [vmem:[%s2216_s2 + $0x8] sm:$0xff] (!%p179_p3) }
   0x8   : > { %v361_v1 = vshrl.u32 (!%p179_p3), %v360_v0, 7 }
   0xa   : > { %v1785_v4 = vsub.s32 (!%p179_p3), 0, %v361_v1  ;;  %v1787_v5 = vsub.s32 (!%p179_p3), 1, %v361_v1  ;;  %v1789_v6 = vsub.s32 (!%p179_p3), 2, %v361_v1  ;;  %v1791_v7 = vsub.s32 (!%p179_p3), 3, %v361_v1 }
   0xb   : > { %v1800_v8 = vsub.s32 (!%p179_p3), 4, %v361_v1  ;;  %v1802_v9 = vsub.s32 (!%p179_p3), 5, %v361_v1  ;;  %v1804_v10 = vsub.s32 (!%p179_p3), 6, %v361_v1  ;;  %v1806_v11 = vsub.s32 (!%p179_p3), 7, %v361_v1 }
   0xc   : > { %v363_v13 = vrot.slane (!%p179_p3), %v1777_v2, %v1785_v4  ;;  %v367_v14 = vrot.slane (!%p179_p3), %v1777_v2, %v1787_v5  ;;  %v763_v15 = vrot.slane (!%p179_p3), %v1782_v3, %v1785_v4  ;;  %v767_v16 = vrot.slane (!%p179_p3), %v1782_v3, %v1787_v5 }
   0xd   : > { %v371_v23 = vrot.slane (!%p179_p3), %v1777_v2, %v1789_v6  ;;  %v375_v24 = vrot.slane (!%p179_p3), %v1777_v2, %v1791_v7  ;;  %v771_v25 = vrot.slane (!%p179_p3), %v1782_v3, %v1789_v6  ;;  %v775_v26 = vrot.slane (!%p179_p3), %v1782_v3, %v1791_v7 }
   0xe   : > { %s2223_s12 = smov (!%p219_p4, %s1724_s12), 1  ;;  %v379_v33 = vrot.slane %v1777_v2, %v1800_v8  ;;  %v383_v34 = vrot.slane %v1777_v2, %v1802_v9  ;;  %v779_v38 = vrot.slane %v1782_v3, %v1800_v8  ;;  %v783_v39 = vrot.slane %v1782_v3, %v1802_v9 }
   0xf   : > { %s1652_s20 = sshll.u32 %s2223_s12, 8  ;;  %v387_v54 = vrot.slane %v1777_v2, %v1804_v10  ;;  %v391_v55 = vrot.slane %v1777_v2, %v1806_v11  ;;  %v787_v56 = vrot.slane %v1782_v3, %v1804_v10  ;;  %v791_v62 = vrot.slane %v1782_v3, %v1806_v11 }
  0x10   : > { %s1798_s23 = scalar_lea.vmem %s2214_s0, %s1652_s20  ;;  %s1841_s26 = scalar_lea.vmem %s2217_s3, %s1652_s20 }
  0x11   : > { %v248_v12 = vld [vmem:[%s1798_s23] sm:$0xff]  ;;  %v249_v17 = vld [vmem:[%s1798_s23 + $0x8] sm:$0xff]  ;;  %v250_v18 = vld [vmem:[%s1798_s23 + $0x10] sm:$0xff] }
  0x12   : > { %v280_v19 = vunpack.c.l.bf16 %v248_v12  ;;  %v281_v20 = vunpack.c.h.bf16 %v248_v12  ;;  %v282_v21 = vunpack.c.l.bf16 %v249_v17  ;;  %v283_v22 = vunpack.c.h.bf16 %v249_v17  ;;  %v251_v35 = vld [vmem:[%s1798_s23 + $0x18] sm:$0xff]  ;;  %v252_v52 = vld [vmem:[%s1798_s23 + $0x20] sm:$0xff]  ;;  %v253_v63 = vld [vmem:[%s1798_s23 + $0x28] sm:$0xff] }
  0x13   : > { %v284_v29 = vunpack.c.l.bf16 %v250_v18  ;;  %v285_v30 = vunpack.c.h.bf16 %v250_v18  ;;  %v286_v46 = vunpack.c.l.bf16 %v251_v35  ;;  %v287_v47 = vunpack.c.h.bf16 %v251_v35 }
  0x14   : > { %v680_v27 = vmul.f32 %v363_v13, %v280_v19  ;;  %v681_v28 = vmul.f32 %v367_v14, %v281_v20  ;;  %v682_v31 = vmul.f32 %v371_v23, %v282_v21  ;;  %v683_v32 = vmul.f32 %v375_v24, %v283_v22  ;;  %v254_v24 = vld [vmem:[%s1798_s23 + $0x30] sm:$0xff] }
  0x15   : > { %v684_v42 = vmul.f32 %v379_v33, %v284_v29  ;;  %v685_v43 = vmul.f32 %v383_v34, %v285_v30  ;;  %v686_v0 = vmul.f32 %v387_v54, %v286_v46  ;;  %v687_v1 = vmul.f32 %v391_v55, %v287_v47  ;;  %v1899_v55 = vld [vmem:[%s2215_s1 + $0x10] sm:$0xff] }
  0x16   : > { %v1080_v36 = vadd.f32 %v763_v15, %v680_v27  ;;  %v1081_v37 = vadd.f32 %v767_v16, %v681_v28  ;;  %v1082_v40 = vadd.f32 %v771_v25, %v682_v31  ;;  %v1083_v41 = vadd.f32 %v775_v26, %v683_v32 }
  0x17   : > { %v1084_v50 = vadd.f32 %v779_v38, %v684_v42  ;;  %v1085_v51 = vadd.f32 %v783_v39, %v685_v43  ;;  %v288_v2 = vunpack.c.l.bf16 %v252_v52  ;;  %v289_v12 = vunpack.c.h.bf16 %v252_v52 }
  0x18   : > { %v1144_v44 = vmax.f32 %v1080_v36, 0.0  ;;  %v1145_v45 = vmax.f32 %v1081_v37, 0.0  ;;  %v1146_v48 = vmax.f32 %v1082_v40, 0.0  ;;  %v1147_v49 = vmax.f32 %v1083_v41, 0.0  ;;  %v255_v37 = vld [vmem:[%s1798_s23 + $0x38] sm:$0xff] }
  0x19   : > { %v1148_v60 = vmax.f32 %v1084_v50, 0.0  ;;  %v1149_v61 = vmax.f32 %v1085_v51, 0.0  ;;  %v395_v14 = vrot.slane %v1853_v57, %v1785_v4  ;;  %v399_v15 = vrot.slane %v1853_v57, %v1787_v5  ;;  %v256_v50 = vld [vmem:[%s1798_s23 + $0x40] sm:$0xff] }
  0x1a   : > { %v1654_v53 = vpack.c.bf16 %v1145_v45, %v1144_v44  ;;  %v1655_v59 = vpack.c.bf16 %v1147_v49, %v1146_v48  ;;  %v795_v16 = vrot.slane %v1858_v58, %v1785_v4  ;;  %v1086_v3 = vadd.f32 %v787_v56, %v686_v0 }
  0x1b   : > { %v1656_v13 = vpack.c.bf16 %v1149_v61, %v1148_v60  ;;  %v1087_v17 = vadd.f32 %v791_v62, %v687_v1  ;;  %v799_v18 = vrot.slane %v1858_v58, %v1787_v5  ;;  %v290_v19 = vunpack.c.l.bf16 %v253_v63  ;;  %v1911_v62 = vld [vmem:[%s2216_s2 + $0x10] sm:$0xff] }
  0x1c   : > { %1464 = vst [vmem:[%s1841_s26] sm:$0xff] %v1654_v53  ;;  %1465 = vst [vmem:[%s1841_s26 + $0x8] sm:$0xff] %v1655_v59  ;;  %v688_v20 = vmul.f32 %v395_v14, %v288_v2  ;;  %v689_v21 = vmul.f32 %v399_v15, %v289_v12  ;;  %v291_v22 = vunpack.c.h.bf16 %v253_v63  ;;  %v403_v23 = vrot.slane %v1853_v57, %v1789_v6  ;;  %v257_v12 = vld [vmem:[%s1798_s23 + $0x48] sm:$0xff] }
  0x1d   : > { %1466 = vst [vmem:[%s1841_s26 + $0x10] sm:$0xff] %v1656_v13  ;;  %v1150_v25 = vmax.f32 %v1086_v3, 0.0  ;;  %v1151_v26 = vmax.f32 %v1087_v17, 0.0  ;;  %v407_v27 = vrot.slane %v1853_v57, %v1791_v7  ;;  %v803_v28 = vrot.slane %v1858_v58, %v1789_v6 }
  0x1e   : > { %v1088_v29 = vadd.f32 %v795_v16, %v688_v20  ;;  %v1089_v30 = vadd.f32 %v799_v18, %v689_v21  ;;  %v690_v31 = vmul.f32 %v403_v23, %v290_v19  ;;  %v807_v32 = vrot.slane %v1858_v58, %v1791_v7 }
  0x1f   : > { %v1657_v33 = vpack.c.bf16 %v1151_v26, %v1150_v25  ;;  %v691_v34 = vmul.f32 %v407_v27, %v291_v22  ;;  %v292_v35 = vunpack.c.l.bf16 %v254_v24  ;;  %v293_v36 = vunpack.c.h.bf16 %v254_v24  ;;  %v258_v22 = vld [vmem:[%s1798_s23 + $0x50] sm:$0xff] }
  0x20   : > { %v1152_v38 = vmax.f32 %v1088_v29, 0.0  ;;  %v1153_v39 = vmax.f32 %v1089_v30, 0.0  ;;  %v1090_v40 = vadd.f32 %v803_v28, %v690_v31  ;;  %v411_v41 = vrot.slane %v1853_v57, %v1800_v8 }
  0x21   : > { %1467 = vst [vmem:[%s1841_s26 + $0x18] sm:$0xff] %v1657_v33  ;;  %v1091_v42 = vadd.f32 %v807_v32, %v691_v34  ;;  %v415_v43 = vrot.slane %v1853_v57, %v1802_v9  ;;  %v811_v44 = vrot.slane %v1858_v58, %v1800_v8  ;;  %v815_v45 = vrot.slane %v1858_v58, %v1802_v9 }
  0x22   : > { %v1658_v46 = vpack.c.bf16 %v1153_v39, %v1152_v38  ;;  %v1154_v47 = vmax.f32 %v1090_v40, 0.0  ;;  %v692_v48 = vmul.f32 %v411_v41, %v292_v35  ;;  %v294_v49 = vunpack.c.l.bf16 %v255_v37  ;;  %v259_v39 = vld [vmem:[%s1798_s23 + $0x58] sm:$0xff] }
  0x23   : > { %v1155_v51 = vmax.f32 %v1091_v42, 0.0  ;;  %v693_v52 = vmul.f32 %v415_v43, %v293_v36  ;;  %v295_v53 = vunpack.c.h.bf16 %v255_v37  ;;  %v419_v54 = vrot.slane %v1853_v57, %v1804_v10 }
  0x24   : > { %1468 = vst [vmem:[%s1841_s26 + $0x20] sm:$0xff] %v1658_v46  ;;  %v1092_v56 = vadd.f32 %v811_v44, %v692_v48  ;;  %v423_v59 = vrot.slane %v1853_v57, %v1806_v11  ;;  %v819_v60 = vrot.slane %v1858_v58, %v1804_v10  ;;  %v823_v61 = vrot.slane %v1858_v58, %v1806_v11 }
  0x25   : > { %v1659_v63 = vpack.c.bf16 %v1155_v51, %v1154_v47  ;;  %v1093_v0 = vadd.f32 %v815_v45, %v693_v52  ;;  %v694_v1 = vmul.f32 %v419_v54, %v294_v49  ;;  %v296_v2 = vunpack.c.l.bf16 %v256_v50  ;;  %v260_v52 = vld [vmem:[%s1798_s23 + $0x60] sm:$0xff] }
  0x26   : > { %v1156_v13 = vmax.f32 %v1092_v56, 0.0  ;;  %v695_v14 = vmul.f32 %v423_v59, %v295_v53  ;;  %v297_v57 = vunpack.c.h.bf16 %v256_v50  ;;  %v427_v15 = vrot.slane %v1899_v55, %v1785_v4 }
  0x27   : > { %1469 = vst [vmem:[%s1841_s26 + $0x28] sm:$0xff] %v1659_v63  ;;  %v1157_v16 = vmax.f32 %v1093_v0, 0.0  ;;  %v1094_v58 = vadd.f32 %v819_v60, %v694_v1  ;;  %v431_v3 = vrot.slane %v1899_v55, %v1787_v5  ;;  %v827_v17 = vrot.slane %v1911_v62, %v1785_v4  ;;  %v1954_v1 = vld [vmem:[%s2215_s1 + $0x18] sm:$0xff] }
  0x28   : > { %v1095_v18 = vadd.f32 %v823_v61, %v695_v14  ;;  %v696_v19 = vmul.f32 %v427_v15, %v296_v2  ;;  %v831_v20 = vrot.slane %v1911_v62, %v1787_v5  ;;  %v298_v21 = vunpack.c.l.bf16 %v257_v12  ;;  %v1959_v2 = vld [vmem:[%s2216_s2 + $0x18] sm:$0xff] }
  0x29   : > { %v1660_v23 = vpack.c.bf16 %v1157_v16, %v1156_v13  ;;  %v1158_v24 = vmax.f32 %v1094_v58, 0.0  ;;  %v697_v25 = vmul.f32 %v431_v3, %v297_v57  ;;  %v299_v26 = vunpack.c.h.bf16 %v257_v12  ;;  %v261_v57 = vld [vmem:[%s1798_s23 + $0x68] sm:$0xff] }
  0x2a   : > { %v1159_v27 = vmax.f32 %v1095_v18, 0.0  ;;  %v1096_v28 = vadd.f32 %v827_v17, %v696_v19  ;;  %v435_v29 = vrot.slane %v1899_v55, %v1789_v6  ;;  %v439_v30 = vrot.slane %v1899_v55, %v1791_v7 }
  0x2b   : > { %1470 = vst [vmem:[%s1841_s26 + $0x30] sm:$0xff] %v1660_v23  ;;  %v1097_v31 = vadd.f32 %v831_v20, %v697_v25  ;;  %v835_v32 = vrot.slane %v1911_v62, %v1789_v6  ;;  %v839_v33 = vrot.slane %v1911_v62, %v1791_v7  ;;  %v300_v34 = vunpack.c.l.bf16 %v258_v22 }
  0x2c   : > { %v1661_v35 = vpack.c.bf16 %v1159_v27, %v1158_v24  ;;  %v1160_v36 = vmax.f32 %v1096_v28, 0.0  ;;  %v698_v37 = vmul.f32 %v435_v29, %v298_v21  ;;  %v699_v38 = vmul.f32 %v439_v30, %v299_v26  ;;  %v262_v24 = vld [vmem:[%s1798_s23 + $0x70] sm:$0xff] }
  0x2d   : > { %v1161_v40 = vmax.f32 %v1097_v31, 0.0  ;;  %v301_v41 = vunpack.c.h.bf16 %v258_v22  ;;  %v443_v42 = vrot.slane %v1899_v55, %v1800_v8  ;;  %v447_v43 = vrot.slane %v1899_v55, %v1802_v9 }
  0x2e   : > { %1471 = vst [vmem:[%s1841_s26 + $0x38] sm:$0xff] %v1661_v35  ;;  %v1098_v44 = vadd.f32 %v835_v32, %v698_v37  ;;  %v1099_v45 = vadd.f32 %v839_v33, %v699_v38  ;;  %v843_v46 = vrot.slane %v1911_v62, %v1800_v8  ;;  %v847_v47 = vrot.slane %v1911_v62, %v1802_v9 }
  0x2f   : > { %v1662_v48 = vpack.c.bf16 %v1161_v40, %v1160_v36  ;;  %v700_v49 = vmul.f32 %v443_v42, %v300_v34  ;;  %v701_v50 = vmul.f32 %v447_v43, %v301_v41  ;;  %v302_v51 = vunpack.c.l.bf16 %v259_v39  ;;  %v263_v41 = vld [vmem:[%s1798_s23 + $0x78] sm:$0xff] }
  0x30   : > { %v1162_v53 = vmax.f32 %v1098_v44, 0.0  ;;  %v1163_v54 = vmax.f32 %v1099_v45, 0.0  ;;  %v303_v56 = vunpack.c.h.bf16 %v259_v39  ;;  %v451_v59 = vrot.slane %v1899_v55, %v1804_v10 }
  0x31   : > { %1472 = vst [vmem:[%s1841_s26 + $0x40] sm:$0xff] %v1662_v48  ;;  %v1100_v60 = vadd.f32 %v843_v46, %v700_v49  ;;  %v1101_v61 = vadd.f32 %v847_v47, %v701_v50  ;;  %v455_v63 = vrot.slane %v1899_v55, %v1806_v11  ;;  %v851_v0 = vrot.slane %v1911_v62, %v1804_v10 }
  0x32   : > { %v1663_v12 = vpack.c.bf16 %v1163_v54, %v1162_v53  ;;  %v702_v13 = vmul.f32 %v451_v59, %v302_v51  ;;  %v855_v14 = vrot.slane %v1911_v62, %v1806_v11  ;;  %v304_v55 = vunpack.c.l.bf16 %v260_v52  ;;  %v264_v54 = vld [vmem:[%s1798_s23 + $0x80] sm:$0xff] }
  0x33   : > { %v1164_v15 = vmax.f32 %v1100_v60, 0.0  ;;  %v1165_v16 = vmax.f32 %v1101_v61, 0.0  ;;  %v703_v58 = vmul.f32 %v455_v63, %v303_v56  ;;  %v305_v3 = vunpack.c.h.bf16 %v260_v52 }
  0x34   : > { %1473 = vst [vmem:[%s1841_s26 + $0x48] sm:$0xff] %v1663_v12  ;;  %v1102_v17 = vadd.f32 %v851_v0, %v702_v13  ;;  %v459_v18 = vrot.slane %v1954_v1, %v1785_v4  ;;  %v463_v19 = vrot.slane %v1954_v1, %v1787_v5  ;;  %v859_v20 = vrot.slane %v1959_v2, %v1785_v4 }
  0x35   : > { %v1664_v62 = vpack.c.bf16 %v1165_v16, %v1164_v15  ;;  %v1103_v21 = vadd.f32 %v855_v14, %v703_v58  ;;  %v863_v22 = vrot.slane %v1959_v2, %v1787_v5  ;;  %v306_v23 = vunpack.c.l.bf16 %v261_v57  ;;  %v2004_v14 = vld [vmem:[%s2215_s1 + $0x20] sm:$0xff]  ;;  %v265_v58 = vld [vmem:[%s1798_s23 + $0x88] sm:$0xff] }
  0x36   : > { %v1166_v25 = vmax.f32 %v1102_v17, 0.0  ;;  %v704_v26 = vmul.f32 %v459_v18, %v304_v55  ;;  %v705_v27 = vmul.f32 %v463_v19, %v305_v3  ;;  %v307_v28 = vunpack.c.h.bf16 %v261_v57  ;;  %v2009_v55 = vld [vmem:[%s2216_s2 + $0x20] sm:$0xff] }
  0x37   : > { %1474 = vst [vmem:[%s1841_s26 + $0x50] sm:$0xff] %v1664_v62  ;;  %v1167_v29 = vmax.f32 %v1103_v21, 0.0  ;;  %v467_v30 = vrot.slane %v1954_v1, %v1789_v6  ;;  %v471_v31 = vrot.slane %v1954_v1, %v1791_v7  ;;  %v867_v32 = vrot.slane %v1959_v2, %v1789_v6 }
  0x38   : > { %v1104_v33 = vadd.f32 %v859_v20, %v704_v26  ;;  %v1105_v34 = vadd.f32 %v863_v22, %v705_v27  ;;  %v871_v35 = vrot.slane %v1959_v2, %v1791_v7  ;;  %v308_v36 = vunpack.c.l.bf16 %v262_v24  ;;  %v266_v26 = vld [vmem:[%s1798_s23 + $0x90] sm:$0xff] }
  0x39   : > { %v1665_v37 = vpack.c.bf16 %v1167_v29, %v1166_v25  ;;  %v706_v38 = vmul.f32 %v467_v30, %v306_v23  ;;  %v707_v39 = vmul.f32 %v471_v31, %v307_v28  ;;  %v309_v40 = vunpack.c.h.bf16 %v262_v24 }
  0x3a   : > { %v1168_v42 = vmax.f32 %v1104_v33, 0.0  ;;  %v1169_v43 = vmax.f32 %v1105_v34, 0.0  ;;  %v475_v44 = vrot.slane %v1954_v1, %v1800_v8  ;;  %v479_v45 = vrot.slane %v1954_v1, %v1802_v9 }
  0x3b   : > { %1475 = vst [vmem:[%s1841_s26 + $0x58] sm:$0xff] %v1665_v37  ;;  %v1106_v46 = vadd.f32 %v867_v32, %v706_v38  ;;  %v1107_v47 = vadd.f32 %v871_v35, %v707_v39  ;;  %v875_v48 = vrot.slane %v1959_v2, %v1800_v8  ;;  %v879_v49 = vrot.slane %v1959_v2, %v1802_v9 }
  0x3c   : > { %v1666_v50 = vpack.c.bf16 %v1169_v43, %v1168_v42  ;;  %v708_v51 = vmul.f32 %v475_v44, %v308_v36  ;;  %v709_v52 = vmul.f32 %v479_v45, %v309_v40  ;;  %v310_v53 = vunpack.c.l.bf16 %v263_v41  ;;  %v267_v43 = vld [vmem:[%s1798_s23 + $0x98] sm:$0xff] }
  0x3d   : > { %v1170_v56 = vmax.f32 %v1106_v46, 0.0  ;;  %v1171_v59 = vmax.f32 %v1107_v47, 0.0  ;;  %v311_v60 = vunpack.c.h.bf16 %v263_v41  ;;  %v483_v61 = vrot.slane %v1954_v1, %v1804_v10 }
  0x3e   : > { %1476 = vst [vmem:[%s1841_s26 + $0x60] sm:$0xff] %v1666_v50  ;;  %v1108_v63 = vadd.f32 %v875_v48, %v708_v51  ;;  %v1109_v0 = vadd.f32 %v879_v49, %v709_v52  ;;  %v487_v12 = vrot.slane %v1954_v1, %v1806_v11  ;;  %v883_v13 = vrot.slane %v1959_v2, %v1804_v10 }
  0x3f   : > { %v1667_v57 = vpack.c.bf16 %v1171_v59, %v1170_v56  ;;  %v710_v15 = vmul.f32 %v483_v61, %v310_v53  ;;  %v887_v16 = vrot.slane %v1959_v2, %v1806_v11  ;;  %v312_v1 = vunpack.c.l.bf16 %v264_v54  ;;  %v268_v59 = vld [vmem:[%s1798_s23 + $0xa0] sm:$0xff] }
  0x40   : > { %v1172_v3 = vmax.f32 %v1108_v63, 0.0  ;;  %v1173_v17 = vmax.f32 %v1109_v0, 0.0  ;;  %v711_v18 = vmul.f32 %v487_v12, %v311_v60  ;;  %v313_v19 = vunpack.c.h.bf16 %v264_v54 }
  0x41   : > { %1477 = vst [vmem:[%s1841_s26 + $0x68] sm:$0xff] %v1667_v57  ;;  %v1110_v20 = vadd.f32 %v883_v13, %v710_v15  ;;  %v491_v62 = vrot.slane %v2004_v14, %v1785_v4  ;;  %v495_v21 = vrot.slane %v2004_v14, %v1787_v5  ;;  %v891_v22 = vrot.slane %v2009_v55, %v1785_v4 }
  0x42   : > { %v1668_v2 = vpack.c.bf16 %v1173_v17, %v1172_v3  ;;  %v1111_v23 = vadd.f32 %v887_v16, %v711_v18  ;;  %v895_v24 = vrot.slane %v2009_v55, %v1787_v5  ;;  %v314_v25 = vunpack.c.l.bf16 %v265_v58  ;;  %v2054_v16 = vld [vmem:[%s2215_s1 + $0x28] sm:$0xff] }
  0x43   : > { %v1174_v27 = vmax.f32 %v1110_v20, 0.0  ;;  %v712_v28 = vmul.f32 %v491_v62, %v312_v1  ;;  %v713_v29 = vmul.f32 %v495_v21, %v313_v19  ;;  %v315_v30 = vunpack.c.h.bf16 %v265_v58  ;;  %v2059_v1 = vld [vmem:[%s2216_s2 + $0x28] sm:$0xff] }
  0x44   : > { %1478 = vst [vmem:[%s1841_s26 + $0x70] sm:$0xff] %v1668_v2  ;;  %v1175_v31 = vmax.f32 %v1111_v23, 0.0  ;;  %v499_v32 = vrot.slane %v2004_v14, %v1789_v6  ;;  %v503_v33 = vrot.slane %v2004_v14, %v1791_v7  ;;  %v899_v34 = vrot.slane %v2009_v55, %v1789_v6  ;;  %v269_v18 = vld [vmem:[%s1798_s23 + $0xa8] sm:$0xff] }
  0x45   : > { %v1112_v35 = vadd.f32 %v891_v22, %v712_v28  ;;  %v1113_v36 = vadd.f32 %v895_v24, %v713_v29  ;;  %v903_v37 = vrot.slane %v2009_v55, %v1791_v7  ;;  %v316_v38 = vunpack.c.l.bf16 %v266_v26  ;;  %v270_v28 = vld [vmem:[%s1798_s23 + $0xb0] sm:$0xff] }
  0x46   : > { %v1669_v39 = vpack.c.bf16 %v1175_v31, %v1174_v27  ;;  %v714_v40 = vmul.f32 %v499_v32, %v314_v25  ;;  %v715_v41 = vmul.f32 %v503_v33, %v315_v30  ;;  %v317_v42 = vunpack.c.h.bf16 %v266_v26 }
  0x47   : > { %v1176_v44 = vmax.f32 %v1112_v35, 0.0  ;;  %v1177_v45 = vmax.f32 %v1113_v36, 0.0  ;;  %v507_v46 = vrot.slane %v2004_v14, %v1800_v8  ;;  %v511_v47 = vrot.slane %v2004_v14, %v1802_v9 }
  0x48   : > { %1479 = vst [vmem:[%s1841_s26 + $0x78] sm:$0xff] %v1669_v39  ;;  %v1114_v48 = vadd.f32 %v899_v34, %v714_v40  ;;  %v1115_v49 = vadd.f32 %v903_v37, %v715_v41  ;;  %v907_v50 = vrot.slane %v2009_v55, %v1800_v8  ;;  %v911_v51 = vrot.slane %v2009_v55, %v1802_v9 }
  0x49   : > { %v1670_v52 = vpack.c.bf16 %v1177_v45, %v1176_v44  ;;  %v716_v53 = vmul.f32 %v507_v46, %v316_v38  ;;  %v717_v54 = vmul.f32 %v511_v47, %v317_v42  ;;  %v318_v56 = vunpack.c.l.bf16 %v267_v43  ;;  %v271_v45 = vld [vmem:[%s1798_s23 + $0xb8] sm:$0xff] }
  0x4a   : > { %v1178_v60 = vmax.f32 %v1114_v48, 0.0  ;;  %v1179_v61 = vmax.f32 %v1115_v49, 0.0  ;;  %v319_v63 = vunpack.c.h.bf16 %v267_v43  ;;  %v515_v0 = vrot.slane %v2004_v14, %v1804_v10 }
  0x4b   : > { %1480 = vst [vmem:[%s1841_s26 + $0x80] sm:$0xff] %v1670_v52  ;;  %v1116_v12 = vadd.f32 %v907_v50, %v716_v53  ;;  %v1117_v13 = vadd.f32 %v911_v51, %v717_v54  ;;  %v519_v57 = vrot.slane %v2004_v14, %v1806_v11  ;;  %v915_v15 = vrot.slane %v2009_v55, %v1804_v10 }
  0x4c   : > { %v1671_v58 = vpack.c.bf16 %v1179_v61, %v1178_v60  ;;  %v718_v3 = vmul.f32 %v515_v0, %v318_v56  ;;  %v919_v17 = vrot.slane %v2009_v55, %v1806_v11  ;;  %v320_v14 = vunpack.c.l.bf16 %v268_v59  ;;  %v272_v61 = vld [vmem:[%s1798_s23 + $0xc0] sm:$0xff] }
  0x4d   : > { %v1180_v19 = vmax.f32 %v1116_v12, 0.0  ;;  %v1181_v20 = vmax.f32 %v1117_v13, 0.0  ;;  %v719_v62 = vmul.f32 %v519_v57, %v319_v63  ;;  %v321_v21 = vunpack.c.h.bf16 %v268_v59 }
  0x4e   : > { %1481 = vst [vmem:[%s1841_s26 + $0x88] sm:$0xff] %v1671_v58  ;;  %v1118_v22 = vadd.f32 %v915_v15, %v718_v3  ;;  %v523_v2 = vrot.slane %v2054_v16, %v1785_v4  ;;  %v527_v23 = vrot.slane %v2054_v16, %v1787_v5  ;;  %v923_v24 = vrot.slane %v2059_v1, %v1785_v4 }
  0x4f   : > { %v1672_v55 = vpack.c.bf16 %v1181_v20, %v1180_v19  ;;  %v1119_v25 = vadd.f32 %v919_v17, %v719_v62  ;;  %v927_v26 = vrot.slane %v2059_v1, %v1787_v5  ;;  %v322_v27 = vunpack.c.l.bf16 %v269_v18  ;;  %v2104_v17 = vld [vmem:[%s2215_s1 + $0x30] sm:$0xff]  ;;  %v273_v62 = vld [vmem:[%s1798_s23 + $0xc8] sm:$0xff] }
  0x50   : > { %v1182_v29 = vmax.f32 %v1118_v22, 0.0  ;;  %v720_v30 = vmul.f32 %v523_v2, %v320_v14  ;;  %v721_v31 = vmul.f32 %v527_v23, %v321_v21  ;;  %v323_v32 = vunpack.c.h.bf16 %v269_v18  ;;  %v2109_v14 = vld [vmem:[%s2216_s2 + $0x30] sm:$0xff] }
  0x51   : > { %1482 = vst [vmem:[%s1841_s26 + $0x90] sm:$0xff] %v1672_v55  ;;  %v1183_v33 = vmax.f32 %v1119_v25, 0.0  ;;  %v531_v34 = vrot.slane %v2054_v16, %v1789_v6  ;;  %v535_v35 = vrot.slane %v2054_v16, %v1791_v7  ;;  %v931_v36 = vrot.slane %v2059_v1, %v1789_v6 }
  0x52   : > { %v1120_v37 = vadd.f32 %v923_v24, %v720_v30  ;;  %v1121_v38 = vadd.f32 %v927_v26, %v721_v31  ;;  %v935_v39 = vrot.slane %v2059_v1, %v1791_v7  ;;  %v324_v40 = vunpack.c.l.bf16 %v270_v28  ;;  %v274_v30 = vld [vmem:[%s1798_s23 + $0xd0] sm:$0xff] }
  0x53   : > { %v1673_v41 = vpack.c.bf16 %v1183_v33, %v1182_v29  ;;  %v722_v42 = vmul.f32 %v531_v34, %v322_v27  ;;  %v723_v43 = vmul.f32 %v535_v35, %v323_v32  ;;  %v325_v44 = vunpack.c.h.bf16 %v270_v28 }
  0x54   : > { %v1184_v46 = vmax.f32 %v1120_v37, 0.0  ;;  %v1185_v47 = vmax.f32 %v1121_v38, 0.0  ;;  %v539_v48 = vrot.slane %v2054_v16, %v1800_v8  ;;  %v543_v49 = vrot.slane %v2054_v16, %v1802_v9 }
  0x55   : > { %1483 = vst [vmem:[%s1841_s26 + $0x98] sm:$0xff] %v1673_v41  ;;  %v1122_v50 = vadd.f32 %v931_v36, %v722_v42  ;;  %v1123_v51 = vadd.f32 %v935_v39, %v723_v43  ;;  %v939_v52 = vrot.slane %v2059_v1, %v1800_v8  ;;  %v943_v53 = vrot.slane %v2059_v1, %v1802_v9 }
  0x56   : > { %v1674_v54 = vpack.c.bf16 %v1185_v47, %v1184_v46  ;;  %v724_v56 = vmul.f32 %v539_v48, %v324_v40  ;;  %v725_v59 = vmul.f32 %v543_v49, %v325_v44  ;;  %v326_v60 = vunpack.c.l.bf16 %v271_v45  ;;  %v275_v47 = vld [vmem:[%s1798_s23 + $0xd8] sm:$0xff] }
  0x57   : > { %v1186_v63 = vmax.f32 %v1122_v50, 0.0  ;;  %v1187_v0 = vmax.f32 %v1123_v51, 0.0  ;;  %v327_v12 = vunpack.c.h.bf16 %v271_v45  ;;  %v547_v13 = vrot.slane %v2054_v16, %v1804_v10 }
  0x58   : > { %1484 = vst [vmem:[%s1841_s26 + $0xa0] sm:$0xff] %v1674_v54  ;;  %v1124_v57 = vadd.f32 %v939_v52, %v724_v56  ;;  %v1125_v15 = vadd.f32 %v943_v53, %v725_v59  ;;  %v551_v58 = vrot.slane %v2054_v16, %v1806_v11  ;;  %v947_v3 = vrot.slane %v2059_v1, %v1804_v10 }
  0x59   : > { %v1675_v18 = vpack.c.bf16 %v1187_v0, %v1186_v63  ;;  %v726_v19 = vmul.f32 %v547_v13, %v326_v60  ;;  %v951_v20 = vrot.slane %v2059_v1, %v1806_v11  ;;  %v328_v16 = vunpack.c.l.bf16 %v272_v61  ;;  %v276_v0 = vld [vmem:[%s1798_s23 + $0xe0] sm:$0xff] }
  0x5a   : > { %v1188_v21 = vmax.f32 %v1124_v57, 0.0  ;;  %v1189_v22 = vmax.f32 %v1125_v15, 0.0  ;;  %v727_v2 = vmul.f32 %v551_v58, %v327_v12  ;;  %v329_v23 = vunpack.c.h.bf16 %v272_v61 }
  0x5b   : > { %1485 = vst [vmem:[%s1841_s26 + $0xa8] sm:$0xff] %v1675_v18  ;;  %v1126_v24 = vadd.f32 %v947_v3, %v726_v19  ;;  %v555_v55 = vrot.slane %v2104_v17, %v1785_v4  ;;  %v559_v25 = vrot.slane %v2104_v17, %v1787_v5  ;;  %v955_v26 = vrot.slane %v2109_v14, %v1785_v4 }
  0x5c   : > { %v1676_v1 = vpack.c.bf16 %v1189_v22, %v1188_v21  ;;  %v1127_v27 = vadd.f32 %v951_v20, %v727_v2  ;;  %v959_v28 = vrot.slane %v2109_v14, %v1787_v5  ;;  %v330_v29 = vunpack.c.l.bf16 %v273_v62  ;;  %v2154_v20 = vld [vmem:[%s2215_s1 + $0x38] sm:$0xff]  ;;  %v277_v2 = vld [vmem:[%s1798_s23 + $0xe8] sm:$0xff] }
  0x5d   : > { %v1190_v31 = vmax.f32 %v1126_v24, 0.0  ;;  %v728_v32 = vmul.f32 %v555_v55, %v328_v16  ;;  %v729_v33 = vmul.f32 %v559_v25, %v329_v23  ;;  %v331_v34 = vunpack.c.h.bf16 %v273_v62  ;;  %v2159_v16 = vld [vmem:[%s2216_s2 + $0x38] sm:$0xff] }
  0x5e   : > { %1486 = vst [vmem:[%s1841_s26 + $0xb0] sm:$0xff] %v1676_v1  ;;  %v1191_v35 = vmax.f32 %v1127_v27, 0.0  ;;  %v563_v36 = vrot.slane %v2104_v17, %v1789_v6  ;;  %v567_v37 = vrot.slane %v2104_v17, %v1791_v7  ;;  %v963_v38 = vrot.slane %v2109_v14, %v1789_v6 }
  0x5f   : > { %v1128_v39 = vadd.f32 %v955_v26, %v728_v32  ;;  %v1129_v40 = vadd.f32 %v959_v28, %v729_v33  ;;  %v967_v41 = vrot.slane %v2109_v14, %v1791_v7  ;;  %v332_v42 = vunpack.c.l.bf16 %v274_v30  ;;  %v278_v32 = vld [vmem:[%s1798_s23 + $0xf0] sm:$0xff] }
  0x60   : > { %v1677_v43 = vpack.c.bf16 %v1191_v35, %v1190_v31  ;;  %v730_v44 = vmul.f32 %v563_v36, %v330_v29  ;;  %v731_v45 = vmul.f32 %v567_v37, %v331_v34  ;;  %v333_v46 = vunpack.c.h.bf16 %v274_v30 }
  0x61   : > { %v1192_v48 = vmax.f32 %v1128_v39, 0.0  ;;  %v1193_v49 = vmax.f32 %v1129_v40, 0.0  ;;  %v571_v50 = vrot.slane %v2104_v17, %v1800_v8  ;;  %v575_v51 = vrot.slane %v2104_v17, %v1802_v9 }
  0x62   : > { %1487 = vst [vmem:[%s1841_s26 + $0xb8] sm:$0xff] %v1677_v43  ;;  %v1130_v52 = vadd.f32 %v963_v38, %v730_v44  ;;  %v1131_v53 = vadd.f32 %v967_v41, %v731_v45  ;;  %v971_v54 = vrot.slane %v2109_v14, %v1800_v8  ;;  %v975_v56 = vrot.slane %v2109_v14, %v1802_v9 }
  0x63   : > { %v1678_v59 = vpack.c.bf16 %v1193_v49, %v1192_v48  ;;  %v732_v60 = vmul.f32 %v571_v50, %v332_v42  ;;  %v733_v61 = vmul.f32 %v575_v51, %v333_v46  ;;  %v334_v63 = vunpack.c.l.bf16 %v275_v47 }
  0x64   : > { %v1194_v12 = vmax.f32 %v1130_v52, 0.0  ;;  %v1195_v13 = vmax.f32 %v1131_v53, 0.0  ;;  %v335_v57 = vunpack.c.h.bf16 %v275_v47  ;;  %v579_v15 = vrot.slane %v2104_v17, %v1804_v10  ;;  %v279_v47 = vld [vmem:[%s1798_s23 + $0xf8] sm:$0xff] }
  0x65   : > { %1488 = vst [vmem:[%s1841_s26 + $0xc0] sm:$0xff] %v1678_v59  ;;  %v1132_v58 = vadd.f32 %v971_v54, %v732_v60  ;;  %v1133_v3 = vadd.f32 %v975_v56, %v733_v61  ;;  %v583_v18 = vrot.slane %v2104_v17, %v1806_v11  ;;  %v979_v19 = vrot.slane %v2109_v14, %v1804_v10 }
  0x66   : > { %v1679_v62 = vpack.c.bf16 %v1195_v13, %v1194_v12  ;;  %v734_v21 = vmul.f32 %v579_v15, %v334_v63  ;;  %v983_v22 = vrot.slane %v2109_v14, %v1806_v11  ;;  %v336_v17 = vunpack.c.l.bf16 %v276_v0 }
  0x67   : > { %v1196_v23 = vmax.f32 %v1132_v58, 0.0  ;;  %v1197_v24 = vmax.f32 %v1133_v3, 0.0  ;;  %v735_v55 = vmul.f32 %v583_v18, %v335_v57  ;;  %v337_v25 = vunpack.c.h.bf16 %v276_v0 }
  0x68   : > { %1489 = vst [vmem:[%s1841_s26 + $0xc8] sm:$0xff] %v1679_v62  ;;  %v1134_v26 = vadd.f32 %v979_v19, %v734_v21  ;;  %v587_v1 = vrot.slane %v2154_v20, %v1785_v4  ;;  %v591_v27 = vrot.slane %v2154_v20, %v1787_v5  ;;  %v987_v28 = vrot.slane %v2159_v16, %v1785_v4 }
  0x69   : > { %v1680_v14 = vpack.c.bf16 %v1197_v24, %v1196_v23  ;;  %v1135_v29 = vadd.f32 %v983_v22, %v735_v55  ;;  %v991_v30 = vrot.slane %v2159_v16, %v1787_v5  ;;  %v338_v31 = vunpack.c.l.bf16 %v277_v2 }
  0x6a   : > { %v1198_v33 = vmax.f32 %v1134_v26, 0.0  ;;  %v736_v34 = vmul.f32 %v587_v1, %v336_v17  ;;  %v737_v35 = vmul.f32 %v591_v27, %v337_v25  ;;  %v339_v36 = vunpack.c.h.bf16 %v277_v2 }
  0x6b   : > { %1490 = vst [vmem:[%s1841_s26 + $0xd0] sm:$0xff] %v1680_v14  ;;  %v1199_v37 = vmax.f32 %v1135_v29, 0.0  ;;  %v595_v38 = vrot.slane %v2154_v20, %v1789_v6  ;;  %v599_v4 = vrot.slane %v2154_v20, %v1791_v7  ;;  %v995_v39 = vrot.slane %v2159_v16, %v1789_v6 }
  0x6c   : > { %v1136_v5 = vadd.f32 %v987_v28, %v736_v34  ;;  %v1137_v40 = vadd.f32 %v991_v30, %v737_v35  ;;  %v999_v41 = vrot.slane %v2159_v16, %v1791_v7  ;;  %v340_v42 = vunpack.c.l.bf16 %v278_v32 }
  0x6d   : > { %v1681_v43 = vpack.c.bf16 %v1199_v37, %v1198_v33  ;;  %v738_v44 = vmul.f32 %v595_v38, %v338_v31  ;;  %v739_v45 = vmul.f32 %v599_v4, %v339_v36  ;;  %v341_v46 = vunpack.c.h.bf16 %v278_v32 }
  0x6e   : > { %v1200_v48 = vmax.f32 %v1136_v5, 0.0  ;;  %v1201_v49 = vmax.f32 %v1137_v40, 0.0  ;;  %v603_v50 = vrot.slane %v2154_v20, %v1800_v8  ;;  %v607_v6 = vrot.slane %v2154_v20, %v1802_v9 }
  0x6f   : > { %1491 = vst [vmem:[%s1841_s26 + $0xd8] sm:$0xff] %v1681_v43  ;;  %v1138_v51 = vadd.f32 %v995_v39, %v738_v44  ;;  %v1139_v52 = vadd.f32 %v999_v41, %v739_v45  ;;  %v1003_v7 = vrot.slane %v2159_v16, %v1800_v8  ;;  %v1007_v53 = vrot.slane %v2159_v16, %v1802_v9 }
  0x70   : > { %v1682_v54 = vpack.c.bf16 %v1201_v49, %v1200_v48  ;;  %v740_v56 = vmul.f32 %v603_v50, %v340_v42  ;;  %v741_v59 = vmul.f32 %v607_v6, %v341_v46  ;;  %v342_v60 = vunpack.c.l.bf16 %v279_v47 }
  0x71   : > { %v1202_v61 = vmax.f32 %v1138_v51, 0.0  ;;  %v1203_v63 = vmax.f32 %v1139_v52, 0.0  ;;  %v343_v0 = vunpack.c.h.bf16 %v279_v47  ;;  %v611_v12 = vrot.slane %v2154_v20, %v1804_v10 }
  0x72   : > { %1492 = vst [vmem:[%s1841_s26 + $0xe0] sm:$0xff] %v1682_v54  ;;  %v1140_v13 = vadd.f32 %v1003_v7, %v740_v56  ;;  %v1141_v57 = vadd.f32 %v1007_v53, %v741_v59  ;;  %v615_v8 = vrot.slane %v2154_v20, %v1806_v11  ;;  %v1011_v9 = vrot.slane %v2159_v16, %v1804_v10 }
  0x73   : > { %v1683_v15 = vpack.c.bf16 %v1203_v63, %v1202_v61  ;;  %v742_v58 = vmul.f32 %v611_v12, %v342_v60  ;;  %v1015_v3 = vrot.slane %v2159_v16, %v1806_v11 }
  0x74   : > { %v1204_v18 = vmax.f32 %v1140_v13, 0.0  ;;  %v1205_v19 = vmax.f32 %v1141_v57, 0.0  ;;  %v743_v62 = vmul.f32 %v615_v8, %v343_v0 }
  0x75   : > { %1493 = vst [vmem:[%s1841_s26 + $0xe8] sm:$0xff] %v1683_v15  ;;  %v1142_v21 = vadd.f32 %v1011_v9, %v742_v58 }
  0x76   : > { %v1684_v22 = vpack.c.bf16 %v1205_v19, %v1204_v18  ;;  %v1143_v17 = vadd.f32 %v1015_v3, %v743_v62 }
  0x77   : > { %v1206_v2 = vmax.f32 %v1142_v21, 0.0 }
  0x78   : > { %1494 = vst [vmem:[%s1841_s26 + $0xf0] sm:$0xff] %v1684_v22  ;;  %v1207_v23 = vmax.f32 %v1143_v17, 0.0 }
  0x7a   : > { %v1685_v20 = vpack.c.bf16 %v1207_v23, %v1206_v2 }
  0x7c   : > { %1495 = vst [vmem:[%s1841_s26 + $0xf8] sm:$0xff] %v1685_v20 }
  0x7d PF: > { %s13_s14 = sadd.s32 1, %s1732_s14   ;;  %s2218_s12 = smov %s1728_s13 }
  0x7e   : > { %p10_p5 = scmp.ge.s32.totalorder %s13_s14, 4   ;;  %s2219_s13 = smov %s2221_s15 }
  0x80   :  { %12 = sbr.rel (!%p10_p5) target bundleno = 2 (0x2), region = 68 }

// kernel: generator_forward.9
= control target key start
LH: loop header
LB: loop body
LE: loop exit
PB: predicated region body
PF: predicated region fallthrough
CT: control target
= control target key end

     0   :  { %10 = vsyncpa [#allocation3], 0  ;;  %s5294_s0 = inlined_call_operand.vmem [shape: bf16[1,16,128], index: 0, kind: input, shape index: {}]   ;;  %s5295_s1 = inlined_call_operand.hbm [shape: bf16[1,128,8192], index: 1, kind: input, shape index: {}]   ;;  %s5296_s2 = inlined_call_operand.vmem [shape: bf16[1,16,8192], index: 2, kind: output, shape index: {0}]   ;;  %s5297_s3 = inlined_call_operand.vmem [shape: f32[1,1,8192], index: 3, kind: output, shape index: {1}]   ;;  %s5298_s4 = inlined_call_operand.vmem [shape: f32[1,1,8192], index: 4, kind: output, shape index: {2}]  }
   0x1   :  { %12 = vsyncpa [#allocation3 + $0x1], 0  ;;  %s4591_s15 = smov 0   ;;  %s4593_s16 = smov 0  }
   0x2   :  { %s4595_s17 = smov 0   ;;  %s4597_s18 = smov 0  }
   0x3   :  { %s4599_s19 = smov 0   ;;  %s4601_s20 = smov 0  }
   0x4 LB: > { %s4074_s21 = sadd.s32 4294967295, %s4558_s20   ;;  %s33_s22 = sadd.s32 1, %s4554_s19  ;;  %s4558_s20 = sphi %s4601_s20, %s18_s20   ;;  %s4554_s19 = sphi %s4599_s19, %s5309_s19   ;;  %s4550_s18 = sphi %s4597_s18, %s5308_s18   ;;  %s4546_s17 = sphi %s4595_s17, %s5307_s17   ;;  %s4542_s16 = sphi %s4593_s16, %s5306_s16   ;;  %s4538_s15 = sphi %s4591_s15, %s5305_s15  }
   0x5   : > { %p35_p0 = scmp.ge.s32.totalorder %s33_s22, 2  ;;  %s74_s23 = sadd.s32 1, %s4546_s17 }
   0x6   : > { %p81_p1 = scmp.ne.s32.totalorder %s4546_s17, %s4542_s16  ;;  %p82_p2 = scmp.eq.s32.totalorder %s4558_s20, 0 }
   0x7   : > { %s5311_s22 = smov (%p35_p0, %s33_s22), 0  ;;  %p87_p4 = scmp.ne.s32.totalorder %s4542_s16, %s4538_s15 }
   0x8   : > { %p4627_p3 = por %p82_p2, %p81_p1  ;;  %s70_s25 = ssub.s32 %s4554_s19, %s5311_s22 }
   0x9   : > { %p88_p5 = scmp.eq.s32.totalorder %s4074_s21, 0  ;;  %p72_p6 = scmp.eq.s32.totalorder %s70_s25, 0 }
   0xa   : > { %p115_p7 = scmp.eq.s32.totalorder %s4074_s21, 1  ;;  %p4421_p10 = scmp.lt.s32.totalorder %s4558_s20, 2 }
   0xb   : > { %p4634_p8 = por %p88_p5, %p87_p4  ;;  %s210_s29 = sand.u32 1, %s4546_s17  }
   0xc   : > { %s4639_s27 = scalar_select %p72_p6, %s4546_s17, %s74_s23  }
   0xd   : > { %p4641_p9 = por %p115_p7, %p81_p1  ;;  %s4381_s30 = sshll.u32 %s4554_s19, 11 }
   0xe   : > { %s4079_s5 = sshll.u32 %s210_s29, 11  ;;  %s4651_s8 = scalar_lea.hbm %s5295_s1, %s4381_s30 }
   0xf   : > { %s5301_s28 = scalar_select %p4641_p9, 1, 0 }
  0x10   : > { %s214_s9 = scalar_lea.vmem [#allocation2], %s4079_s5  ;;  %p4655_p11 = pnand %p4421_p10, %p4627_p3 }
  0x11   : > { %s223_s10 = sshll.u32 %s214_s9, 4  ;;  %s4662_s12 = scalar_lea.sflag [#allocation3], %s210_s29  ;;  %s4659_s10 = int_to_ptr.vmem [resolvable:$true] %s223_s10 }
  0x12   : > { %s4478_s13 = scalar_lea.hbm %s4651_s8, 32768  ;;  %p4480_p0 = pneg %p4655_p11 }
  0x13   : > { %p4479_p13 = scmp.ne.s32.totalorder %s4651_s8, %s4478_s13  ;;  %s4483_s21 = scalar_lea.hbm %s5295_s1, 65536 }
  0x14   : > { %p4484_p3 = scmp.lt.u32.totalorder %s4651_s8, %s5295_s1  ;;  %p4485_p4 = scmp.lt.u32.totalorder %s4483_s21, %s4478_s13 }
  0x15   : > { %p4481_p1 = pnand %p4480_p0, %p4479_p13  ;;  %p4487_p6 = scmp.lt.u32.totalorder %s4478_s13, %s4651_s8 }
  0x16   : > { %p4486_p5 = por %p4485_p4, %p4484_p3 }
  0x17   : > { %p4482_p2 = pneg %p4481_p1 }
  0x18   : > { %p4488_p7 = por %p4487_p6, %p4486_p5 }
  0x1a   : > { %p4489_p10 = pnand %p4488_p7, %p4482_p2 }
  0x1c   : > { %4492 = shalt.err (!%p4489_p10)
}
  0x1d   : > { %s4493_s25 = scalar_lea.vmem %s4659_s10, 32768  ;;  %s4560_s29 = smov [#allocation2]  }
  0x1e   : > { %p4494_p13 = scmp.ne.s32.totalorder %s4659_s10, %s4493_s25  ;;  %s4498_s30 = sshll.u32 %s4560_s29, 4  ;;  %s4499_s30 = int_to_ptr.vmem [resolvable:$false] %s4498_s30 }
  0x1f   : > { %s4500_s5 = scalar_lea.vmem %s4499_s30, 65536  ;;  %p4501_p9 = scmp.lt.s32.totalorder %s4659_s10, %s4499_s30 }
  0x20   : > { %p4496_p1 = pnand %p4494_p13, %p4480_p0  ;;  %p4502_p3 = scmp.lt.s32.totalorder %s4500_s5, %s4493_s25 }
  0x22   : > { %p4497_p12 = pneg %p4496_p1  ;;  %p4503_p4 = por %p4502_p3, %p4501_p9 }
  0x24   : > { %p4504_p5 = pnand %p4503_p4, %p4497_p12 }
  0x26   : > { %4507 = shalt.err (!%p4504_p5)
}
  0x27   : > { %s4561_s6 = smov 4096   ;;  %s4562_s7 = smov 2048  }
  0x28   : > { %s4563_s9 = smov 128   ;;  %p231_p0 = scmp.lt.s32.totalorder %s4558_s20, 3 }
  0x29   : > { %4420 = dma.hbm_to_vmem [thread:$0]  (!%p4655_p11), %s4651_s8, 32768, %s4659_s10, %s4662_s12, %s4561_s6, %s4562_s7, %s4563_s9  }
  0x2a   : > { %p5303_p2 = scmp.ge.s32.totalorder %s4558_s20, 1 }
  0x2c   : > { %p232_p6 = pnand %p5303_p2, %p231_p0 }
  0x2d   : > { %s4694_s13 = sand.u32 (!%p232_p6), 1, %s4542_s16  }
  0x2e   : > { %235 = sbr.rel (%p232_p6) target bundleno = 559 (0x22f), region = 28  ;;  %s4083_s14 = sshll.u32 (!%p232_p6), %s4694_s13, 11 }
  0x2f   : > { %s238_s15 = scalar_lea.sflag (!%p232_p6), [#allocation3], %s4694_s13  ;;  %s4698_s21 = scalar_lea.vmem (!%p232_p6), [#allocation2], %s4083_s14 }
  0x35   : > { %4533 = dma.done.wait (%p4634_p8), %s238_s15, 32768  }
  0x36   : > { %4535 = vsyncadd (%p4634_p8), %s238_s15, 4294934528  ;;  %v4564_v0 = vmov 0   ;;  %v336_v1 = vld [vmem:[%s4698_s21] sm:$0xff]  ;;  %v337_v3 = vld [vmem:[%s4698_s21 + $0x8] sm:$0xff]  ;;  %s4084_s12 = sshll.u32 %s4694_s13, 8  ;;  %s4085_s24 = sshll.u32 %s4550_s18, 5 }
  0x37   : > { %1910 = vmatprep.mubr.bf16.mxu0 %v4564_v0  ;;  %1953 = vmatprep.mubr.bf16.mxu1 %v4564_v0  ;;  %v352_v2 = vld [vmem:[%s4698_s21 + $0x80] sm:$0xff]  ;;  %v353_v5 = vld [vmem:[%s4698_s21 + $0x88] sm:$0xff]  ;;  %v338_v63 = vld [vmem:[%s4698_s21 + $0x10] sm:$0xff]  ;;  %s5029_s23 = scalar_lea.vmem [#allocation4], %s4084_s12  ;;  %p306_p8 = scmp.lt.s32.totalorder %s4085_s24, 63 }
  0x38   : > { %v4089_v4 = vcombine.high %v336_v1, %v352_v2  ;;  %v4088_v6 = vcombine.low %v336_v1, %v352_v2  ;;  %v368_v7 = vld [vmem:[%s4698_s21 + $0x100] sm:$0xff]  ;;  %v4091_v9 = vcombine.high %v337_v3, %v353_v5  ;;  %v4090_v10 = vcombine.low %v337_v3, %v353_v5  ;;  %v369_v12 = vld [vmem:[%s4698_s21 + $0x108] sm:$0xff]  ;;  %v354_v1 = vld [vmem:[%s4698_s21 + $0x90] sm:$0xff]  ;;  %p5304_p9 = scmp.ne.s32.totalorder %s5301_s28, 0 }
  0x39   : > { %v384_v8 = vld [vmem:[%s4698_s21 + $0x180] sm:$0xff]  ;;  %v385_v13 = vld [vmem:[%s4698_s21 + $0x188] sm:$0xff]  ;;  %v339_v2 = vld [vmem:[%s4698_s21 + $0x18] sm:$0xff]  ;;  %s5313_s24 = smov (!%p306_p8, %s4085_s24), 63  ;;  %s4414_s9 = sshll.u32 (%p5304_p9), %s4550_s18, 7 }
  0x3a   : > { %v4121_v11 = vcombine.high %v368_v7, %v384_v8  ;;  %v400_v14 = vld [vmem:[%s4698_s21 + $0x200] sm:$0xff]  ;;  %1878 = vmatprep.subr.bf16.mxu0 %v4089_v4  ;;  %v4123_v15 = vcombine.high %v369_v12, %v385_v13  ;;  %v401_v17 = vld [vmem:[%s4698_s21 + $0x208] sm:$0xff]  ;;  %1921 = vmatprep.subr.bf16.mxu1 %v4091_v9  ;;  %v4120_v19 = vcombine.low %v368_v7, %v384_v8  ;;  %v355_v3 = vld [vmem:[%s4698_s21 + $0x98] sm:$0xff]  ;;  %s5074_s30 = scalar_lea.vmem %s5297_s3, %s5313_s24  ;;  %s5080_s7 = scalar_lea.vmem %s5298_s4, %s5313_s24 }
  0x3b   : > { %v416_v16 = vld [vmem:[%s4698_s21 + $0x280] sm:$0xff]  ;;  %v417_v18 = vld [vmem:[%s4698_s21 + $0x288] sm:$0xff]  ;;  %1879 = vmatpush1.bf16.msra.mxu0 %v4088_v6  ;;  %1922 = vmatpush1.bf16.msra.mxu1 %v4090_v10  ;;  %v4122_v20 = vcombine.low %v369_v12, %v385_v13  ;;  %v4093_v6 = vcombine.high %v338_v63, %v354_v1  ;;  %v4095_v7 = vcombine.high %v339_v2, %v355_v3  ;;  %v370_v8 = vld [vmem:[%s4698_s21 + $0x110] sm:$0xff]  ;;  %s5213_s15 = scalar_lea.vmem (%p5304_p9), %s5296_s2, %s4414_s9 }
  0x3c   : > { %1880 = vmatprep.subr.bf16.mxu0 %v4121_v11  ;;  %v4153_v21 = vcombine.high %v400_v14, %v416_v16  ;;  %1923 = vmatprep.subr.bf16.mxu1 %v4123_v15  ;;  %v4155_v22 = vcombine.high %v401_v17, %v417_v18  ;;  %v432_v23 = vld [vmem:[%s4698_s21 + $0x300] sm:$0xff]  ;;  %v433_v25 = vld [vmem:[%s4698_s21 + $0x308] sm:$0xff]  ;;  %v4152_v27 = vcombine.low %v400_v14, %v416_v16  ;;  %v386_v9 = vld [vmem:[%s4698_s21 + $0x190] sm:$0xff] }
  0x3d   : > { %v448_v24 = vld [vmem:[%s4698_s21 + $0x380] sm:$0xff]  ;;  %v449_v26 = vld [vmem:[%s4698_s21 + $0x388] sm:$0xff]  ;;  %v4154_v28 = vcombine.low %v401_v17, %v417_v18  ;;  %v371_v11 = vld [vmem:[%s4698_s21 + $0x118] sm:$0xff]  ;;  %v4092_v13 = vcombine.low %v338_v63, %v354_v1  ;;  %v4094_v14 = vcombine.low %v339_v2, %v355_v3  ;;  %v4125_v15 = vcombine.high %v370_v8, %v386_v9 }
  0x3e   : > { %v4185_v29 = vcombine.high %v432_v23, %v448_v24  ;;  %v4187_v30 = vcombine.high %v433_v25, %v449_v26  ;;  %v464_v31 = vld [vmem:[%s4698_s21 + $0x400] sm:$0xff]  ;;  %v465_v33 = vld [vmem:[%s4698_s21 + $0x408] sm:$0xff]  ;;  %v4184_v35 = vcombine.low %v432_v23, %v448_v24  ;;  %v4186_v36 = vcombine.low %v433_v25, %v449_v26  ;;  %v387_v12 = vld [vmem:[%s4698_s21 + $0x198] sm:$0xff] }
  0x3f   : > { %1881 = vmatpush1.bf16.msra.mxu0 %v4120_v19  ;;  %1924 = vmatpush1.bf16.msra.mxu1 %v4122_v20  ;;  %v480_v32 = vld [vmem:[%s4698_s21 + $0x480] sm:$0xff]  ;;  %v481_v34 = vld [vmem:[%s4698_s21 + $0x488] sm:$0xff]  ;;  %v4127_v16 = vcombine.high %v371_v11, %v387_v12  ;;  %v402_v17 = vld [vmem:[%s4698_s21 + $0x210] sm:$0xff] }
  0x40   : > { %1882 = vmatprep.subr.bf16.mxu0 %v4153_v21  ;;  %1925 = vmatprep.subr.bf16.mxu1 %v4155_v22  ;;  %v4217_v37 = vcombine.high %v464_v31, %v480_v32  ;;  %v4219_v38 = vcombine.high %v465_v33, %v481_v34  ;;  %v496_v39 = vld [vmem:[%s4698_s21 + $0x500] sm:$0xff]  ;;  %v497_v41 = vld [vmem:[%s4698_s21 + $0x508] sm:$0xff]  ;;  %v4216_v43 = vcombine.low %v464_v31, %v480_v32  ;;  %v418_v18 = vld [vmem:[%s4698_s21 + $0x290] sm:$0xff] }
  0x41   : > { %v512_v40 = vld [vmem:[%s4698_s21 + $0x580] sm:$0xff]  ;;  %v513_v42 = vld [vmem:[%s4698_s21 + $0x588] sm:$0xff]  ;;  %v4218_v44 = vcombine.low %v465_v33, %v481_v34  ;;  %v403_v19 = vld [vmem:[%s4698_s21 + $0x218] sm:$0xff]  ;;  %v4124_v21 = vcombine.low %v370_v8, %v386_v9  ;;  %v4126_v22 = vcombine.low %v371_v11, %v387_v12  ;;  %v4157_v23 = vcombine.high %v402_v17, %v418_v18 }
  0x42   : > { %v4249_v45 = vcombine.high %v496_v39, %v512_v40  ;;  %v4251_v46 = vcombine.high %v497_v41, %v513_v42  ;;  %v528_v47 = vld [vmem:[%s4698_s21 + $0x600] sm:$0xff]  ;;  %v529_v49 = vld [vmem:[%s4698_s21 + $0x608] sm:$0xff]  ;;  %v4248_v51 = vcombine.low %v496_v39, %v512_v40  ;;  %v4250_v52 = vcombine.low %v497_v41, %v513_v42  ;;  %v419_v20 = vld [vmem:[%s4698_s21 + $0x298] sm:$0xff] }
  0x43   : > { %1883 = vmatpush1.bf16.msra.mxu0 %v4152_v27  ;;  %1926 = vmatpush1.bf16.msra.mxu1 %v4154_v28  ;;  %v544_v48 = vld [vmem:[%s4698_s21 + $0x680] sm:$0xff]  ;;  %v545_v50 = vld [vmem:[%s4698_s21 + $0x688] sm:$0xff]  ;;  %v4159_v24 = vcombine.high %v403_v19, %v419_v20  ;;  %v434_v25 = vld [vmem:[%s4698_s21 + $0x310] sm:$0xff] }
  0x44   : > { %1884 = vmatprep.subr.bf16.mxu0 %v4185_v29  ;;  %1927 = vmatprep.subr.bf16.mxu1 %v4187_v30  ;;  %v4281_v53 = vcombine.high %v528_v47, %v544_v48  ;;  %v4283_v54 = vcombine.high %v529_v49, %v545_v50  ;;  %v560_v55 = vld [vmem:[%s4698_s21 + $0x700] sm:$0xff]  ;;  %v561_v57 = vld [vmem:[%s4698_s21 + $0x708] sm:$0xff]  ;;  %v4280_v59 = vcombine.low %v528_v47, %v544_v48  ;;  %v450_v26 = vld [vmem:[%s4698_s21 + $0x390] sm:$0xff] }
  0x45   : > { %v576_v56 = vld [vmem:[%s4698_s21 + $0x780] sm:$0xff]  ;;  %v577_v58 = vld [vmem:[%s4698_s21 + $0x788] sm:$0xff]  ;;  %v4282_v60 = vcombine.low %v529_v49, %v545_v50  ;;  %v435_v27 = vld [vmem:[%s4698_s21 + $0x318] sm:$0xff]  ;;  %v4156_v29 = vcombine.low %v402_v17, %v418_v18  ;;  %v4158_v30 = vcombine.low %v403_v19, %v419_v20  ;;  %v4189_v31 = vcombine.high %v434_v25, %v450_v26 }
  0x46   : > { %v4313_v61 = vcombine.high %v560_v55, %v576_v56  ;;  %v4315_v62 = vcombine.high %v561_v57, %v577_v58  ;;  %v4312_v4 = vcombine.low %v560_v55, %v576_v56  ;;  %v4314_v5 = vcombine.low %v561_v57, %v577_v58  ;;  %v4747_v10 = vld [vmem:[%s5294_s0] sm:$0xff]   ;;  %v451_v28 = vld [vmem:[%s4698_s21 + $0x398] sm:$0xff]  ;;  %v466_v33 = vld [vmem:[%s4698_s21 + $0x410] sm:$0xff] }
  0x47   : > { %1885 = vmatpush1.bf16.msra.mxu0 %v4184_v35  ;;  %1928 = vmatpush1.bf16.msra.mxu1 %v4186_v36  ;;  %v4191_v32 = vcombine.high %v435_v27, %v451_v28  ;;  %v482_v34 = vld [vmem:[%s4698_s21 + $0x490] sm:$0xff]  ;;  %v467_v35 = vld [vmem:[%s4698_s21 + $0x418] sm:$0xff]  ;;  %v340_v2 = vld [vmem:[%s4698_s21 + $0x20] sm:$0xff] }
  0x48   : > { %1886 = vmatprep.subr.bf16.mxu0 %v4217_v37  ;;  %1929 = vmatprep.subr.bf16.mxu1 %v4219_v38  ;;  %v483_v36 = vld [vmem:[%s4698_s21 + $0x498] sm:$0xff]  ;;  %v4188_v37 = vcombine.low %v434_v25, %v450_v26  ;;  %v4190_v38 = vcombine.low %v435_v27, %v451_v28  ;;  %v4221_v39 = vcombine.high %v466_v33, %v482_v34  ;;  %v498_v41 = vld [vmem:[%s4698_s21 + $0x510] sm:$0xff]  ;;  %v356_v3 = vld [vmem:[%s4698_s21 + $0xa0] sm:$0xff] }
  0x49   : > { %v4223_v40 = vcombine.high %v467_v35, %v483_v36  ;;  %v514_v42 = vld [vmem:[%s4698_s21 + $0x590] sm:$0xff]  ;;  %v4097_v8 = vcombine.high %v340_v2, %v356_v3  ;;  %v372_v11 = vld [vmem:[%s4698_s21 + $0x120] sm:$0xff] }
  0x4a   : > { %v4253_v47 = vcombine.high %v498_v41, %v514_v42  ;;  %v530_v49 = vld [vmem:[%s4698_s21 + $0x610] sm:$0xff]  ;;  %v388_v12 = vld [vmem:[%s4698_s21 + $0x1a0] sm:$0xff] }
  0x4b   : > { %1887 = vmatpush1.bf16.msra.mxu0 %v4216_v43  ;;  %1930 = vmatpush1.bf16.msra.mxu1 %v4218_v44  ;;  %v499_v43 = vld [vmem:[%s4698_s21 + $0x518] sm:$0xff]  ;;  %v546_v50 = vld [vmem:[%s4698_s21 + $0x690] sm:$0xff]  ;;  %v4129_v17 = vcombine.high %v372_v11, %v388_v12  ;;  %v404_v19 = vld [vmem:[%s4698_s21 + $0x220] sm:$0xff] }
  0x4c   : > { %1888 = vmatprep.subr.bf16.mxu0 %v4249_v45  ;;  %1931 = vmatprep.subr.bf16.mxu1 %v4251_v46  ;;  %v515_v44 = vld [vmem:[%s4698_s21 + $0x598] sm:$0xff]  ;;  %v4220_v45 = vcombine.low %v466_v33, %v482_v34  ;;  %v4222_v46 = vcombine.low %v467_v35, %v483_v36  ;;  %v4285_v55 = vcombine.high %v530_v49, %v546_v50  ;;  %v562_v57 = vld [vmem:[%s4698_s21 + $0x710] sm:$0xff]  ;;  %v420_v20 = vld [vmem:[%s4698_s21 + $0x2a0] sm:$0xff] }
  0x4d   : > { %v4255_v48 = vcombine.high %v499_v43, %v515_v44  ;;  %v578_v58 = vld [vmem:[%s4698_s21 + $0x790] sm:$0xff]  ;;  %v4161_v25 = vcombine.high %v404_v19, %v420_v20  ;;  %v436_v27 = vld [vmem:[%s4698_s21 + $0x320] sm:$0xff] }
  0x4e   : > { %v4317_v63 = vcombine.high %v562_v57, %v578_v58  ;;  %v452_v28 = vld [vmem:[%s4698_s21 + $0x3a0] sm:$0xff] }
  0x4f   : > { %1889 = vmatpush1.bf16.msra.mxu0 %v4248_v51  ;;  %1932 = vmatpush1.bf16.msra.mxu1 %v4250_v52  ;;  %v531_v51 = vld [vmem:[%s4698_s21 + $0x618] sm:$0xff]  ;;  %v4193_v33 = vcombine.high %v436_v27, %v452_v28  ;;  %v468_v35 = vld [vmem:[%s4698_s21 + $0x420] sm:$0xff] }
  0x50   : > { %1890 = vmatprep.subr.bf16.mxu0 %v4281_v53  ;;  %1933 = vmatprep.subr.bf16.mxu1 %v4283_v54  ;;  %v547_v52 = vld [vmem:[%s4698_s21 + $0x698] sm:$0xff]  ;;  %v4252_v53 = vcombine.low %v498_v41, %v514_v42  ;;  %v4254_v54 = vcombine.low %v499_v43, %v515_v44  ;;  %v484_v36 = vld [vmem:[%s4698_s21 + $0x4a0] sm:$0xff] }
  0x51   : > { %v4287_v56 = vcombine.high %v531_v51, %v547_v52  ;;  %v4225_v41 = vcombine.high %v468_v35, %v484_v36  ;;  %v500_v43 = vld [vmem:[%s4698_s21 + $0x520] sm:$0xff] }
  0x52   : > { %v516_v44 = vld [vmem:[%s4698_s21 + $0x5a0] sm:$0xff] }
  0x53   : > { %1891 = vmatpush1.bf16.msra.mxu0 %v4280_v59  ;;  %1934 = vmatpush1.bf16.msra.mxu1 %v4282_v60  ;;  %v563_v59 = vld [vmem:[%s4698_s21 + $0x718] sm:$0xff] }
  0x54   : > { %1892 = vmatprep.subr.bf16.mxu0 %v4313_v61  ;;  %1935 = vmatprep.subr.bf16.mxu1 %v4315_v62  ;;  %v579_v60 = vld [vmem:[%s4698_s21 + $0x798] sm:$0xff]  ;;  %v4284_v61 = vcombine.low %v530_v49, %v546_v50  ;;  %v4286_v62 = vcombine.low %v531_v51, %v547_v52  ;;  %v4257_v49 = vcombine.high %v500_v43, %v516_v44  ;;  %v532_v51 = vld [vmem:[%s4698_s21 + $0x620] sm:$0xff] }
  0x55   : > { %v4319_v1 = vcombine.high %v563_v59, %v579_v60  ;;  %v548_v52 = vld [vmem:[%s4698_s21 + $0x6a0] sm:$0xff] }
  0x57   : > { %1893 = vmatpush1.bf16.msra.mxu0 %v4312_v4  ;;  %1936 = vmatpush1.bf16.msra.mxu1 %v4314_v5  ;;  %v341_v4 = vld [vmem:[%s4698_s21 + $0x28] sm:$0xff] }
  0x58   : > { %1964 = vmatprep.subr.bf16.mxu0 %v4093_v6  ;;  %2007 = vmatprep.subr.bf16.mxu1 %v4095_v7  ;;  %v357_v5 = vld [vmem:[%s4698_s21 + $0xa8] sm:$0xff]  ;;  %v4316_v6 = vcombine.low %v562_v57, %v578_v58  ;;  %v4318_v7 = vcombine.low %v563_v59, %v579_v60  ;;  %v4289_v57 = vcombine.high %v532_v51, %v548_v52  ;;  %v564_v59 = vld [vmem:[%s4698_s21 + $0x720] sm:$0xff] }
  0x59   : > { %v4099_v9 = vcombine.high %v341_v4, %v357_v5  ;;  %v580_v60 = vld [vmem:[%s4698_s21 + $0x7a0] sm:$0xff] }
  0x5a   : > { %1911 = vmatmul.mubr.bf16.vlgmr.msra.gmra.mrb[0].mxu0 %v4747_v10  ;;  %1954 = vmatmul.mubr.bf16.vlgmr.msra.gmra.mrb[0].mxu1 %v4747_v10 }
  0x5b   : > { %1965 = vmatpush1.bf16.msra.mxu0 %v4092_v13  ;;  %2008 = vmatpush1.bf16.msra.mxu1 %v4094_v14  ;;  %v373_v13 = vld [vmem:[%s4698_s21 + $0x128] sm:$0xff] }
  0x5c   : > { %1966 = vmatprep.subr.bf16.mxu0 %v4125_v15  ;;  %2009 = vmatprep.subr.bf16.mxu1 %v4127_v16  ;;  %v389_v14 = vld [vmem:[%s4698_s21 + $0x1a8] sm:$0xff]  ;;  %v4096_v15 = vcombine.low %v340_v2, %v356_v3  ;;  %v4098_v16 = vcombine.low %v341_v4, %v357_v5  ;;  %v4321_v2 = vcombine.high %v564_v59, %v580_v60  ;;  %v342_v4 = vld [vmem:[%s4698_s21 + $0x30] sm:$0xff] }
  0x5d   : > { %1996 = vmatprep.mubr.bf16.mxu0 %v4564_v0  ;;  %2039 = vmatprep.mubr.bf16.mxu1 %v4564_v0  ;;  %v4131_v18 = vcombine.high %v373_v13, %v389_v14  ;;  %v358_v5 = vld [vmem:[%s4698_s21 + $0xb0] sm:$0xff] }
  0x5f   : > { %1967 = vmatpush1.bf16.msra.mxu0 %v4124_v21  ;;  %2010 = vmatpush1.bf16.msra.mxu1 %v4126_v22  ;;  %v405_v21 = vld [vmem:[%s4698_s21 + $0x228] sm:$0xff] }
  0x60   : > { %1968 = vmatprep.subr.bf16.mxu0 %v4157_v23  ;;  %2011 = vmatprep.subr.bf16.mxu1 %v4159_v24  ;;  %v421_v22 = vld [vmem:[%s4698_s21 + $0x2a8] sm:$0xff]  ;;  %v4128_v23 = vcombine.low %v372_v11, %v388_v12  ;;  %v4130_v24 = vcombine.low %v373_v13, %v389_v14  ;;  %v4101_v11 = vcombine.high %v342_v4, %v358_v5  ;;  %v374_v13 = vld [vmem:[%s4698_s21 + $0x130] sm:$0xff] }
  0x61   : > { %v4163_v26 = vcombine.high %v405_v21, %v421_v22  ;;  %v390_v14 = vld [vmem:[%s4698_s21 + $0x1b0] sm:$0xff] }
  0x63   : > { %1969 = vmatpush1.bf16.msra.mxu0 %v4156_v29  ;;  %2012 = vmatpush1.bf16.msra.mxu1 %v4158_v30  ;;  %v437_v29 = vld [vmem:[%s4698_s21 + $0x328] sm:$0xff] }
  0x64   : > { %1970 = vmatprep.subr.bf16.mxu0 %v4189_v31  ;;  %2013 = vmatprep.subr.bf16.mxu1 %v4191_v32  ;;  %v453_v30 = vld [vmem:[%s4698_s21 + $0x3a8] sm:$0xff]  ;;  %v4160_v31 = vcombine.low %v404_v19, %v420_v20  ;;  %v4162_v32 = vcombine.low %v405_v21, %v421_v22  ;;  %v4133_v19 = vcombine.high %v374_v13, %v390_v14  ;;  %v406_v21 = vld [vmem:[%s4698_s21 + $0x230] sm:$0xff] }
  0x65   : > { %v4195_v34 = vcombine.high %v437_v29, %v453_v30  ;;  %v422_v22 = vld [vmem:[%s4698_s21 + $0x2b0] sm:$0xff] }
  0x67   : > { %1971 = vmatpush1.bf16.msra.mxu0 %v4188_v37  ;;  %2014 = vmatpush1.bf16.msra.mxu1 %v4190_v38  ;;  %v469_v37 = vld [vmem:[%s4698_s21 + $0x428] sm:$0xff] }
  0x68   : > { %1972 = vmatprep.subr.bf16.mxu0 %v4221_v39  ;;  %2015 = vmatprep.subr.bf16.mxu1 %v4223_v40  ;;  %v485_v38 = vld [vmem:[%s4698_s21 + $0x4a8] sm:$0xff]  ;;  %v4192_v39 = vcombine.low %v436_v27, %v452_v28  ;;  %v4194_v40 = vcombine.low %v437_v29, %v453_v30  ;;  %v4165_v27 = vcombine.high %v406_v21, %v422_v22  ;;  %v438_v29 = vld [vmem:[%s4698_s21 + $0x330] sm:$0xff] }
  0x69   : > { %v4227_v42 = vcombine.high %v469_v37, %v485_v38  ;;  %v454_v30 = vld [vmem:[%s4698_s21 + $0x3b0] sm:$0xff] }
  0x6b   : > { %1973 = vmatpush1.bf16.msra.mxu0 %v4220_v45  ;;  %2016 = vmatpush1.bf16.msra.mxu1 %v4222_v46  ;;  %v501_v45 = vld [vmem:[%s4698_s21 + $0x528] sm:$0xff] }
  0x6c   : > { %1974 = vmatprep.subr.bf16.mxu0 %v4253_v47  ;;  %2017 = vmatprep.subr.bf16.mxu1 %v4255_v48  ;;  %v517_v46 = vld [vmem:[%s4698_s21 + $0x5a8] sm:$0xff]  ;;  %v4224_v47 = vcombine.low %v468_v35, %v484_v36  ;;  %v4226_v48 = vcombine.low %v469_v37, %v485_v38  ;;  %v4197_v35 = vcombine.high %v438_v29, %v454_v30  ;;  %v470_v37 = vld [vmem:[%s4698_s21 + $0x430] sm:$0xff] }
  0x6d   : > { %v4259_v50 = vcombine.high %v501_v45, %v517_v46  ;;  %v486_v38 = vld [vmem:[%s4698_s21 + $0x4b0] sm:$0xff] }
  0x6f   : > { %1975 = vmatpush1.bf16.msra.mxu0 %v4252_v53  ;;  %2018 = vmatpush1.bf16.msra.mxu1 %v4254_v54  ;;  %v533_v53 = vld [vmem:[%s4698_s21 + $0x628] sm:$0xff] }
  0x70   : > { %1976 = vmatprep.subr.bf16.mxu0 %v4285_v55  ;;  %2019 = vmatprep.subr.bf16.mxu1 %v4287_v56  ;;  %v549_v54 = vld [vmem:[%s4698_s21 + $0x6a8] sm:$0xff]  ;;  %v4256_v55 = vcombine.low %v500_v43, %v516_v44  ;;  %v4258_v56 = vcombine.low %v501_v45, %v517_v46  ;;  %v4229_v43 = vcombine.high %v470_v37, %v486_v38  ;;  %v502_v45 = vld [vmem:[%s4698_s21 + $0x530] sm:$0xff] }
  0x71   : > { %v4291_v58 = vcombine.high %v533_v53, %v549_v54  ;;  %v518_v46 = vld [vmem:[%s4698_s21 + $0x5b0] sm:$0xff] }
  0x73   : > { %1977 = vmatpush1.bf16.msra.mxu0 %v4284_v61  ;;  %2020 = vmatpush1.bf16.msra.mxu1 %v4286_v62  ;;  %v565_v61 = vld [vmem:[%s4698_s21 + $0x728] sm:$0xff] }
  0x74   : > { %1978 = vmatprep.subr.bf16.mxu0 %v4317_v63  ;;  %2021 = vmatprep.subr.bf16.mxu1 %v4319_v1  ;;  %v581_v62 = vld [vmem:[%s4698_s21 + $0x7a8] sm:$0xff]  ;;  %v4288_v63 = vcombine.low %v532_v51, %v548_v52  ;;  %v4290_v1 = vcombine.low %v533_v53, %v549_v54  ;;  %v4261_v51 = vcombine.high %v502_v45, %v518_v46  ;;  %v534_v53 = vld [vmem:[%s4698_s21 + $0x630] sm:$0xff] }
  0x75   : > { %v4323_v3 = vcombine.high %v565_v61, %v581_v62  ;;  %v550_v54 = vld [vmem:[%s4698_s21 + $0x6b0] sm:$0xff] }
  0x77   : > { %1979 = vmatpush1.bf16.msra.mxu0 %v4316_v6  ;;  %2022 = vmatpush1.bf16.msra.mxu1 %v4318_v7  ;;  %v343_v6 = vld [vmem:[%s4698_s21 + $0x38] sm:$0xff] }
  0x78   : > { %2050 = vmatprep.subr.bf16.mxu0 %v4097_v8  ;;  %2093 = vmatprep.subr.bf16.mxu1 %v4099_v9  ;;  %v359_v7 = vld [vmem:[%s4698_s21 + $0xb8] sm:$0xff]  ;;  %v4320_v8 = vcombine.low %v564_v59, %v580_v60  ;;  %v4322_v9 = vcombine.low %v565_v61, %v581_v62  ;;  %v4293_v59 = vcombine.high %v534_v53, %v550_v54  ;;  %v566_v61 = vld [vmem:[%s4698_s21 + $0x730] sm:$0xff] }
  0x79   : > { %v4103_v12 = vcombine.high %v343_v6, %v359_v7  ;;  %v582_v62 = vld [vmem:[%s4698_s21 + $0x7b0] sm:$0xff] }
  0x7a   : > { %1997 = vmatmul.mubr.bf16.vlgmr.msra.gmra.mrb[4].mxu0 %v4747_v10  ;;  %2040 = vmatmul.mubr.bf16.vlgmr.msra.gmra.mrb[4].mxu1 %v4747_v10 }
  0x7b   : > { %2051 = vmatpush1.bf16.msra.mxu0 %v4096_v15  ;;  %2094 = vmatpush1.bf16.msra.mxu1 %v4098_v16  ;;  %v375_v15 = vld [vmem:[%s4698_s21 + $0x138] sm:$0xff] }
  0x7c   : > { %2052 = vmatprep.subr.bf16.mxu0 %v4129_v17  ;;  %2095 = vmatprep.subr.bf16.mxu1 %v4131_v18  ;;  %v391_v16 = vld [vmem:[%s4698_s21 + $0x1b8] sm:$0xff]  ;;  %v4100_v17 = vcombine.low %v342_v4, %v358_v5  ;;  %v4102_v18 = vcombine.low %v343_v6, %v359_v7  ;;  %v4325_v4 = vcombine.high %v566_v61, %v582_v62  ;;  %v344_v6 = vld [vmem:[%s4698_s21 + $0x40] sm:$0xff] }
  0x7d   : > { %2082 = vmatprep.mubr.bf16.mxu0 %v4564_v0  ;;  %2125 = vmatprep.mubr.bf16.mxu1 %v4564_v0  ;;  %v4135_v20 = vcombine.high %v375_v15, %v391_v16  ;;  %v360_v7 = vld [vmem:[%s4698_s21 + $0xc0] sm:$0xff] }
  0x7f   : > { %2053 = vmatpush1.bf16.msra.mxu0 %v4128_v23  ;;  %2096 = vmatpush1.bf16.msra.mxu1 %v4130_v24  ;;  %v407_v23 = vld [vmem:[%s4698_s21 + $0x238] sm:$0xff] }
  0x80   : > { %2054 = vmatprep.subr.bf16.mxu0 %v4161_v25  ;;  %2097 = vmatprep.subr.bf16.mxu1 %v4163_v26  ;;  %v423_v24 = vld [vmem:[%s4698_s21 + $0x2b8] sm:$0xff]  ;;  %v4132_v25 = vcombine.low %v374_v13, %v390_v14  ;;  %v4134_v26 = vcombine.low %v375_v15, %v391_v16  ;;  %v4105_v13 = vcombine.high %v344_v6, %v360_v7  ;;  %v376_v15 = vld [vmem:[%s4698_s21 + $0x140] sm:$0xff] }
  0x81   : > { %v4167_v28 = vcombine.high %v407_v23, %v423_v24  ;;  %v392_v16 = vld [vmem:[%s4698_s21 + $0x1c0] sm:$0xff] }
  0x83   : > { %2055 = vmatpush1.bf16.msra.mxu0 %v4160_v31  ;;  %2098 = vmatpush1.bf16.msra.mxu1 %v4162_v32  ;;  %v439_v31 = vld [vmem:[%s4698_s21 + $0x338] sm:$0xff] }
  0x84   : > { %2056 = vmatprep.subr.bf16.mxu0 %v4193_v33  ;;  %2099 = vmatprep.subr.bf16.mxu1 %v4195_v34  ;;  %v455_v32 = vld [vmem:[%s4698_s21 + $0x3b8] sm:$0xff]  ;;  %v4164_v33 = vcombine.low %v406_v21, %v422_v22  ;;  %v4166_v34 = vcombine.low %v407_v23, %v423_v24  ;;  %v4137_v21 = vcombine.high %v376_v15, %v392_v16  ;;  %v408_v23 = vld [vmem:[%s4698_s21 + $0x240] sm:$0xff] }
  0x85   : > { %v4199_v36 = vcombine.high %v439_v31, %v455_v32  ;;  %v424_v24 = vld [vmem:[%s4698_s21 + $0x2c0] sm:$0xff] }
  0x87   : > { %2057 = vmatpush1.bf16.msra.mxu0 %v4192_v39  ;;  %2100 = vmatpush1.bf16.msra.mxu1 %v4194_v40  ;;  %v471_v39 = vld [vmem:[%s4698_s21 + $0x438] sm:$0xff] }
  0x88   : > { %2058 = vmatprep.subr.bf16.mxu0 %v4225_v41  ;;  %2101 = vmatprep.subr.bf16.mxu1 %v4227_v42  ;;  %v487_v40 = vld [vmem:[%s4698_s21 + $0x4b8] sm:$0xff]  ;;  %v4196_v41 = vcombine.low %v438_v29, %v454_v30  ;;  %v4198_v42 = vcombine.low %v439_v31, %v455_v32  ;;  %v4169_v29 = vcombine.high %v408_v23, %v424_v24  ;;  %v440_v31 = vld [vmem:[%s4698_s21 + $0x340] sm:$0xff] }
  0x89   : > { %v4231_v44 = vcombine.high %v471_v39, %v487_v40  ;;  %v456_v32 = vld [vmem:[%s4698_s21 + $0x3c0] sm:$0xff] }
  0x8b   : > { %2059 = vmatpush1.bf16.msra.mxu0 %v4224_v47  ;;  %2102 = vmatpush1.bf16.msra.mxu1 %v4226_v48  ;;  %v503_v47 = vld [vmem:[%s4698_s21 + $0x538] sm:$0xff] }
  0x8c   : > { %2060 = vmatprep.subr.bf16.mxu0 %v4257_v49  ;;  %2103 = vmatprep.subr.bf16.mxu1 %v4259_v50  ;;  %v519_v48 = vld [vmem:[%s4698_s21 + $0x5b8] sm:$0xff]  ;;  %v4228_v49 = vcombine.low %v470_v37, %v486_v38  ;;  %v4230_v50 = vcombine.low %v471_v39, %v487_v40  ;;  %v4201_v37 = vcombine.high %v440_v31, %v456_v32  ;;  %v472_v39 = vld [vmem:[%s4698_s21 + $0x440] sm:$0xff] }
  0x8d   : > { %v4263_v52 = vcombine.high %v503_v47, %v519_v48  ;;  %v488_v40 = vld [vmem:[%s4698_s21 + $0x4c0] sm:$0xff] }
  0x8f   : > { %2061 = vmatpush1.bf16.msra.mxu0 %v4256_v55  ;;  %2104 = vmatpush1.bf16.msra.mxu1 %v4258_v56  ;;  %v535_v55 = vld [vmem:[%s4698_s21 + $0x638] sm:$0xff] }
  0x90   : > { %2062 = vmatprep.subr.bf16.mxu0 %v4289_v57  ;;  %2105 = vmatprep.subr.bf16.mxu1 %v4291_v58  ;;  %v551_v56 = vld [vmem:[%s4698_s21 + $0x6b8] sm:$0xff]  ;;  %v4260_v57 = vcombine.low %v502_v45, %v518_v46  ;;  %v4262_v58 = vcombine.low %v503_v47, %v519_v48  ;;  %v4233_v45 = vcombine.high %v472_v39, %v488_v40  ;;  %v504_v47 = vld [vmem:[%s4698_s21 + $0x540] sm:$0xff] }
  0x91   : > { %v4295_v60 = vcombine.high %v535_v55, %v551_v56  ;;  %v520_v48 = vld [vmem:[%s4698_s21 + $0x5c0] sm:$0xff] }
  0x93   : > { %2063 = vmatpush1.bf16.msra.mxu0 %v4288_v63  ;;  %2106 = vmatpush1.bf16.msra.mxu1 %v4290_v1  ;;  %v567_v63 = vld [vmem:[%s4698_s21 + $0x738] sm:$0xff] }
  0x94   : > { %2064 = vmatprep.subr.bf16.mxu0 %v4321_v2  ;;  %2107 = vmatprep.subr.bf16.mxu1 %v4323_v3  ;;  %v583_v1 = vld [vmem:[%s4698_s21 + $0x7b8] sm:$0xff]  ;;  %v4292_v2 = vcombine.low %v534_v53, %v550_v54  ;;  %v4294_v3 = vcombine.low %v535_v55, %v551_v56  ;;  %v4265_v53 = vcombine.high %v504_v47, %v520_v48  ;;  %v536_v55 = vld [vmem:[%s4698_s21 + $0x640] sm:$0xff] }
  0x95   : > { %v4327_v5 = vcombine.high %v567_v63, %v583_v1  ;;  %v552_v56 = vld [vmem:[%s4698_s21 + $0x6c0] sm:$0xff] }
  0x97   : > { %2065 = vmatpush1.bf16.msra.mxu0 %v4320_v8  ;;  %2108 = vmatpush1.bf16.msra.mxu1 %v4322_v9  ;;  %v345_v8 = vld [vmem:[%s4698_s21 + $0x48] sm:$0xff] }
  0x98   : > { %2136 = vmatprep.subr.bf16.mxu0 %v4101_v11  ;;  %2179 = vmatprep.subr.bf16.mxu1 %v4103_v12  ;;  %v361_v9 = vld [vmem:[%s4698_s21 + $0xc8] sm:$0xff]  ;;  %v4324_v11 = vcombine.low %v566_v61, %v582_v62  ;;  %v4326_v12 = vcombine.low %v567_v63, %v583_v1  ;;  %v4297_v61 = vcombine.high %v536_v55, %v552_v56  ;;  %v568_v63 = vld [vmem:[%s4698_s21 + $0x740] sm:$0xff] }
  0x99   : > { %v4107_v14 = vcombine.high %v345_v8, %v361_v9  ;;  %v584_v1 = vld [vmem:[%s4698_s21 + $0x7c0] sm:$0xff] }
  0x9a   : > { %2083 = vmatmul.mubr.bf16.vlgmr.msra.gmra.mrb[8].mxu0 %v4747_v10  ;;  %2126 = vmatmul.mubr.bf16.vlgmr.msra.gmra.mrb[8].mxu1 %v4747_v10 }
  0x9b   : > { %2137 = vmatpush1.bf16.msra.mxu0 %v4100_v17  ;;  %2180 = vmatpush1.bf16.msra.mxu1 %v4102_v18  ;;  %v377_v17 = vld [vmem:[%s4698_s21 + $0x148] sm:$0xff] }
  0x9c   : > { %2138 = vmatprep.subr.bf16.mxu0 %v4133_v19  ;;  %2181 = vmatprep.subr.bf16.mxu1 %v4135_v20  ;;  %v393_v18 = vld [vmem:[%s4698_s21 + $0x1c8] sm:$0xff]  ;;  %v4104_v19 = vcombine.low %v344_v6, %v360_v7  ;;  %v4106_v20 = vcombine.low %v345_v8, %v361_v9  ;;  %v4329_v6 = vcombine.high %v568_v63, %v584_v1  ;;  %v346_v8 = vld [vmem:[%s4698_s21 + $0x50] sm:$0xff] }
  0x9d   : > { %2168 = vmatprep.mubr.bf16.mxu0 %v4564_v0  ;;  %2211 = vmatprep.mubr.bf16.mxu1 %v4564_v0  ;;  %v4139_v22 = vcombine.high %v377_v17, %v393_v18  ;;  %v362_v9 = vld [vmem:[%s4698_s21 + $0xd0] sm:$0xff] }
  0x9f   : > { %2139 = vmatpush1.bf16.msra.mxu0 %v4132_v25  ;;  %2182 = vmatpush1.bf16.msra.mxu1 %v4134_v26  ;;  %v409_v25 = vld [vmem:[%s4698_s21 + $0x248] sm:$0xff] }
  0xa0   : > { %2140 = vmatprep.subr.bf16.mxu0 %v4165_v27  ;;  %2183 = vmatprep.subr.bf16.mxu1 %v4167_v28  ;;  %v425_v26 = vld [vmem:[%s4698_s21 + $0x2c8] sm:$0xff]  ;;  %v4136_v27 = vcombine.low %v376_v15, %v392_v16  ;;  %v4138_v28 = vcombine.low %v377_v17, %v393_v18  ;;  %v4109_v15 = vcombine.high %v346_v8, %v362_v9  ;;  %v378_v17 = vld [vmem:[%s4698_s21 + $0x150] sm:$0xff] }
  0xa1   : > { %v4171_v30 = vcombine.high %v409_v25, %v425_v26  ;;  %v394_v18 = vld [vmem:[%s4698_s21 + $0x1d0] sm:$0xff] }
  0xa3   : > { %2141 = vmatpush1.bf16.msra.mxu0 %v4164_v33  ;;  %2184 = vmatpush1.bf16.msra.mxu1 %v4166_v34  ;;  %v441_v33 = vld [vmem:[%s4698_s21 + $0x348] sm:$0xff] }
  0xa4   : > { %2142 = vmatprep.subr.bf16.mxu0 %v4197_v35  ;;  %2185 = vmatprep.subr.bf16.mxu1 %v4199_v36  ;;  %v457_v34 = vld [vmem:[%s4698_s21 + $0x3c8] sm:$0xff]  ;;  %v4168_v35 = vcombine.low %v408_v23, %v424_v24  ;;  %v4170_v36 = vcombine.low %v409_v25, %v425_v26  ;;  %v4141_v23 = vcombine.high %v378_v17, %v394_v18  ;;  %v410_v25 = vld [vmem:[%s4698_s21 + $0x250] sm:$0xff] }
  0xa5   : > { %v4203_v38 = vcombine.high %v441_v33, %v457_v34  ;;  %v426_v26 = vld [vmem:[%s4698_s21 + $0x2d0] sm:$0xff] }
  0xa7   : > { %2143 = vmatpush1.bf16.msra.mxu0 %v4196_v41  ;;  %2186 = vmatpush1.bf16.msra.mxu1 %v4198_v42  ;;  %v473_v41 = vld [vmem:[%s4698_s21 + $0x448] sm:$0xff] }
  0xa8   : > { %2144 = vmatprep.subr.bf16.mxu0 %v4229_v43  ;;  %2187 = vmatprep.subr.bf16.mxu1 %v4231_v44  ;;  %v489_v42 = vld [vmem:[%s4698_s21 + $0x4c8] sm:$0xff]  ;;  %v4200_v43 = vcombine.low %v440_v31, %v456_v32  ;;  %v4202_v44 = vcombine.low %v441_v33, %v457_v34  ;;  %v4173_v31 = vcombine.high %v410_v25, %v426_v26  ;;  %v442_v33 = vld [vmem:[%s4698_s21 + $0x350] sm:$0xff] }
  0xa9   : > { %v4235_v46 = vcombine.high %v473_v41, %v489_v42  ;;  %v458_v34 = vld [vmem:[%s4698_s21 + $0x3d0] sm:$0xff] }
  0xab   : > { %2145 = vmatpush1.bf16.msra.mxu0 %v4228_v49  ;;  %2188 = vmatpush1.bf16.msra.mxu1 %v4230_v50  ;;  %v505_v49 = vld [vmem:[%s4698_s21 + $0x548] sm:$0xff] }
  0xac   : > { %2146 = vmatprep.subr.bf16.mxu0 %v4261_v51  ;;  %2189 = vmatprep.subr.bf16.mxu1 %v4263_v52  ;;  %v521_v50 = vld [vmem:[%s4698_s21 + $0x5c8] sm:$0xff]  ;;  %v4232_v51 = vcombine.low %v472_v39, %v488_v40  ;;  %v4234_v52 = vcombine.low %v473_v41, %v489_v42  ;;  %v474_v40 = vld [vmem:[%s4698_s21 + $0x450] sm:$0xff]  ;;  %v475_v42 = vld [vmem:[%s4698_s21 + $0x458] sm:$0xff] }
  0xad   : > { %v4267_v54 = vcombine.high %v505_v49, %v521_v50  ;;  %v490_v41 = vld [vmem:[%s4698_s21 + $0x4d0] sm:$0xff] }
  0xaf   : > { %2147 = vmatpush1.bf16.msra.mxu0 %v4260_v57  ;;  %2190 = vmatpush1.bf16.msra.mxu1 %v4262_v58  ;;  %v537_v57 = vld [vmem:[%s4698_s21 + $0x648] sm:$0xff] }
  0xb0   : > { %2148 = vmatprep.subr.bf16.mxu0 %v4293_v59  ;;  %2191 = vmatprep.subr.bf16.mxu1 %v4295_v60  ;;  %v553_v58 = vld [vmem:[%s4698_s21 + $0x6c8] sm:$0xff]  ;;  %v4264_v59 = vcombine.low %v504_v47, %v520_v48  ;;  %v4266_v60 = vcombine.low %v505_v49, %v521_v50  ;;  %v506_v48 = vld [vmem:[%s4698_s21 + $0x550] sm:$0xff]  ;;  %v507_v50 = vld [vmem:[%s4698_s21 + $0x558] sm:$0xff] }
  0xb1   : > { %v4299_v62 = vcombine.high %v537_v57, %v553_v58  ;;  %v522_v49 = vld [vmem:[%s4698_s21 + $0x5d0] sm:$0xff] }
  0xb3   : > { %2149 = vmatpush1.bf16.msra.mxu0 %v4292_v2  ;;  %2192 = vmatpush1.bf16.msra.mxu1 %v4294_v3  ;;  %v569_v2 = vld [vmem:[%s4698_s21 + $0x748] sm:$0xff] }
  0xb4   : > { %2150 = vmatprep.subr.bf16.mxu0 %v4325_v4  ;;  %2193 = vmatprep.subr.bf16.mxu1 %v4327_v5  ;;  %v585_v3 = vld [vmem:[%s4698_s21 + $0x7c8] sm:$0xff]  ;;  %v4296_v4 = vcombine.low %v536_v55, %v552_v56  ;;  %v4298_v5 = vcombine.low %v537_v57, %v553_v58  ;;  %v538_v56 = vld [vmem:[%s4698_s21 + $0x650] sm:$0xff]  ;;  %v539_v58 = vld [vmem:[%s4698_s21 + $0x658] sm:$0xff] }
  0xb5   : > { %v4331_v7 = vcombine.high %v569_v2, %v585_v3  ;;  %v554_v57 = vld [vmem:[%s4698_s21 + $0x6d0] sm:$0xff] }
  0xb7   : > { %2151 = vmatpush1.bf16.msra.mxu0 %v4324_v11  ;;  %2194 = vmatpush1.bf16.msra.mxu1 %v4326_v12  ;;  %v347_v11 = vld [vmem:[%s4698_s21 + $0x58] sm:$0xff] }
  0xb8   : > { %2222 = vmatprep.subr.bf16.mxu0 %v4105_v13  ;;  %2265 = vmatprep.subr.bf16.mxu1 %v4107_v14  ;;  %v363_v12 = vld [vmem:[%s4698_s21 + $0xd8] sm:$0xff]  ;;  %v4328_v13 = vcombine.low %v568_v63, %v584_v1  ;;  %v4330_v14 = vcombine.low %v569_v2, %v585_v3  ;;  %v570_v1 = vld [vmem:[%s4698_s21 + $0x750] sm:$0xff] }
  0xb9   : > { %v4111_v16 = vcombine.high %v347_v11, %v363_v12  ;;  %v586_v2 = vld [vmem:[%s4698_s21 + $0x7d0] sm:$0xff]  ;;  %v571_v3 = vld [vmem:[%s4698_s21 + $0x758] sm:$0xff] }
  0xba   : > { %2169 = vmatmul.mubr.bf16.vlgmr.msra.gmra.mrb[12].mxu0 %v4747_v10  ;;  %2212 = vmatmul.mubr.bf16.vlgmr.msra.gmra.mrb[12].mxu1 %v4747_v10 }
  0xbb   : > { %2223 = vmatpush1.bf16.msra.mxu0 %v4104_v19  ;;  %2266 = vmatpush1.bf16.msra.mxu1 %v4106_v20  ;;  %v379_v19 = vld [vmem:[%s4698_s21 + $0x158] sm:$0xff] }
  0xbc   : > { %2224 = vmatprep.subr.bf16.mxu0 %v4137_v21  ;;  %2267 = vmatprep.subr.bf16.mxu1 %v4139_v22  ;;  %v395_v20 = vld [vmem:[%s4698_s21 + $0x1d8] sm:$0xff]  ;;  %v4108_v21 = vcombine.low %v346_v8, %v362_v9  ;;  %v4110_v22 = vcombine.low %v347_v11, %v363_v12  ;;  %v348_v9 = vld [vmem:[%s4698_s21 + $0x60] sm:$0xff]  ;;  %v349_v12 = vld [vmem:[%s4698_s21 + $0x68] sm:$0xff] }
  0xbd   : > { %2254 = vmatprep.mubr.bf16.mxu0 %v4564_v0  ;;  %2297 = vmatprep.mubr.bf16.mxu1 %v4564_v0  ;;  %v4143_v24 = vcombine.high %v379_v19, %v395_v20  ;;  %v364_v11 = vld [vmem:[%s4698_s21 + $0xe0] sm:$0xff] }
  0xbf   : > { %2225 = vmatpush1.bf16.msra.mxu0 %v4136_v27  ;;  %2268 = vmatpush1.bf16.msra.mxu1 %v4138_v28  ;;  %v411_v27 = vld [vmem:[%s4698_s21 + $0x258] sm:$0xff] }
  0xc0   : > { %2226 = vmatprep.subr.bf16.mxu0 %v4169_v29  ;;  %2269 = vmatprep.subr.bf16.mxu1 %v4171_v30  ;;  %v427_v28 = vld [vmem:[%s4698_s21 + $0x2d8] sm:$0xff]  ;;  %v4140_v29 = vcombine.low %v378_v17, %v394_v18  ;;  %v4142_v30 = vcombine.low %v379_v19, %v395_v20  ;;  %v380_v18 = vld [vmem:[%s4698_s21 + $0x160] sm:$0xff]  ;;  %v381_v20 = vld [vmem:[%s4698_s21 + $0x168] sm:$0xff] }
  0xc1   : > { %v4175_v32 = vcombine.high %v411_v27, %v427_v28  ;;  %v396_v19 = vld [vmem:[%s4698_s21 + $0x1e0] sm:$0xff] }
  0xc3   : > { %2227 = vmatpush1.bf16.msra.mxu0 %v4168_v35  ;;  %2270 = vmatpush1.bf16.msra.mxu1 %v4170_v36  ;;  %v443_v35 = vld [vmem:[%s4698_s21 + $0x358] sm:$0xff] }
  0xc4   : > { %2228 = vmatprep.subr.bf16.mxu0 %v4201_v37  ;;  %2271 = vmatprep.subr.bf16.mxu1 %v4203_v38  ;;  %v459_v36 = vld [vmem:[%s4698_s21 + $0x3d8] sm:$0xff]  ;;  %v4174_v37 = vcombine.low %v411_v27, %v427_v28  ;;  %v4205_v38 = vcombine.high %v442_v33, %v458_v34  ;;  %v428_v27 = vld [vmem:[%s4698_s21 + $0x2e0] sm:$0xff] }
  0xc5   : > { %v4207_v39 = vcombine.high %v443_v35, %v459_v36  ;;  %v4936_v28 = vld [vmem:[%s5294_s0] sm:$0xff]  }
  0xc7   : > { %2229 = vmatpush1.bf16.msra.mxu0 %v4200_v43  ;;  %2272 = vmatpush1.bf16.msra.mxu1 %v4202_v44  ;;  %v491_v43 = vld [vmem:[%s4698_s21 + $0x4d8] sm:$0xff]  ;;  %v4204_v44 = vcombine.low %v442_v33, %v458_v34 }
  0xc8   : > { %2230 = vmatprep.subr.bf16.mxu0 %v4233_v45  ;;  %2273 = vmatprep.subr.bf16.mxu1 %v4235_v46  ;;  %v4206_v45 = vcombine.low %v443_v35, %v459_v36  ;;  %v4237_v46 = vcombine.high %v474_v40, %v490_v41  ;;  %v4239_v47 = vcombine.high %v475_v42, %v491_v43  ;;  %v444_v35 = vld [vmem:[%s4698_s21 + $0x360] sm:$0xff] }
  0xc9   : > { %v460_v36 = vld [vmem:[%s4698_s21 + $0x3e0] sm:$0xff] }
  0xcb   : > { %2231 = vmatpush1.bf16.msra.mxu0 %v4232_v51  ;;  %2274 = vmatpush1.bf16.msra.mxu1 %v4234_v52  ;;  %v523_v51 = vld [vmem:[%s4698_s21 + $0x5d8] sm:$0xff]  ;;  %v4236_v52 = vcombine.low %v474_v40, %v490_v41  ;;  %v4209_v40 = vcombine.high %v444_v35, %v460_v36 }
  0xcc   : > { %2232 = vmatprep.subr.bf16.mxu0 %v4265_v53  ;;  %2275 = vmatprep.subr.bf16.mxu1 %v4267_v54  ;;  %v4238_v53 = vcombine.low %v475_v42, %v491_v43  ;;  %v4269_v54 = vcombine.high %v506_v48, %v522_v49  ;;  %v4271_v55 = vcombine.high %v507_v50, %v523_v51  ;;  %v476_v42 = vld [vmem:[%s4698_s21 + $0x460] sm:$0xff] }
  0xcd   : > { %v492_v43 = vld [vmem:[%s4698_s21 + $0x4e0] sm:$0xff] }
  0xcf   : > { %2233 = vmatpush1.bf16.msra.mxu0 %v4264_v59  ;;  %2276 = vmatpush1.bf16.msra.mxu1 %v4266_v60  ;;  %v555_v59 = vld [vmem:[%s4698_s21 + $0x6d8] sm:$0xff]  ;;  %v4268_v60 = vcombine.low %v506_v48, %v522_v49  ;;  %v4241_v48 = vcombine.high %v476_v42, %v492_v43 }
  0xd0   : > { %2234 = vmatprep.subr.bf16.mxu0 %v4297_v61  ;;  %2277 = vmatprep.subr.bf16.mxu1 %v4299_v62  ;;  %v4270_v61 = vcombine.low %v507_v50, %v523_v51  ;;  %v4301_v62 = vcombine.high %v538_v56, %v554_v57  ;;  %v4303_v63 = vcombine.high %v539_v58, %v555_v59  ;;  %v508_v50 = vld [vmem:[%s4698_s21 + $0x560] sm:$0xff] }
  0xd1   : > { %v524_v51 = vld [vmem:[%s4698_s21 + $0x5e0] sm:$0xff] }
  0xd3   : > { %2235 = vmatpush1.bf16.msra.mxu0 %v4296_v4  ;;  %2278 = vmatpush1.bf16.msra.mxu1 %v4298_v5  ;;  %v587_v4 = vld [vmem:[%s4698_s21 + $0x7d8] sm:$0xff]  ;;  %v4300_v5 = vcombine.low %v538_v56, %v554_v57  ;;  %v4273_v56 = vcombine.high %v508_v50, %v524_v51 }
  0xd4   : > { %2236 = vmatprep.subr.bf16.mxu0 %v4329_v6  ;;  %2279 = vmatprep.subr.bf16.mxu1 %v4331_v7  ;;  %v4302_v6 = vcombine.low %v539_v58, %v555_v59  ;;  %v4333_v7 = vcombine.high %v570_v1, %v586_v2  ;;  %v4335_v8 = vcombine.high %v571_v3, %v587_v4  ;;  %v540_v58 = vld [vmem:[%s4698_s21 + $0x660] sm:$0xff] }
  0xd5   : > { %v556_v59 = vld [vmem:[%s4698_s21 + $0x6e0] sm:$0xff] }
  0xd7   : > { %2237 = vmatpush1.bf16.msra.mxu0 %v4328_v13  ;;  %2280 = vmatpush1.bf16.msra.mxu1 %v4330_v14  ;;  %v365_v13 = vld [vmem:[%s4698_s21 + $0xe8] sm:$0xff]  ;;  %v4332_v14 = vcombine.low %v570_v1, %v586_v2  ;;  %v4305_v1 = vcombine.high %v540_v58, %v556_v59 }
  0xd8   : > { %2308 = vmatprep.subr.bf16.mxu0 %v4109_v15  ;;  %2351 = vmatprep.subr.bf16.mxu1 %v4111_v16  ;;  %v4334_v15 = vcombine.low %v571_v3, %v587_v4  ;;  %v4113_v16 = vcombine.high %v348_v9, %v364_v11  ;;  %v4115_v17 = vcombine.high %v349_v12, %v365_v13  ;;  %v572_v3 = vld [vmem:[%s4698_s21 + $0x760] sm:$0xff] }
  0xd9   : > { %v588_v4 = vld [vmem:[%s4698_s21 + $0x7e0] sm:$0xff] }
  0xda   : > { %2255 = vmatmul.mubr.bf16.vlgmr.msra.gmra.mrb[16].mxu0 %v4747_v10  ;;  %2298 = vmatmul.mubr.bf16.vlgmr.msra.gmra.mrb[16].mxu1 %v4747_v10  ;;  %v4172_v10 = vcombine.low %v410_v25, %v426_v26  ;;  %v412_v26 = vld [vmem:[%s4698_s21 + $0x260] sm:$0xff] }
  0xdb   : > { %2309 = vmatpush1.bf16.msra.mxu0 %v4108_v21  ;;  %2352 = vmatpush1.bf16.msra.mxu1 %v4110_v22  ;;  %v397_v21 = vld [vmem:[%s4698_s21 + $0x1e8] sm:$0xff]  ;;  %v4112_v22 = vcombine.low %v348_v9, %v364_v11  ;;  %v4177_v33 = vcombine.high %v412_v26, %v428_v27  ;;  %v4337_v9 = vcombine.high %v572_v3, %v588_v4 }
  0xdc   : > { %2310 = vmatprep.subr.bf16.mxu0 %v4141_v23  ;;  %2353 = vmatprep.subr.bf16.mxu1 %v4143_v24  ;;  %v4114_v23 = vcombine.low %v349_v12, %v365_v13  ;;  %v4145_v24 = vcombine.high %v380_v18, %v396_v19  ;;  %v4147_v25 = vcombine.high %v381_v20, %v397_v21  ;;  %v350_v12 = vld [vmem:[%s4698_s21 + $0x70] sm:$0xff] }
  0xdd   : > { %2340 = vmatprep.mubr.bf16.mxu0 %v4564_v0  ;;  %2383 = vmatprep.mubr.bf16.mxu1 %v4564_v0  ;;  %v366_v13 = vld [vmem:[%s4698_s21 + $0xf0] sm:$0xff] }
  0xdf   : > { %2311 = vmatpush1.bf16.msra.mxu0 %v4140_v29  ;;  %2354 = vmatpush1.bf16.msra.mxu1 %v4142_v30  ;;  %v413_v29 = vld [vmem:[%s4698_s21 + $0x268] sm:$0xff] }
  0xe0   : > { %2312 = vmatprep.subr.bf16.mxu0 %v4173_v31  ;;  %2355 = vmatprep.subr.bf16.mxu1 %v4175_v32  ;;  %v429_v30 = vld [vmem:[%s4698_s21 + $0x2e8] sm:$0xff]  ;;  %v4144_v31 = vcombine.low %v380_v18, %v396_v19  ;;  %v4146_v32 = vcombine.low %v381_v20, %v397_v21  ;;  %v4117_v18 = vcombine.high %v350_v12, %v366_v13  ;;  %v382_v20 = vld [vmem:[%s4698_s21 + $0x170] sm:$0xff] }
  0xe1   : > { %v4179_v34 = vcombine.high %v413_v29, %v429_v30  ;;  %v398_v21 = vld [vmem:[%s4698_s21 + $0x1f0] sm:$0xff] }
  0xe3   : > { %2313 = vmatpush1.bf16.msra.mxu0 %v4172_v10  ;;  %2356 = vmatpush1.bf16.msra.mxu1 %v4174_v37  ;;  %v445_v10 = vld [vmem:[%s4698_s21 + $0x368] sm:$0xff] }
  0xe4   : > { %2314 = vmatprep.subr.bf16.mxu0 %v4205_v38  ;;  %2357 = vmatprep.subr.bf16.mxu1 %v4207_v39  ;;  %v461_v37 = vld [vmem:[%s4698_s21 + $0x3e8] sm:$0xff]  ;;  %v4176_v38 = vcombine.low %v412_v26, %v428_v27  ;;  %v4178_v39 = vcombine.low %v413_v29, %v429_v30  ;;  %v4149_v26 = vcombine.high %v382_v20, %v398_v21  ;;  %v414_v29 = vld [vmem:[%s4698_s21 + $0x270] sm:$0xff] }
  0xe5   : > { %v4211_v41 = vcombine.high %v445_v10, %v461_v37  ;;  %v430_v30 = vld [vmem:[%s4698_s21 + $0x2f0] sm:$0xff] }
  0xe7   : > { %2315 = vmatpush1.bf16.msra.mxu0 %v4204_v44  ;;  %2358 = vmatpush1.bf16.msra.mxu1 %v4206_v45  ;;  %v477_v44 = vld [vmem:[%s4698_s21 + $0x468] sm:$0xff] }
  0xe8   : > { %2316 = vmatprep.subr.bf16.mxu0 %v4237_v46  ;;  %2359 = vmatprep.subr.bf16.mxu1 %v4239_v47  ;;  %v493_v45 = vld [vmem:[%s4698_s21 + $0x4e8] sm:$0xff]  ;;  %v4208_v46 = vcombine.low %v444_v35, %v460_v36  ;;  %v4210_v47 = vcombine.low %v445_v10, %v461_v37  ;;  %v4181_v35 = vcombine.high %v414_v29, %v430_v30  ;;  %v446_v10 = vld [vmem:[%s4698_s21 + $0x370] sm:$0xff] }
  0xe9   : > { %v4243_v49 = vcombine.high %v477_v44, %v493_v45  ;;  %v462_v37 = vld [vmem:[%s4698_s21 + $0x3f0] sm:$0xff] }
  0xeb   : > { %2317 = vmatpush1.bf16.msra.mxu0 %v4236_v52  ;;  %2360 = vmatpush1.bf16.msra.mxu1 %v4238_v53  ;;  %v509_v52 = vld [vmem:[%s4698_s21 + $0x568] sm:$0xff] }
  0xec   : > { %2318 = vmatprep.subr.bf16.mxu0 %v4269_v54  ;;  %2361 = vmatprep.subr.bf16.mxu1 %v4271_v55  ;;  %v525_v53 = vld [vmem:[%s4698_s21 + $0x5e8] sm:$0xff]  ;;  %v4240_v54 = vcombine.low %v476_v42, %v492_v43  ;;  %v4242_v55 = vcombine.low %v477_v44, %v493_v45  ;;  %v4213_v42 = vcombine.high %v446_v10, %v462_v37  ;;  %v478_v44 = vld [vmem:[%s4698_s21 + $0x470] sm:$0xff] }
  0xed   : > { %v4275_v57 = vcombine.high %v509_v52, %v525_v53  ;;  %v494_v45 = vld [vmem:[%s4698_s21 + $0x4f0] sm:$0xff] }
  0xef   : > { %2319 = vmatpush1.bf16.msra.mxu0 %v4268_v60  ;;  %2362 = vmatpush1.bf16.msra.mxu1 %v4270_v61  ;;  %v541_v60 = vld [vmem:[%s4698_s21 + $0x668] sm:$0xff] }
  0xf0   : > { %2320 = vmatprep.subr.bf16.mxu0 %v4301_v62  ;;  %2363 = vmatprep.subr.bf16.mxu1 %v4303_v63  ;;  %v557_v61 = vld [vmem:[%s4698_s21 + $0x6e8] sm:$0xff]  ;;  %v4272_v62 = vcombine.low %v508_v50, %v524_v51  ;;  %v4274_v63 = vcombine.low %v509_v52, %v525_v53  ;;  %v510_v51 = vld [vmem:[%s4698_s21 + $0x570] sm:$0xff]  ;;  %v511_v53 = vld [vmem:[%s4698_s21 + $0x578] sm:$0xff] }
  0xf1   : > { %v4307_v2 = vcombine.high %v541_v60, %v557_v61  ;;  %v526_v52 = vld [vmem:[%s4698_s21 + $0x5f0] sm:$0xff] }
  0xf3   : > { %2321 = vmatpush1.bf16.msra.mxu0 %v4300_v5  ;;  %2364 = vmatpush1.bf16.msra.mxu1 %v4302_v6  ;;  %v573_v5 = vld [vmem:[%s4698_s21 + $0x768] sm:$0xff] }
  0xf4   : > { %2322 = vmatprep.subr.bf16.mxu0 %v4333_v7  ;;  %2365 = vmatprep.subr.bf16.mxu1 %v4335_v8  ;;  %v589_v6 = vld [vmem:[%s4698_s21 + $0x7e8] sm:$0xff]  ;;  %v4304_v7 = vcombine.low %v540_v58, %v556_v59  ;;  %v4306_v8 = vcombine.low %v541_v60, %v557_v61  ;;  %v3057_v58 = vlaneseq  ;;  %v4277_v60 = vcombine.high %v510_v51, %v526_v52 }
  0xf5   : > { %v4339_v11 = vcombine.high %v573_v5, %v589_v6 }
  0xf7   : > { %2323 = vmatpush1.bf16.msra.mxu0 %v4332_v14  ;;  %2366 = vmatpush1.bf16.msra.mxu1 %v4334_v15  ;;  %v351_v14 = vld [vmem:[%s4698_s21 + $0x78] sm:$0xff] }
  0xf8   : > { %2394 = vmatprep.subr.bf16.mxu0 %v4113_v16  ;;  %2437 = vmatprep.subr.bf16.mxu1 %v4115_v17  ;;  %v367_v15 = vld [vmem:[%s4698_s21 + $0xf8] sm:$0xff]  ;;  %v4336_v16 = vcombine.low %v572_v3, %v588_v4  ;;  %v4338_v17 = vcombine.low %v573_v5, %v589_v6  ;;  %v5001_v3 = vld [vmem:[%s4698_s21 + $0x770] sm:$0xff]  ;;  %v4276_v5 = vcombine.low %v510_v51, %v526_v52 }
  0xf9   : > { %v4119_v19 = vcombine.high %v351_v14, %v367_v15  ;;  %v5004_v4 = vld [vmem:[%s4698_s21 + $0x7f0] sm:$0xff] }
  0xfa   : > { %2341 = vmatmul.mubr.bf16.vlgmr.msra.gmra.mrb[20].mxu0 %v4936_v28  ;;  %2384 = vmatmul.mubr.bf16.vlgmr.msra.gmra.mrb[20].mxu1 %v4936_v28 }
  0xfb   : > { %2395 = vmatpush1.bf16.msra.mxu0 %v4112_v22  ;;  %2438 = vmatpush1.bf16.msra.mxu1 %v4114_v23  ;;  %v383_v22 = vld [vmem:[%s4698_s21 + $0x178] sm:$0xff] }
  0xfc   : > { %2396 = vmatprep.subr.bf16.mxu0 %v4145_v24  ;;  %2439 = vmatprep.subr.bf16.mxu1 %v4147_v25  ;;  %v399_v23 = vld [vmem:[%s4698_s21 + $0x1f8] sm:$0xff]  ;;  %v4116_v24 = vcombine.low %v350_v12, %v366_v13  ;;  %v4118_v25 = vcombine.low %v351_v14, %v367_v15 }
  0xfd   : > { %2426 = vmatprep.mubr.bf16.mxu0 %v4564_v0  ;;  %2469 = vmatprep.mubr.bf16.mxu1 %v4564_v0  ;;  %v4151_v27 = vcombine.high %v383_v22, %v399_v23 }
  0xff   : > { %2397 = vmatpush1.bf16.msra.mxu0 %v4144_v31  ;;  %2440 = vmatpush1.bf16.msra.mxu1 %v4146_v32  ;;  %v415_v31 = vld [vmem:[%s4698_s21 + $0x278] sm:$0xff] }
 0x100   : > { %2398 = vmatprep.subr.bf16.mxu0 %v4177_v33  ;;  %2441 = vmatprep.subr.bf16.mxu1 %v4179_v34  ;;  %v431_v32 = vld [vmem:[%s4698_s21 + $0x2f8] sm:$0xff]  ;;  %v4148_v33 = vcombine.low %v382_v20, %v398_v21  ;;  %v4150_v34 = vcombine.low %v383_v22, %v399_v23  ;;  %v4340_v21 = vcombine.low %v5001_v3, %v5004_v4 }
 0x101   : > { %v4183_v36 = vcombine.high %v415_v31, %v431_v32 }
 0x103   : > { %2399 = vmatpush1.bf16.msra.mxu0 %v4176_v38  ;;  %2442 = vmatpush1.bf16.msra.mxu1 %v4178_v39  ;;  %v447_v38 = vld [vmem:[%s4698_s21 + $0x378] sm:$0xff] }
 0x104   : > { %2400 = vmatprep.subr.bf16.mxu0 %v4209_v40  ;;  %2443 = vmatprep.subr.bf16.mxu1 %v4211_v41  ;;  %v463_v39 = vld [vmem:[%s4698_s21 + $0x3f8] sm:$0xff]  ;;  %v4180_v40 = vcombine.low %v414_v29, %v430_v30  ;;  %v4182_v41 = vcombine.low %v415_v31, %v431_v32 }
 0x105   : > { %v4215_v43 = vcombine.high %v447_v38, %v463_v39 }
 0x107   : > { %2401 = vmatpush1.bf16.msra.mxu0 %v4208_v46  ;;  %2444 = vmatpush1.bf16.msra.mxu1 %v4210_v47  ;;  %v479_v46 = vld [vmem:[%s4698_s21 + $0x478] sm:$0xff] }
 0x108   : > { %2402 = vmatprep.subr.bf16.mxu0 %v4241_v48  ;;  %2445 = vmatprep.subr.bf16.mxu1 %v4243_v49  ;;  %v495_v47 = vld [vmem:[%s4698_s21 + $0x4f8] sm:$0xff]  ;;  %v4212_v48 = vcombine.low %v446_v10, %v462_v37  ;;  %v4245_v49 = vcombine.high %v478_v44, %v494_v45 }
 0x109   : > { %v4247_v50 = vcombine.high %v479_v46, %v495_v47  ;;  %v4246_v59 = vcombine.low %v479_v46, %v495_v47 }
 0x10b   : > { %2403 = vmatpush1.bf16.msra.mxu0 %v4240_v54  ;;  %2446 = vmatpush1.bf16.msra.mxu1 %v4242_v55  ;;  %v527_v54 = vld [vmem:[%s4698_s21 + $0x5f8] sm:$0xff]  ;;  %v4244_v55 = vcombine.low %v478_v44, %v494_v45 }
 0x10c   : > { %2404 = vmatprep.subr.bf16.mxu0 %v4273_v56  ;;  %2447 = vmatprep.subr.bf16.mxu1 %v4275_v57  ;;  %v4565_v56 = vmov 1966171168   ;;  %v4279_v61 = vcombine.high %v511_v53, %v527_v54 }
 0x10d   : > { %v3055_v57 = vunpack.c.l.s4 %v4565_v56 }
 0x10f   : > { %2405 = vmatpush1.bf16.msra.mxu0 %v4272_v62  ;;  %2448 = vmatpush1.bf16.msra.mxu1 %v4274_v63  ;;  %v542_v62 = vld [vmem:[%s4698_s21 + $0x670] sm:$0xff]  ;;  %v3056_v6 = vunpack.c.0.s8 %v3055_v57 }
 0x110   : > { %2406 = vmatprep.subr.bf16.mxu0 %v4305_v1  ;;  %2449 = vmatprep.subr.bf16.mxu1 %v4307_v2  ;;  %v558_v63 = vld [vmem:[%s4698_s21 + $0x6f0] sm:$0xff]  ;;  %v4995_v1 = vld [vmem:[%s4698_s21 + $0x678] sm:$0xff] }
 0x111   : > { %v4998_v2 = vld [vmem:[%s4698_s21 + $0x6f8] sm:$0xff]  ;;  %v4309_v12 = vcombine.high %v542_v62, %v558_v63  ;;  %v4308_v14 = vcombine.low %v542_v62, %v558_v63 }
 0x112   : > { %v4310_v15 = vcombine.low %v4995_v1, %v4998_v2 }
 0x113   : > { %2407 = vmatpush1.bf16.msra.mxu0 %v4304_v7  ;;  %2450 = vmatpush1.bf16.msra.mxu1 %v4306_v8  ;;  %v3058_v7 = vshrl.u32 %v3057_v58, 7  ;;  %v5008_v8 = vld [vmem:[%s4698_s21 + $0x778] sm:$0xff] }
 0x114   : > { %2408 = vmatprep.subr.bf16.mxu0 %v4337_v9  ;;  %2451 = vmatprep.subr.bf16.mxu1 %v4339_v11  ;;  %v5011_v9 = vld [vmem:[%s4698_s21 + $0x7f8] sm:$0xff]  ;;  %v4278_v11 = vcombine.low %v511_v53, %v527_v54 }
 0x115   : > { %v4342_v22 = vcombine.low %v5008_v8, %v5011_v9  ;;  %v4343_v23 = vcombine.high %v5008_v8, %v5011_v9  ;;  %v5025_v30 = vsub.s32 %v3056_v6, %v3058_v7 }
 0x117   : > { %2409 = vmatpush1.bf16.msra.mxu0 %v4336_v16  ;;  %2452 = vmatpush1.bf16.msra.mxu1 %v4338_v17  ;;  %v4311_v16 = vcombine.high %v4995_v1, %v4998_v2  ;;  %v4341_v17 = vcombine.high %v5001_v3, %v5004_v4 }
 0x118   : > { %2480 = vmatprep.subr.bf16.mxu0 %v4117_v18  ;;  %2523 = vmatprep.subr.bf16.mxu1 %v4119_v19 }
 0x11a   : > { %2427 = vmatmul.mubr.bf16.vlgmr.msra.gmra.mrb[24].mxu0 %v4936_v28  ;;  %2470 = vmatmul.mubr.bf16.vlgmr.msra.gmra.mrb[24].mxu1 %v4936_v28 }
 0x11b   : > { %2481 = vmatpush1.bf16.msra.mxu0 %v4116_v24  ;;  %2524 = vmatpush1.bf16.msra.mxu1 %v4118_v25 }
 0x11c   : > { %2482 = vmatprep.subr.bf16.mxu0 %v4149_v26  ;;  %2525 = vmatprep.subr.bf16.mxu1 %v4151_v27 }
 0x11d   : > { %2512 = vmatprep.mubr.bf16.mxu0 %v4564_v0  ;;  %2555 = vmatprep.mubr.bf16.mxu1 %v4564_v0  ;;  %v4214_v0 = vcombine.low %v447_v38, %v463_v39 }
 0x11f   : > { %2483 = vmatpush1.bf16.msra.mxu0 %v4148_v33  ;;  %2526 = vmatpush1.bf16.msra.mxu1 %v4150_v34 }
 0x120   : > { %2484 = vmatprep.subr.bf16.mxu0 %v4181_v35  ;;  %2527 = vmatprep.subr.bf16.mxu1 %v4183_v36 }
 0x123   : > { %2485 = vmatpush1.bf16.msra.mxu0 %v4180_v40  ;;  %2528 = vmatpush1.bf16.msra.mxu1 %v4182_v41 }
 0x124   : > { %2486 = vmatprep.subr.bf16.mxu0 %v4213_v42  ;;  %2529 = vmatprep.subr.bf16.mxu1 %v4215_v43 }
 0x127   : > { %2487 = vmatpush1.bf16.msra.mxu0 %v4212_v48  ;;  %2530 = vmatpush1.bf16.msra.mxu1 %v4214_v0 }
 0x128   : > { %2488 = vmatprep.subr.bf16.mxu0 %v4245_v49  ;;  %2531 = vmatprep.subr.bf16.mxu1 %v4247_v50 }
 0x12b   : > { %2489 = vmatpush1.bf16.msra.mxu0 %v4244_v55  ;;  %2532 = vmatpush1.bf16.msra.mxu1 %v4246_v59 }
 0x12c   : > { %2490 = vmatprep.subr.bf16.mxu0 %v4277_v60  ;;  %2533 = vmatprep.subr.bf16.mxu1 %v4279_v61 }
 0x12d   : > { %v1912_v13 = vpop.f32.mrb[0].mxu0  ;;  %v1955_v19 = vpop.f32.mrb[0].mxu1 }
 0x12e   : > { %v3262_v18 = vmul.f32 %v1912_v13, %v1912_v13  ;;  %v1914_v20 = vpop.f32.mrb[1].mxu0  ;;  %v3264_v24 = vmul.f32 %v1955_v19, %v1955_v19  ;;  %v1957_v27 = vpop.f32.mrb[1].mxu1 }
 0x12f   : > { %v4382_v25 = vpack.c.bf16 %v1914_v20, %v1912_v13  ;;  %v3263_v26 = vmul.f32 %v1914_v20, %v1914_v20  ;;  %v1916_v29 = vpop.f32.mrb[2].mxu0  ;;  %2491 = vmatpush1.bf16.msra.mxu0 %v4276_v5  ;;  %v4383_v31 = vpack.c.bf16 %v1957_v27, %v1955_v19  ;;  %v3265_v32 = vmul.f32 %v1957_v27, %v1957_v27  ;;  %v1959_v35 = vpop.f32.mrb[2].mxu1 }
 0x130   : > { %v2794_v33 = vadd.f32 %v1916_v29, %v1912_v13  ;;  %v3294_v34 = vmul.f32 %v1916_v29, %v1916_v29  ;;  %2534 = vmatpush1.bf16.msra.mxu1 %v4278_v11  ;;  %v1918_v36 = vpop.f32.mrb[3].mxu0  ;;  %v2808_v10 = vadd.f32 %v1959_v35, %v1955_v19  ;;  %v3296_v37 = vmul.f32 %v1959_v35, %v1959_v35  ;;  %v1961_v40 = vpop.f32.mrb[3].mxu1 }
 0x131   : > { %2758 = vst [vmem:[%s5029_s23] sm:$0xff] %v4382_v25  ;;  %v4398_v38 = vpack.c.bf16 %v1918_v36, %v1916_v29  ;;  %v2801_v39 = vadd.f32 %v1918_v36, %v1914_v20  ;;  %2492 = vmatprep.subr.bf16.mxu0 %v4309_v12  ;;  %2759 = vst [vmem:[%s5029_s23 + $0x8] sm:$0xff] %v4383_v31  ;;  %v3295_v43 = vmul.f32 %v1918_v36, %v1918_v36 }
 0x132   : > { %v2795_v41 = vrot.slane %v2794_v33, 4  ;;  %v3326_v42 = vadd.f32 %v3294_v34, %v3262_v18  ;;  %v4399_v44 = vpack.c.bf16 %v1961_v40, %v1959_v35  ;;  %2535 = vmatprep.subr.bf16.mxu1 %v4311_v16  ;;  %v2809_v45 = vrot.slane %v2808_v10, 4 }
 0x133   : > { %v3340_v46 = vadd.f32 %v3296_v37, %v3264_v24  ;;  %2774 = vst [vmem:[%s5029_s23 + $0x80] sm:$0xff] %v4398_v38  ;;  %v2802_v47 = vrot.slane %v2801_v39, 4  ;;  %v2815_v48 = vadd.f32 %v1961_v40, %v1957_v27  ;;  %2493 = vmatpush1.bf16.msra.mxu0 %v4308_v14  ;;  %v3333_v50 = vadd.f32 %v3295_v43, %v3263_v26 }
 0x134   : > { %v2796_v0 = vadd.f32 %v2795_v41, %v2794_v33  ;;  %v3327_v49 = vrot.slane %v3326_v42, 4  ;;  %2775 = vst [vmem:[%s5029_s23 + $0x88] sm:$0xff] %v4399_v44  ;;  %v3297_v51 = vmul.f32 %v1961_v40, %v1961_v40  ;;  %2536 = vmatpush1.bf16.msra.mxu1 %v4310_v15  ;;  %2494 = vmatprep.subr.bf16.mxu0 %v4341_v17 }
 0x135   : > { %v2810_v52 = vadd.f32 %v2809_v45, %v2808_v10  ;;  %v3341_v53 = vrot.slane %v3340_v46, 4  ;;  %v2803_v54 = vadd.f32 %v2802_v47, %v2801_v39  ;;  %v2816_v55 = vrot.slane %v2815_v48, 4  ;;  %2537 = vmatprep.subr.bf16.mxu1 %v4343_v23 }
 0x136   : > { %v2797_v56 = vrot.slane %v2796_v0, 2  ;;  %v3328_v57 = vadd.f32 %v3327_v49, %v3326_v42  ;;  %v3334_v58 = vrot.slane %v3333_v50, 4  ;;  %v3347_v59 = vadd.f32 %v3297_v51, %v3265_v32 }
 0x137   : > { %v2811_v60 = vrot.slane %v2810_v52, 2  ;;  %v3342_v61 = vadd.f32 %v3341_v53, %v3340_v46  ;;  %v2804_v62 = vrot.slane %v2803_v54, 2  ;;  %v2817_v63 = vadd.f32 %v2816_v55, %v2815_v48  ;;  %2495 = vmatpush1.bf16.msra.mxu0 %v4340_v21 }
 0x138   : > { %v2798_v1 = vadd.f32 %v2797_v56, %v2796_v0  ;;  %v3329_v2 = vrot.slane %v3328_v57, 2  ;;  %v3335_v3 = vadd.f32 %v3334_v58, %v3333_v50  ;;  %v3348_v4 = vrot.slane %v3347_v59, 4  ;;  %2538 = vmatpush1.bf16.msra.mxu1 %v4342_v22 }
 0x139   : > { %v2812_v5 = vadd.f32 %v2811_v60, %v2810_v52  ;;  %v3343_v6 = vrot.slane %v3342_v61, 2  ;;  %v2805_v7 = vadd.f32 %v2804_v62, %v2803_v54  ;;  %v2818_v8 = vrot.slane %v2817_v63, 2 }
 0x13a   : > { %v2799_v9 = vrot.slane %v2798_v1, 1  ;;  %v3330_v11 = vadd.f32 %v3329_v2, %v3328_v57  ;;  %v3336_v12 = vrot.slane %v3335_v3, 2  ;;  %v3349_v13 = vadd.f32 %v3348_v4, %v3347_v59  ;;  %2513 = vmatmul.mubr.bf16.vlgmr.msra.gmra.mrb[28].mxu0 %v4936_v28 }
 0x13b   : > { %v2813_v14 = vrot.slane %v2812_v5, 1  ;;  %v3344_v15 = vadd.f32 %v3343_v6, %v3342_v61  ;;  %v2806_v16 = vrot.slane %v2805_v7, 1  ;;  %v2819_v17 = vadd.f32 %v2818_v8, %v2817_v63  ;;  %2556 = vmatmul.mubr.bf16.vlgmr.msra.gmra.mrb[28].mxu1 %v4936_v28 }
 0x13c   : > { %v2800_v18 = vadd.f32 %v2799_v9, %v2798_v1  ;;  %v3331_v19 = vrot.slane %v3330_v11, 1  ;;  %v3337_v20 = vadd.f32 %v3336_v12, %v3335_v3  ;;  %v3350_v21 = vrot.slane %v3349_v13, 2 }
 0x13d   : > { %v2814_v22 = vadd.f32 %v2813_v14, %v2812_v5  ;;  %v3345_v23 = vrot.slane %v3344_v15, 1  ;;  %v2807_v24 = vadd.f32 %v2806_v16, %v2805_v7  ;;  %v2820_v25 = vrot.slane %v2819_v17, 1 }
 0x13e   : > { %v3332_v26 = vadd.f32 %v3331_v19, %v3330_v11  ;;  %v3338_v27 = vrot.slane %v3337_v20, 1  ;;  %v3351_v29 = vadd.f32 %v3350_v21, %v3349_v13 }
 0x13f   : > { %v3050_v31 = vcombine.low %v2800_v18, %v2807_v24  ;;  %v2821_v32 = vadd.f32 %v2820_v25, %v2819_v17  ;;  %v3346_v33 = vadd.f32 %v3345_v23, %v3344_v15 }
 0x140   : > { %v3339_v34 = vadd.f32 %v3338_v27, %v3337_v20  ;;  %v3352_v35 = vrot.slane %v3351_v29, 1 }
 0x141   : > { %v5038_v36 = vrot.slane %v3050_v31, %v5025_v30  ;;  %v3051_v28 = vcombine.low %v2814_v22, %v2821_v32 }
 0x142   : > { %v3582_v10 = vcombine.low %v3332_v26, %v3339_v34  ;;  %v3353_v37 = vadd.f32 %v3352_v35, %v3351_v29 }
 0x143   : > { %v5041_v38 = vrot.slane %v3051_v28, %v5025_v30 }
 0x144   : > { %v5044_v39 = vrot.slane %v3582_v10, %v5025_v30  ;;  %v3583_v40 = vcombine.low %v3346_v33, %v3353_v37 }
 0x145   : > { %v3082_v41 = vcombine.low %v5038_v36, %v5041_v38 }
 0x146   : > { %v5049_v42 = vrot.slane %v3583_v40, %v5025_v30 }
 0x148   : > { %v3614_v43 = vcombine.low %v5044_v39, %v5049_v42 }
 0x14d   : > { %v1998_v44 = vpop.f32.mrb[4].mxu0  ;;  %v2041_v46 = vpop.f32.mrb[4].mxu1 }
 0x14e   : > { %v3266_v45 = vmul.f32 %v1998_v44, %v1998_v44  ;;  %v2000_v47 = vpop.f32.mrb[5].mxu0  ;;  %v3268_v48 = vmul.f32 %v2041_v46, %v2041_v46  ;;  %v2043_v50 = vpop.f32.mrb[5].mxu1 }
 0x14f   : > { %v4384_v0 = vpack.c.bf16 %v2000_v47, %v1998_v44  ;;  %v3267_v49 = vmul.f32 %v2000_v47, %v2000_v47  ;;  %v2002_v51 = vpop.f32.mrb[6].mxu0  ;;  %v4385_v52 = vpack.c.bf16 %v2043_v50, %v2041_v46  ;;  %v3269_v53 = vmul.f32 %v2043_v50, %v2043_v50  ;;  %v2045_v56 = vpop.f32.mrb[6].mxu1 }
 0x150   : > { %v2822_v54 = vadd.f32 %v2002_v51, %v1998_v44  ;;  %v3298_v55 = vmul.f32 %v2002_v51, %v2002_v51  ;;  %v2004_v57 = vpop.f32.mrb[7].mxu0  ;;  %v2836_v58 = vadd.f32 %v2045_v56, %v2041_v46  ;;  %v3300_v59 = vmul.f32 %v2045_v56, %v2045_v56  ;;  %v2047_v62 = vpop.f32.mrb[7].mxu1 }
 0x151   : > { %2760 = vst [vmem:[%s5029_s23 + $0x10] sm:$0xff] %v4384_v0  ;;  %v4400_v60 = vpack.c.bf16 %v2004_v57, %v2002_v51  ;;  %v2829_v61 = vadd.f32 %v2004_v57, %v2000_v47  ;;  %2761 = vst [vmem:[%s5029_s23 + $0x18] sm:$0xff] %v4385_v52  ;;  %v3299_v2 = vmul.f32 %v2004_v57, %v2004_v57 }
 0x152   : > { %v2823_v63 = vrot.slane %v2822_v54, 4  ;;  %v3354_v1 = vadd.f32 %v3298_v55, %v3266_v45  ;;  %v4401_v3 = vpack.c.bf16 %v2047_v62, %v2045_v56  ;;  %v2837_v4 = vrot.slane %v2836_v58, 4 }
 0x153   : > { %v3368_v5 = vadd.f32 %v3300_v59, %v3268_v48  ;;  %2776 = vst [vmem:[%s5029_s23 + $0x90] sm:$0xff] %v4400_v60  ;;  %v2830_v6 = vrot.slane %v2829_v61, 4  ;;  %v2843_v7 = vadd.f32 %v2047_v62, %v2043_v50  ;;  %v3361_v11 = vadd.f32 %v3299_v2, %v3267_v49 }
 0x154   : > { %v2824_v8 = vadd.f32 %v2823_v63, %v2822_v54  ;;  %v3355_v9 = vrot.slane %v3354_v1, 4  ;;  %2777 = vst [vmem:[%s5029_s23 + $0x98] sm:$0xff] %v4401_v3  ;;  %v3301_v12 = vmul.f32 %v2047_v62, %v2047_v62  ;;  %v2838_v13 = vadd.f32 %v2837_v4, %v2836_v58 }
 0x155   : > { %v3369_v14 = vrot.slane %v3368_v5, 4  ;;  %v2831_v15 = vadd.f32 %v2830_v6, %v2829_v61  ;;  %v2844_v16 = vrot.slane %v2843_v7, 4  ;;  %v3362_v19 = vrot.slane %v3361_v11, 4 }
 0x156   : > { %v2825_v17 = vrot.slane %v2824_v8, 2  ;;  %v3356_v18 = vadd.f32 %v3355_v9, %v3354_v1  ;;  %v3375_v20 = vadd.f32 %v3301_v12, %v3269_v53  ;;  %v2839_v21 = vrot.slane %v2838_v13, 2 }
 0x157   : > { %v3370_v22 = vadd.f32 %v3369_v14, %v3368_v5  ;;  %v2832_v23 = vrot.slane %v2831_v15, 2  ;;  %v2845_v24 = vadd.f32 %v2844_v16, %v2843_v7  ;;  %v3363_v27 = vadd.f32 %v3362_v19, %v3361_v11 }
 0x158   : > { %v2826_v25 = vadd.f32 %v2825_v17, %v2824_v8  ;;  %v3357_v26 = vrot.slane %v3356_v18, 2  ;;  %v3376_v29 = vrot.slane %v3375_v20, 4  ;;  %v2840_v31 = vadd.f32 %v2839_v21, %v2838_v13 }
 0x159   : > { %v3371_v32 = vrot.slane %v3370_v22, 2  ;;  %v2833_v33 = vadd.f32 %v2832_v23, %v2831_v15  ;;  %v2846_v34 = vrot.slane %v2845_v24, 2  ;;  %v3364_v10 = vrot.slane %v3363_v27, 2 }
 0x15a   : > { %v2827_v35 = vrot.slane %v2826_v25, 1  ;;  %v3358_v28 = vadd.f32 %v3357_v26, %v3356_v18  ;;  %v3377_v37 = vadd.f32 %v3376_v29, %v3375_v20  ;;  %v2841_v40 = vrot.slane %v2840_v31, 1 }
 0x15b   : > { %v3372_v44 = vadd.f32 %v3371_v32, %v3370_v22  ;;  %v2834_v45 = vrot.slane %v2833_v33, 1  ;;  %v2847_v46 = vadd.f32 %v2846_v34, %v2845_v24  ;;  %v3365_v0 = vadd.f32 %v3364_v10, %v3363_v27 }
 0x15c   : > { %v2828_v47 = vadd.f32 %v2827_v35, %v2826_v25  ;;  %v3359_v48 = vrot.slane %v3358_v28, 1  ;;  %v3378_v49 = vrot.slane %v3377_v37, 2  ;;  %v2842_v50 = vadd.f32 %v2841_v40, %v2840_v31 }
 0x15d   : > { %v3373_v51 = vrot.slane %v3372_v44, 1  ;;  %v2835_v52 = vadd.f32 %v2834_v45, %v2833_v33  ;;  %v2848_v53 = vrot.slane %v2847_v46, 1  ;;  %v3366_v55 = vrot.slane %v3365_v0, 1 }
 0x15e   : > { %v3360_v54 = vadd.f32 %v3359_v48, %v3358_v28  ;;  %v3379_v56 = vadd.f32 %v3378_v49, %v3377_v37  ;;  %v3090_v8 = vrot.slane %v3082_v41, %v5025_v30  ;;  %v3622_v13 = vrot.slane %v3614_v43, %v5025_v30 }
 0x15f   : > { %v3052_v57 = vcombine.low %v2828_v47, %v2835_v52  ;;  %v2849_v58 = vadd.f32 %v2848_v53, %v2847_v46  ;;  %v3374_v59 = vadd.f32 %v3373_v51, %v3372_v44  ;;  %v3367_v60 = vadd.f32 %v3366_v55, %v3365_v0 }
 0x160   : > { %v3380_v61 = vrot.slane %v3379_v56, 1 }
 0x161   : > { %v3074_v62 = vrot.slane %v3052_v57, %v5025_v30  ;;  %v3053_v63 = vcombine.low %v2842_v50, %v2849_v58  ;;  %v3584_v1 = vcombine.low %v3360_v54, %v3367_v60 }
 0x162   : > { %v3381_v2 = vadd.f32 %v3380_v61, %v3379_v56 }
 0x163   : > { %v3081_v3 = vrot.slane %v3053_v63, %v5025_v30  ;;  %v3606_v4 = vrot.slane %v3584_v1, %v5025_v30 }
 0x164   : > { %v3585_v5 = vcombine.low %v3374_v59, %v3381_v2 }
 0x165   : > { %v3083_v6 = vcombine.low %v3074_v62, %v3081_v3 }
 0x166   : > { %v3613_v7 = vrot.slane %v3585_v5, %v5025_v30 }
 0x167   : > { %v3097_v9 = vrot.slane %v3083_v6, %v5025_v30 }
 0x168   : > { %v3615_v11 = vcombine.low %v3606_v4, %v3613_v7 }
 0x169   : > { %v3098_v12 = vcombine.low %v3090_v8, %v3097_v9 }
 0x16a   : > { %v3629_v14 = vrot.slane %v3615_v11, %v5025_v30 }
 0x16b   : > { %3254 = vst [vmem:[%s5074_s30] sm:$0xff] %v3098_v12 }
 0x16c   : > { %v3630_v15 = vcombine.low %v3622_v13, %v3629_v14 }
 0x16d   : > { %v2084_v36 = vpop.f32.mrb[8].mxu0  ;;  %v2127_v39 = vpop.f32.mrb[8].mxu1 }
 0x16e   : > { %v3270_v38 = vmul.f32 %v2084_v36, %v2084_v36  ;;  %v2086_v41 = vpop.f32.mrb[9].mxu0  ;;  %v3272_v42 = vmul.f32 %v2127_v39, %v2127_v39  ;;  %v2129_v17 = vpop.f32.mrb[9].mxu1  ;;  %3786 = vst [vmem:[%s5080_s7] sm:$0xff] %v3630_v15 }
 0x16f   : > { %v4386_v43 = vpack.c.bf16 %v2086_v41, %v2084_v36  ;;  %v3271_v16 = vmul.f32 %v2086_v41, %v2086_v41  ;;  %v2088_v18 = vpop.f32.mrb[10].mxu0  ;;  %v4387_v19 = vpack.c.bf16 %v2129_v17, %v2127_v39  ;;  %v3273_v20 = vmul.f32 %v2129_v17, %v2129_v17  ;;  %v2131_v23 = vpop.f32.mrb[10].mxu1 }
 0x170   : > { %v2850_v21 = vadd.f32 %v2088_v18, %v2084_v36  ;;  %v3302_v22 = vmul.f32 %v2088_v18, %v2088_v18  ;;  %v2090_v24 = vpop.f32.mrb[11].mxu0  ;;  %v2864_v25 = vadd.f32 %v2131_v23, %v2127_v39  ;;  %v3304_v26 = vmul.f32 %v2131_v23, %v2131_v23  ;;  %v2133_v31 = vpop.f32.mrb[11].mxu1 }
 0x171   : > { %2762 = vst [vmem:[%s5029_s23 + $0x20] sm:$0xff] %v4386_v43  ;;  %v4402_v27 = vpack.c.bf16 %v2090_v24, %v2088_v18  ;;  %v2857_v29 = vadd.f32 %v2090_v24, %v2086_v41  ;;  %2763 = vst [vmem:[%s5029_s23 + $0x28] sm:$0xff] %v4387_v19  ;;  %v3303_v34 = vmul.f32 %v2090_v24, %v2090_v24 }
 0x172   : > { %v2851_v32 = vrot.slane %v2850_v21, 4  ;;  %v3382_v33 = vadd.f32 %v3302_v22, %v3270_v38  ;;  %v4403_v35 = vpack.c.bf16 %v2133_v31, %v2131_v23  ;;  %v2865_v28 = vrot.slane %v2864_v25, 4 }
 0x173   : > { %v3396_v10 = vadd.f32 %v3304_v26, %v3272_v42  ;;  %2778 = vst [vmem:[%s5029_s23 + $0xa0] sm:$0xff] %v4402_v27  ;;  %v2858_v37 = vrot.slane %v2857_v29, 4  ;;  %v2871_v40 = vadd.f32 %v2133_v31, %v2129_v17  ;;  %v3389_v46 = vadd.f32 %v3303_v34, %v3271_v16 }
 0x174   : > { %v2852_v44 = vadd.f32 %v2851_v32, %v2850_v21  ;;  %v3383_v45 = vrot.slane %v3382_v33, 4  ;;  %2779 = vst [vmem:[%s5029_s23 + $0xa8] sm:$0xff] %v4403_v35  ;;  %v3305_v47 = vmul.f32 %v2133_v31, %v2133_v31  ;;  %v2866_v48 = vadd.f32 %v2865_v28, %v2864_v25 }
 0x175   : > { %v3397_v0 = vrot.slane %v3396_v10, 4  ;;  %v2859_v49 = vadd.f32 %v2858_v37, %v2857_v29  ;;  %v2872_v50 = vrot.slane %v2871_v40, 4  ;;  %v3390_v53 = vrot.slane %v3389_v46, 4 }
 0x176   : > { %v2853_v51 = vrot.slane %v2852_v44, 2  ;;  %v3384_v52 = vadd.f32 %v3383_v45, %v3382_v33  ;;  %v3403_v54 = vadd.f32 %v3305_v47, %v3273_v20  ;;  %v2867_v55 = vrot.slane %v2866_v48, 2 }
 0x177   : > { %v3398_v56 = vadd.f32 %v3397_v0, %v3396_v10  ;;  %v2860_v57 = vrot.slane %v2859_v49, 2  ;;  %v2873_v58 = vadd.f32 %v2872_v50, %v2871_v40  ;;  %v3391_v61 = vadd.f32 %v3390_v53, %v3389_v46 }
 0x178   : > { %v2854_v59 = vadd.f32 %v2853_v51, %v2852_v44  ;;  %v3385_v60 = vrot.slane %v3384_v52, 2  ;;  %v3404_v62 = vrot.slane %v3403_v54, 4  ;;  %v2868_v63 = vadd.f32 %v2867_v55, %v2866_v48 }
 0x179   : > { %v3399_v1 = vrot.slane %v3398_v56, 2  ;;  %v2861_v2 = vadd.f32 %v2860_v57, %v2859_v49  ;;  %v2874_v3 = vrot.slane %v2873_v58, 2  ;;  %v3392_v6 = vrot.slane %v3391_v61, 2 }
 0x17a   : > { %v2855_v4 = vrot.slane %v2854_v59, 1  ;;  %v3386_v5 = vadd.f32 %v3385_v60, %v3384_v52  ;;  %v3405_v7 = vadd.f32 %v3404_v62, %v3403_v54  ;;  %v2869_v8 = vrot.slane %v2868_v63, 1 }
 0x17b   : > { %v3400_v9 = vadd.f32 %v3399_v1, %v3398_v56  ;;  %v2862_v11 = vrot.slane %v2861_v2, 1  ;;  %v2875_v12 = vadd.f32 %v2874_v3, %v2873_v58  ;;  %v3393_v15 = vadd.f32 %v3392_v6, %v3391_v61 }
 0x17c   : > { %v2856_v13 = vadd.f32 %v2855_v4, %v2854_v59  ;;  %v3387_v14 = vrot.slane %v3386_v5, 1  ;;  %v3406_v36 = vrot.slane %v3405_v7, 2  ;;  %v2870_v38 = vadd.f32 %v2869_v8, %v2868_v63 }
 0x17d   : > { %v3401_v39 = vrot.slane %v3400_v9, 1  ;;  %v2863_v41 = vadd.f32 %v2862_v11, %v2861_v2  ;;  %v2876_v42 = vrot.slane %v2875_v12, 1  ;;  %v3394_v16 = vrot.slane %v3393_v15, 1 }
 0x17e   : > { %v3388_v43 = vadd.f32 %v3387_v14, %v3386_v5  ;;  %v3407_v17 = vadd.f32 %v3406_v36, %v3405_v7 }
 0x17f   : > { %v3099_v18 = vcombine.low %v2856_v13, %v2863_v41  ;;  %v2877_v19 = vadd.f32 %v2876_v42, %v2875_v12  ;;  %v3402_v20 = vadd.f32 %v3401_v39, %v3400_v9  ;;  %v3395_v21 = vadd.f32 %v3394_v16, %v3393_v15 }
 0x180   : > { %v3408_v22 = vrot.slane %v3407_v17, 1 }
 0x181   : > { %v5089_v23 = vrot.slane %v3099_v18, %v5025_v30  ;;  %v3100_v24 = vcombine.low %v2870_v38, %v2877_v19  ;;  %v3631_v25 = vcombine.low %v3388_v43, %v3395_v21 }
 0x182   : > { %v3409_v26 = vadd.f32 %v3408_v22, %v3407_v17 }
 0x183   : > { %v5092_v27 = vrot.slane %v3100_v24, %v5025_v30  ;;  %v5095_v29 = vrot.slane %v3631_v25, %v5025_v30 }
 0x184   : > { %v3632_v31 = vcombine.low %v3402_v20, %v3409_v26 }
 0x185   : > { %v3131_v32 = vcombine.low %v5089_v23, %v5092_v27 }
 0x186   : > { %v5100_v33 = vrot.slane %v3632_v31, %v5025_v30 }
 0x188   : > { %v3663_v34 = vcombine.low %v5095_v29, %v5100_v33 }
 0x18d   : > { %v2170_v35 = vpop.f32.mrb[12].mxu0  ;;  %v2213_v10 = vpop.f32.mrb[12].mxu1 }
 0x18e   : > { %v3274_v28 = vmul.f32 %v2170_v35, %v2170_v35  ;;  %v2172_v37 = vpop.f32.mrb[13].mxu0  ;;  %v3276_v40 = vmul.f32 %v2213_v10, %v2213_v10  ;;  %v2215_v46 = vpop.f32.mrb[13].mxu1 }
 0x18f   : > { %v4388_v44 = vpack.c.bf16 %v2172_v37, %v2170_v35  ;;  %v3275_v45 = vmul.f32 %v2172_v37, %v2172_v37  ;;  %v2174_v47 = vpop.f32.mrb[14].mxu0  ;;  %v4389_v48 = vpack.c.bf16 %v2215_v46, %v2213_v10  ;;  %v3277_v0 = vmul.f32 %v2215_v46, %v2215_v46  ;;  %v2217_v51 = vpop.f32.mrb[14].mxu1 }
 0x190   : > { %v2878_v49 = vadd.f32 %v2174_v47, %v2170_v35  ;;  %v3306_v50 = vmul.f32 %v2174_v47, %v2174_v47  ;;  %v2176_v52 = vpop.f32.mrb[15].mxu0  ;;  %v2892_v53 = vadd.f32 %v2217_v51, %v2213_v10  ;;  %v3308_v54 = vmul.f32 %v2217_v51, %v2217_v51  ;;  %v2219_v57 = vpop.f32.mrb[15].mxu1 }
 0x191   : > { %2764 = vst [vmem:[%s5029_s23 + $0x30] sm:$0xff] %v4388_v44  ;;  %v4404_v55 = vpack.c.bf16 %v2176_v52, %v2174_v47  ;;  %v2885_v56 = vadd.f32 %v2176_v52, %v2172_v37  ;;  %2765 = vst [vmem:[%s5029_s23 + $0x38] sm:$0xff] %v4389_v48  ;;  %v3307_v60 = vmul.f32 %v2176_v52, %v2176_v52 }
 0x192   : > { %v2879_v58 = vrot.slane %v2878_v49, 4  ;;  %v3410_v59 = vadd.f32 %v3306_v50, %v3274_v28  ;;  %v4405_v61 = vpack.c.bf16 %v2219_v57, %v2217_v51  ;;  %v2893_v62 = vrot.slane %v2892_v53, 4 }
 0x193   : > { %v3424_v63 = vadd.f32 %v3308_v54, %v3276_v40  ;;  %2780 = vst [vmem:[%s5029_s23 + $0xb0] sm:$0xff] %v4404_v55  ;;  %v2886_v1 = vrot.slane %v2885_v56, 4  ;;  %v2899_v2 = vadd.f32 %v2219_v57, %v2215_v46  ;;  %v3417_v5 = vadd.f32 %v3307_v60, %v3275_v45 }
 0x194   : > { %v2880_v3 = vadd.f32 %v2879_v58, %v2878_v49  ;;  %v3411_v4 = vrot.slane %v3410_v59, 4  ;;  %2781 = vst [vmem:[%s5029_s23 + $0xb8] sm:$0xff] %v4405_v61  ;;  %v3309_v6 = vmul.f32 %v2219_v57, %v2219_v57  ;;  %v2894_v7 = vadd.f32 %v2893_v62, %v2892_v53 }
 0x195   : > { %v3425_v8 = vrot.slane %v3424_v63, 4  ;;  %v2887_v9 = vadd.f32 %v2886_v1, %v2885_v56  ;;  %v2900_v11 = vrot.slane %v2899_v2, 4  ;;  %v3418_v14 = vrot.slane %v3417_v5, 4 }
 0x196   : > { %v2881_v12 = vrot.slane %v2880_v3, 2  ;;  %v3412_v13 = vadd.f32 %v3411_v4, %v3410_v59  ;;  %v3431_v15 = vadd.f32 %v3309_v6, %v3277_v0  ;;  %v2895_v36 = vrot.slane %v2894_v7, 2 }
 0x197   : > { %v3426_v38 = vadd.f32 %v3425_v8, %v3424_v63  ;;  %v2888_v39 = vrot.slane %v2887_v9, 2  ;;  %v2901_v41 = vadd.f32 %v2900_v11, %v2899_v2  ;;  %v3419_v16 = vadd.f32 %v3418_v14, %v3417_v5 }
 0x198   : > { %v2882_v42 = vadd.f32 %v2881_v12, %v2880_v3  ;;  %v3413_v43 = vrot.slane %v3412_v13, 2  ;;  %v3432_v17 = vrot.slane %v3431_v15, 4  ;;  %v2896_v18 = vadd.f32 %v2895_v36, %v2894_v7 }
 0x199   : > { %v3427_v19 = vrot.slane %v3426_v38, 2  ;;  %v2889_v20 = vadd.f32 %v2888_v39, %v2887_v9  ;;  %v2902_v21 = vrot.slane %v2901_v41, 2  ;;  %v3420_v25 = vrot.slane %v3419_v16, 2 }
 0x19a   : > { %v2883_v22 = vrot.slane %v2882_v42, 1  ;;  %v3414_v24 = vadd.f32 %v3413_v43, %v3412_v13  ;;  %v3433_v26 = vadd.f32 %v3432_v17, %v3431_v15  ;;  %v2897_v31 = vrot.slane %v2896_v18, 1 }
 0x19b   : > { %v3428_v35 = vadd.f32 %v3427_v19, %v3426_v38  ;;  %v2890_v28 = vrot.slane %v2889_v20, 1  ;;  %v2903_v10 = vadd.f32 %v2902_v21, %v2901_v41  ;;  %v3421_v44 = vadd.f32 %v3420_v25, %v3419_v16 }
 0x19c   : > { %v2884_v37 = vadd.f32 %v2883_v22, %v2882_v42  ;;  %v3415_v40 = vrot.slane %v3414_v24, 1  ;;  %v3434_v45 = vrot.slane %v3433_v26, 2  ;;  %v2898_v46 = vadd.f32 %v2897_v31, %v2896_v18 }
 0x19d   : > { %v3429_v47 = vrot.slane %v3428_v35, 1  ;;  %v2891_v48 = vadd.f32 %v2890_v28, %v2889_v20  ;;  %v2904_v0 = vrot.slane %v2903_v10, 1  ;;  %v3422_v50 = vrot.slane %v3421_v44, 1 }
 0x19e   : > { %v3416_v49 = vadd.f32 %v3415_v40, %v3414_v24  ;;  %v3435_v51 = vadd.f32 %v3434_v45, %v3433_v26  ;;  %v3139_v3 = vrot.slane %v3131_v32, %v5025_v30  ;;  %v3671_v7 = vrot.slane %v3663_v34, %v5025_v30 }
 0x19f   : > { %v3101_v52 = vcombine.low %v2884_v37, %v2891_v48  ;;  %v2905_v53 = vadd.f32 %v2904_v0, %v2903_v10  ;;  %v3430_v54 = vadd.f32 %v3429_v47, %v3428_v35  ;;  %v3423_v55 = vadd.f32 %v3422_v50, %v3421_v44 }
 0x1a0   : > { %v3436_v56 = vrot.slane %v3435_v51, 1 }
 0x1a1   : > { %v3123_v57 = vrot.slane %v3101_v52, %v5025_v30  ;;  %v3102_v58 = vcombine.low %v2898_v46, %v2905_v53  ;;  %v3633_v59 = vcombine.low %v3416_v49, %v3423_v55 }
 0x1a2   : > { %v3437_v60 = vadd.f32 %v3436_v56, %v3435_v51 }
 0x1a3   : > { %v3130_v61 = vrot.slane %v3102_v58, %v5025_v30  ;;  %v3655_v62 = vrot.slane %v3633_v59, %v5025_v30 }
 0x1a4   : > { %v3634_v63 = vcombine.low %v3430_v54, %v3437_v60 }
 0x1a5   : > { %v3132_v1 = vcombine.low %v3123_v57, %v3130_v61 }
 0x1a6   : > { %v3662_v2 = vrot.slane %v3634_v63, %v5025_v30 }
 0x1a7   : > { %v3146_v4 = vrot.slane %v3132_v1, %v5025_v30 }
 0x1a8   : > { %v3664_v5 = vcombine.low %v3655_v62, %v3662_v2 }
 0x1a9   : > { %v3147_v6 = vcombine.low %v3139_v3, %v3146_v4 }
 0x1aa   : > { %v3678_v8 = vrot.slane %v3664_v5, %v5025_v30 }
 0x1ab   : > { %3255 = vst [vmem:[%s5074_s30 + $0x8] sm:$0xff] %v3147_v6 }
 0x1ac   : > { %v3679_v9 = vcombine.low %v3671_v7, %v3678_v8 }
 0x1ad   : > { %v2256_v11 = vpop.f32.mrb[16].mxu0  ;;  %v2299_v13 = vpop.f32.mrb[16].mxu1 }
 0x1ae   : > { %v3278_v12 = vmul.f32 %v2256_v11, %v2256_v11  ;;  %v2258_v23 = vpop.f32.mrb[17].mxu0  ;;  %v3280_v27 = vmul.f32 %v2299_v13, %v2299_v13  ;;  %v2301_v15 = vpop.f32.mrb[17].mxu1  ;;  %3787 = vst [vmem:[%s5080_s7 + $0x8] sm:$0xff] %v3679_v9 }
 0x1af   : > { %v4390_v32 = vpack.c.bf16 %v2258_v23, %v2256_v11  ;;  %v3279_v14 = vmul.f32 %v2258_v23, %v2258_v23  ;;  %v2260_v36 = vpop.f32.mrb[18].mxu0  ;;  %v4391_v38 = vpack.c.bf16 %v2301_v15, %v2299_v13  ;;  %v3281_v39 = vmul.f32 %v2301_v15, %v2301_v15  ;;  %v2303_v34 = vpop.f32.mrb[18].mxu1 }
 0x1b0   : > { %v2906_v29 = vadd.f32 %v2260_v36, %v2256_v11  ;;  %v3310_v33 = vmul.f32 %v2260_v36, %v2260_v36  ;;  %v2262_v41 = vpop.f32.mrb[19].mxu0  ;;  %v2920_v42 = vadd.f32 %v2303_v34, %v2299_v13  ;;  %v3312_v43 = vmul.f32 %v2303_v34, %v2303_v34  ;;  %v2305_v18 = vpop.f32.mrb[19].mxu1 }
 0x1b1   : > { %2766 = vst [vmem:[%s5029_s23 + $0x40] sm:$0xff] %v4390_v32  ;;  %v4406_v16 = vpack.c.bf16 %v2262_v41, %v2260_v36  ;;  %v2913_v17 = vadd.f32 %v2262_v41, %v2258_v23  ;;  %2767 = vst [vmem:[%s5029_s23 + $0x48] sm:$0xff] %v4391_v38  ;;  %v3311_v21 = vmul.f32 %v2262_v41, %v2262_v41 }
 0x1b2   : > { %v2907_v19 = vrot.slane %v2906_v29, 4  ;;  %v3438_v20 = vadd.f32 %v3310_v33, %v3278_v12  ;;  %v4407_v22 = vpack.c.bf16 %v2305_v18, %v2303_v34  ;;  %v2921_v24 = vrot.slane %v2920_v42, 4 }
 0x1b3   : > { %v3452_v25 = vadd.f32 %v3312_v43, %v3280_v27  ;;  %2782 = vst [vmem:[%s5029_s23 + $0xc0] sm:$0xff] %v4406_v16  ;;  %v2914_v26 = vrot.slane %v2913_v17, 4  ;;  %v2927_v31 = vadd.f32 %v2305_v18, %v2301_v15  ;;  %v3445_v10 = vadd.f32 %v3311_v21, %v3279_v14 }
 0x1b4   : > { %v2908_v35 = vadd.f32 %v2907_v19, %v2906_v29  ;;  %v3439_v28 = vrot.slane %v3438_v20, 4  ;;  %2783 = vst [vmem:[%s5029_s23 + $0xc8] sm:$0xff] %v4407_v22  ;;  %v3313_v37 = vmul.f32 %v2305_v18, %v2305_v18  ;;  %v2922_v40 = vadd.f32 %v2921_v24, %v2920_v42 }
 0x1b5   : > { %v3453_v44 = vrot.slane %v3452_v25, 4  ;;  %v2915_v45 = vadd.f32 %v2914_v26, %v2913_v17  ;;  %v2928_v46 = vrot.slane %v2927_v31, 4  ;;  %v3446_v0 = vrot.slane %v3445_v10, 4 }
 0x1b6   : > { %v2909_v47 = vrot.slane %v2908_v35, 2  ;;  %v3440_v48 = vadd.f32 %v3439_v28, %v3438_v20  ;;  %v3459_v49 = vadd.f32 %v3313_v37, %v3281_v39  ;;  %v2923_v50 = vrot.slane %v2922_v40, 2 }
 0x1b7   : > { %v3454_v51 = vadd.f32 %v3453_v44, %v3452_v25  ;;  %v2916_v52 = vrot.slane %v2915_v45, 2  ;;  %v2929_v53 = vadd.f32 %v2928_v46, %v2927_v31  ;;  %v3447_v56 = vadd.f32 %v3446_v0, %v3445_v10 }
 0x1b8   : > { %v2910_v54 = vadd.f32 %v2909_v47, %v2908_v35  ;;  %v3441_v55 = vrot.slane %v3440_v48, 2  ;;  %v3460_v57 = vrot.slane %v3459_v49, 4  ;;  %v2924_v58 = vadd.f32 %v2923_v50, %v2922_v40 }
 0x1b9   : > { %v3455_v59 = vrot.slane %v3454_v51, 2  ;;  %v2917_v60 = vadd.f32 %v2916_v52, %v2915_v45  ;;  %v2930_v61 = vrot.slane %v2929_v53, 2  ;;  %v3448_v1 = vrot.slane %v3447_v56, 2 }
 0x1ba   : > { %v2911_v62 = vrot.slane %v2910_v54, 1  ;;  %v3442_v63 = vadd.f32 %v3441_v55, %v3440_v48  ;;  %v3461_v2 = vadd.f32 %v3460_v57, %v3459_v49  ;;  %v2925_v3 = vrot.slane %v2924_v58, 1 }
 0x1bb   : > { %v3456_v4 = vadd.f32 %v3455_v59, %v3454_v51  ;;  %v2918_v5 = vrot.slane %v2917_v60, 1  ;;  %v2931_v6 = vadd.f32 %v2930_v61, %v2929_v53  ;;  %v3449_v9 = vadd.f32 %v3448_v1, %v3447_v56 }
 0x1bc   : > { %v2912_v7 = vadd.f32 %v2911_v62, %v2910_v54  ;;  %v3443_v8 = vrot.slane %v3442_v63, 1  ;;  %v3462_v11 = vrot.slane %v3461_v2, 2  ;;  %v2926_v12 = vadd.f32 %v2925_v3, %v2924_v58 }
 0x1bd   : > { %v3457_v13 = vrot.slane %v3456_v4, 1  ;;  %v2919_v23 = vadd.f32 %v2918_v5, %v2917_v60  ;;  %v2932_v27 = vrot.slane %v2931_v6, 1  ;;  %v3450_v14 = vrot.slane %v3449_v9, 1 }
 0x1be   : > { %v3444_v32 = vadd.f32 %v3443_v8, %v3442_v63  ;;  %v3463_v15 = vadd.f32 %v3462_v11, %v3461_v2 }
 0x1bf   : > { %v3148_v36 = vcombine.low %v2912_v7, %v2919_v23  ;;  %v2933_v38 = vadd.f32 %v2932_v27, %v2931_v6  ;;  %v3458_v39 = vadd.f32 %v3457_v13, %v3456_v4  ;;  %v3451_v29 = vadd.f32 %v3450_v14, %v3449_v9 }
 0x1c0   : > { %v3464_v33 = vrot.slane %v3463_v15, 1 }
 0x1c1   : > { %v5129_v34 = vrot.slane %v3148_v36, %v5025_v30  ;;  %v3149_v41 = vcombine.low %v2926_v12, %v2933_v38  ;;  %v3680_v42 = vcombine.low %v3444_v32, %v3451_v29 }
 0x1c2   : > { %v3465_v43 = vadd.f32 %v3464_v33, %v3463_v15 }
 0x1c3   : > { %v5132_v16 = vrot.slane %v3149_v41, %v5025_v30  ;;  %v5135_v17 = vrot.slane %v3680_v42, %v5025_v30 }
 0x1c4   : > { %v3681_v18 = vcombine.low %v3458_v39, %v3465_v43 }
 0x1c5   : > { %v3180_v19 = vcombine.low %v5129_v34, %v5132_v16 }
 0x1c6   : > { %v5140_v20 = vrot.slane %v3681_v18, %v5025_v30 }
 0x1c8   : > { %v3712_v21 = vcombine.low %v5135_v17, %v5140_v20 }
 0x1cd   : > { %v2342_v22 = vpop.f32.mrb[20].mxu0  ;;  %v2385_v25 = vpop.f32.mrb[20].mxu1 }
 0x1ce   : > { %v3282_v24 = vmul.f32 %v2342_v22, %v2342_v22  ;;  %v2344_v26 = vpop.f32.mrb[21].mxu0  ;;  %v3284_v31 = vmul.f32 %v2385_v25, %v2385_v25  ;;  %v2387_v10 = vpop.f32.mrb[21].mxu1 }
 0x1cf   : > { %v4392_v35 = vpack.c.bf16 %v2344_v26, %v2342_v22  ;;  %v3283_v28 = vmul.f32 %v2344_v26, %v2344_v26  ;;  %v2346_v37 = vpop.f32.mrb[22].mxu0  ;;  %v4393_v40 = vpack.c.bf16 %v2387_v10, %v2385_v25  ;;  %v3285_v44 = vmul.f32 %v2387_v10, %v2387_v10  ;;  %v2389_v47 = vpop.f32.mrb[22].mxu1 }
 0x1d0   : > { %v2934_v45 = vadd.f32 %v2346_v37, %v2342_v22  ;;  %v3314_v46 = vmul.f32 %v2346_v37, %v2346_v37  ;;  %v2348_v48 = vpop.f32.mrb[23].mxu0  ;;  %v2948_v0 = vadd.f32 %v2389_v47, %v2385_v25  ;;  %v3316_v49 = vmul.f32 %v2389_v47, %v2389_v47  ;;  %v2391_v52 = vpop.f32.mrb[23].mxu1 }
 0x1d1   : > { %2768 = vst [vmem:[%s5029_s23 + $0x50] sm:$0xff] %v4392_v35  ;;  %v4408_v50 = vpack.c.bf16 %v2348_v48, %v2346_v37  ;;  %v2941_v51 = vadd.f32 %v2348_v48, %v2344_v26  ;;  %2769 = vst [vmem:[%s5029_s23 + $0x58] sm:$0xff] %v4393_v40  ;;  %v3315_v55 = vmul.f32 %v2348_v48, %v2348_v48 }
 0x1d2   : > { %v2935_v53 = vrot.slane %v2934_v45, 4  ;;  %v3466_v54 = vadd.f32 %v3314_v46, %v3282_v24  ;;  %v4409_v56 = vpack.c.bf16 %v2391_v52, %v2389_v47  ;;  %v2949_v57 = vrot.slane %v2948_v0, 4 }
 0x1d3   : > { %v3480_v58 = vadd.f32 %v3316_v49, %v3284_v31  ;;  %2784 = vst [vmem:[%s5029_s23 + $0xd0] sm:$0xff] %v4408_v50  ;;  %v2942_v59 = vrot.slane %v2941_v51, 4  ;;  %v2955_v60 = vadd.f32 %v2391_v52, %v2387_v10  ;;  %v3473_v63 = vadd.f32 %v3315_v55, %v3283_v28 }
 0x1d4   : > { %v2936_v61 = vadd.f32 %v2935_v53, %v2934_v45  ;;  %v3467_v62 = vrot.slane %v3466_v54, 4  ;;  %2785 = vst [vmem:[%s5029_s23 + $0xd8] sm:$0xff] %v4409_v56  ;;  %v3317_v1 = vmul.f32 %v2391_v52, %v2391_v52  ;;  %v2950_v2 = vadd.f32 %v2949_v57, %v2948_v0 }
 0x1d5   : > { %v3481_v3 = vrot.slane %v3480_v58, 4  ;;  %v2943_v4 = vadd.f32 %v2942_v59, %v2941_v51  ;;  %v2956_v5 = vrot.slane %v2955_v60, 4  ;;  %v3474_v8 = vrot.slane %v3473_v63, 4 }
 0x1d6   : > { %v2937_v6 = vrot.slane %v2936_v61, 2  ;;  %v3468_v7 = vadd.f32 %v3467_v62, %v3466_v54  ;;  %v3487_v9 = vadd.f32 %v3317_v1, %v3285_v44  ;;  %v2951_v11 = vrot.slane %v2950_v2, 2 }
 0x1d7   : > { %v3482_v12 = vadd.f32 %v3481_v3, %v3480_v58  ;;  %v2944_v13 = vrot.slane %v2943_v4, 2  ;;  %v2957_v23 = vadd.f32 %v2956_v5, %v2955_v60  ;;  %v3475_v14 = vadd.f32 %v3474_v8, %v3473_v63 }
 0x1d8   : > { %v2938_v27 = vadd.f32 %v2937_v6, %v2936_v61  ;;  %v3469_v32 = vrot.slane %v3468_v7, 2  ;;  %v3488_v15 = vrot.slane %v3487_v9, 4  ;;  %v2952_v36 = vadd.f32 %v2951_v11, %v2950_v2 }
 0x1d9   : > { %v3483_v38 = vrot.slane %v3482_v12, 2  ;;  %v2945_v39 = vadd.f32 %v2944_v13, %v2943_v4  ;;  %v2958_v29 = vrot.slane %v2957_v23, 2  ;;  %v3476_v42 = vrot.slane %v3475_v14, 2 }
 0x1da   : > { %v2939_v33 = vrot.slane %v2938_v27, 1  ;;  %v3470_v41 = vadd.f32 %v3469_v32, %v3468_v7  ;;  %v3489_v43 = vadd.f32 %v3488_v15, %v3487_v9  ;;  %v2953_v18 = vrot.slane %v2952_v36, 1 }
 0x1db   : > { %v3484_v22 = vadd.f32 %v3483_v38, %v3482_v12  ;;  %v2946_v24 = vrot.slane %v2945_v39, 1  ;;  %v2959_v25 = vadd.f32 %v2958_v29, %v2957_v23  ;;  %v3477_v35 = vadd.f32 %v3476_v42, %v3475_v14 }
 0x1dc   : > { %v2940_v26 = vadd.f32 %v2939_v33, %v2938_v27  ;;  %v3471_v31 = vrot.slane %v3470_v41, 1  ;;  %v3490_v28 = vrot.slane %v3489_v43, 2  ;;  %v2954_v10 = vadd.f32 %v2953_v18, %v2952_v36 }
 0x1dd   : > { %v3485_v37 = vrot.slane %v3484_v22, 1  ;;  %v2947_v40 = vadd.f32 %v2946_v24, %v2945_v39  ;;  %v2960_v44 = vrot.slane %v2959_v25, 1  ;;  %v3478_v46 = vrot.slane %v3477_v35, 1 }
 0x1de   : > { %v3472_v45 = vadd.f32 %v3471_v31, %v3470_v41  ;;  %v3491_v47 = vadd.f32 %v3490_v28, %v3489_v43  ;;  %v3188_v61 = vrot.slane %v3180_v19, %v5025_v30  ;;  %v3720_v2 = vrot.slane %v3712_v21, %v5025_v30 }
 0x1df   : > { %v3150_v48 = vcombine.low %v2940_v26, %v2947_v40  ;;  %v2961_v0 = vadd.f32 %v2960_v44, %v2959_v25  ;;  %v3486_v49 = vadd.f32 %v3485_v37, %v3484_v22  ;;  %v3479_v50 = vadd.f32 %v3478_v46, %v3477_v35 }
 0x1e0   : > { %v3492_v51 = vrot.slane %v3491_v47, 1 }
 0x1e1   : > { %v3172_v52 = vrot.slane %v3150_v48, %v5025_v30  ;;  %v3151_v53 = vcombine.low %v2954_v10, %v2961_v0  ;;  %v3682_v54 = vcombine.low %v3472_v45, %v3479_v50 }
 0x1e2   : > { %v3493_v55 = vadd.f32 %v3492_v51, %v3491_v47 }
 0x1e3   : > { %v3179_v56 = vrot.slane %v3151_v53, %v5025_v30  ;;  %v3704_v57 = vrot.slane %v3682_v54, %v5025_v30 }
 0x1e4   : > { %v3683_v58 = vcombine.low %v3486_v49, %v3493_v55 }
 0x1e5   : > { %v3181_v59 = vcombine.low %v3172_v52, %v3179_v56 }
 0x1e6   : > { %v3711_v60 = vrot.slane %v3683_v58, %v5025_v30 }
 0x1e7   : > { %v3195_v62 = vrot.slane %v3181_v59, %v5025_v30 }
 0x1e8   : > { %v3713_v63 = vcombine.low %v3704_v57, %v3711_v60 }
 0x1e9   : > { %v3196_v1 = vcombine.low %v3188_v61, %v3195_v62 }
 0x1ea   : > { %v3727_v3 = vrot.slane %v3713_v63, %v5025_v30 }
 0x1eb   : > { %3256 = vst [vmem:[%s5074_s30 + $0x10] sm:$0xff] %v3196_v1 }
 0x1ec   : > { %v3728_v4 = vcombine.low %v3720_v2, %v3727_v3 }
 0x1ed   : > { %v2428_v5 = vpop.f32.mrb[24].mxu0  ;;  %v2471_v7 = vpop.f32.mrb[24].mxu1 }
 0x1ee   : > { %v3286_v6 = vmul.f32 %v2428_v5, %v2428_v5  ;;  %v2430_v34 = vpop.f32.mrb[25].mxu0  ;;  %v3288_v16 = vmul.f32 %v2471_v7, %v2471_v7  ;;  %v2473_v9 = vpop.f32.mrb[25].mxu1  ;;  %3788 = vst [vmem:[%s5080_s7 + $0x10] sm:$0xff] %v3728_v4 }
 0x1ef   : > { %v4394_v19 = vpack.c.bf16 %v2430_v34, %v2428_v5  ;;  %v3287_v8 = vmul.f32 %v2430_v34, %v2430_v34  ;;  %v2432_v11 = vpop.f32.mrb[26].mxu0  ;;  %v4395_v12 = vpack.c.bf16 %v2473_v9, %v2471_v7  ;;  %v3289_v13 = vmul.f32 %v2473_v9, %v2473_v9  ;;  %v2475_v21 = vpop.f32.mrb[26].mxu1 }
 0x1f0   : > { %v2962_v17 = vadd.f32 %v2432_v11, %v2428_v5  ;;  %v3318_v20 = vmul.f32 %v2432_v11, %v2432_v11  ;;  %v2434_v23 = vpop.f32.mrb[27].mxu0  ;;  %v2976_v27 = vadd.f32 %v2475_v21, %v2471_v7  ;;  %v3320_v32 = vmul.f32 %v2475_v21, %v2475_v21  ;;  %v2477_v36 = vpop.f32.mrb[27].mxu1 }
 0x1f1   : > { %2770 = vst [vmem:[%s5029_s23 + $0x60] sm:$0xff] %v4394_v19  ;;  %v4410_v14 = vpack.c.bf16 %v2434_v23, %v2432_v11  ;;  %v2969_v15 = vadd.f32 %v2434_v23, %v2430_v34  ;;  %2771 = vst [vmem:[%s5029_s23 + $0x68] sm:$0xff] %v4395_v12  ;;  %v3319_v29 = vmul.f32 %v2434_v23, %v2434_v23 }
 0x1f2   : > { %v2963_v38 = vrot.slane %v2962_v17, 4  ;;  %v3494_v39 = vadd.f32 %v3318_v20, %v3286_v6  ;;  %v4411_v33 = vpack.c.bf16 %v2477_v36, %v2475_v21  ;;  %v2977_v41 = vrot.slane %v2976_v27, 4 }
 0x1f3   : > { %v3508_v42 = vadd.f32 %v3320_v32, %v3288_v16  ;;  %2786 = vst [vmem:[%s5029_s23 + $0xe0] sm:$0xff] %v4410_v14  ;;  %v2970_v43 = vrot.slane %v2969_v15, 4  ;;  %v2983_v18 = vadd.f32 %v2477_v36, %v2473_v9  ;;  %v3501_v25 = vadd.f32 %v3319_v29, %v3287_v8 }
 0x1f4   : > { %v2964_v22 = vadd.f32 %v2963_v38, %v2962_v17  ;;  %v3495_v24 = vrot.slane %v3494_v39, 4  ;;  %2787 = vst [vmem:[%s5029_s23 + $0xe8] sm:$0xff] %v4411_v33  ;;  %v3321_v26 = vmul.f32 %v2477_v36, %v2477_v36  ;;  %v2978_v31 = vadd.f32 %v2977_v41, %v2976_v27 }
 0x1f5   : > { %v3509_v35 = vrot.slane %v3508_v42, 4  ;;  %v2971_v28 = vadd.f32 %v2970_v43, %v2969_v15  ;;  %v2984_v10 = vrot.slane %v2983_v18, 4  ;;  %v3502_v44 = vrot.slane %v3501_v25, 4 }
 0x1f6   : > { %v2965_v37 = vrot.slane %v2964_v22, 2  ;;  %v3496_v40 = vadd.f32 %v3495_v24, %v3494_v39  ;;  %v3515_v45 = vadd.f32 %v3321_v26, %v3289_v13  ;;  %v2979_v46 = vrot.slane %v2978_v31, 2 }
 0x1f7   : > { %v3510_v47 = vadd.f32 %v3509_v35, %v3508_v42  ;;  %v2972_v48 = vrot.slane %v2971_v28, 2  ;;  %v2985_v0 = vadd.f32 %v2984_v10, %v2983_v18  ;;  %v3503_v51 = vadd.f32 %v3502_v44, %v3501_v25 }
 0x1f8   : > { %v2966_v49 = vadd.f32 %v2965_v37, %v2964_v22  ;;  %v3497_v50 = vrot.slane %v3496_v40, 2  ;;  %v3516_v52 = vrot.slane %v3515_v45, 4  ;;  %v2980_v53 = vadd.f32 %v2979_v46, %v2978_v31 }
 0x1f9   : > { %v3511_v54 = vrot.slane %v3510_v47, 2  ;;  %v2973_v55 = vadd.f32 %v2972_v48, %v2971_v28  ;;  %v2986_v56 = vrot.slane %v2985_v0, 2  ;;  %v3504_v59 = vrot.slane %v3503_v51, 2 }
 0x1fa   : > { %v2967_v57 = vrot.slane %v2966_v49, 1  ;;  %v3498_v58 = vadd.f32 %v3497_v50, %v3496_v40  ;;  %v3517_v60 = vadd.f32 %v3516_v52, %v3515_v45  ;;  %v2981_v61 = vrot.slane %v2980_v53, 1 }
 0x1fb   : > { %v3512_v62 = vadd.f32 %v3511_v54, %v3510_v47  ;;  %v2974_v63 = vrot.slane %v2973_v55, 1  ;;  %v2987_v1 = vadd.f32 %v2986_v56, %v2985_v0  ;;  %v3505_v4 = vadd.f32 %v3504_v59, %v3503_v51 }
 0x1fc   : > { %v2968_v2 = vadd.f32 %v2967_v57, %v2966_v49  ;;  %v3499_v3 = vrot.slane %v3498_v58, 1  ;;  %v3518_v5 = vrot.slane %v3517_v60, 2  ;;  %v2982_v6 = vadd.f32 %v2981_v61, %v2980_v53 }
 0x1fd   : > { %v3513_v7 = vrot.slane %v3512_v62, 1  ;;  %v2975_v34 = vadd.f32 %v2974_v63, %v2973_v55  ;;  %v2988_v16 = vrot.slane %v2987_v1, 1  ;;  %v3506_v8 = vrot.slane %v3505_v4, 1 }
 0x1fe   : > { %v3500_v19 = vadd.f32 %v3499_v3, %v3498_v58  ;;  %v3519_v9 = vadd.f32 %v3518_v5, %v3517_v60 }
 0x1ff   : > { %v3197_v11 = vcombine.low %v2968_v2, %v2975_v34  ;;  %v2989_v12 = vadd.f32 %v2988_v16, %v2987_v1  ;;  %v3514_v13 = vadd.f32 %v3513_v7, %v3512_v62  ;;  %v3507_v17 = vadd.f32 %v3506_v8, %v3505_v4 }
 0x200   : > { %v3520_v20 = vrot.slane %v3519_v9, 1 }
 0x201   : > { %v5169_v21 = vrot.slane %v3197_v11, %v5025_v30  ;;  %v3198_v23 = vcombine.low %v2982_v6, %v2989_v12  ;;  %v3729_v27 = vcombine.low %v3500_v19, %v3507_v17 }
 0x202   : > { %v3521_v32 = vadd.f32 %v3520_v20, %v3519_v9 }
 0x203   : > { %v5172_v14 = vrot.slane %v3198_v23, %v5025_v30  ;;  %v5175_v15 = vrot.slane %v3729_v27, %v5025_v30 }
 0x204   : > { %v3730_v36 = vcombine.low %v3514_v13, %v3521_v32 }
 0x205   : > { %v3229_v38 = vcombine.low %v5169_v21, %v5172_v14  ;;  %v3833_v21 = vld [vmem:[%s5029_s23] sm:$0xff] (%p5304_p9)  ;;  %v3835_v14 = vld [vmem:[%s5029_s23 + $0x8] sm:$0xff] (%p5304_p9) }
 0x206   : > { %v5180_v39 = vrot.slane %v3730_v36, %v5025_v30  ;;  %3834 = vst [vmem:[%s5213_s15] sm:$0xff] (%p5304_p9), %v3833_v21  ;;  %3836 = vst [vmem:[%s5213_s15 + $0x8] sm:$0xff] (%p5304_p9), %v3835_v14 }
 0x208   : > { %v3761_v29 = vcombine.low %v5175_v15, %v5180_v39  ;;  %v3839_v15 = vld [vmem:[%s5029_s23 + $0x18] sm:$0xff] (%p5304_p9)  ;;  %v3843_v39 = vld [vmem:[%s5029_s23 + $0x28] sm:$0xff] (%p5304_p9) }
 0x209   : > { %3840 = vst [vmem:[%s5213_s15 + $0x18] sm:$0xff] (%p5304_p9), %v3839_v15  ;;  %3844 = vst [vmem:[%s5213_s15 + $0x28] sm:$0xff] (%p5304_p9), %v3843_v39 }
 0x20d   : > { %v2514_v33 = vpop.f32.mrb[28].mxu0 }
 0x20e   : > { %v2557_v41 = vpop.f32.mrb[28].mxu1  ;;  %v2516_v42 = vpop.f32.mrb[29].mxu0  ;;  %v3290_v43 = vmul.f32 %v2514_v33, %v2514_v33 }
 0x20f   : > { %v3292_v18 = vmul.f32 %v2557_v41, %v2557_v41  ;;  %v4396_v22 = vpack.c.bf16 %v2516_v42, %v2514_v33  ;;  %v3291_v24 = vmul.f32 %v2516_v42, %v2516_v42  ;;  %v2559_v25 = vpop.f32.mrb[29].mxu1  ;;  %v2518_v26 = vpop.f32.mrb[30].mxu0 }
 0x210   : > { %v4397_v31 = vpack.c.bf16 %v2559_v25, %v2557_v41  ;;  %v3293_v35 = vmul.f32 %v2559_v25, %v2559_v25  ;;  %v2990_v28 = vadd.f32 %v2518_v26, %v2514_v33  ;;  %v3322_v10 = vmul.f32 %v2518_v26, %v2518_v26  ;;  %v2561_v37 = vpop.f32.mrb[30].mxu1  ;;  %v2520_v40 = vpop.f32.mrb[31].mxu0 }
 0x211   : > { %2772 = vst [vmem:[%s5029_s23 + $0x70] sm:$0xff] %v4396_v22  ;;  %v3004_v44 = vadd.f32 %v2561_v37, %v2557_v41  ;;  %v3324_v45 = vmul.f32 %v2561_v37, %v2561_v37  ;;  %v4412_v46 = vpack.c.bf16 %v2520_v40, %v2518_v26  ;;  %v2997_v47 = vadd.f32 %v2520_v40, %v2516_v42  ;;  %v2563_v48 = vpop.f32.mrb[31].mxu1 }
 0x212   : > { %2773 = vst [vmem:[%s5029_s23 + $0x78] sm:$0xff] %v4397_v31  ;;  %v2991_v0 = vrot.slane %v2990_v28, 4  ;;  %v3522_v49 = vadd.f32 %v3322_v10, %v3290_v43  ;;  %v3323_v50 = vmul.f32 %v2520_v40, %v2520_v40  ;;  %v4413_v51 = vpack.c.bf16 %v2563_v48, %v2561_v37 }
 0x213   : > { %v3005_v52 = vrot.slane %v3004_v44, 4  ;;  %v3536_v53 = vadd.f32 %v3324_v45, %v3292_v18  ;;  %2788 = vst [vmem:[%s5029_s23 + $0xf0] sm:$0xff] %v4412_v46  ;;  %v2998_v54 = vrot.slane %v2997_v47, 4  ;;  %v3011_v55 = vadd.f32 %v2563_v48, %v2559_v25 }
 0x214   : > { %v2992_v56 = vadd.f32 %v2991_v0, %v2990_v28  ;;  %v3523_v57 = vrot.slane %v3522_v49, 4  ;;  %v3529_v58 = vadd.f32 %v3323_v50, %v3291_v24  ;;  %2789 = vst [vmem:[%s5029_s23 + $0xf8] sm:$0xff] %v4413_v51  ;;  %v3325_v59 = vmul.f32 %v2563_v48, %v2563_v48 }
 0x215   : > { %v3006_v60 = vadd.f32 %v3005_v52, %v3004_v44  ;;  %v3537_v61 = vrot.slane %v3536_v53, 4  ;;  %v2999_v62 = vadd.f32 %v2998_v54, %v2997_v47  ;;  %v3012_v63 = vrot.slane %v3011_v55, 4 }
 0x216   : > { %v2993_v1 = vrot.slane %v2992_v56, 2  ;;  %v3524_v2 = vadd.f32 %v3523_v57, %v3522_v49  ;;  %v3530_v3 = vrot.slane %v3529_v58, 4  ;;  %v3543_v4 = vadd.f32 %v3325_v59, %v3293_v35 }
 0x217   : > { %v3007_v5 = vrot.slane %v3006_v60, 2  ;;  %v3538_v6 = vadd.f32 %v3537_v61, %v3536_v53  ;;  %v3000_v7 = vrot.slane %v2999_v62, 2  ;;  %v3013_v34 = vadd.f32 %v3012_v63, %v3011_v55  ;;  %v3847_v63 = vld [vmem:[%s5029_s23 + $0x38] sm:$0xff] (%p5304_p9) }
 0x218   : > { %v2994_v16 = vadd.f32 %v2993_v1, %v2992_v56  ;;  %v3525_v19 = vrot.slane %v3524_v2, 2  ;;  %v3531_v8 = vadd.f32 %v3530_v3, %v3529_v58  ;;  %v3544_v9 = vrot.slane %v3543_v4, 4  ;;  %v3849_v1 = vld [vmem:[%s5029_s23 + $0x40] sm:$0xff] (%p5304_p9)  ;;  %3848 = vst [vmem:[%s5213_s15 + $0x38] sm:$0xff] (%p5304_p9), %v3847_v63  ;;  %v3853_v3 = vld [vmem:[%s5029_s23 + $0x50] sm:$0xff] (%p5304_p9) }
 0x219   : > { %v3008_v11 = vadd.f32 %v3007_v5, %v3006_v60  ;;  %v3539_v12 = vrot.slane %v3538_v6, 2  ;;  %v3001_v13 = vadd.f32 %v3000_v7, %v2999_v62  ;;  %v3014_v17 = vrot.slane %v3013_v34, 2  ;;  %3850 = vst [vmem:[%s5213_s15 + $0x40] sm:$0xff] (%p5304_p9), %v3849_v1  ;;  %3854 = vst [vmem:[%s5213_s15 + $0x50] sm:$0xff] (%p5304_p9), %v3853_v3  ;;  %v3857_v5 = vld [vmem:[%s5029_s23 + $0x60] sm:$0xff] (%p5304_p9)  ;;  %v3861_v7 = vld [vmem:[%s5029_s23 + $0x70] sm:$0xff] (%p5304_p9) }
 0x21a   : > { %v2995_v20 = vrot.slane %v2994_v16, 1  ;;  %v3526_v23 = vadd.f32 %v3525_v19, %v3524_v2  ;;  %v3532_v27 = vrot.slane %v3531_v8, 2  ;;  %v3545_v32 = vadd.f32 %v3544_v9, %v3543_v4  ;;  %v3851_v2 = vld [vmem:[%s5029_s23 + $0x48] sm:$0xff] (%p5304_p9)  ;;  %v3855_v4 = vld [vmem:[%s5029_s23 + $0x58] sm:$0xff] (%p5304_p9)  ;;  %3858 = vst [vmem:[%s5213_s15 + $0x60] sm:$0xff] (%p5304_p9), %v3857_v5  ;;  %3862 = vst [vmem:[%s5213_s15 + $0x70] sm:$0xff] (%p5304_p9), %v3861_v7 }
 0x21b   : > { %v3009_v36 = vrot.slane %v3008_v11, 1  ;;  %v3540_v33 = vadd.f32 %v3539_v12, %v3538_v6  ;;  %v3002_v41 = vrot.slane %v3001_v13, 1  ;;  %v3015_v42 = vadd.f32 %v3014_v17, %v3013_v34  ;;  %3852 = vst [vmem:[%s5213_s15 + $0x48] sm:$0xff] (%p5304_p9), %v3851_v2  ;;  %3856 = vst [vmem:[%s5213_s15 + $0x58] sm:$0xff] (%p5304_p9), %v3855_v4  ;;  %v3859_v6 = vld [vmem:[%s5029_s23 + $0x68] sm:$0xff] (%p5304_p9)  ;;  %v3863_v34 = vld [vmem:[%s5029_s23 + $0x78] sm:$0xff] (%p5304_p9) }
 0x21c   : > { %v2996_v43 = vadd.f32 %v2995_v20, %v2994_v16  ;;  %v3527_v18 = vrot.slane %v3526_v23, 1  ;;  %v3533_v22 = vadd.f32 %v3532_v27, %v3531_v8  ;;  %v3546_v24 = vrot.slane %v3545_v32, 2  ;;  %3860 = vst [vmem:[%s5213_s15 + $0x68] sm:$0xff] (%p5304_p9), %v3859_v6  ;;  %v3865_v16 = vld [vmem:[%s5029_s23 + $0x80] sm:$0xff] (%p5304_p9)  ;;  %v3867_v19 = vld [vmem:[%s5029_s23 + $0x88] sm:$0xff] (%p5304_p9)  ;;  %3864 = vst [vmem:[%s5213_s15 + $0x78] sm:$0xff] (%p5304_p9), %v3863_v34 }
 0x21d   : > { %v3010_v25 = vadd.f32 %v3009_v36, %v3008_v11  ;;  %v3541_v26 = vrot.slane %v3540_v33, 1  ;;  %v3003_v31 = vadd.f32 %v3002_v41, %v3001_v13  ;;  %v3016_v35 = vrot.slane %v3015_v42, 1  ;;  %3866 = vst [vmem:[%s5213_s15 + $0x100] sm:$0xff] (%p5304_p9), %v3865_v16  ;;  %3868 = vst [vmem:[%s5213_s15 + $0x108] sm:$0xff] (%p5304_p9), %v3867_v19  ;;  %v3869_v8 = vld [vmem:[%s5029_s23 + $0x90] sm:$0xff] (%p5304_p9)  ;;  %v3871_v9 = vld [vmem:[%s5029_s23 + $0x98] sm:$0xff] (%p5304_p9) }
 0x21e   : > { %v3528_v28 = vadd.f32 %v3527_v18, %v3526_v23  ;;  %v3534_v10 = vrot.slane %v3533_v22, 1  ;;  %v3547_v37 = vadd.f32 %v3546_v24, %v3545_v32  ;;  %v3237_v56 = vrot.slane %v3229_v38, %v5025_v30  ;;  %v3841_v38 = vld [vmem:[%s5029_s23 + $0x20] sm:$0xff] (%p5304_p9)  ;;  %3870 = vst [vmem:[%s5213_s15 + $0x110] sm:$0xff] (%p5304_p9), %v3869_v8  ;;  %3872 = vst [vmem:[%s5213_s15 + $0x118] sm:$0xff] (%p5304_p9), %v3871_v9  ;;  %v3875_v12 = vld [vmem:[%s5029_s23 + $0xa8] sm:$0xff] (%p5304_p9) }
 0x21f   : > { %v3199_v40 = vcombine.low %v2996_v43, %v3003_v31  ;;  %v3017_v44 = vadd.f32 %v3016_v35, %v3015_v42  ;;  %v3542_v45 = vadd.f32 %v3541_v26, %v3540_v33  ;;  %v3769_v60 = vrot.slane %v3761_v29, %v5025_v30  ;;  %3842 = vst [vmem:[%s5213_s15 + $0x20] sm:$0xff] (%p5304_p9), %v3841_v38  ;;  %v3845_v29 = vld [vmem:[%s5029_s23 + $0x30] sm:$0xff] (%p5304_p9)  ;;  %v3873_v11 = vld [vmem:[%s5029_s23 + $0xa0] sm:$0xff] (%p5304_p9)  ;;  %v3879_v17 = vld [vmem:[%s5029_s23 + $0xb8] sm:$0xff] (%p5304_p9) }
 0x220   : > { %v3535_v46 = vadd.f32 %v3534_v10, %v3533_v22  ;;  %v3548_v47 = vrot.slane %v3547_v37, 1  ;;  %3846 = vst [vmem:[%s5213_s15 + $0x30] sm:$0xff] (%p5304_p9), %v3845_v29  ;;  %3874 = vst [vmem:[%s5213_s15 + $0x120] sm:$0xff] (%p5304_p9), %v3873_v11  ;;  %v3877_v13 = vld [vmem:[%s5029_s23 + $0xb0] sm:$0xff] (%p5304_p9)  ;;  %v3881_v20 = vld [vmem:[%s5029_s23 + $0xc0] sm:$0xff] (%p5304_p9) }
 0x221   : > { %v3221_v48 = vrot.slane %v3199_v40, %v5025_v30  ;;  %v3200_v0 = vcombine.low %v3010_v25, %v3017_v44  ;;  %3876 = vst [vmem:[%s5213_s15 + $0x128] sm:$0xff] (%p5304_p9), %v3875_v12  ;;  %3878 = vst [vmem:[%s5213_s15 + $0x130] sm:$0xff] (%p5304_p9), %v3877_v13  ;;  %v3883_v23 = vld [vmem:[%s5029_s23 + $0xc8] sm:$0xff] (%p5304_p9)  ;;  %v3885_v27 = vld [vmem:[%s5029_s23 + $0xd0] sm:$0xff] (%p5304_p9) }
 0x222   : > { %v3731_v49 = vcombine.low %v3528_v28, %v3535_v46  ;;  %v3549_v50 = vadd.f32 %v3548_v47, %v3547_v37  ;;  %3880 = vst [vmem:[%s5213_s15 + $0x138] sm:$0xff] (%p5304_p9), %v3879_v17  ;;  %3882 = vst [vmem:[%s5213_s15 + $0x140] sm:$0xff] (%p5304_p9), %v3881_v20  ;;  %v3887_v32 = vld [vmem:[%s5029_s23 + $0xd8] sm:$0xff] (%p5304_p9)  ;;  %v3889_v36 = vld [vmem:[%s5029_s23 + $0xe0] sm:$0xff] (%p5304_p9) }
 0x223   : > { %v3228_v51 = vrot.slane %v3200_v0, %v5025_v30  ;;  %3884 = vst [vmem:[%s5213_s15 + $0x148] sm:$0xff] (%p5304_p9), %v3883_v23  ;;  %3886 = vst [vmem:[%s5213_s15 + $0x150] sm:$0xff] (%p5304_p9), %v3885_v27  ;;  %v3891_v33 = vld [vmem:[%s5029_s23 + $0xe8] sm:$0xff] (%p5304_p9)  ;;  %v3893_v41 = vld [vmem:[%s5029_s23 + $0xf0] sm:$0xff] (%p5304_p9) }
 0x224   : > { %v3753_v52 = vrot.slane %v3731_v49, %v5025_v30  ;;  %v3732_v53 = vcombine.low %v3542_v45, %v3549_v50  ;;  %3888 = vst [vmem:[%s5213_s15 + $0x158] sm:$0xff] (%p5304_p9), %v3887_v32  ;;  %3890 = vst [vmem:[%s5213_s15 + $0x160] sm:$0xff] (%p5304_p9), %v3889_v36  ;;  %v3895_v42 = vld [vmem:[%s5029_s23 + $0xf8] sm:$0xff] (%p5304_p9) }
 0x225   : > { %v3230_v54 = vcombine.low %v3221_v48, %v3228_v51  ;;  %3892 = vst [vmem:[%s5213_s15 + $0x168] sm:$0xff] (%p5304_p9), %v3891_v33  ;;  %3894 = vst [vmem:[%s5213_s15 + $0x170] sm:$0xff] (%p5304_p9), %v3893_v41 }
 0x226   : > { %v3760_v55 = vrot.slane %v3732_v53, %v5025_v30  ;;  %3896 = vst [vmem:[%s5213_s15 + $0x178] sm:$0xff] (%p5304_p9), %v3895_v42 }
 0x227   : > { %v3244_v57 = vrot.slane %v3230_v54, %v5025_v30 }
 0x228   : > { %v3762_v58 = vcombine.low %v3753_v52, %v3760_v55  ;;  %3812 = sbr.rel (!%p5304_p9) target bundleno = 559 (0x22f), region = 40 }
 0x229   : > { %v3245_v59 = vcombine.low %v3237_v56, %v3244_v57 }
 0x22a   : > { %v3776_v61 = vrot.slane %v3762_v58, %v5025_v30  ;;  %v3837_v30 = vld [vmem:[%s5029_s23 + $0x10] sm:$0xff] (%p5304_p9) }
 0x22b   : > { %3257 = vst [vmem:[%s5074_s30 + $0x18] sm:$0xff] %v3245_v59  ;;  %3838 = vst [vmem:[%s5213_s15 + $0x10] sm:$0xff] (%p5304_p9), %v3837_v30 }
 0x22c   : > { %v3777_v62 = vcombine.low %v3769_v60, %v3776_v61 }
 0x22e   : > { %3789 = vst [vmem:[%s5080_s7 + $0x18] sm:$0xff] %v3777_v62 }
 0x22f PF: > { %s18_s20 = sadd.s32 1, %s4558_s20   ;;  %s5305_s15 = smov %s4542_s16 }
 0x230   : > { %p15_p11 = scmp.ge.s32.totalorder %s18_s20, 4   ;;  %s5306_s16 = smov %s4546_s17 }
 0x231   : > { %s5307_s17 = smov %s4639_s27  ;;  %s5308_s18 = smov %s4554_s19 }
 0x232   : > { %s5309_s19 = smov %s5311_s22  ;;  %17 = sbr.rel (!%p15_p11) target bundleno = 4 (0x4), region = 122 }
 0x239   :  { %3942 = vsyncpa [#allocation3], 1 }
 0x23a   :  { %3944 = vsyncpa [#allocation3 + $0x1], 1 }

// kernel: generator_forward.12
= control target key start
LH: loop header
LB: loop body
LE: loop exit
PB: predicated region body
PF: predicated region fallthrough
CT: control target
= control target key end

     0   :  { %s623_s12 = smov 0   ;;  %s625_s13 = smov 0   ;;  %s729_s0 = inlined_call_operand.vmem [shape: bf16[128,256], index: 0, kind: input, shape index: {}]   ;;  %s730_s1 = inlined_call_operand.vmem [shape: f32[1,256], index: 1, kind: input, shape index: {}]   ;;  %s731_s2 = inlined_call_operand.vmem [shape: f32[1,256], index: 2, kind: input, shape index: {}]   ;;  %s732_s3 = inlined_call_operand.vmem [shape: bf16[128,256], index: 3, kind: output, shape index: {}]  }
   0x1   :  { %s627_s14 = smov 0  }
   0x2 LB: > { %s25_s15 = sadd.s32 1, %s597_s13  ;;  %p528_p0 = scmp.ge.s32.totalorder %s601_s14, 1  ;;  %s601_s14 = sphi %s627_s14, %s13_s14   ;;  %s597_s13 = sphi %s625_s13, %s734_s13   ;;  %s593_s12 = sphi %s623_s12, %s733_s12  }
   0x3   : > { %p27_p1 = scmp.ge.s32.totalorder %s25_s15, 2  ;;  %p180_p2 = scmp.lt.s32.totalorder %s601_s14, 3 }
   0x5   : > { %s736_s15 = smov (%p27_p1, %s25_s15), 0  ;;  %p181_p3 = pnand %p528_p0, %p180_p2 }
   0x6   : > { %s529_s16 = sshll.u32 (!%p181_p3), %s593_s12, 3  ;;  %v282_v0 = vlaneseq (!%p181_p3)  ;;  %v280_v2 = vld [vmem:[%s730_s1] sm:$0x3] (!%p181_p3) }
   0x7   : > { %184 = sbr.rel (%p181_p3) target bundleno = 40 (0x28), region = 32  ;;  %p224_p4 = scmp.lt.s32.totalorder (!%p181_p3), %s529_s16, 15  ;;  %v308_v5 = vld [vmem:[%s731_s2] sm:$0x3] (!%p181_p3) }
   0x8   : > { %v283_v1 = vshrl.u32 (!%p181_p3), %v282_v0, 7 }
   0xa   : > { %v284_v3 = vsub.s32 (!%p181_p3), 0, %v283_v1  ;;  %v288_v4 = vsub.s32 (!%p181_p3), 1, %v283_v1 }
   0xc   : > { %v657_v6 = vrot.slane (!%p181_p3), %v280_v2, %v284_v3  ;;  %v659_v7 = vrot.slane (!%p181_p3), %v280_v2, %v288_v4  ;;  %v662_v9 = vrot.slane (!%p181_p3), %v308_v5, %v284_v3  ;;  %v664_v10 = vrot.slane (!%p181_p3), %v308_v5, %v288_v4 }
   0xe   : > { %s738_s16 = smov (!%p224_p4, %s529_s16), 15 }
   0xf   : > { %s545_s21 = sshll.u32 %s738_s16, 3 }
  0x10   : > { %s655_s24 = scalar_lea.vmem %s729_s0, %s545_s21  ;;  %s692_s27 = scalar_lea.vmem %s732_s3, %s545_s21 }
  0x11   : > { %v256_v8 = vld [vmem:[%s655_s24] sm:$0xff]  ;;  %v257_v11 = vld [vmem:[%s655_s24 + $0x8] sm:$0xff]  ;;  %v258_v12 = vld [vmem:[%s655_s24 + $0x10] sm:$0xff] }
  0x12   : > { %v264_v13 = vunpack.c.l.bf16 %v256_v8  ;;  %v265_v14 = vunpack.c.h.bf16 %v256_v8  ;;  %v266_v15 = vunpack.c.l.bf16 %v257_v11  ;;  %v267_v16 = vunpack.c.h.bf16 %v257_v11  ;;  %v259_v17 = vld [vmem:[%s655_s24 + $0x18] sm:$0xff]  ;;  %v260_v38 = vld [vmem:[%s655_s24 + $0x20] sm:$0xff]  ;;  %v261_v43 = vld [vmem:[%s655_s24 + $0x28] sm:$0xff] }
  0x13   : > { %v268_v18 = vunpack.c.l.bf16 %v258_v12  ;;  %v269_v19 = vunpack.c.h.bf16 %v258_v12  ;;  %v270_v20 = vunpack.c.l.bf16 %v259_v17  ;;  %v271_v21 = vunpack.c.h.bf16 %v259_v17  ;;  %v262_v48 = vld [vmem:[%s655_s24 + $0x30] sm:$0xff]  ;;  %v263_v53 = vld [vmem:[%s655_s24 + $0x38] sm:$0xff] }
  0x14   : > { %v292_v22 = vmul.f32 %v657_v6, %v264_v13  ;;  %v293_v23 = vmul.f32 %v659_v7, %v265_v14  ;;  %v294_v24 = vmul.f32 %v657_v6, %v266_v15  ;;  %v295_v25 = vmul.f32 %v659_v7, %v267_v16 }
  0x15   : > { %v296_v26 = vmul.f32 %v657_v6, %v268_v18  ;;  %v297_v27 = vmul.f32 %v659_v7, %v269_v19  ;;  %v298_v28 = vmul.f32 %v657_v6, %v270_v20  ;;  %v299_v29 = vmul.f32 %v659_v7, %v271_v21 }
  0x16   : > { %v320_v30 = vadd.f32 %v662_v9, %v292_v22  ;;  %v321_v31 = vadd.f32 %v664_v10, %v293_v23  ;;  %v322_v32 = vadd.f32 %v662_v9, %v294_v24  ;;  %v323_v33 = vadd.f32 %v664_v10, %v295_v25 }
  0x17   : > { %v324_v34 = vadd.f32 %v662_v9, %v296_v26  ;;  %v325_v35 = vadd.f32 %v664_v10, %v297_v27  ;;  %v326_v36 = vadd.f32 %v662_v9, %v298_v28  ;;  %v327_v37 = vadd.f32 %v664_v10, %v299_v29 }
  0x18   : > { %v336_v39 = vmax.f32 %v320_v30, 0.0  ;;  %v337_v40 = vmax.f32 %v321_v31, 0.0  ;;  %v338_v41 = vmax.f32 %v322_v32, 0.0  ;;  %v339_v42 = vmax.f32 %v323_v33, 0.0 }
  0x19   : > { %v340_v44 = vmax.f32 %v324_v34, 0.0  ;;  %v341_v45 = vmax.f32 %v325_v35, 0.0  ;;  %v342_v46 = vmax.f32 %v326_v36, 0.0  ;;  %v343_v47 = vmax.f32 %v327_v37, 0.0 }
  0x1a   : > { %v547_v49 = vpack.c.bf16 %v337_v40, %v336_v39  ;;  %v548_v50 = vpack.c.bf16 %v339_v42, %v338_v41  ;;  %v272_v51 = vunpack.c.l.bf16 %v260_v38  ;;  %v273_v52 = vunpack.c.h.bf16 %v260_v38 }
  0x1b   : > { %v549_v54 = vpack.c.bf16 %v341_v45, %v340_v44  ;;  %v550_v55 = vpack.c.bf16 %v343_v47, %v342_v46  ;;  %v274_v56 = vunpack.c.l.bf16 %v261_v43  ;;  %v275_v57 = vunpack.c.h.bf16 %v261_v43 }
  0x1c   : > { %400 = vst [vmem:[%s692_s27] sm:$0xff] %v547_v49  ;;  %401 = vst [vmem:[%s692_s27 + $0x8] sm:$0xff] %v548_v50  ;;  %v300_v58 = vmul.f32 %v657_v6, %v272_v51  ;;  %v301_v59 = vmul.f32 %v659_v7, %v273_v52  ;;  %v276_v60 = vunpack.c.l.bf16 %v262_v48  ;;  %v277_v61 = vunpack.c.h.bf16 %v262_v48 }
  0x1d   : > { %402 = vst [vmem:[%s692_s27 + $0x10] sm:$0xff] %v549_v54  ;;  %403 = vst [vmem:[%s692_s27 + $0x18] sm:$0xff] %v550_v55  ;;  %v302_v62 = vmul.f32 %v657_v6, %v274_v56  ;;  %v303_v63 = vmul.f32 %v659_v7, %v275_v57  ;;  %v278_v0 = vunpack.c.l.bf16 %v263_v53  ;;  %v279_v1 = vunpack.c.h.bf16 %v263_v53 }
  0x1e   : > { %v328_v2 = vadd.f32 %v662_v9, %v300_v58  ;;  %v329_v3 = vadd.f32 %v664_v10, %v301_v59  ;;  %v304_v4 = vmul.f32 %v657_v6, %v276_v60  ;;  %v305_v5 = vmul.f32 %v659_v7, %v277_v61 }
  0x1f   : > { %v330_v8 = vadd.f32 %v662_v9, %v302_v62  ;;  %v331_v11 = vadd.f32 %v664_v10, %v303_v63  ;;  %v306_v12 = vmul.f32 %v657_v6, %v278_v0  ;;  %v307_v13 = vmul.f32 %v659_v7, %v279_v1 }
  0x20   : > { %v344_v14 = vmax.f32 %v328_v2, 0.0  ;;  %v345_v15 = vmax.f32 %v329_v3, 0.0  ;;  %v332_v16 = vadd.f32 %v662_v9, %v304_v4  ;;  %v333_v17 = vadd.f32 %v664_v10, %v305_v5 }
  0x21   : > { %v346_v18 = vmax.f32 %v330_v8, 0.0  ;;  %v347_v19 = vmax.f32 %v331_v11, 0.0  ;;  %v334_v20 = vadd.f32 %v662_v9, %v306_v12  ;;  %v335_v21 = vadd.f32 %v664_v10, %v307_v13 }
  0x22   : > { %v551_v22 = vpack.c.bf16 %v345_v15, %v344_v14  ;;  %v348_v6 = vmax.f32 %v332_v16, 0.0  ;;  %v349_v23 = vmax.f32 %v333_v17, 0.0 }
  0x23   : > { %v552_v24 = vpack.c.bf16 %v347_v19, %v346_v18  ;;  %v350_v7 = vmax.f32 %v334_v20, 0.0  ;;  %v351_v25 = vmax.f32 %v335_v21, 0.0 }
  0x24   : > { %404 = vst [vmem:[%s692_s27 + $0x20] sm:$0xff] %v551_v22  ;;  %v553_v26 = vpack.c.bf16 %v349_v23, %v348_v6 }
  0x25   : > { %405 = vst [vmem:[%s692_s27 + $0x28] sm:$0xff] %v552_v24  ;;  %v554_v27 = vpack.c.bf16 %v351_v25, %v350_v7 }
  0x26   : > { %406 = vst [vmem:[%s692_s27 + $0x30] sm:$0xff] %v553_v26 }
  0x27   : > { %407 = vst [vmem:[%s692_s27 + $0x38] sm:$0xff] %v554_v27 }
  0x28 PF: > { %s13_s14 = sadd.s32 1, %s601_s14   ;;  %s733_s12 = smov %s597_s13 }
  0x29   : > { %p10_p5 = scmp.ge.s32.totalorder %s13_s14, 4   ;;  %s734_s13 = smov %s736_s15 }
  0x2b   :  { %12 = sbr.rel (!%p10_p5) target bundleno = 2 (0x2), region = 68 }

// kernel: generator_forward.11
= control target key start
LH: loop header
LB: loop body
LE: loop exit
PB: predicated region body
PF: predicated region fallthrough
CT: control target
= control target key end

     0   :  { %s3668_s15 = smov 0   ;;  %s3670_s16 = smov 0   ;;  %s4086_s0 = inlined_call_operand.vmem [shape: bf16[4,32,2048], index: 0, kind: input, shape index: {}]   ;;  %s4087_s1 = inlined_call_operand.vmem [shape: bf16[4,2048,256], index: 1, kind: input, shape index: {}]   ;;  %s4088_s2 = inlined_call_operand.vmem [shape: bf16[4,32,256], index: 2, kind: output, shape index: {0}]   ;;  %s4089_s3 = inlined_call_operand.vmem [shape: f32[4,1,256], index: 3, kind: output, shape index: {1}]   ;;  %s4090_s4 = inlined_call_operand.vmem [shape: f32[4,1,256], index: 4, kind: output, shape index: {2}]  }
   0x1   :  { %s3672_s17 = smov 0  }
   0x2 LB: > { %s34_s18 = sadd.s32 1, %s3635_s16  ;;  %p2841_p0 = scmp.ge.s32.totalorder %s3639_s17, 1  ;;  %s3639_s17 = sphi %s3672_s17, %s15_s17   ;;  %s3635_s16 = sphi %s3670_s16, %s4094_s16   ;;  %s3631_s15 = sphi %s3668_s15, %s4093_s15  }
   0x3   : > { %p36_p1 = scmp.ge.s32.totalorder %s34_s18, 4  ;;  %p219_p2 = scmp.lt.s32.totalorder %s3639_s17, 5 }
   0x5   : > { %s4096_s18 = smov (%p36_p1, %s34_s18), 0  ;;  %p220_p3 = pnand %p2841_p0, %p219_p2 }
   0x6   : > { %p285_p4 = scmp.lt.s32.totalorder (!%p220_p3), %s3631_s15, 3 }
   0x7   : > { %223 = sbr.rel (%p220_p3) target bundleno = 525 (0x20d), region = 28 }
   0xe   : > { %s4098_s15 = smov (!%p285_p4, %s3631_s15), 3 }
   0xf   : > { %s3145_s19 = sshll.u32 %s4098_s15, 11  ;;  %s3144_s23 = sshll.u32 %s4098_s15, 8 }
  0x10   : > { %s3692_s22 = scalar_lea.vmem %s4087_s1, %s3145_s19  ;;  %s3742_s26 = scalar_lea.vmem %s4086_s0, %s3144_s23 }
  0x11   : > { %v3233_v0 = vld [vmem:[%s3692_s22 + $0x4] ss:$8 sps:$4 sm:$0xff]   ;;  %v3237_v2 = vld [vmem:[%s3692_s22] ss:$8 sps:$4 sm:$0xff]   ;;  %v3239_v4 = vld [vmem:[%s3692_s22 + $0x14] ss:$8 sps:$4 sm:$0xff]  }
  0x12   : > { %v3235_v1 = vld [vmem:[%s3692_s22 + $0x404] ss:$8 sps:$4 sm:$0xff]   ;;  %2077 = vmatprep.subr.bf16.mxu1 %v3233_v0  ;;  %v3238_v3 = vld [vmem:[%s3692_s22 + $0x400] ss:$8 sps:$4 sm:$0xff]   ;;  %v3241_v5 = vld [vmem:[%s3692_s22 + $0x414] ss:$8 sps:$4 sm:$0xff]  }
  0x13   : > { %2289 = vmatprep.subr.bf16.mxu0 %v3235_v1  ;;  %2078 = vmatpush1.bf16.msra.mxu1 %v3237_v2  ;;  %v3243_v6 = vld [vmem:[%s3692_s22 + $0x10] ss:$8 sps:$4 sm:$0xff]   ;;  %v3245_v8 = vld [vmem:[%s3692_s22 + $0x24] ss:$8 sps:$4 sm:$0xff]   ;;  %v3249_v10 = vld [vmem:[%s3692_s22 + $0x20] ss:$8 sps:$4 sm:$0xff]  }
  0x14   : > { %2290 = vmatpush1.bf16.msra.mxu0 %v3238_v3  ;;  %2079 = vmatprep.subr.bf16.mxu1 %v3239_v4  ;;  %v3244_v7 = vld [vmem:[%s3692_s22 + $0x410] ss:$8 sps:$4 sm:$0xff]   ;;  %v3247_v9 = vld [vmem:[%s3692_s22 + $0x424] ss:$8 sps:$4 sm:$0xff]   ;;  %v3250_v11 = vld [vmem:[%s3692_s22 + $0x420] ss:$8 sps:$4 sm:$0xff]  }
  0x15   : > { %2291 = vmatprep.subr.bf16.mxu0 %v3241_v5  ;;  %v3251_v12 = vld [vmem:[%s3692_s22 + $0x34] ss:$8 sps:$4 sm:$0xff]   ;;  %v3255_v14 = vld [vmem:[%s3692_s22 + $0x30] ss:$8 sps:$4 sm:$0xff]   ;;  %v3257_v16 = vld [vmem:[%s3692_s22 + $0x44] ss:$8 sps:$4 sm:$0xff]  }
  0x16   : > { %v3253_v13 = vld [vmem:[%s3692_s22 + $0x434] ss:$8 sps:$4 sm:$0xff]   ;;  %v3256_v15 = vld [vmem:[%s3692_s22 + $0x430] ss:$8 sps:$4 sm:$0xff]   ;;  %v3259_v17 = vld [vmem:[%s3692_s22 + $0x444] ss:$8 sps:$4 sm:$0xff]  }
  0x17   : > { %2080 = vmatpush1.bf16.msra.mxu1 %v3243_v6  ;;  %v3261_v18 = vld [vmem:[%s3692_s22 + $0x40] ss:$8 sps:$4 sm:$0xff]   ;;  %v3263_v20 = vld [vmem:[%s3692_s22 + $0x54] ss:$8 sps:$4 sm:$0xff]   ;;  %v3267_v22 = vld [vmem:[%s3692_s22 + $0x50] ss:$8 sps:$4 sm:$0xff]  }
  0x18   : > { %2292 = vmatpush1.bf16.msra.mxu0 %v3244_v7  ;;  %2081 = vmatprep.subr.bf16.mxu1 %v3245_v8  ;;  %v3262_v19 = vld [vmem:[%s3692_s22 + $0x440] ss:$8 sps:$4 sm:$0xff]   ;;  %v3265_v21 = vld [vmem:[%s3692_s22 + $0x454] ss:$8 sps:$4 sm:$0xff]   ;;  %v3268_v23 = vld [vmem:[%s3692_s22 + $0x450] ss:$8 sps:$4 sm:$0xff]  }
  0x19   : > { %2293 = vmatprep.subr.bf16.mxu0 %v3247_v9  ;;  %v3269_v24 = vld [vmem:[%s3692_s22 + $0x64] ss:$8 sps:$4 sm:$0xff]   ;;  %v3273_v26 = vld [vmem:[%s3692_s22 + $0x60] ss:$8 sps:$4 sm:$0xff]   ;;  %v3275_v28 = vld [vmem:[%s3692_s22 + $0x74] ss:$8 sps:$4 sm:$0xff]  }
  0x1a   : > { %v3271_v25 = vld [vmem:[%s3692_s22 + $0x464] ss:$8 sps:$4 sm:$0xff]   ;;  %v3274_v27 = vld [vmem:[%s3692_s22 + $0x460] ss:$8 sps:$4 sm:$0xff]   ;;  %v3277_v29 = vld [vmem:[%s3692_s22 + $0x474] ss:$8 sps:$4 sm:$0xff]  }
  0x1b   : > { %2082 = vmatpush1.bf16.msra.mxu1 %v3249_v10  ;;  %v3279_v30 = vld [vmem:[%s3692_s22 + $0x70] ss:$8 sps:$4 sm:$0xff]   ;;  %v3281_v32 = vld [vmem:[%s3692_s22 + $0x84] ss:$8 sps:$4 sm:$0xff]   ;;  %v3285_v34 = vld [vmem:[%s3692_s22 + $0x80] ss:$8 sps:$4 sm:$0xff]  }
  0x1c   : > { %2294 = vmatpush1.bf16.msra.mxu0 %v3250_v11  ;;  %2083 = vmatprep.subr.bf16.mxu1 %v3251_v12  ;;  %v3280_v31 = vld [vmem:[%s3692_s22 + $0x470] ss:$8 sps:$4 sm:$0xff]   ;;  %v3283_v33 = vld [vmem:[%s3692_s22 + $0x484] ss:$8 sps:$4 sm:$0xff]   ;;  %v3286_v35 = vld [vmem:[%s3692_s22 + $0x480] ss:$8 sps:$4 sm:$0xff]  }
  0x1d   : > { %2295 = vmatprep.subr.bf16.mxu0 %v3253_v13  ;;  %v3287_v36 = vld [vmem:[%s3692_s22 + $0x94] ss:$8 sps:$4 sm:$0xff]   ;;  %v3291_v38 = vld [vmem:[%s3692_s22 + $0x90] ss:$8 sps:$4 sm:$0xff]   ;;  %v3293_v40 = vld [vmem:[%s3692_s22 + $0xa4] ss:$8 sps:$4 sm:$0xff]  }
  0x1e   : > { %v3289_v37 = vld [vmem:[%s3692_s22 + $0x494] ss:$8 sps:$4 sm:$0xff]   ;;  %v3292_v39 = vld [vmem:[%s3692_s22 + $0x490] ss:$8 sps:$4 sm:$0xff]   ;;  %v3295_v41 = vld [vmem:[%s3692_s22 + $0x4a4] ss:$8 sps:$4 sm:$0xff]  }
  0x1f   : > { %2084 = vmatpush1.bf16.msra.mxu1 %v3255_v14  ;;  %v3297_v42 = vld [vmem:[%s3692_s22 + $0xa0] ss:$8 sps:$4 sm:$0xff]   ;;  %v3299_v44 = vld [vmem:[%s3692_s22 + $0xb4] ss:$8 sps:$4 sm:$0xff]   ;;  %v3303_v46 = vld [vmem:[%s3692_s22 + $0xb0] ss:$8 sps:$4 sm:$0xff]  }
  0x20   : > { %2296 = vmatpush1.bf16.msra.mxu0 %v3256_v15  ;;  %2085 = vmatprep.subr.bf16.mxu1 %v3257_v16  ;;  %v3298_v43 = vld [vmem:[%s3692_s22 + $0x4a0] ss:$8 sps:$4 sm:$0xff]   ;;  %v3301_v45 = vld [vmem:[%s3692_s22 + $0x4b4] ss:$8 sps:$4 sm:$0xff]   ;;  %v3304_v47 = vld [vmem:[%s3692_s22 + $0x4b0] ss:$8 sps:$4 sm:$0xff]  }
  0x21   : > { %2297 = vmatprep.subr.bf16.mxu0 %v3259_v17  ;;  %v349_v48 = vld [vmem:[%s3742_s26] sm:$0xff]  ;;  %v3311_v58 = vld [vmem:[%s3692_s22 + $0xd4] ss:$8 sps:$4 sm:$0xff]   ;;  %v3315_v60 = vld [vmem:[%s3692_s22 + $0xd0] ss:$8 sps:$4 sm:$0xff]   ;;  %s2848_s27 = sshll.u32 %s4098_s15, 1 }
  0x22   : > { %v357_v49 = vld [vmem:[%s3742_s26 + $0x40] sm:$0xff]  ;;  %v3313_v59 = vld [vmem:[%s3692_s22 + $0x4d4] ss:$8 sps:$4 sm:$0xff]   ;;  %v3316_v61 = vld [vmem:[%s3692_s22 + $0x4d0] ss:$8 sps:$4 sm:$0xff]   ;;  %s4040_s30 = scalar_lea.vmem %s4089_s3, %s2848_s27  ;;  %s4053_s7 = scalar_lea.vmem %s4090_s4, %s2848_s27 }
  0x23   : > { %2086 = vmatpush1.bf16.msra.mxu1 %v3261_v18  ;;  %v3305_v50 = vld [vmem:[%s3692_s22 + $0xc4] ss:$8 sps:$4 sm:$0xff]   ;;  %v2851_v52 = vcombine.high %v349_v48, %v357_v49  ;;  %v3309_v56 = vld [vmem:[%s3692_s22 + $0xc0] ss:$8 sps:$4 sm:$0xff]   ;;  %v3323_v2 = vld [vmem:[%s3692_s22 + $0xf4] ss:$8 sps:$4 sm:$0xff]   ;;  %v2850_v8 = vcombine.low %v349_v48, %v357_v49 }
  0x24   : > { %2298 = vmatpush1.bf16.msra.mxu0 %v3262_v19  ;;  %2087 = vmatprep.subr.bf16.mxu1 %v3263_v20  ;;  %v3307_v51 = vld [vmem:[%s3692_s22 + $0x4c4] ss:$8 sps:$4 sm:$0xff]   ;;  %v3310_v57 = vld [vmem:[%s3692_s22 + $0x4c0] ss:$8 sps:$4 sm:$0xff]   ;;  %v3325_v3 = vld [vmem:[%s3692_s22 + $0x4f4] ss:$8 sps:$4 sm:$0xff]  }
  0x25   : > { %2299 = vmatprep.subr.bf16.mxu0 %v3265_v21  ;;  %v353_v53 = vld [vmem:[%s3742_s26 + $0x20] sm:$0xff]  ;;  %2109 = vmatprep.mubr.bf16.mxu1 %v2851_v52  ;;  %v3327_v4 = vld [vmem:[%s3692_s22 + $0xf0] ss:$8 sps:$4 sm:$0xff]   ;;  %v3337_v12 = vld [vmem:[%s3692_s22 + $0x114] ss:$8 sps:$4 sm:$0xff]   ;;  %s3146_s8 = sshll.u32 %s4098_s15, 5 }
  0x26   : > { %v361_v54 = vld [vmem:[%s3742_s26 + $0x60] sm:$0xff]  ;;  %v3328_v5 = vld [vmem:[%s3692_s22 + $0x4f0] ss:$8 sps:$4 sm:$0xff]   ;;  %v3340_v13 = vld [vmem:[%s3692_s22 + $0x514] ss:$8 sps:$4 sm:$0xff]   ;;  %s4062_s11 = scalar_lea.vmem %s4088_s2, %s3146_s8 }
  0x27   : > { %2088 = vmatpush1.bf16.msra.mxu1 %v3267_v22  ;;  %v2859_v55 = vcombine.high %v353_v53, %v361_v54  ;;  %v3317_v62 = vld [vmem:[%s3692_s22 + $0xe4] ss:$8 sps:$4 sm:$0xff]   ;;  %v3321_v0 = vld [vmem:[%s3692_s22 + $0xe0] ss:$8 sps:$4 sm:$0xff]   ;;  %v2858_v10 = vcombine.low %v353_v53, %v361_v54  ;;  %v3335_v14 = vld [vmem:[%s3692_s22 + $0x110] ss:$8 sps:$4 sm:$0xff]  }
  0x28   : > { %2300 = vmatpush1.bf16.msra.mxu0 %v3268_v23  ;;  %2089 = vmatprep.subr.bf16.mxu1 %v3269_v24  ;;  %v3319_v63 = vld [vmem:[%s3692_s22 + $0x4e4] ss:$8 sps:$4 sm:$0xff]   ;;  %v3322_v1 = vld [vmem:[%s3692_s22 + $0x4e0] ss:$8 sps:$4 sm:$0xff]   ;;  %v3338_v15 = vld [vmem:[%s3692_s22 + $0x510] ss:$8 sps:$4 sm:$0xff]  }
  0x29   : > { %2301 = vmatprep.subr.bf16.mxu0 %v3271_v25  ;;  %2321 = vmatprep.mubr.bf16.mxu0 %v2859_v55  ;;  %v3331_v6 = vld [vmem:[%s3692_s22 + $0x104] ss:$8 sps:$4 sm:$0xff]   ;;  %v3329_v9 = vld [vmem:[%s3692_s22 + $0x100] ss:$8 sps:$4 sm:$0xff]   ;;  %v3349_v20 = vld [vmem:[%s3692_s22 + $0x134] ss:$8 sps:$4 sm:$0xff]  }
  0x2a   : > { %v3334_v7 = vld [vmem:[%s3692_s22 + $0x504] ss:$8 sps:$4 sm:$0xff]   ;;  %v3332_v11 = vld [vmem:[%s3692_s22 + $0x500] ss:$8 sps:$4 sm:$0xff]   ;;  %v3352_v21 = vld [vmem:[%s3692_s22 + $0x534] ss:$8 sps:$4 sm:$0xff]  }
  0x2b   : > { %2090 = vmatpush1.bf16.msra.mxu1 %v3273_v26  ;;  %v3343_v16 = vld [vmem:[%s3692_s22 + $0x124] ss:$8 sps:$4 sm:$0xff]   ;;  %v3341_v18 = vld [vmem:[%s3692_s22 + $0x120] ss:$8 sps:$4 sm:$0xff]   ;;  %v3347_v22 = vld [vmem:[%s3692_s22 + $0x130] ss:$8 sps:$4 sm:$0xff]  }
  0x2c   : > { %2302 = vmatpush1.bf16.msra.mxu0 %v3274_v27  ;;  %2091 = vmatprep.subr.bf16.mxu1 %v3275_v28  ;;  %v3346_v17 = vld [vmem:[%s3692_s22 + $0x524] ss:$8 sps:$4 sm:$0xff]   ;;  %v3344_v19 = vld [vmem:[%s3692_s22 + $0x520] ss:$8 sps:$4 sm:$0xff]   ;;  %v3350_v23 = vld [vmem:[%s3692_s22 + $0x530] ss:$8 sps:$4 sm:$0xff]  }
  0x2d   : > { %2303 = vmatprep.subr.bf16.mxu0 %v3277_v29  ;;  %v3355_v24 = vld [vmem:[%s3692_s22 + $0x144] ss:$8 sps:$4 sm:$0xff]   ;;  %v3353_v26 = vld [vmem:[%s3692_s22 + $0x140] ss:$8 sps:$4 sm:$0xff]   ;;  %v3361_v28 = vld [vmem:[%s3692_s22 + $0x154] ss:$8 sps:$4 sm:$0xff]  }
  0x2e   : > { %v3358_v25 = vld [vmem:[%s3692_s22 + $0x544] ss:$8 sps:$4 sm:$0xff]   ;;  %v3356_v27 = vld [vmem:[%s3692_s22 + $0x540] ss:$8 sps:$4 sm:$0xff]   ;;  %v3364_v29 = vld [vmem:[%s3692_s22 + $0x554] ss:$8 sps:$4 sm:$0xff]  }
  0x2f   : > { %2092 = vmatpush1.bf16.msra.mxu1 %v3279_v30  ;;  %v365_v30 = vld [vmem:[%s3742_s26 + $0x80] sm:$0xff]  ;;  %v3811_v49 = vld [vmem:[%s3742_s26 + $0x28] sm:$0xff]  ;;  %v3374_v52 = vld [vmem:[%s3692_s22 + $0x570] ss:$8 sps:$4 sm:$0xff]  }
  0x30   : > { %2304 = vmatpush1.bf16.msra.mxu0 %v3280_v31  ;;  %2093 = vmatprep.subr.bf16.mxu1 %v3281_v32  ;;  %v373_v31 = vld [vmem:[%s3742_s26 + $0xc0] sm:$0xff]  ;;  %v3359_v32 = vld [vmem:[%s3692_s22 + $0x150] ss:$8 sps:$4 sm:$0xff]  }
  0x31   : > { %2305 = vmatprep.subr.bf16.mxu0 %v3283_v33  ;;  %v2867_v33 = vcombine.high %v365_v30, %v373_v31  ;;  %v3379_v54 = vld [vmem:[%s3692_s22 + $0x184] ss:$8 sps:$4 sm:$0xff]  }
  0x32   : > { %v3382_v55 = vld [vmem:[%s3692_s22 + $0x584] ss:$8 sps:$4 sm:$0xff]  }
  0x33   : > { %2094 = vmatpush1.bf16.msra.mxu1 %v3285_v34  ;;  %v3362_v34 = vld [vmem:[%s3692_s22 + $0x550] ss:$8 sps:$4 sm:$0xff]  }
  0x34   : > { %2306 = vmatpush1.bf16.msra.mxu0 %v3286_v35  ;;  %2095 = vmatprep.subr.bf16.mxu1 %v3287_v36  ;;  %v369_v35 = vld [vmem:[%s3742_s26 + $0xa0] sm:$0xff] }
  0x35   : > { %2307 = vmatprep.subr.bf16.mxu0 %v3289_v37  ;;  %v377_v36 = vld [vmem:[%s3742_s26 + $0xe0] sm:$0xff]  ;;  %v2866_v37 = vcombine.low %v365_v30, %v373_v31  ;;  %v3433_v30 = vld [vmem:[%s3692_s22 + $0x214] ss:$8 sps:$4 sm:$0xff]  }
  0x36   : > { %v3436_v31 = vld [vmem:[%s3692_s22 + $0x614] ss:$8 sps:$4 sm:$0xff]  }
  0x37   : > { %2096 = vmatpush1.bf16.msra.mxu1 %v3291_v38  ;;  %v3367_v38 = vld [vmem:[%s3692_s22 + $0x164] ss:$8 sps:$4 sm:$0xff]  }
  0x38   : > { %2308 = vmatpush1.bf16.msra.mxu0 %v3292_v39  ;;  %2097 = vmatprep.subr.bf16.mxu1 %v3293_v40  ;;  %v2875_v39 = vcombine.high %v369_v35, %v377_v36  ;;  %v2874_v40 = vcombine.low %v369_v35, %v377_v36  ;;  %v3431_v36 = vld [vmem:[%s3692_s22 + $0x210] ss:$8 sps:$4 sm:$0xff]  }
  0x39   : > { %2309 = vmatprep.subr.bf16.mxu0 %v3295_v41  ;;  %v3370_v41 = vld [vmem:[%s3692_s22 + $0x564] ss:$8 sps:$4 sm:$0xff]  }
  0x3b   : > { %2098 = vmatpush1.bf16.msra.mxu1 %v3297_v42  ;;  %v3365_v42 = vld [vmem:[%s3692_s22 + $0x160] ss:$8 sps:$4 sm:$0xff]  }
  0x3c   : > { %2310 = vmatpush1.bf16.msra.mxu0 %v3298_v43  ;;  %2099 = vmatprep.subr.bf16.mxu1 %v3299_v44  ;;  %v3368_v43 = vld [vmem:[%s3692_s22 + $0x560] ss:$8 sps:$4 sm:$0xff]  }
  0x3d   : > { %2311 = vmatprep.subr.bf16.mxu0 %v3301_v45  ;;  %v3801_v44 = vld [vmem:[%s3742_s26 + $0x8] sm:$0xff] }
  0x3e   : > { %v3804_v45 = vld [vmem:[%s3742_s26 + $0x48] sm:$0xff] }
  0x3f   : > { %2100 = vmatpush1.bf16.msra.mxu1 %v3303_v46  ;;  %v3373_v46 = vld [vmem:[%s3692_s22 + $0x174] ss:$8 sps:$4 sm:$0xff]   ;;  %v2853_v48 = vcombine.high %v3801_v44, %v3804_v45 }
  0x40   : > { %2312 = vmatpush1.bf16.msra.mxu0 %v3304_v47  ;;  %2101 = vmatprep.subr.bf16.mxu1 %v3305_v50  ;;  %v3376_v47 = vld [vmem:[%s3692_s22 + $0x574] ss:$8 sps:$4 sm:$0xff]   ;;  %v3814_v50 = vld [vmem:[%s3742_s26 + $0x68] sm:$0xff] }
  0x41   : > { %2313 = vmatprep.subr.bf16.mxu0 %v3307_v51  ;;  %v3371_v51 = vld [vmem:[%s3692_s22 + $0x170] ss:$8 sps:$4 sm:$0xff]   ;;  %v2861_v53 = vcombine.high %v3811_v49, %v3814_v50 }
  0x43   : > { %2102 = vmatpush1.bf16.msra.mxu1 %v3309_v56  ;;  %v3377_v56 = vld [vmem:[%s3692_s22 + $0x180] ss:$8 sps:$4 sm:$0xff]  }
  0x44   : > { %2314 = vmatpush1.bf16.msra.mxu0 %v3310_v57  ;;  %2103 = vmatprep.subr.bf16.mxu1 %v3311_v58  ;;  %v3380_v57 = vld [vmem:[%s3692_s22 + $0x580] ss:$8 sps:$4 sm:$0xff]   ;;  %v3385_v58 = vld [vmem:[%s3692_s22 + $0x194] ss:$8 sps:$4 sm:$0xff]  }
  0x45   : > { %2315 = vmatprep.subr.bf16.mxu0 %v3313_v59  ;;  %v3388_v59 = vld [vmem:[%s3692_s22 + $0x594] ss:$8 sps:$4 sm:$0xff]  }
  0x47   : > { %2104 = vmatpush1.bf16.msra.mxu1 %v3315_v60  ;;  %v3383_v60 = vld [vmem:[%s3692_s22 + $0x190] ss:$8 sps:$4 sm:$0xff]  }
  0x48   : > { %2316 = vmatpush1.bf16.msra.mxu0 %v3316_v61  ;;  %2105 = vmatprep.subr.bf16.mxu1 %v3317_v62  ;;  %v3386_v61 = vld [vmem:[%s3692_s22 + $0x590] ss:$8 sps:$4 sm:$0xff]   ;;  %v3391_v62 = vld [vmem:[%s3692_s22 + $0x1a4] ss:$8 sps:$4 sm:$0xff]  }
  0x49   : > { %2317 = vmatprep.subr.bf16.mxu0 %v3319_v63  ;;  %v3394_v63 = vld [vmem:[%s3692_s22 + $0x5a4] ss:$8 sps:$4 sm:$0xff]  }
  0x4b   : > { %2106 = vmatpush1.bf16.msra.mxu1 %v3321_v0  ;;  %v3389_v0 = vld [vmem:[%s3692_s22 + $0x1a0] ss:$8 sps:$4 sm:$0xff]  }
  0x4c   : > { %2318 = vmatpush1.bf16.msra.mxu0 %v3322_v1  ;;  %2107 = vmatprep.subr.bf16.mxu1 %v3323_v2  ;;  %v3392_v1 = vld [vmem:[%s3692_s22 + $0x5a0] ss:$8 sps:$4 sm:$0xff]   ;;  %v3397_v2 = vld [vmem:[%s3692_s22 + $0x1b4] ss:$8 sps:$4 sm:$0xff]  }
  0x4d   : > { %2319 = vmatprep.subr.bf16.mxu0 %v3325_v3  ;;  %v3400_v3 = vld [vmem:[%s3692_s22 + $0x5b4] ss:$8 sps:$4 sm:$0xff]  }
  0x4f   : > { %2108 = vmatpush1.bf16.msra.mxu1 %v3327_v4  ;;  %v3395_v4 = vld [vmem:[%s3692_s22 + $0x1b0] ss:$8 sps:$4 sm:$0xff]  }
  0x50   : > { %2320 = vmatpush1.bf16.msra.mxu0 %v3328_v5  ;;  %2130 = vmatprep.subr.bf16.mxu1 %v3331_v6  ;;  %v3398_v5 = vld [vmem:[%s3692_s22 + $0x5b0] ss:$8 sps:$4 sm:$0xff]   ;;  %v3403_v6 = vld [vmem:[%s3692_s22 + $0x1c4] ss:$8 sps:$4 sm:$0xff]  }
  0x51   : > { %2342 = vmatprep.subr.bf16.mxu0 %v3334_v7  ;;  %v3406_v7 = vld [vmem:[%s3692_s22 + $0x5c4] ss:$8 sps:$4 sm:$0xff]  }
  0x52   : > { %2110 = vmatmul.mubr.bf16.vlgmr.msra.gmra.mrb[0].mxu1 %v2850_v8  ;;  %v3401_v8 = vld [vmem:[%s3692_s22 + $0x1c0] ss:$8 sps:$4 sm:$0xff]  }
  0x53   : > { %2322 = vmatmul.mubr.bf16.vlgmr.msra.gmra.mrb[0].mxu0 %v2858_v10  ;;  %2131 = vmatpush1.bf16.msra.mxu1 %v3329_v9  ;;  %v3404_v9 = vld [vmem:[%s3692_s22 + $0x5c0] ss:$8 sps:$4 sm:$0xff]   ;;  %v3409_v10 = vld [vmem:[%s3692_s22 + $0x1d4] ss:$8 sps:$4 sm:$0xff]  }
  0x54   : > { %2343 = vmatpush1.bf16.msra.mxu0 %v3332_v11  ;;  %2132 = vmatprep.subr.bf16.mxu1 %v3337_v12  ;;  %v3412_v11 = vld [vmem:[%s3692_s22 + $0x5d4] ss:$8 sps:$4 sm:$0xff]   ;;  %v3407_v12 = vld [vmem:[%s3692_s22 + $0x1d0] ss:$8 sps:$4 sm:$0xff]  }
  0x55   : > { %2344 = vmatprep.subr.bf16.mxu0 %v3340_v13  ;;  %2119 = vmatprep.mubr.bf16.mxu1 %v2867_v33  ;;  %v3410_v13 = vld [vmem:[%s3692_s22 + $0x5d0] ss:$8 sps:$4 sm:$0xff]   ;;  %v378_v33 = vld [vmem:[%s3742_s26 + $0xe8] sm:$0xff] }
  0x56   : > { %2331 = vmatprep.mubr.bf16.mxu0 %v2875_v39  ;;  %v3442_v39 = vld [vmem:[%s3692_s22 + $0x624] ss:$8 sps:$4 sm:$0xff]  }
  0x57   : > { %2133 = vmatpush1.bf16.msra.mxu1 %v3335_v14  ;;  %v3415_v14 = vld [vmem:[%s3692_s22 + $0x1e4] ss:$8 sps:$4 sm:$0xff]  }
  0x58   : > { %2345 = vmatpush1.bf16.msra.mxu0 %v3338_v15  ;;  %2134 = vmatprep.subr.bf16.mxu1 %v3343_v16  ;;  %v3418_v15 = vld [vmem:[%s3692_s22 + $0x5e4] ss:$8 sps:$4 sm:$0xff]   ;;  %v3413_v16 = vld [vmem:[%s3692_s22 + $0x1e0] ss:$8 sps:$4 sm:$0xff]  }
  0x59   : > { %2346 = vmatprep.subr.bf16.mxu0 %v3346_v17  ;;  %v3416_v17 = vld [vmem:[%s3692_s22 + $0x5e0] ss:$8 sps:$4 sm:$0xff]  }
  0x5a   : > { %2120 = vmatmul.mubr.bf16.gmra.mrb[4].mxu1 %v2866_v37  ;;  %v3434_v37 = vld [vmem:[%s3692_s22 + $0x610] ss:$8 sps:$4 sm:$0xff]  }
  0x5b   : > { %2135 = vmatpush1.bf16.msra.mxu1 %v3341_v18  ;;  %2332 = vmatmul.mubr.bf16.gmra.mrb[4].mxu0 %v2874_v40  ;;  %v3421_v18 = vld [vmem:[%s3692_s22 + $0x1f4] ss:$8 sps:$4 sm:$0xff]   ;;  %v3437_v40 = vld [vmem:[%s3692_s22 + $0x220] ss:$8 sps:$4 sm:$0xff]  }
  0x5c   : > { %2347 = vmatpush1.bf16.msra.mxu0 %v3344_v19  ;;  %2136 = vmatprep.subr.bf16.mxu1 %v3349_v20  ;;  %v3424_v19 = vld [vmem:[%s3692_s22 + $0x5f4] ss:$8 sps:$4 sm:$0xff]   ;;  %v3419_v20 = vld [vmem:[%s3692_s22 + $0x1f0] ss:$8 sps:$4 sm:$0xff]  }
  0x5d   : > { %2348 = vmatprep.subr.bf16.mxu0 %v3352_v21  ;;  %2162 = vmatprep.mubr.bf16.mxu1 %v2853_v48  ;;  %v3422_v21 = vld [vmem:[%s3692_s22 + $0x5f0] ss:$8 sps:$4 sm:$0xff]   ;;  %v3445_v48 = vld [vmem:[%s3692_s22 + $0x234] ss:$8 sps:$4 sm:$0xff]  }
  0x5e   : > { %2374 = vmatprep.mubr.bf16.mxu0 %v2861_v53  ;;  %v3446_v53 = vld [vmem:[%s3692_s22 + $0x630] ss:$8 sps:$4 sm:$0xff]  }
  0x5f   : > { %2137 = vmatpush1.bf16.msra.mxu1 %v3347_v22  ;;  %v3427_v22 = vld [vmem:[%s3692_s22 + $0x204] ss:$8 sps:$4 sm:$0xff]  }
  0x60   : > { %2349 = vmatpush1.bf16.msra.mxu0 %v3350_v23  ;;  %2138 = vmatprep.subr.bf16.mxu1 %v3355_v24  ;;  %v3430_v23 = vld [vmem:[%s3692_s22 + $0x604] ss:$8 sps:$4 sm:$0xff]   ;;  %v3425_v24 = vld [vmem:[%s3692_s22 + $0x200] ss:$8 sps:$4 sm:$0xff]  }
  0x61   : > { %2350 = vmatprep.subr.bf16.mxu0 %v3358_v25  ;;  %v3428_v25 = vld [vmem:[%s3692_s22 + $0x600] ss:$8 sps:$4 sm:$0xff]  }
  0x63   : > { %2139 = vmatpush1.bf16.msra.mxu1 %v3353_v26  ;;  %v366_v26 = vld [vmem:[%s3742_s26 + $0x88] sm:$0xff] }
  0x64   : > { %2351 = vmatpush1.bf16.msra.mxu0 %v3356_v27  ;;  %2140 = vmatprep.subr.bf16.mxu1 %v3361_v28  ;;  %v2852_v27 = vcombine.low %v3801_v44, %v3804_v45  ;;  %v2860_v28 = vcombine.low %v3811_v49, %v3814_v50  ;;  %v3876_v45 = vld [vmem:[%s3742_s26 + $0x50] sm:$0xff] }
  0x65   : > { %2352 = vmatprep.subr.bf16.mxu0 %v3364_v29  ;;  %v374_v29 = vld [vmem:[%s3742_s26 + $0xc8] sm:$0xff]  ;;  %v3448_v49 = vld [vmem:[%s3692_s22 + $0x634] ss:$8 sps:$4 sm:$0xff]  }
  0x67   : > { %2141 = vmatpush1.bf16.msra.mxu1 %v3359_v32  ;;  %v370_v32 = vld [vmem:[%s3742_s26 + $0xa8] sm:$0xff] }
  0x68   : > { %2353 = vmatpush1.bf16.msra.mxu0 %v3362_v34  ;;  %2142 = vmatprep.subr.bf16.mxu1 %v3367_v38  ;;  %v2869_v34 = vcombine.high %v366_v26, %v374_v29  ;;  %v2877_v35 = vcombine.high %v370_v32, %v378_v33  ;;  %v3439_v38 = vld [vmem:[%s3692_s22 + $0x224] ss:$8 sps:$4 sm:$0xff]   ;;  %v2876_v44 = vcombine.low %v370_v32, %v378_v33  ;;  %v3509_v32 = vld [vmem:[%s3692_s22 + $0x2e0] ss:$8 sps:$4 sm:$0xff]  }
  0x69   : > { %2354 = vmatprep.subr.bf16.mxu0 %v3370_v41  ;;  %v3440_v41 = vld [vmem:[%s3692_s22 + $0x620] ss:$8 sps:$4 sm:$0xff]  }
  0x6a   : > { %v3512_v33 = vld [vmem:[%s3692_s22 + $0x6e0] ss:$8 sps:$4 sm:$0xff]  }
  0x6b   : > { %2143 = vmatpush1.bf16.msra.mxu1 %v3365_v42  ;;  %v3873_v42 = vld [vmem:[%s3742_s26 + $0x10] sm:$0xff] }
  0x6c   : > { %2355 = vmatpush1.bf16.msra.mxu0 %v3368_v43  ;;  %2144 = vmatprep.subr.bf16.mxu1 %v3373_v46  ;;  %v2868_v43 = vcombine.low %v366_v26, %v374_v29  ;;  %v3879_v46 = vld [vmem:[%s3742_s26 + $0x30] sm:$0xff]  ;;  %v2855_v50 = vcombine.high %v3873_v42, %v3876_v45 }
  0x6d   : > { %2356 = vmatprep.subr.bf16.mxu0 %v3376_v47  ;;  %v3882_v47 = vld [vmem:[%s3742_s26 + $0x70] sm:$0xff] }
  0x6e   : > { %v3505_v26 = vld [vmem:[%s3692_s22 + $0x2d4] ss:$8 sps:$4 sm:$0xff]   ;;  %v3506_v29 = vld [vmem:[%s3692_s22 + $0x6d0] ss:$8 sps:$4 sm:$0xff]  }
  0x6f   : > { %2145 = vmatpush1.bf16.msra.mxu1 %v3371_v51  ;;  %v2863_v51 = vcombine.high %v3879_v46, %v3882_v47 }
  0x70   : > { %2357 = vmatpush1.bf16.msra.mxu0 %v3374_v52  ;;  %2146 = vmatprep.subr.bf16.mxu1 %v3379_v54  ;;  %v3443_v52 = vld [vmem:[%s3692_s22 + $0x230] ss:$8 sps:$4 sm:$0xff]   ;;  %v3451_v54 = vld [vmem:[%s3692_s22 + $0x244] ss:$8 sps:$4 sm:$0xff]  }
  0x71   : > { %2358 = vmatprep.subr.bf16.mxu0 %v3382_v55  ;;  %v3454_v55 = vld [vmem:[%s3692_s22 + $0x644] ss:$8 sps:$4 sm:$0xff]  }
  0x73   : > { %2147 = vmatpush1.bf16.msra.mxu1 %v3377_v56  ;;  %v3449_v56 = vld [vmem:[%s3692_s22 + $0x240] ss:$8 sps:$4 sm:$0xff]  }
  0x74   : > { %2359 = vmatpush1.bf16.msra.mxu0 %v3380_v57  ;;  %2148 = vmatprep.subr.bf16.mxu1 %v3385_v58  ;;  %v3452_v57 = vld [vmem:[%s3692_s22 + $0x640] ss:$8 sps:$4 sm:$0xff]   ;;  %v3457_v58 = vld [vmem:[%s3692_s22 + $0x254] ss:$8 sps:$4 sm:$0xff]  }
  0x75   : > { %2360 = vmatprep.subr.bf16.mxu0 %v3388_v59  ;;  %v3460_v59 = vld [vmem:[%s3692_s22 + $0x654] ss:$8 sps:$4 sm:$0xff]  }
  0x77   : > { %2149 = vmatpush1.bf16.msra.mxu1 %v3383_v60  ;;  %v3455_v60 = vld [vmem:[%s3692_s22 + $0x250] ss:$8 sps:$4 sm:$0xff]  }
  0x78   : > { %2361 = vmatpush1.bf16.msra.mxu0 %v3386_v61  ;;  %2150 = vmatprep.subr.bf16.mxu1 %v3391_v62  ;;  %v3458_v61 = vld [vmem:[%s3692_s22 + $0x650] ss:$8 sps:$4 sm:$0xff]   ;;  %v3463_v62 = vld [vmem:[%s3692_s22 + $0x264] ss:$8 sps:$4 sm:$0xff]  }
  0x79   : > { %2362 = vmatprep.subr.bf16.mxu0 %v3394_v63  ;;  %v3466_v63 = vld [vmem:[%s3692_s22 + $0x664] ss:$8 sps:$4 sm:$0xff]  }
  0x7b   : > { %2151 = vmatpush1.bf16.msra.mxu1 %v3389_v0  ;;  %v3461_v0 = vld [vmem:[%s3692_s22 + $0x260] ss:$8 sps:$4 sm:$0xff]  }
  0x7c   : > { %2363 = vmatpush1.bf16.msra.mxu0 %v3392_v1  ;;  %2152 = vmatprep.subr.bf16.mxu1 %v3397_v2  ;;  %v3464_v1 = vld [vmem:[%s3692_s22 + $0x660] ss:$8 sps:$4 sm:$0xff]   ;;  %v3469_v2 = vld [vmem:[%s3692_s22 + $0x274] ss:$8 sps:$4 sm:$0xff]  }
  0x7d   : > { %2364 = vmatprep.subr.bf16.mxu0 %v3400_v3  ;;  %v3472_v3 = vld [vmem:[%s3692_s22 + $0x674] ss:$8 sps:$4 sm:$0xff]  }
  0x7f   : > { %2153 = vmatpush1.bf16.msra.mxu1 %v3395_v4  ;;  %v3467_v4 = vld [vmem:[%s3692_s22 + $0x270] ss:$8 sps:$4 sm:$0xff]  }
  0x80   : > { %2365 = vmatpush1.bf16.msra.mxu0 %v3398_v5  ;;  %2154 = vmatprep.subr.bf16.mxu1 %v3403_v6  ;;  %v3470_v5 = vld [vmem:[%s3692_s22 + $0x670] ss:$8 sps:$4 sm:$0xff]   ;;  %v3475_v6 = vld [vmem:[%s3692_s22 + $0x284] ss:$8 sps:$4 sm:$0xff]  }
  0x81   : > { %2366 = vmatprep.subr.bf16.mxu0 %v3406_v7  ;;  %v3478_v7 = vld [vmem:[%s3692_s22 + $0x684] ss:$8 sps:$4 sm:$0xff]  }
  0x83   : > { %2155 = vmatpush1.bf16.msra.mxu1 %v3401_v8  ;;  %v3473_v8 = vld [vmem:[%s3692_s22 + $0x280] ss:$8 sps:$4 sm:$0xff]  }
  0x84   : > { %2367 = vmatpush1.bf16.msra.mxu0 %v3404_v9  ;;  %2156 = vmatprep.subr.bf16.mxu1 %v3409_v10  ;;  %v3476_v9 = vld [vmem:[%s3692_s22 + $0x680] ss:$8 sps:$4 sm:$0xff]   ;;  %v3481_v10 = vld [vmem:[%s3692_s22 + $0x294] ss:$8 sps:$4 sm:$0xff]  }
  0x85   : > { %2368 = vmatprep.subr.bf16.mxu0 %v3412_v11  ;;  %v3484_v11 = vld [vmem:[%s3692_s22 + $0x694] ss:$8 sps:$4 sm:$0xff]  }
  0x87   : > { %2157 = vmatpush1.bf16.msra.mxu1 %v3407_v12  ;;  %v3479_v12 = vld [vmem:[%s3692_s22 + $0x290] ss:$8 sps:$4 sm:$0xff]  }
  0x88   : > { %2369 = vmatpush1.bf16.msra.mxu0 %v3410_v13  ;;  %2158 = vmatprep.subr.bf16.mxu1 %v3415_v14  ;;  %v3482_v13 = vld [vmem:[%s3692_s22 + $0x690] ss:$8 sps:$4 sm:$0xff]   ;;  %v3487_v14 = vld [vmem:[%s3692_s22 + $0x2a4] ss:$8 sps:$4 sm:$0xff]  }
  0x89   : > { %2370 = vmatprep.subr.bf16.mxu0 %v3418_v15  ;;  %v3490_v15 = vld [vmem:[%s3692_s22 + $0x6a4] ss:$8 sps:$4 sm:$0xff]  }
  0x8b   : > { %2159 = vmatpush1.bf16.msra.mxu1 %v3413_v16  ;;  %v3485_v16 = vld [vmem:[%s3692_s22 + $0x2a0] ss:$8 sps:$4 sm:$0xff]  }
  0x8c   : > { %2371 = vmatpush1.bf16.msra.mxu0 %v3416_v17  ;;  %2160 = vmatprep.subr.bf16.mxu1 %v3421_v18  ;;  %v3488_v17 = vld [vmem:[%s3692_s22 + $0x6a0] ss:$8 sps:$4 sm:$0xff]   ;;  %v3493_v18 = vld [vmem:[%s3692_s22 + $0x2b4] ss:$8 sps:$4 sm:$0xff]  }
  0x8d   : > { %2372 = vmatprep.subr.bf16.mxu0 %v3424_v19  ;;  %v3496_v19 = vld [vmem:[%s3692_s22 + $0x6b4] ss:$8 sps:$4 sm:$0xff]  }
  0x8f   : > { %2161 = vmatpush1.bf16.msra.mxu1 %v3419_v20  ;;  %v3491_v20 = vld [vmem:[%s3692_s22 + $0x2b0] ss:$8 sps:$4 sm:$0xff]  }
  0x90   : > { %2373 = vmatpush1.bf16.msra.mxu0 %v3422_v21  ;;  %2183 = vmatprep.subr.bf16.mxu1 %v3427_v22  ;;  %v3494_v21 = vld [vmem:[%s3692_s22 + $0x6b0] ss:$8 sps:$4 sm:$0xff]   ;;  %v3499_v22 = vld [vmem:[%s3692_s22 + $0x2c4] ss:$8 sps:$4 sm:$0xff]  }
  0x91   : > { %2395 = vmatprep.subr.bf16.mxu0 %v3430_v23  ;;  %v3502_v23 = vld [vmem:[%s3692_s22 + $0x6c4] ss:$8 sps:$4 sm:$0xff]  }
  0x92   : > { %2163 = vmatmul.mubr.bf16.vlgmr.msra.gmra.mrb[0].mxu1 %v2852_v27  ;;  %v3508_v27 = vld [vmem:[%s3692_s22 + $0x6d4] ss:$8 sps:$4 sm:$0xff]  }
  0x93   : > { %2375 = vmatmul.mubr.bf16.vlgmr.msra.gmra.mrb[0].mxu0 %v2860_v28  ;;  %2184 = vmatpush1.bf16.msra.mxu1 %v3425_v24  ;;  %v3497_v24 = vld [vmem:[%s3692_s22 + $0x2c0] ss:$8 sps:$4 sm:$0xff]   ;;  %v3503_v28 = vld [vmem:[%s3692_s22 + $0x2d0] ss:$8 sps:$4 sm:$0xff]  }
  0x94   : > { %2396 = vmatpush1.bf16.msra.mxu0 %v3428_v25  ;;  %2185 = vmatprep.subr.bf16.mxu1 %v3433_v30  ;;  %v3500_v25 = vld [vmem:[%s3692_s22 + $0x6c0] ss:$8 sps:$4 sm:$0xff]   ;;  %v3511_v30 = vld [vmem:[%s3692_s22 + $0x2e4] ss:$8 sps:$4 sm:$0xff]  }
  0x95   : > { %2397 = vmatprep.subr.bf16.mxu0 %v3436_v31  ;;  %2172 = vmatprep.mubr.bf16.mxu1 %v2869_v34  ;;  %v3514_v31 = vld [vmem:[%s3692_s22 + $0x6e4] ss:$8 sps:$4 sm:$0xff]   ;;  %v3517_v34 = vld [vmem:[%s3692_s22 + $0x2f4] ss:$8 sps:$4 sm:$0xff]  }
  0x96   : > { %2384 = vmatprep.mubr.bf16.mxu0 %v2877_v35  ;;  %v3520_v35 = vld [vmem:[%s3692_s22 + $0x6f4] ss:$8 sps:$4 sm:$0xff]  }
  0x97   : > { %2186 = vmatpush1.bf16.msra.mxu1 %v3431_v36  ;;  %v3515_v36 = vld [vmem:[%s3692_s22 + $0x2f0] ss:$8 sps:$4 sm:$0xff]  }
  0x98   : > { %2398 = vmatpush1.bf16.msra.mxu0 %v3434_v37  ;;  %2187 = vmatprep.subr.bf16.mxu1 %v3439_v38  ;;  %v3518_v37 = vld [vmem:[%s3692_s22 + $0x6f0] ss:$8 sps:$4 sm:$0xff]   ;;  %v3523_v38 = vld [vmem:[%s3692_s22 + $0x304] ss:$8 sps:$4 sm:$0xff]  }
  0x99   : > { %2399 = vmatprep.subr.bf16.mxu0 %v3442_v39  ;;  %v3526_v39 = vld [vmem:[%s3692_s22 + $0x704] ss:$8 sps:$4 sm:$0xff]  }
  0x9a   : > { %2173 = vmatmul.mubr.bf16.gmra.mrb[4].mxu1 %v2868_v43  ;;  %v2862_v43 = vcombine.low %v3879_v46, %v3882_v47  ;;  %v3527_v46 = vld [vmem:[%s3692_s22 + $0x310] ss:$8 sps:$4 sm:$0xff]  }
  0x9b   : > { %2385 = vmatmul.mubr.bf16.gmra.mrb[4].mxu0 %v2876_v44  ;;  %2188 = vmatpush1.bf16.msra.mxu1 %v3437_v40  ;;  %v367_v40 = vld [vmem:[%s3742_s26 + $0x90] sm:$0xff] }
  0x9c   : > { %2400 = vmatpush1.bf16.msra.mxu0 %v3440_v41  ;;  %2189 = vmatprep.subr.bf16.mxu1 %v3445_v48  ;;  %v2854_v41 = vcombine.low %v3873_v42, %v3876_v45  ;;  %v375_v44 = vld [vmem:[%s3742_s26 + $0xd0] sm:$0xff] }
  0x9d   : > { %2401 = vmatprep.subr.bf16.mxu0 %v3448_v49  ;;  %2215 = vmatprep.mubr.bf16.mxu1 %v2855_v50  ;;  %v371_v48 = vld [vmem:[%s3742_s26 + $0xb0] sm:$0xff]  ;;  %v3521_v50 = vld [vmem:[%s3692_s22 + $0x300] ss:$8 sps:$4 sm:$0xff]   ;;  %v2871_v42 = vcombine.high %v367_v40, %v375_v44 }
  0x9e   : > { %2427 = vmatprep.mubr.bf16.mxu0 %v2863_v51  ;;  %v379_v49 = vld [vmem:[%s3742_s26 + $0xf0] sm:$0xff]  ;;  %v3524_v51 = vld [vmem:[%s3692_s22 + $0x700] ss:$8 sps:$4 sm:$0xff]  }
  0x9f   : > { %2190 = vmatpush1.bf16.msra.mxu1 %v3443_v52  ;;  %v3529_v52 = vld [vmem:[%s3692_s22 + $0x314] ss:$8 sps:$4 sm:$0xff]   ;;  %v2879_v45 = vcombine.high %v371_v48, %v379_v49  ;;  %v3530_v47 = vld [vmem:[%s3692_s22 + $0x710] ss:$8 sps:$4 sm:$0xff]  }
  0xa0   : > { %2402 = vmatpush1.bf16.msra.mxu0 %v3446_v53  ;;  %2191 = vmatprep.subr.bf16.mxu1 %v3451_v54  ;;  %v3532_v53 = vld [vmem:[%s3692_s22 + $0x714] ss:$8 sps:$4 sm:$0xff]   ;;  %v3535_v54 = vld [vmem:[%s3692_s22 + $0x324] ss:$8 sps:$4 sm:$0xff]  }
  0xa1   : > { %2403 = vmatprep.subr.bf16.mxu0 %v3454_v55  ;;  %v3538_v55 = vld [vmem:[%s3692_s22 + $0x724] ss:$8 sps:$4 sm:$0xff]  }
  0xa3   : > { %2192 = vmatpush1.bf16.msra.mxu1 %v3449_v56  ;;  %v3959_v56 = vld [vmem:[%s3742_s26 + $0x18] sm:$0xff] }
  0xa4   : > { %2404 = vmatpush1.bf16.msra.mxu0 %v3452_v57  ;;  %2193 = vmatprep.subr.bf16.mxu1 %v3457_v58  ;;  %v2870_v57 = vcombine.low %v367_v40, %v375_v44  ;;  %v2878_v58 = vcombine.low %v371_v48, %v379_v49  ;;  %v3593_v40 = vld [vmem:[%s3692_s22 + $0x3c0] ss:$8 sps:$4 sm:$0xff]   ;;  %v3604_v44 = vld [vmem:[%s3692_s22 + $0x7d4] ss:$8 sps:$4 sm:$0xff]   ;;  %v3599_v48 = vld [vmem:[%s3692_s22 + $0x3d0] ss:$8 sps:$4 sm:$0xff]  }
  0xa5   : > { %2405 = vmatprep.subr.bf16.mxu0 %v3460_v59  ;;  %v3962_v59 = vld [vmem:[%s3742_s26 + $0x58] sm:$0xff] }
  0xa6   : > { %v3602_v49 = vld [vmem:[%s3692_s22 + $0x7d0] ss:$8 sps:$4 sm:$0xff]  }
  0xa7   : > { %2194 = vmatpush1.bf16.msra.mxu1 %v3455_v60  ;;  %v3965_v60 = vld [vmem:[%s3742_s26 + $0x38] sm:$0xff] }
  0xa8   : > { %2406 = vmatpush1.bf16.msra.mxu0 %v3458_v61  ;;  %2195 = vmatprep.subr.bf16.mxu1 %v3463_v62  ;;  %v3968_v61 = vld [vmem:[%s3742_s26 + $0x78] sm:$0xff]  ;;  %v3533_v62 = vld [vmem:[%s3692_s22 + $0x320] ss:$8 sps:$4 sm:$0xff]  }
  0xa9   : > { %2407 = vmatprep.subr.bf16.mxu0 %v3466_v63  ;;  %v3536_v63 = vld [vmem:[%s3692_s22 + $0x720] ss:$8 sps:$4 sm:$0xff]  }
  0xab   : > { %2196 = vmatpush1.bf16.msra.mxu1 %v3461_v0  ;;  %v3541_v0 = vld [vmem:[%s3692_s22 + $0x334] ss:$8 sps:$4 sm:$0xff]  }
  0xac   : > { %2408 = vmatpush1.bf16.msra.mxu0 %v3464_v1  ;;  %2197 = vmatprep.subr.bf16.mxu1 %v3469_v2  ;;  %v3544_v1 = vld [vmem:[%s3692_s22 + $0x734] ss:$8 sps:$4 sm:$0xff]   ;;  %v2857_v2 = vcombine.high %v3959_v56, %v3962_v59 }
  0xad   : > { %2409 = vmatprep.subr.bf16.mxu0 %v3472_v3  ;;  %v2865_v3 = vcombine.high %v3965_v60, %v3968_v61 }
  0xaf   : > { %2198 = vmatpush1.bf16.msra.mxu1 %v3467_v4  ;;  %v3539_v4 = vld [vmem:[%s3692_s22 + $0x330] ss:$8 sps:$4 sm:$0xff]  }
  0xb0   : > { %2410 = vmatpush1.bf16.msra.mxu0 %v3470_v5  ;;  %2199 = vmatprep.subr.bf16.mxu1 %v3475_v6  ;;  %v3542_v5 = vld [vmem:[%s3692_s22 + $0x730] ss:$8 sps:$4 sm:$0xff]   ;;  %v3547_v6 = vld [vmem:[%s3692_s22 + $0x344] ss:$8 sps:$4 sm:$0xff]  }
  0xb1   : > { %2411 = vmatprep.subr.bf16.mxu0 %v3478_v7  ;;  %v3550_v7 = vld [vmem:[%s3692_s22 + $0x744] ss:$8 sps:$4 sm:$0xff]  }
  0xb3   : > { %2200 = vmatpush1.bf16.msra.mxu1 %v3473_v8  ;;  %v3545_v8 = vld [vmem:[%s3692_s22 + $0x340] ss:$8 sps:$4 sm:$0xff]  }
  0xb4   : > { %2412 = vmatpush1.bf16.msra.mxu0 %v3476_v9  ;;  %2201 = vmatprep.subr.bf16.mxu1 %v3481_v10  ;;  %v3548_v9 = vld [vmem:[%s3692_s22 + $0x740] ss:$8 sps:$4 sm:$0xff]   ;;  %v3553_v10 = vld [vmem:[%s3692_s22 + $0x354] ss:$8 sps:$4 sm:$0xff]  }
  0xb5   : > { %2413 = vmatprep.subr.bf16.mxu0 %v3484_v11  ;;  %v3556_v11 = vld [vmem:[%s3692_s22 + $0x754] ss:$8 sps:$4 sm:$0xff]  }
  0xb7   : > { %2202 = vmatpush1.bf16.msra.mxu1 %v3479_v12  ;;  %v3551_v12 = vld [vmem:[%s3692_s22 + $0x350] ss:$8 sps:$4 sm:$0xff]  }
  0xb8   : > { %2414 = vmatpush1.bf16.msra.mxu0 %v3482_v13  ;;  %2203 = vmatprep.subr.bf16.mxu1 %v3487_v14  ;;  %v3554_v13 = vld [vmem:[%s3692_s22 + $0x750] ss:$8 sps:$4 sm:$0xff]   ;;  %v3559_v14 = vld [vmem:[%s3692_s22 + $0x364] ss:$8 sps:$4 sm:$0xff]  }
  0xb9   : > { %2415 = vmatprep.subr.bf16.mxu0 %v3490_v15  ;;  %v3562_v15 = vld [vmem:[%s3692_s22 + $0x764] ss:$8 sps:$4 sm:$0xff]  }
  0xbb   : > { %2204 = vmatpush1.bf16.msra.mxu1 %v3485_v16  ;;  %v3557_v16 = vld [vmem:[%s3692_s22 + $0x360] ss:$8 sps:$4 sm:$0xff]  }
  0xbc   : > { %2416 = vmatpush1.bf16.msra.mxu0 %v3488_v17  ;;  %2205 = vmatprep.subr.bf16.mxu1 %v3493_v18  ;;  %v3560_v17 = vld [vmem:[%s3692_s22 + $0x760] ss:$8 sps:$4 sm:$0xff]   ;;  %v3565_v18 = vld [vmem:[%s3692_s22 + $0x374] ss:$8 sps:$4 sm:$0xff]  }
  0xbd   : > { %2417 = vmatprep.subr.bf16.mxu0 %v3496_v19  ;;  %v3568_v19 = vld [vmem:[%s3692_s22 + $0x774] ss:$8 sps:$4 sm:$0xff]  }
  0xbf   : > { %2206 = vmatpush1.bf16.msra.mxu1 %v3491_v20  ;;  %v3563_v20 = vld [vmem:[%s3692_s22 + $0x370] ss:$8 sps:$4 sm:$0xff]  }
  0xc0   : > { %2418 = vmatpush1.bf16.msra.mxu0 %v3494_v21  ;;  %2207 = vmatprep.subr.bf16.mxu1 %v3499_v22  ;;  %v3566_v21 = vld [vmem:[%s3692_s22 + $0x770] ss:$8 sps:$4 sm:$0xff]   ;;  %v3571_v22 = vld [vmem:[%s3692_s22 + $0x384] ss:$8 sps:$4 sm:$0xff]  }
  0xc1   : > { %2419 = vmatprep.subr.bf16.mxu0 %v3502_v23  ;;  %v3574_v23 = vld [vmem:[%s3692_s22 + $0x784] ss:$8 sps:$4 sm:$0xff]  }
  0xc3   : > { %2208 = vmatpush1.bf16.msra.mxu1 %v3497_v24  ;;  %v3569_v24 = vld [vmem:[%s3692_s22 + $0x380] ss:$8 sps:$4 sm:$0xff]  }
  0xc4   : > { %2420 = vmatpush1.bf16.msra.mxu0 %v3500_v25  ;;  %2209 = vmatprep.subr.bf16.mxu1 %v3505_v26  ;;  %v3572_v25 = vld [vmem:[%s3692_s22 + $0x780] ss:$8 sps:$4 sm:$0xff]   ;;  %v3577_v26 = vld [vmem:[%s3692_s22 + $0x394] ss:$8 sps:$4 sm:$0xff]  }
  0xc5   : > { %2421 = vmatprep.subr.bf16.mxu0 %v3508_v27  ;;  %v3580_v27 = vld [vmem:[%s3692_s22 + $0x794] ss:$8 sps:$4 sm:$0xff]  }
  0xc7   : > { %2210 = vmatpush1.bf16.msra.mxu1 %v3503_v28  ;;  %v3575_v28 = vld [vmem:[%s3692_s22 + $0x390] ss:$8 sps:$4 sm:$0xff]  }
  0xc8   : > { %2422 = vmatpush1.bf16.msra.mxu0 %v3506_v29  ;;  %2211 = vmatprep.subr.bf16.mxu1 %v3511_v30  ;;  %v3578_v29 = vld [vmem:[%s3692_s22 + $0x790] ss:$8 sps:$4 sm:$0xff]   ;;  %v3583_v30 = vld [vmem:[%s3692_s22 + $0x3a4] ss:$8 sps:$4 sm:$0xff]  }
  0xc9   : > { %2423 = vmatprep.subr.bf16.mxu0 %v3514_v31  ;;  %v3586_v31 = vld [vmem:[%s3692_s22 + $0x7a4] ss:$8 sps:$4 sm:$0xff]  }
  0xcb   : > { %2212 = vmatpush1.bf16.msra.mxu1 %v3509_v32  ;;  %v3581_v32 = vld [vmem:[%s3692_s22 + $0x3a0] ss:$8 sps:$4 sm:$0xff]  }
  0xcc   : > { %2424 = vmatpush1.bf16.msra.mxu0 %v3512_v33  ;;  %2213 = vmatprep.subr.bf16.mxu1 %v3517_v34  ;;  %v3584_v33 = vld [vmem:[%s3692_s22 + $0x7a0] ss:$8 sps:$4 sm:$0xff]   ;;  %v3589_v34 = vld [vmem:[%s3692_s22 + $0x3b4] ss:$8 sps:$4 sm:$0xff]  }
  0xcd   : > { %2425 = vmatprep.subr.bf16.mxu0 %v3520_v35  ;;  %v3592_v35 = vld [vmem:[%s3692_s22 + $0x7b4] ss:$8 sps:$4 sm:$0xff]  }
  0xcf   : > { %2214 = vmatpush1.bf16.msra.mxu1 %v3515_v36  ;;  %v3587_v36 = vld [vmem:[%s3692_s22 + $0x3b0] ss:$8 sps:$4 sm:$0xff]  }
  0xd0   : > { %2426 = vmatpush1.bf16.msra.mxu0 %v3518_v37  ;;  %2236 = vmatprep.subr.bf16.mxu1 %v3523_v38  ;;  %v3590_v37 = vld [vmem:[%s3692_s22 + $0x7b0] ss:$8 sps:$4 sm:$0xff]   ;;  %v3595_v38 = vld [vmem:[%s3692_s22 + $0x3c4] ss:$8 sps:$4 sm:$0xff]  }
  0xd1   : > { %2448 = vmatprep.subr.bf16.mxu0 %v3526_v39  ;;  %v3598_v39 = vld [vmem:[%s3692_s22 + $0x7c4] ss:$8 sps:$4 sm:$0xff]  }
  0xd2   : > { %2216 = vmatmul.mubr.bf16.vlgmr.msra.gmra.mrb[0].mxu1 %v2854_v41  ;;  %v3596_v41 = vld [vmem:[%s3692_s22 + $0x7c0] ss:$8 sps:$4 sm:$0xff]  }
  0xd3   : > { %2428 = vmatmul.mubr.bf16.vlgmr.msra.gmra.mrb[0].mxu0 %v2862_v43  ;;  %2237 = vmatpush1.bf16.msra.mxu1 %v3521_v50  ;;  %v3601_v43 = vld [vmem:[%s3692_s22 + $0x3d4] ss:$8 sps:$4 sm:$0xff]   ;;  %v3607_v50 = vld [vmem:[%s3692_s22 + $0x3e4] ss:$8 sps:$4 sm:$0xff]  }
  0xd4   : > { %2449 = vmatpush1.bf16.msra.mxu0 %v3524_v51  ;;  %2238 = vmatprep.subr.bf16.mxu1 %v3529_v52  ;;  %v3610_v51 = vld [vmem:[%s3692_s22 + $0x7e4] ss:$8 sps:$4 sm:$0xff]   ;;  %v3605_v52 = vld [vmem:[%s3692_s22 + $0x3e0] ss:$8 sps:$4 sm:$0xff]  }
  0xd5   : > { %2450 = vmatprep.subr.bf16.mxu0 %v3532_v53  ;;  %2225 = vmatprep.mubr.bf16.mxu1 %v2871_v42  ;;  %v3608_v53 = vld [vmem:[%s3692_s22 + $0x7e0] ss:$8 sps:$4 sm:$0xff]   ;;  %v3613_v42 = vld [vmem:[%s3692_s22 + $0x3f4] ss:$8 sps:$4 sm:$0xff]  }
  0xd6   : > { %2437 = vmatprep.mubr.bf16.mxu0 %v2879_v45  ;;  %v3616_v45 = vld [vmem:[%s3692_s22 + $0x7f4] ss:$8 sps:$4 sm:$0xff]  }
  0xd7   : > { %2239 = vmatpush1.bf16.msra.mxu1 %v3527_v46  ;;  %v3611_v46 = vld [vmem:[%s3692_s22 + $0x3f0] ss:$8 sps:$4 sm:$0xff]  }
  0xd8   : > { %2451 = vmatpush1.bf16.msra.mxu0 %v3530_v47  ;;  %2240 = vmatprep.subr.bf16.mxu1 %v3535_v54  ;;  %v3614_v47 = vld [vmem:[%s3692_s22 + $0x7f0] ss:$8 sps:$4 sm:$0xff]  }
  0xd9   : > { %2452 = vmatprep.subr.bf16.mxu0 %v3538_v55  ;;  %v368_v54 = vld [vmem:[%s3742_s26 + $0x98] sm:$0xff] }
  0xda   : > { %2226 = vmatmul.mubr.bf16.gmra.mrb[4].mxu1 %v2870_v57  ;;  %v376_v55 = vld [vmem:[%s3742_s26 + $0xd8] sm:$0xff] }
  0xdb   : > { %2438 = vmatmul.mubr.bf16.gmra.mrb[4].mxu0 %v2878_v58  ;;  %2241 = vmatpush1.bf16.msra.mxu1 %v3533_v62  ;;  %v372_v57 = vld [vmem:[%s3742_s26 + $0xb8] sm:$0xff]  ;;  %v2856_v62 = vcombine.low %v3959_v56, %v3962_v59  ;;  %v3641_v59 = vmov 0.0  }
  0xdc   : > { %2453 = vmatpush1.bf16.msra.mxu0 %v3536_v63  ;;  %2242 = vmatprep.subr.bf16.mxu1 %v3541_v0  ;;  %v380_v58 = vld [vmem:[%s3742_s26 + $0xf8] sm:$0xff]  ;;  %v2864_v63 = vcombine.low %v3965_v60, %v3968_v61  ;;  %v2873_v0 = vcombine.high %v368_v54, %v376_v55 }
  0xdd   : > { %2454 = vmatprep.subr.bf16.mxu0 %v3544_v1  ;;  %2268 = vmatprep.mubr.bf16.mxu1 %v2857_v2  ;;  %v2881_v1 = vcombine.high %v372_v57, %v380_v58  ;;  %v2872_v2 = vcombine.low %v368_v54, %v376_v55 }
  0xde   : > { %2480 = vmatprep.mubr.bf16.mxu0 %v2865_v3  ;;  %v2880_v3 = vcombine.low %v372_v57, %v380_v58  ;;  %v3642_v57 = vmov 1966171168  }
  0xdf   : > { %2243 = vmatpush1.bf16.msra.mxu1 %v3539_v4  ;;  %v343_v4 = vlaneseq  ;;  %v2552_v58 = vunpack.c.l.s4 %v3642_v57 }
  0xe0   : > { %2455 = vmatpush1.bf16.msra.mxu0 %v3542_v5  ;;  %2244 = vmatprep.subr.bf16.mxu1 %v3547_v6 }
  0xe1   : > { %2456 = vmatprep.subr.bf16.mxu0 %v3550_v7  ;;  %vm4043_vm0 = vcmp.lt.s32.totalorder %v343_v4, 256 }
  0xe2   : > { %347 = vst.msk [vmem:[%s4040_s30] sm:$0x3] %vm4043_vm0, %v3641_v59  ;;  %348 = vst.msk [vmem:[%s4053_s7] sm:$0x3] %vm4043_vm0, %v3641_v59 }
  0xe3   : > { %2245 = vmatpush1.bf16.msra.mxu1 %v3545_v8 }
  0xe4   : > { %2457 = vmatpush1.bf16.msra.mxu0 %v3548_v9  ;;  %2246 = vmatprep.subr.bf16.mxu1 %v3553_v10 }
  0xe5   : > { %2458 = vmatprep.subr.bf16.mxu0 %v3556_v11 }
  0xe7   : > { %2247 = vmatpush1.bf16.msra.mxu1 %v3551_v12 }
  0xe8   : > { %2459 = vmatpush1.bf16.msra.mxu0 %v3554_v13  ;;  %2248 = vmatprep.subr.bf16.mxu1 %v3559_v14 }
  0xe9   : > { %2460 = vmatprep.subr.bf16.mxu0 %v3562_v15 }
  0xeb   : > { %2249 = vmatpush1.bf16.msra.mxu1 %v3557_v16 }
  0xec   : > { %2461 = vmatpush1.bf16.msra.mxu0 %v3560_v17  ;;  %2250 = vmatprep.subr.bf16.mxu1 %v3565_v18 }
  0xed   : > { %2462 = vmatprep.subr.bf16.mxu0 %v3568_v19 }
  0xef   : > { %2251 = vmatpush1.bf16.msra.mxu1 %v3563_v20 }
  0xf0   : > { %2463 = vmatpush1.bf16.msra.mxu0 %v3566_v21  ;;  %2252 = vmatprep.subr.bf16.mxu1 %v3571_v22 }
  0xf1   : > { %2464 = vmatprep.subr.bf16.mxu0 %v3574_v23 }
  0xf3   : > { %2253 = vmatpush1.bf16.msra.mxu1 %v3569_v24 }
  0xf4   : > { %2465 = vmatpush1.bf16.msra.mxu0 %v3572_v25  ;;  %2254 = vmatprep.subr.bf16.mxu1 %v3577_v26 }
  0xf5   : > { %2466 = vmatprep.subr.bf16.mxu0 %v3580_v27 }
  0xf7   : > { %2255 = vmatpush1.bf16.msra.mxu1 %v3575_v28 }
  0xf8   : > { %2467 = vmatpush1.bf16.msra.mxu0 %v3578_v29  ;;  %2256 = vmatprep.subr.bf16.mxu1 %v3583_v30 }
  0xf9   : > { %2468 = vmatprep.subr.bf16.mxu0 %v3586_v31 }
  0xfb   : > { %2257 = vmatpush1.bf16.msra.mxu1 %v3581_v32 }
  0xfc   : > { %2469 = vmatpush1.bf16.msra.mxu0 %v3584_v33  ;;  %2258 = vmatprep.subr.bf16.mxu1 %v3589_v34 }
  0xfd   : > { %2470 = vmatprep.subr.bf16.mxu0 %v3592_v35 }
  0xff   : > { %2259 = vmatpush1.bf16.msra.mxu1 %v3587_v36 }
 0x100   : > { %2471 = vmatpush1.bf16.msra.mxu0 %v3590_v37  ;;  %2260 = vmatprep.subr.bf16.mxu1 %v3595_v38 }
 0x101   : > { %2472 = vmatprep.subr.bf16.mxu0 %v3598_v39 }
 0x103   : > { %2261 = vmatpush1.bf16.msra.mxu1 %v3593_v40 }
 0x104   : > { %2473 = vmatpush1.bf16.msra.mxu0 %v3596_v41  ;;  %2262 = vmatprep.subr.bf16.mxu1 %v3601_v43 }
 0x105   : > { %2474 = vmatprep.subr.bf16.mxu0 %v3604_v44 }
 0x107   : > { %2263 = vmatpush1.bf16.msra.mxu1 %v3599_v48 }
 0x108   : > { %2475 = vmatpush1.bf16.msra.mxu0 %v3602_v49  ;;  %2264 = vmatprep.subr.bf16.mxu1 %v3607_v50 }
 0x109   : > { %2476 = vmatprep.subr.bf16.mxu0 %v3610_v51 }
 0x10b   : > { %2265 = vmatpush1.bf16.msra.mxu1 %v3605_v52 }
 0x10c   : > { %2477 = vmatpush1.bf16.msra.mxu0 %v3608_v53  ;;  %2266 = vmatprep.subr.bf16.mxu1 %v3613_v42 }
 0x10d   : > { %2478 = vmatprep.subr.bf16.mxu0 %v3616_v45 }
 0x10f   : > { %2267 = vmatpush1.bf16.msra.mxu1 %v3611_v46 }
 0x110   : > { %2479 = vmatpush1.bf16.msra.mxu0 %v3614_v47 }
 0x112   : > { %2269 = vmatmul.mubr.bf16.vlgmr.msra.gmra.mrb[0].mxu1 %v2856_v62 }
 0x113   : > { %2481 = vmatmul.mubr.bf16.vlgmr.msra.gmra.mrb[0].mxu0 %v2864_v63  ;;  %2278 = vmatprep.mubr.bf16.mxu1 %v2873_v0 }
 0x114   : > { %2490 = vmatprep.mubr.bf16.mxu0 %v2881_v1 }
 0x11a   : > { %2279 = vmatmul.mubr.bf16.gmra.mrb[4].mxu1 %v2872_v2 }
 0x11b   : > { %2491 = vmatmul.mubr.bf16.gmra.mrb[4].mxu0 %v2880_v3 }
 0x1e5   : > { %v2270_v60 = vpop.f32.mrb[0].mxu1 }
 0x1e6   : > { %v2482_v61 = vpop.f32.mrb[0].mxu0  ;;  %v2272_v6 = vpop.f32.mrb[1].mxu1 }
 0x1e7   : > { %v3151_v5 = vadd.f32 %v2482_v61, %v2270_v60  ;;  %v2484_v7 = vpop.f32.mrb[1].mxu0  ;;  %v2274_v9 = vpop.f32.mrb[2].mxu1  ;;  %v2553_v61 = vunpack.c.0.s8 %v2552_v58 }
 0x1e8   : > { %v3152_v8 = vadd.f32 %v2484_v7, %v2272_v6  ;;  %v2486_v10 = vpop.f32.mrb[2].mxu0  ;;  %v2276_v12 = vpop.f32.mrb[3].mxu1 }
 0x1e9   : > { %v3153_v11 = vadd.f32 %v2486_v10, %v2274_v9  ;;  %v2488_v13 = vpop.f32.mrb[3].mxu0  ;;  %v2573_v16 = vmul.f32 %v3151_v5, %v3151_v5 }
 0x1ea   : > { %v3147_v14 = vpack.c.bf16 %v3152_v8, %v3151_v5  ;;  %v3154_v15 = vadd.f32 %v2488_v13, %v2276_v12  ;;  %v2574_v19 = vmul.f32 %v3152_v8, %v3152_v8 }
 0x1eb   : > { %v2530_v17 = vadd.f32 %v3153_v11, %v3151_v5  ;;  %v2575_v18 = vmul.f32 %v3153_v11, %v3153_v11  ;;  %v2555_v5 = vshrl.u32 %v343_v4, 7  ;;  %v2529_v4 = vld [vmem:[%s4040_s30] sm:$0x3] }
 0x1ec   : > { %2525 = vst [vmem:[%s4062_s11] sm:$0xff] %v3147_v14  ;;  %v3148_v20 = vpack.c.bf16 %v3154_v15, %v3153_v11  ;;  %v2539_v21 = vadd.f32 %v3154_v15, %v3152_v8  ;;  %v2576_v22 = vmul.f32 %v3154_v15, %v3154_v15 }
 0x1ed   : > { %v2581_v23 = vadd.f32 %v2575_v18, %v2573_v16  ;;  %v2280_v25 = vpop.f32.mrb[4].mxu1  ;;  %v2556_v14 = vsub.s32 %v2553_v61, %v2555_v5 }
 0x1ee   : > { %2526 = vst [vmem:[%s4062_s11 + $0x8] sm:$0xff] %v3148_v20  ;;  %v2590_v24 = vadd.f32 %v2576_v22, %v2574_v19  ;;  %v2492_v26 = vpop.f32.mrb[4].mxu0  ;;  %v2282_v28 = vpop.f32.mrb[5].mxu1 }
 0x1ef   : > { %v3155_v27 = vadd.f32 %v2492_v26, %v2280_v25  ;;  %v2494_v29 = vpop.f32.mrb[5].mxu0  ;;  %v2284_v31 = vpop.f32.mrb[6].mxu1 }
 0x1f0   : > { %v3156_v30 = vadd.f32 %v2494_v29, %v2282_v28  ;;  %v2496_v32 = vpop.f32.mrb[6].mxu0  ;;  %v2286_v36 = vpop.f32.mrb[7].mxu1 }
 0x1f1   : > { %v2531_v33 = vadd.f32 %v3155_v27, %v2530_v17  ;;  %v2577_v34 = vmul.f32 %v3155_v27, %v3155_v27  ;;  %v3157_v35 = vadd.f32 %v2496_v32, %v2284_v31  ;;  %v2498_v37 = vpop.f32.mrb[7].mxu0 }
 0x1f2   : > { %v3149_v38 = vpack.c.bf16 %v3156_v30, %v3155_v27  ;;  %v2540_v39 = vadd.f32 %v3156_v30, %v2539_v21  ;;  %v2578_v40 = vmul.f32 %v3156_v30, %v3156_v30  ;;  %v3158_v41 = vadd.f32 %v2498_v37, %v2286_v36 }
 0x1f3   : > { %v2582_v43 = vadd.f32 %v2581_v23, %v2577_v34  ;;  %v2532_v44 = vadd.f32 %v3157_v35, %v2531_v33  ;;  %v2579_v48 = vmul.f32 %v3157_v35, %v3157_v35  ;;  %v2572_v23 = vld [vmem:[%s4053_s7] sm:$0x3] }
 0x1f4   : > { %2527 = vst [vmem:[%s4062_s11 + $0x10] sm:$0xff] %v3149_v38  ;;  %v2591_v49 = vadd.f32 %v2590_v24, %v2578_v40  ;;  %v3150_v50 = vpack.c.bf16 %v3158_v41, %v3157_v35  ;;  %v2541_v51 = vadd.f32 %v3158_v41, %v2540_v39  ;;  %v2580_v52 = vmul.f32 %v3158_v41, %v3158_v41 }
 0x1f5   : > { %v2533_v53 = vrot.slane %v2532_v44, 4  ;;  %v2583_v42 = vadd.f32 %v2582_v43, %v2579_v48 }
 0x1f6   : > { %2528 = vst [vmem:[%s4062_s11 + $0x18] sm:$0xff] %v3150_v50  ;;  %v2542_v45 = vrot.slane %v2541_v51, 4  ;;  %v2592_v46 = vadd.f32 %v2591_v49, %v2580_v52 }
 0x1f7   : > { %v2534_v47 = vadd.f32 %v2533_v53, %v2532_v44  ;;  %v2584_v54 = vrot.slane %v2583_v42, 4 }
 0x1f8   : > { %v2543_v55 = vadd.f32 %v2542_v45, %v2541_v51  ;;  %v2593_v62 = vrot.slane %v2592_v46, 4 }
 0x1f9   : > { %v2535_v63 = vrot.slane %v2534_v47, 2  ;;  %v2585_v0 = vadd.f32 %v2584_v54, %v2583_v42 }
 0x1fa   : > { %v2544_v1 = vrot.slane %v2543_v55, 2  ;;  %v2594_v2 = vadd.f32 %v2593_v62, %v2592_v46 }
 0x1fb   : > { %v2536_v3 = vadd.f32 %v2535_v63, %v2534_v47  ;;  %v2586_v59 = vrot.slane %v2585_v0, 2 }
 0x1fc   : > { %v2545_v60 = vadd.f32 %v2544_v1, %v2543_v55  ;;  %v2595_v6 = vrot.slane %v2594_v2, 2 }
 0x1fd   : > { %v2537_v7 = vrot.slane %v2536_v3, 1  ;;  %v2587_v8 = vadd.f32 %v2586_v59, %v2585_v0 }
 0x1fe   : > { %v2546_v9 = vrot.slane %v2545_v60, 1  ;;  %v2596_v10 = vadd.f32 %v2595_v6, %v2594_v2 }
 0x1ff   : > { %v2538_v11 = vadd.f32 %v2537_v7, %v2536_v3  ;;  %v2588_v12 = vrot.slane %v2587_v8, 1 }
 0x200   : > { %v2547_v13 = vadd.f32 %v2546_v9, %v2545_v60  ;;  %v2597_v15 = vrot.slane %v2596_v10, 1 }
 0x201   : > { %v2589_v16 = vadd.f32 %v2588_v12, %v2587_v8 }
 0x202   : > { %v2550_v17 = vcombine.low %v2538_v11, %v2547_v13  ;;  %v2598_v18 = vadd.f32 %v2597_v15, %v2596_v10 }
 0x204   : > { %v2557_v19 = vrot.slane %v2550_v17, %v2556_v14  ;;  %v2601_v20 = vcombine.low %v2589_v16, %v2598_v18 }
 0x206   : > { %v2564_v21 = vrot.slane %v2557_v19, %v2556_v14  ;;  %v2608_v22 = vrot.slane %v2601_v20, %v2556_v14 }
 0x208   : > { %v2566_v24 = vadd.f32 %v2564_v21, %v2529_v4  ;;  %v2615_v25 = vrot.slane %v2608_v22, %v2556_v14 }
 0x20a   : > { %2571 = vst.msk [vmem:[%s4040_s30] sm:$0x3] %vm4043_vm0, %v2566_v24  ;;  %v2617_v26 = vadd.f32 %v2615_v25, %v2572_v23 }
 0x20c   : > { %2618 = vst.msk [vmem:[%s4053_s7] sm:$0x3] %vm4043_vm0, %v2617_v26 }
 0x20d PF: > { %s15_s17 = sadd.s32 1, %s3639_s17   ;;  %s4093_s15 = smov %s3635_s16 }
 0x20e   : > { %p12_p5 = scmp.ge.s32.totalorder %s15_s17, 6   ;;  %s4094_s16 = smov %s4096_s18 }
 0x210   :  { %14 = sbr.rel (!%p12_p5) target bundleno = 2 (0x2), region = 89 }

// kernel: generator_forward.14
= control target key start
LH: loop header
LB: loop body
LE: loop exit
PB: predicated region body
PF: predicated region fallthrough
CT: control target
= control target key end

     0   :  { %s990_s12 = smov 0   ;;  %s992_s13 = smov 0   ;;  %s1140_s0 = inlined_call_operand.vmem [shape: bf16[512,128], index: 0, kind: input, shape index: {}]   ;;  %s1141_s1 = inlined_call_operand.vmem [shape: f32[1,128], index: 1, kind: input, shape index: {}]   ;;  %s1142_s2 = inlined_call_operand.vmem [shape: f32[1,128], index: 2, kind: input, shape index: {}]   ;;  %s1143_s3 = inlined_call_operand.vmem [shape: bf16[512,128], index: 3, kind: output, shape index: {}]  }
   0x1   :  { %s994_s14 = smov 0  }
   0x2 LB: > { %s25_s15 = sadd.s32 1, %s964_s13  ;;  %p675_p0 = scmp.ge.s32.totalorder %s968_s14, 1  ;;  %s968_s14 = sphi %s994_s14, %s13_s14   ;;  %s964_s13 = sphi %s992_s13, %s1145_s13   ;;  %s960_s12 = sphi %s990_s12, %s1144_s12  }
   0x3   : > { %p27_p1 = scmp.ge.s32.totalorder %s25_s15, 2  ;;  %p173_p2 = scmp.lt.s32.totalorder %s968_s14, 3 }
   0x5   : > { %s1147_s15 = smov (%p27_p1, %s25_s15), 0  ;;  %p174_p3 = pnand %p675_p0, %p173_p2 }
   0x6   : > { %s676_s16 = sshll.u32 (!%p174_p3), %s960_s12, 5  ;;  %v1021_v0 = vld [vmem:[%s1141_s1] ss:$0 sm:$0xff] (!%p174_p3) }
   0x7   : > { %177 = sbr.rel (%p174_p3) target bundleno = 60 (0x3c), region = 32  ;;  %p210_p4 = scmp.lt.s32.totalorder (!%p174_p3), %s676_s16, 63  ;;  %v1030_v9 = vld [vmem:[%s1142_s2] ss:$0 sm:$0xff] (!%p174_p3) }
   0xe   : > { %s1149_s16 = smov (!%p210_p4, %s676_s16), 63 }
   0xf   : > { %s677_s17 = sshll.u32 %s1149_s16, 2 }
  0x10   : > { %s1016_s20 = scalar_lea.vmem %s1140_s0, %s677_s17  ;;  %s1055_s27 = scalar_lea.vmem %s1143_s3, %s677_s17 }
  0x11   : > { %v749_v1 = vld [vmem:[%s1016_s20] sm:$0xff]   ;;  %v892_v2 = vld [vmem:[%s1016_s20 + $0x8] sm:$0xff]   ;;  %v893_v3 = vld [vmem:[%s1016_s20 + $0x10] sm:$0xff]  }
  0x12   : > { %v750_v4 = vunpack.c.l.bf16 %v749_v1  ;;  %v751_v5 = vunpack.c.h.bf16 %v749_v1  ;;  %v754_v6 = vunpack.c.l.bf16 %v892_v2  ;;  %v755_v7 = vunpack.c.h.bf16 %v892_v2  ;;  %v894_v8 = vld [vmem:[%s1016_s20 + $0x18] sm:$0xff]   ;;  %v895_v30 = vld [vmem:[%s1016_s20 + $0x20] sm:$0xff]   ;;  %v896_v35 = vld [vmem:[%s1016_s20 + $0x28] sm:$0xff]  }
  0x13   : > { %v758_v10 = vunpack.c.l.bf16 %v893_v3  ;;  %v759_v11 = vunpack.c.h.bf16 %v893_v3  ;;  %v762_v12 = vunpack.c.l.bf16 %v894_v8  ;;  %v763_v13 = vunpack.c.h.bf16 %v894_v8  ;;  %v897_v40 = vld [vmem:[%s1016_s20 + $0x30] sm:$0xff]   ;;  %v898_v45 = vld [vmem:[%s1016_s20 + $0x38] sm:$0xff]   ;;  %v899_v3 = vld [vmem:[%s1016_s20 + $0x40] sm:$0xff]  }
  0x14   : > { %v304_v14 = vmul.f32 %v750_v4, %v1021_v0  ;;  %v305_v15 = vmul.f32 %v751_v5, %v1021_v0  ;;  %v306_v16 = vmul.f32 %v754_v6, %v1021_v0  ;;  %v307_v17 = vmul.f32 %v755_v7, %v1021_v0 }
  0x15   : > { %v308_v18 = vmul.f32 %v758_v10, %v1021_v0  ;;  %v309_v19 = vmul.f32 %v759_v11, %v1021_v0  ;;  %v310_v20 = vmul.f32 %v762_v12, %v1021_v0  ;;  %v311_v21 = vmul.f32 %v763_v13, %v1021_v0  ;;  %v900_v13 = vld [vmem:[%s1016_s20 + $0x48] sm:$0xff]  }
  0x16   : > { %v343_v22 = vadd.f32 %v1030_v9, %v304_v14  ;;  %v344_v23 = vadd.f32 %v1030_v9, %v305_v15  ;;  %v345_v24 = vadd.f32 %v1030_v9, %v306_v16  ;;  %v346_v25 = vadd.f32 %v1030_v9, %v307_v17 }
  0x17   : > { %v347_v26 = vadd.f32 %v1030_v9, %v308_v18  ;;  %v348_v27 = vadd.f32 %v1030_v9, %v309_v19  ;;  %v349_v28 = vadd.f32 %v1030_v9, %v310_v20  ;;  %v350_v29 = vadd.f32 %v1030_v9, %v311_v21  ;;  %v901_v18 = vld [vmem:[%s1016_s20 + $0x50] sm:$0xff]  }
  0x18   : > { %v375_v31 = vmax.f32 %v343_v22, 0.0  ;;  %v376_v32 = vmax.f32 %v344_v23, 0.0  ;;  %v377_v33 = vmax.f32 %v345_v24, 0.0  ;;  %v378_v34 = vmax.f32 %v346_v25, 0.0  ;;  %v902_v23 = vld [vmem:[%s1016_s20 + $0x58] sm:$0xff]  }
  0x19   : > { %v379_v36 = vmax.f32 %v347_v26, 0.0  ;;  %v380_v37 = vmax.f32 %v348_v27, 0.0  ;;  %v381_v38 = vmax.f32 %v349_v28, 0.0  ;;  %v382_v39 = vmax.f32 %v350_v29, 0.0 }
  0x1a   : > { %v815_v41 = vpack.c.bf16 %v376_v32, %v375_v31  ;;  %v820_v42 = vpack.c.bf16 %v378_v34, %v377_v33  ;;  %v766_v43 = vunpack.c.l.bf16 %v895_v30  ;;  %v767_v44 = vunpack.c.h.bf16 %v895_v30 }
  0x1b   : > { %v825_v46 = vpack.c.bf16 %v380_v37, %v379_v36  ;;  %v830_v47 = vpack.c.bf16 %v382_v39, %v381_v38  ;;  %v770_v48 = vunpack.c.l.bf16 %v896_v35  ;;  %v771_v49 = vunpack.c.h.bf16 %v896_v35 }
  0x1c   : > { %816 = vst [vmem:[%s1055_s27] sm:$0xff] %v815_v41   ;;  %907 = vst [vmem:[%s1055_s27 + $0x8] sm:$0xff] %v820_v42   ;;  %v312_v50 = vmul.f32 %v766_v43, %v1021_v0  ;;  %v313_v51 = vmul.f32 %v767_v44, %v1021_v0  ;;  %v774_v52 = vunpack.c.l.bf16 %v897_v40  ;;  %v775_v53 = vunpack.c.h.bf16 %v897_v40  ;;  %v903_v40 = vld [vmem:[%s1016_s20 + $0x60] sm:$0xff]  }
  0x1d   : > { %908 = vst [vmem:[%s1055_s27 + $0x10] sm:$0xff] %v825_v46   ;;  %909 = vst [vmem:[%s1055_s27 + $0x18] sm:$0xff] %v830_v47   ;;  %v314_v54 = vmul.f32 %v770_v48, %v1021_v0  ;;  %v315_v55 = vmul.f32 %v771_v49, %v1021_v0  ;;  %v778_v56 = vunpack.c.l.bf16 %v898_v45  ;;  %v779_v57 = vunpack.c.h.bf16 %v898_v45 }
  0x1e   : > { %v351_v58 = vadd.f32 %v1030_v9, %v312_v50  ;;  %v352_v59 = vadd.f32 %v1030_v9, %v313_v51  ;;  %v316_v60 = vmul.f32 %v774_v52, %v1021_v0  ;;  %v317_v61 = vmul.f32 %v775_v53, %v1021_v0  ;;  %v904_v53 = vld [vmem:[%s1016_s20 + $0x68] sm:$0xff]  }
  0x1f   : > { %v353_v62 = vadd.f32 %v1030_v9, %v314_v54  ;;  %v354_v63 = vadd.f32 %v1030_v9, %v315_v55  ;;  %v318_v1 = vmul.f32 %v778_v56, %v1021_v0  ;;  %v319_v2 = vmul.f32 %v779_v57, %v1021_v0 }
  0x20   : > { %v383_v4 = vmax.f32 %v351_v58, 0.0  ;;  %v384_v5 = vmax.f32 %v352_v59, 0.0  ;;  %v355_v6 = vadd.f32 %v1030_v9, %v316_v60  ;;  %v356_v7 = vadd.f32 %v1030_v9, %v317_v61  ;;  %v905_v58 = vld [vmem:[%s1016_s20 + $0x70] sm:$0xff]  }
  0x21   : > { %v385_v8 = vmax.f32 %v353_v62, 0.0  ;;  %v386_v10 = vmax.f32 %v354_v63, 0.0  ;;  %v357_v11 = vadd.f32 %v1030_v9, %v318_v1  ;;  %v358_v12 = vadd.f32 %v1030_v9, %v319_v2  ;;  %v906_v63 = vld [vmem:[%s1016_s20 + $0x78] sm:$0xff]  }
  0x22   : > { %v835_v14 = vpack.c.bf16 %v384_v5, %v383_v4  ;;  %v387_v15 = vmax.f32 %v355_v6, 0.0  ;;  %v388_v16 = vmax.f32 %v356_v7, 0.0  ;;  %v782_v17 = vunpack.c.l.bf16 %v899_v3 }
  0x23   : > { %v840_v19 = vpack.c.bf16 %v386_v10, %v385_v8  ;;  %v389_v20 = vmax.f32 %v357_v11, 0.0  ;;  %v390_v21 = vmax.f32 %v358_v12, 0.0  ;;  %v783_v22 = vunpack.c.h.bf16 %v899_v3 }
  0x24   : > { %910 = vst [vmem:[%s1055_s27 + $0x20] sm:$0xff] %v835_v14   ;;  %v845_v24 = vpack.c.bf16 %v388_v16, %v387_v15  ;;  %v320_v25 = vmul.f32 %v782_v17, %v1021_v0  ;;  %v786_v26 = vunpack.c.l.bf16 %v900_v13  ;;  %v787_v27 = vunpack.c.h.bf16 %v900_v13 }
  0x25   : > { %911 = vst [vmem:[%s1055_s27 + $0x28] sm:$0xff] %v840_v19   ;;  %v850_v28 = vpack.c.bf16 %v390_v21, %v389_v20  ;;  %v321_v29 = vmul.f32 %v783_v22, %v1021_v0  ;;  %v790_v30 = vunpack.c.l.bf16 %v901_v18  ;;  %v791_v31 = vunpack.c.h.bf16 %v901_v18 }
  0x26   : > { %912 = vst [vmem:[%s1055_s27 + $0x30] sm:$0xff] %v845_v24   ;;  %v359_v32 = vadd.f32 %v1030_v9, %v320_v25  ;;  %v322_v33 = vmul.f32 %v786_v26, %v1021_v0  ;;  %v323_v34 = vmul.f32 %v787_v27, %v1021_v0  ;;  %v794_v35 = vunpack.c.l.bf16 %v902_v23 }
  0x27   : > { %913 = vst [vmem:[%s1055_s27 + $0x38] sm:$0xff] %v850_v28   ;;  %v360_v36 = vadd.f32 %v1030_v9, %v321_v29  ;;  %v324_v37 = vmul.f32 %v790_v30, %v1021_v0  ;;  %v325_v38 = vmul.f32 %v791_v31, %v1021_v0  ;;  %v795_v39 = vunpack.c.h.bf16 %v902_v23 }
  0x28   : > { %v391_v41 = vmax.f32 %v359_v32, 0.0  ;;  %v361_v42 = vadd.f32 %v1030_v9, %v322_v33  ;;  %v362_v43 = vadd.f32 %v1030_v9, %v323_v34  ;;  %v326_v44 = vmul.f32 %v794_v35, %v1021_v0 }
  0x29   : > { %v392_v45 = vmax.f32 %v360_v36, 0.0  ;;  %v363_v46 = vadd.f32 %v1030_v9, %v324_v37  ;;  %v364_v47 = vadd.f32 %v1030_v9, %v325_v38  ;;  %v327_v48 = vmul.f32 %v795_v39, %v1021_v0 }
  0x2a   : > { %v393_v49 = vmax.f32 %v361_v42, 0.0  ;;  %v394_v50 = vmax.f32 %v362_v43, 0.0  ;;  %v365_v51 = vadd.f32 %v1030_v9, %v326_v44  ;;  %v798_v52 = vunpack.c.l.bf16 %v903_v40 }
  0x2b   : > { %v855_v54 = vpack.c.bf16 %v392_v45, %v391_v41  ;;  %v395_v55 = vmax.f32 %v363_v46, 0.0  ;;  %v396_v56 = vmax.f32 %v364_v47, 0.0  ;;  %v366_v57 = vadd.f32 %v1030_v9, %v327_v48 }
  0x2c   : > { %v860_v59 = vpack.c.bf16 %v394_v50, %v393_v49  ;;  %v397_v60 = vmax.f32 %v365_v51, 0.0  ;;  %v799_v61 = vunpack.c.h.bf16 %v903_v40  ;;  %v328_v62 = vmul.f32 %v798_v52, %v1021_v0 }
  0x2d   : > { %914 = vst [vmem:[%s1055_s27 + $0x40] sm:$0xff] %v855_v54   ;;  %v865_v1 = vpack.c.bf16 %v396_v56, %v395_v55  ;;  %v398_v2 = vmax.f32 %v366_v57, 0.0  ;;  %v802_v3 = vunpack.c.l.bf16 %v904_v53  ;;  %v803_v4 = vunpack.c.h.bf16 %v904_v53 }
  0x2e   : > { %915 = vst [vmem:[%s1055_s27 + $0x48] sm:$0xff] %v860_v59   ;;  %v329_v5 = vmul.f32 %v799_v61, %v1021_v0  ;;  %v367_v6 = vadd.f32 %v1030_v9, %v328_v62  ;;  %v806_v7 = vunpack.c.l.bf16 %v905_v58  ;;  %v807_v8 = vunpack.c.h.bf16 %v905_v58 }
  0x2f   : > { %916 = vst [vmem:[%s1055_s27 + $0x50] sm:$0xff] %v865_v1   ;;  %v870_v10 = vpack.c.bf16 %v398_v2, %v397_v60  ;;  %v330_v11 = vmul.f32 %v802_v3, %v1021_v0  ;;  %v331_v12 = vmul.f32 %v803_v4, %v1021_v0  ;;  %v810_v13 = vunpack.c.l.bf16 %v906_v63 }
  0x30   : > { %v368_v14 = vadd.f32 %v1030_v9, %v329_v5  ;;  %v399_v15 = vmax.f32 %v367_v6, 0.0  ;;  %v332_v16 = vmul.f32 %v806_v7, %v1021_v0  ;;  %v333_v17 = vmul.f32 %v807_v8, %v1021_v0 }
  0x31   : > { %917 = vst [vmem:[%s1055_s27 + $0x58] sm:$0xff] %v870_v10   ;;  %v369_v18 = vadd.f32 %v1030_v9, %v330_v11  ;;  %v370_v19 = vadd.f32 %v1030_v9, %v331_v12  ;;  %v811_v20 = vunpack.c.h.bf16 %v906_v63  ;;  %v334_v21 = vmul.f32 %v810_v13, %v1021_v0 }
  0x32   : > { %v400_v22 = vmax.f32 %v368_v14, 0.0  ;;  %v371_v23 = vadd.f32 %v1030_v9, %v332_v16  ;;  %v372_v24 = vadd.f32 %v1030_v9, %v333_v17 }
  0x33   : > { %v401_v25 = vmax.f32 %v369_v18, 0.0  ;;  %v402_v26 = vmax.f32 %v370_v19, 0.0  ;;  %v335_v27 = vmul.f32 %v811_v20, %v1021_v0  ;;  %v373_v28 = vadd.f32 %v1030_v9, %v334_v21 }
  0x34   : > { %v875_v29 = vpack.c.bf16 %v400_v22, %v399_v15  ;;  %v403_v30 = vmax.f32 %v371_v23, 0.0  ;;  %v404_v31 = vmax.f32 %v372_v24, 0.0 }
  0x35   : > { %v880_v32 = vpack.c.bf16 %v402_v26, %v401_v25  ;;  %v374_v33 = vadd.f32 %v1030_v9, %v335_v27  ;;  %v405_v34 = vmax.f32 %v373_v28, 0.0 }
  0x36   : > { %918 = vst [vmem:[%s1055_s27 + $0x60] sm:$0xff] %v875_v29   ;;  %v885_v35 = vpack.c.bf16 %v404_v31, %v403_v30 }
  0x37   : > { %919 = vst [vmem:[%s1055_s27 + $0x68] sm:$0xff] %v880_v32   ;;  %v406_v36 = vmax.f32 %v374_v33, 0.0 }
  0x38   : > { %920 = vst [vmem:[%s1055_s27 + $0x70] sm:$0xff] %v885_v35  }
  0x39   : > { %v890_v37 = vpack.c.bf16 %v406_v36, %v405_v34 }
  0x3b   : > { %921 = vst [vmem:[%s1055_s27 + $0x78] sm:$0xff] %v890_v37  }
  0x3c PF: > { %s13_s14 = sadd.s32 1, %s968_s14   ;;  %s1144_s12 = smov %s964_s13 }
  0x3d   : > { %p10_p5 = scmp.ge.s32.totalorder %s13_s14, 4   ;;  %s1145_s13 = smov %s1147_s15 }
  0x3f   :  { %12 = sbr.rel (!%p10_p5) target bundleno = 2 (0x2), region = 68 }

// kernel: generator_forward.13
= control target key start
LH: loop header
LB: loop body
LE: loop exit
PB: predicated region body
PF: predicated region fallthrough
CT: control target
= control target key end

     0   :  { %s2563_s15 = smov 0   ;;  %s2565_s16 = smov 0   ;;  %s2815_s0 = inlined_call_operand.vmem [shape: bf16[4,128,1024], index: 0, kind: input, shape index: {}]   ;;  %s2816_s1 = inlined_call_operand.vmem [shape: bf16[4,1024,128], index: 1, kind: input, shape index: {}]   ;;  %s2817_s2 = inlined_call_operand.vmem [shape: bf16[4,128,128], index: 2, kind: output, shape index: {0}]   ;;  %s2818_s3 = inlined_call_operand.vmem [shape: f32[4,1,128], index: 3, kind: output, shape index: {1}]   ;;  %s2819_s4 = inlined_call_operand.vmem [shape: f32[4,1,128], index: 4, kind: output, shape index: {2}]  }
   0x1   :  { %s2567_s17 = smov 0  }
   0x2 LB: > { %s34_s18 = sadd.s32 1, %s2531_s16  ;;  %p1949_p0 = scmp.ge.s32.totalorder %s2535_s17, 1  ;;  %s2535_s17 = sphi %s2567_s17, %s15_s17   ;;  %s2531_s16 = sphi %s2565_s16, %s2821_s16   ;;  %s2527_s15 = sphi %s2563_s15, %s2820_s15  }
   0x3   : > { %p36_p1 = scmp.ge.s32.totalorder %s34_s18, 4  ;;  %p217_p2 = scmp.lt.s32.totalorder %s2535_s17, 5 }
   0x5   : > { %s2823_s18 = smov (%p36_p1, %s34_s18), 0  ;;  %p218_p3 = pnand %p1949_p0, %p217_p2 }
   0x6   : > { %p276_p4 = scmp.lt.s32.totalorder (!%p218_p3), %s2527_s15, 3 }
   0x7   : > { %221 = sbr.rel (%p218_p3) target bundleno = 411 (0x19b), region = 28 }
   0xe   : > { %s2825_s15 = smov (!%p276_p4, %s2527_s15), 3 }
   0xf   : > { %s2102_s19 = sshll.u32 %s2825_s15, 9  ;;  %s2730_s28 = scalar_lea.vmem %s2818_s3, %s2825_s15 }
  0x10   : > { %s2589_s22 = scalar_lea.vmem %s2816_s1, %s2102_s19  ;;  %s2626_s25 = scalar_lea.vmem %s2815_s0, %s2102_s19 }
  0x11   : > { %v2449_v0 = vld [vmem:[%s2589_s22 + $0x40] sm:$0xff]   ;;  %v2453_v4 = vld [vmem:[%s2589_s22 + $0x48] sm:$0xff]   ;;  %v2457_v8 = vld [vmem:[%s2589_s22 + $0x50] sm:$0xff]   ;;  %s2736_s5 = scalar_lea.vmem %s2819_s4, %s2825_s15  ;;  %s2104_s6 = sshll.u32 %s2825_s15, 6 }
  0x12   : > { %v2450_v1 = vld [vmem:[%s2589_s22 + $0xc0] sm:$0xff]   ;;  %2168 = vmatprep.subr.bf16.mxu0 %v2449_v0  ;;  %v2454_v5 = vld [vmem:[%s2589_s22 + $0xc8] sm:$0xff]   ;;  %v2458_v9 = vld [vmem:[%s2589_s22 + $0xd0] sm:$0xff]   ;;  %s2778_s9 = scalar_lea.vmem %s2817_s2, %s2104_s6 }
  0x13   : > { %v2451_v2 = vld [vmem:[%s2589_s22] sm:$0xff]   ;;  %2232 = vmatprep.subr.bf16.mxu1 %v2450_v1  ;;  %v2455_v6 = vld [vmem:[%s2589_s22 + $0x8] sm:$0xff]   ;;  %v2459_v10 = vld [vmem:[%s2589_s22 + $0x10] sm:$0xff]  }
  0x14   : > { %v2452_v3 = vld [vmem:[%s2589_s22 + $0x80] sm:$0xff]   ;;  %2169 = vmatpush3.bf16.msra.mxu0 %v2451_v2  ;;  %v2456_v7 = vld [vmem:[%s2589_s22 + $0x88] sm:$0xff]   ;;  %v2460_v11 = vld [vmem:[%s2589_s22 + $0x90] sm:$0xff]  }
  0x15   : > { %2233 = vmatpush3.bf16.msra.mxu1 %v2452_v3  ;;  %2170 = vmatprep.subr.bf16.mxu0 %v2453_v4  ;;  %v2461_v12 = vld [vmem:[%s2589_s22 + $0x58] sm:$0xff]   ;;  %v2465_v16 = vld [vmem:[%s2589_s22 + $0x60] sm:$0xff]   ;;  %v2469_v20 = vld [vmem:[%s2589_s22 + $0x68] sm:$0xff]  }
  0x16   : > { %2234 = vmatprep.subr.bf16.mxu1 %v2454_v5  ;;  %v2462_v13 = vld [vmem:[%s2589_s22 + $0xd8] sm:$0xff]   ;;  %v2466_v17 = vld [vmem:[%s2589_s22 + $0xe0] sm:$0xff]   ;;  %v2470_v21 = vld [vmem:[%s2589_s22 + $0xe8] sm:$0xff]  }
  0x17   : > { %v2463_v14 = vld [vmem:[%s2589_s22 + $0x18] sm:$0xff]   ;;  %v2467_v18 = vld [vmem:[%s2589_s22 + $0x20] sm:$0xff]   ;;  %v2471_v22 = vld [vmem:[%s2589_s22 + $0x28] sm:$0xff]  }
  0x18   : > { %2171 = vmatpush3.bf16.msra.mxu0 %v2455_v6  ;;  %v2464_v15 = vld [vmem:[%s2589_s22 + $0x98] sm:$0xff]   ;;  %v2468_v19 = vld [vmem:[%s2589_s22 + $0xa0] sm:$0xff]   ;;  %v2472_v23 = vld [vmem:[%s2589_s22 + $0xa8] sm:$0xff]  }
  0x19   : > { %2235 = vmatpush3.bf16.msra.mxu1 %v2456_v7  ;;  %2172 = vmatprep.subr.bf16.mxu0 %v2457_v8  ;;  %v2473_v24 = vld [vmem:[%s2589_s22 + $0x70] sm:$0xff]   ;;  %v2477_v28 = vld [vmem:[%s2589_s22 + $0x78] sm:$0xff]   ;;  %v326_v32 = vld [vmem:[%s2626_s25] sm:$0xff] }
  0x1a   : > { %2236 = vmatprep.subr.bf16.mxu1 %v2458_v9  ;;  %v2474_v25 = vld [vmem:[%s2589_s22 + $0xf0] sm:$0xff]   ;;  %v2478_v29 = vld [vmem:[%s2589_s22 + $0xf8] sm:$0xff]   ;;  %v330_v33 = vld [vmem:[%s2626_s25 + $0x20] sm:$0xff] }
  0x1b   : > { %v2475_v26 = vld [vmem:[%s2589_s22 + $0x30] sm:$0xff]   ;;  %v2479_v30 = vld [vmem:[%s2589_s22 + $0x38] sm:$0xff]   ;;  %v327_v34 = vld [vmem:[%s2626_s25 + $0x8] sm:$0xff]  ;;  %v1956_v35 = vcombine.low %v326_v32, %v330_v33  ;;  %v1957_v36 = vcombine.high %v326_v32, %v330_v33 }
  0x1c   : > { %2173 = vmatpush3.bf16.msra.mxu0 %v2459_v10  ;;  %v2476_v27 = vld [vmem:[%s2589_s22 + $0xb0] sm:$0xff]   ;;  %v2480_v31 = vld [vmem:[%s2589_s22 + $0xb8] sm:$0xff]   ;;  %v331_v37 = vld [vmem:[%s2626_s25 + $0x28] sm:$0xff] }
  0x1d   : > { %2237 = vmatpush3.bf16.msra.mxu1 %v2460_v11  ;;  %2174 = vmatprep.subr.bf16.mxu0 %v2461_v12  ;;  %v1958_v38 = vcombine.low %v327_v34, %v331_v37  ;;  %v1959_v39 = vcombine.high %v327_v34, %v331_v37  ;;  %v2481_v40 = vld [vmem:[%s2589_s22 + $0x140] sm:$0xff]   ;;  %v335_v47 = vld [vmem:[%s2626_s25 + $0x48] sm:$0xff]  ;;  %v2489_v62 = vld [vmem:[%s2589_s22 + $0x150] sm:$0xff]  }
  0x1e   : > { %2238 = vmatprep.subr.bf16.mxu1 %v2462_v13  ;;  %1254 = vmatprep.mubr.bf16.mxu0 %v1957_v36  ;;  %v2482_v41 = vld [vmem:[%s2589_s22 + $0x100] sm:$0xff]   ;;  %v339_v48 = vld [vmem:[%s2626_s25 + $0x68] sm:$0xff]  ;;  %v2490_v63 = vld [vmem:[%s2589_s22 + $0x110] sm:$0xff]  }
  0x1f   : > { %1351 = vmatprep.mubr.bf16.mxu1 %v1959_v39  ;;  %v2483_v42 = vld [vmem:[%s2589_s22 + $0x1c0] sm:$0xff]   ;;  %v1967_v49 = vcombine.high %v335_v47, %v339_v48  ;;  %v2485_v50 = vld [vmem:[%s2589_s22 + $0x148] sm:$0xff]   ;;  %v1966_v53 = vcombine.low %v335_v47, %v339_v48  ;;  %v2491_v0 = vld [vmem:[%s2589_s22 + $0x1d0] sm:$0xff]  }
  0x20   : > { %2175 = vmatpush3.bf16.msra.mxu0 %v2463_v14  ;;  %v2484_v43 = vld [vmem:[%s2589_s22 + $0x180] sm:$0xff]   ;;  %v2486_v52 = vld [vmem:[%s2589_s22 + $0x108] sm:$0xff]   ;;  %v2492_v1 = vld [vmem:[%s2589_s22 + $0x190] sm:$0xff]  }
  0x21   : > { %2239 = vmatpush3.bf16.msra.mxu1 %v2464_v15  ;;  %2176 = vmatprep.subr.bf16.mxu0 %v2465_v16  ;;  %v334_v44 = vld [vmem:[%s2626_s25 + $0x40] sm:$0xff]  ;;  %v2487_v54 = vld [vmem:[%s2589_s22 + $0x1c8] sm:$0xff]   ;;  %v2493_v10 = vld [vmem:[%s2589_s22 + $0x158] sm:$0xff]  }
  0x22   : > { %2240 = vmatprep.subr.bf16.mxu1 %v2466_v17  ;;  %v338_v45 = vld [vmem:[%s2626_s25 + $0x60] sm:$0xff]  ;;  %v2488_v55 = vld [vmem:[%s2589_s22 + $0x188] sm:$0xff]   ;;  %v2494_v11 = vld [vmem:[%s2589_s22 + $0x118] sm:$0xff]  }
  0x23   : > { %v1965_v46 = vcombine.high %v334_v44, %v338_v45  ;;  %v1964_v51 = vcombine.low %v334_v44, %v338_v45  ;;  %v342_v56 = vld [vmem:[%s2626_s25 + $0x80] sm:$0xff]  ;;  %v343_v58 = vld [vmem:[%s2626_s25 + $0x88] sm:$0xff]  ;;  %v2495_v12 = vld [vmem:[%s2589_s22 + $0x1d8] sm:$0xff]  }
  0x24   : > { %2177 = vmatpush3.bf16.msra.mxu0 %v2467_v18  ;;  %v346_v57 = vld [vmem:[%s2626_s25 + $0xa0] sm:$0xff]  ;;  %v347_v59 = vld [vmem:[%s2626_s25 + $0xa8] sm:$0xff]  ;;  %v2496_v13 = vld [vmem:[%s2589_s22 + $0x198] sm:$0xff]  }
  0x25   : > { %2241 = vmatpush3.bf16.msra.mxu1 %v2468_v19  ;;  %2178 = vmatprep.subr.bf16.mxu0 %v2469_v20  ;;  %v1973_v60 = vcombine.high %v342_v56, %v346_v57  ;;  %v1975_v61 = vcombine.high %v343_v58, %v347_v59  ;;  %v1972_v2 = vcombine.low %v342_v56, %v346_v57  ;;  %v350_v3 = vld [vmem:[%s2626_s25 + $0xc0] sm:$0xff]  ;;  %v351_v5 = vld [vmem:[%s2626_s25 + $0xc8] sm:$0xff]  ;;  %v2506_v39 = vld [vmem:[%s2589_s22 + $0x130] sm:$0xff]  }
  0x26   : > { %2242 = vmatprep.subr.bf16.mxu1 %v2470_v21  ;;  %v354_v4 = vld [vmem:[%s2626_s25 + $0xe0] sm:$0xff]  ;;  %v1974_v6 = vcombine.low %v343_v58, %v347_v59  ;;  %v355_v8 = vld [vmem:[%s2626_s25 + $0xe8] sm:$0xff]  ;;  %v2510_v48 = vld [vmem:[%s2589_s22 + $0x138] sm:$0xff]  }
  0x27   : > { %v1981_v7 = vcombine.high %v350_v3, %v354_v4  ;;  %v1983_v9 = vcombine.high %v351_v5, %v355_v8  ;;  %v358_v14 = vld [vmem:[%s2626_s25 + $0x100] sm:$0xff]  ;;  %v359_v16 = vld [vmem:[%s2626_s25 + $0x108] sm:$0xff]  ;;  %v1980_v19 = vcombine.low %v350_v3, %v354_v4  ;;  %v1982_v21 = vcombine.low %v351_v5, %v355_v8  ;;  %v337_v8 = vld [vmem:[%s2626_s25 + $0x58] sm:$0xff] }
  0x28   : > { %2179 = vmatpush3.bf16.msra.mxu0 %v2471_v22  ;;  %v362_v15 = vld [vmem:[%s2626_s25 + $0x120] sm:$0xff]  ;;  %v363_v17 = vld [vmem:[%s2626_s25 + $0x128] sm:$0xff] }
  0x29   : > { %2243 = vmatpush3.bf16.msra.mxu1 %v2472_v23  ;;  %2180 = vmatprep.subr.bf16.mxu0 %v2473_v24  ;;  %v2497_v18 = vld [vmem:[%s2589_s22 + $0x160] sm:$0xff]   ;;  %v1989_v22 = vcombine.high %v358_v14, %v362_v15  ;;  %v1991_v24 = vcombine.high %v359_v16, %v363_v17  ;;  %v2503_v32 = vld [vmem:[%s2589_s22 + $0x1e8] sm:$0xff]   ;;  %v1988_v34 = vcombine.low %v358_v14, %v362_v15  ;;  %v344_v14 = vld [vmem:[%s2626_s25 + $0x90] sm:$0xff] }
  0x2a   : > { %2244 = vmatprep.subr.bf16.mxu1 %v2474_v25  ;;  %v2498_v20 = vld [vmem:[%s2589_s22 + $0x120] sm:$0xff]   ;;  %v2504_v33 = vld [vmem:[%s2589_s22 + $0x1a8] sm:$0xff]   ;;  %v348_v15 = vld [vmem:[%s2626_s25 + $0xb0] sm:$0xff] }
  0x2b   : > { %v2499_v23 = vld [vmem:[%s2589_s22 + $0x1e0] sm:$0xff]   ;;  %v375_v44 = vld [vmem:[%s2626_s25 + $0x188] sm:$0xff] }
  0x2c   : > { %2181 = vmatpush3.bf16.msra.mxu0 %v2475_v26  ;;  %v2500_v25 = vld [vmem:[%s2589_s22 + $0x1a0] sm:$0xff]   ;;  %v379_v45 = vld [vmem:[%s2626_s25 + $0x1a8] sm:$0xff] }
  0x2d   : > { %2245 = vmatpush3.bf16.msra.mxu1 %v2476_v27  ;;  %2182 = vmatprep.subr.bf16.mxu0 %v2477_v28  ;;  %v366_v26 = vld [vmem:[%s2626_s25 + $0x140] sm:$0xff]  ;;  %v2501_v28 = vld [vmem:[%s2589_s22 + $0x168] sm:$0xff]   ;;  %v2006_v59 = vcombine.low %v375_v44, %v379_v45 }
  0x2e   : > { %2246 = vmatprep.subr.bf16.mxu1 %v2478_v29  ;;  %v370_v27 = vld [vmem:[%s2626_s25 + $0x160] sm:$0xff]  ;;  %v367_v29 = vld [vmem:[%s2626_s25 + $0x148] sm:$0xff] }
  0x2f   : > { %v1997_v36 = vcombine.high %v366_v26, %v370_v27  ;;  %v1996_v47 = vcombine.low %v366_v26, %v370_v27  ;;  %v383_v56 = vld [vmem:[%s2626_s25 + $0x1c8] sm:$0xff]  ;;  %v1976_v26 = vcombine.low %v344_v14, %v348_v15 }
  0x30   : > { %2183 = vmatpush3.bf16.msra.mxu0 %v2479_v30  ;;  %v371_v30 = vld [vmem:[%s2626_s25 + $0x168] sm:$0xff] }
  0x31   : > { %2247 = vmatpush3.bf16.msra.mxu1 %v2480_v31  ;;  %2296 = vmatprep.subr.bf16.mxu0 %v2481_v40  ;;  %v2502_v31 = vld [vmem:[%s2589_s22 + $0x128] sm:$0xff]   ;;  %v1999_v37 = vcombine.high %v367_v29, %v371_v30  ;;  %v2507_v40 = vld [vmem:[%s2589_s22 + $0x1f0] sm:$0xff]  }
  0x32   : > { %2360 = vmatprep.subr.bf16.mxu1 %v2483_v42  ;;  %v378_v42 = vld [vmem:[%s2626_s25 + $0x1a0] sm:$0xff]  ;;  %v387_v57 = vld [vmem:[%s2626_s25 + $0x1e8] sm:$0xff] }
  0x33   : > { %1255 = vmatmul.mubr.bf16.vlgmr.msra.gmra.mrb[0].mxu0 %v1956_v35  ;;  %v1990_v35 = vcombine.low %v359_v16, %v363_v17  ;;  %v2014_v3 = vcombine.low %v383_v56, %v387_v57  ;;  %v345_v16 = vld [vmem:[%s2626_s25 + $0x98] sm:$0xff] }
  0x34   : > { %1352 = vmatmul.mubr.bf16.vlgmr.msra.gmra.mrb[0].mxu1 %v1958_v38  ;;  %2297 = vmatpush3.bf16.msra.mxu0 %v2482_v41  ;;  %v2505_v38 = vld [vmem:[%s2589_s22 + $0x170] sm:$0xff]   ;;  %v374_v41 = vld [vmem:[%s2626_s25 + $0x180] sm:$0xff]  ;;  %v349_v17 = vld [vmem:[%s2626_s25 + $0xb8] sm:$0xff] }
  0x35   : > { %2361 = vmatpush3.bf16.msra.mxu1 %v2484_v43  ;;  %1262 = vmatprep.mubr.bf16.mxu0 %v1965_v46  ;;  %v2508_v43 = vld [vmem:[%s2589_s22 + $0x1b0] sm:$0xff]   ;;  %v2509_v46 = vld [vmem:[%s2589_s22 + $0x178] sm:$0xff]   ;;  %v2004_v58 = vcombine.low %v374_v41, %v378_v42  ;;  %v1978_v27 = vcombine.low %v345_v16, %v349_v17 }
  0x36   : > { %1359 = vmatprep.mubr.bf16.mxu1 %v1967_v49  ;;  %2298 = vmatprep.subr.bf16.mxu0 %v2485_v50  ;;  %v1998_v49 = vcombine.low %v367_v29, %v371_v30  ;;  %v2005_v50 = vcombine.high %v374_v41, %v378_v42  ;;  %v360_v30 = vld [vmem:[%s2626_s25 + $0x110] sm:$0xff]  ;;  %v373_v41 = vld [vmem:[%s2626_s25 + $0x178] sm:$0xff] }
  0x37   : > { %2362 = vmatprep.subr.bf16.mxu1 %v2487_v54  ;;  %v382_v54 = vld [vmem:[%s2626_s25 + $0x1c0] sm:$0xff] }
  0x38   : > { %2299 = vmatpush3.bf16.msra.mxu0 %v2486_v52  ;;  %v2007_v52 = vcombine.high %v375_v44, %v379_v45 }
  0x39   : > { %2363 = vmatpush3.bf16.msra.mxu1 %v2488_v55  ;;  %2300 = vmatprep.subr.bf16.mxu0 %v2489_v62  ;;  %v386_v55 = vld [vmem:[%s2626_s25 + $0x1e0] sm:$0xff]  ;;  %v328_v62 = vld [vmem:[%s2626_s25 + $0x10] sm:$0xff] }
  0x3a   : > { %2364 = vmatprep.subr.bf16.mxu1 %v2491_v0  ;;  %v329_v0 = vld [vmem:[%s2626_s25 + $0x18] sm:$0xff] }
  0x3b   : > { %1263 = vmatmul.mubr.bf16.gmra.mrb[4].mxu0 %v1964_v51  ;;  %v2511_v51 = vld [vmem:[%s2589_s22 + $0x1f8] sm:$0xff]  }
  0x3c   : > { %1360 = vmatmul.mubr.bf16.gmra.mrb[4].mxu1 %v1966_v53  ;;  %1270 = vmatprep.mubr.bf16.mxu0 %v1973_v60  ;;  %v2512_v53 = vld [vmem:[%s2589_s22 + $0x1b8] sm:$0xff]   ;;  %v2013_v60 = vcombine.high %v382_v54, %v386_v55 }
  0x3d   : > { %1367 = vmatprep.mubr.bf16.mxu1 %v1975_v61  ;;  %2301 = vmatpush3.bf16.msra.mxu0 %v2490_v63  ;;  %v2015_v61 = vcombine.high %v383_v56, %v387_v57  ;;  %v332_v63 = vld [vmem:[%s2626_s25 + $0x30] sm:$0xff]  ;;  %v385_v56 = vld [vmem:[%s2626_s25 + $0x1d8] sm:$0xff] }
  0x3e   : > { %2365 = vmatpush3.bf16.msra.mxu1 %v2492_v1  ;;  %2302 = vmatprep.subr.bf16.mxu0 %v2493_v10  ;;  %v333_v1 = vld [vmem:[%s2626_s25 + $0x38] sm:$0xff]  ;;  %v1961_v4 = vcombine.high %v328_v62, %v332_v63  ;;  %v1960_v10 = vcombine.low %v328_v62, %v332_v63 }
  0x3f   : > { %2366 = vmatprep.subr.bf16.mxu1 %v2495_v12  ;;  %v1963_v5 = vcombine.high %v329_v0, %v333_v1  ;;  %v389_v57 = vld [vmem:[%s2626_s25 + $0x1f8] sm:$0xff] }
  0x40   : > { %v2018_v63 = vcombine.low %v385_v56, %v389_v57 }
  0x41   : > { %2303 = vmatpush3.bf16.msra.mxu0 %v2494_v11  ;;  %v1962_v11 = vcombine.low %v329_v0, %v333_v1 }
  0x42   : > { %2367 = vmatpush3.bf16.msra.mxu1 %v2496_v13  ;;  %2304 = vmatprep.subr.bf16.mxu0 %v2497_v18 }
  0x43   : > { %1271 = vmatmul.mubr.bf16.gmra.mrb[8].mxu0 %v1972_v2  ;;  %2368 = vmatprep.subr.bf16.mxu1 %v2499_v23  ;;  %v2012_v2 = vcombine.low %v382_v54, %v386_v55  ;;  %v356_v23 = vld [vmem:[%s2626_s25 + $0xf0] sm:$0xff] }
  0x44   : > { %1368 = vmatmul.mubr.bf16.gmra.mrb[8].mxu1 %v1974_v6  ;;  %1278 = vmatprep.mubr.bf16.mxu0 %v1981_v7  ;;  %v336_v6 = vld [vmem:[%s2626_s25 + $0x50] sm:$0xff] }
  0x45   : > { %1375 = vmatprep.mubr.bf16.mxu1 %v1983_v9  ;;  %2305 = vmatpush3.bf16.msra.mxu0 %v2498_v20  ;;  %v340_v7 = vld [vmem:[%s2626_s25 + $0x70] sm:$0xff]  ;;  %v341_v9 = vld [vmem:[%s2626_s25 + $0x78] sm:$0xff]  ;;  %v1977_v20 = vcombine.high %v344_v14, %v348_v15 }
  0x46   : > { %2369 = vmatpush3.bf16.msra.mxu1 %v2500_v25  ;;  %2306 = vmatprep.subr.bf16.mxu0 %v2501_v28  ;;  %v1969_v12 = vcombine.high %v336_v6, %v340_v7  ;;  %v1971_v13 = vcombine.high %v337_v8, %v341_v9  ;;  %v1968_v18 = vcombine.low %v336_v6, %v340_v7  ;;  %v357_v25 = vld [vmem:[%s2626_s25 + $0xf8] sm:$0xff]  ;;  %v384_v54 = vld [vmem:[%s2626_s25 + $0x1d0] sm:$0xff] }
  0x47   : > { %2370 = vmatprep.subr.bf16.mxu1 %v2503_v32  ;;  %v361_v32 = vld [vmem:[%s2626_s25 + $0x118] sm:$0xff]  ;;  %v388_v55 = vld [vmem:[%s2626_s25 + $0x1f0] sm:$0xff] }
  0x48   : > { %v2016_v62 = vcombine.low %v384_v54, %v388_v55 }
  0x49   : > { %2307 = vmatpush3.bf16.msra.mxu0 %v2502_v31  ;;  %v364_v31 = vld [vmem:[%s2626_s25 + $0x130] sm:$0xff] }
  0x4a   : > { %2371 = vmatpush3.bf16.msra.mxu1 %v2504_v33  ;;  %2308 = vmatprep.subr.bf16.mxu0 %v2505_v38  ;;  %v365_v33 = vld [vmem:[%s2626_s25 + $0x138] sm:$0xff]  ;;  %v368_v38 = vld [vmem:[%s2626_s25 + $0x150] sm:$0xff]  ;;  %v1992_v42 = vcombine.low %v360_v30, %v364_v31 }
  0x4b   : > { %1279 = vmatmul.mubr.bf16.gmra.mrb[12].mxu0 %v1980_v19  ;;  %2372 = vmatprep.subr.bf16.mxu1 %v2507_v40  ;;  %v1970_v19 = vcombine.low %v337_v8, %v341_v9  ;;  %v369_v40 = vld [vmem:[%s2626_s25 + $0x158] sm:$0xff]  ;;  %v2537_v9 = vmov 0.0  }
  0x4c   : > { %1376 = vmatmul.mubr.bf16.gmra.mrb[12].mxu1 %v1982_v21  ;;  %1286 = vmatprep.mubr.bf16.mxu0 %v1989_v22  ;;  %v1979_v21 = vcombine.high %v345_v16, %v349_v17  ;;  %v352_v22 = vld [vmem:[%s2626_s25 + $0xd0] sm:$0xff]  ;;  %v2003_v45 = vcombine.high %v369_v40, %v373_v41  ;;  %324 = vst [vmem:[%s2730_s28] sm:$0x1] %v2537_v9  ;;  %325 = vst [vmem:[%s2736_s5] sm:$0x1] %v2537_v9 }
  0x4d   : > { %1383 = vmatprep.mubr.bf16.mxu1 %v1991_v24  ;;  %2309 = vmatpush3.bf16.msra.mxu0 %v2506_v39  ;;  %v353_v24 = vld [vmem:[%s2626_s25 + $0xd8] sm:$0xff]  ;;  %v1985_v28 = vcombine.high %v352_v22, %v356_v23  ;;  %v372_v39 = vld [vmem:[%s2626_s25 + $0x170] sm:$0xff] }
  0x4e   : > { %2373 = vmatpush3.bf16.msra.mxu1 %v2508_v43  ;;  %2310 = vmatprep.subr.bf16.mxu0 %v2509_v46  ;;  %v1987_v29 = vcombine.high %v353_v24, %v357_v25  ;;  %v1994_v43 = vcombine.low %v361_v32, %v365_v33  ;;  %v2001_v44 = vcombine.high %v368_v38, %v372_v39  ;;  %v376_v46 = vld [vmem:[%s2626_s25 + $0x190] sm:$0xff] }
  0x4f   : > { %2374 = vmatprep.subr.bf16.mxu1 %v2511_v51  ;;  %v2002_v51 = vcombine.low %v369_v40, %v373_v41 }
  0x51   : > { %2311 = vmatpush3.bf16.msra.mxu0 %v2510_v48  ;;  %v377_v48 = vld [vmem:[%s2626_s25 + $0x198] sm:$0xff] }
  0x52   : > { %2375 = vmatpush3.bf16.msra.mxu1 %v2512_v53 }
  0x53   : > { %1287 = vmatmul.mubr.bf16.gmra.mrb[16].mxu0 %v1988_v34  ;;  %v1984_v34 = vcombine.low %v352_v22, %v356_v23 }
  0x54   : > { %1384 = vmatmul.mubr.bf16.gmra.mrb[16].mxu1 %v1990_v35  ;;  %1294 = vmatprep.mubr.bf16.mxu0 %v1997_v36  ;;  %v1986_v35 = vcombine.low %v353_v24, %v357_v25  ;;  %v1993_v36 = vcombine.high %v360_v30, %v364_v31 }
  0x55   : > { %1391 = vmatprep.mubr.bf16.mxu1 %v1999_v37  ;;  %v1995_v37 = vcombine.high %v361_v32, %v365_v33 }
  0x5b   : > { %1295 = vmatmul.mubr.bf16.gmra.mrb[20].mxu0 %v1996_v47  ;;  %v380_v47 = vld [vmem:[%s2626_s25 + $0x1b0] sm:$0xff] }
  0x5c   : > { %1392 = vmatmul.mubr.bf16.gmra.mrb[20].mxu1 %v1998_v49  ;;  %1302 = vmatprep.mubr.bf16.mxu0 %v2005_v50  ;;  %v381_v49 = vld [vmem:[%s2626_s25 + $0x1b8] sm:$0xff]  ;;  %v2000_v50 = vcombine.low %v368_v38, %v372_v39 }
  0x5d   : > { %1399 = vmatprep.mubr.bf16.mxu1 %v2007_v52  ;;  %v2009_v52 = vcombine.high %v376_v46, %v380_v47  ;;  %v2011_v53 = vcombine.high %v377_v48, %v381_v49 }
  0x63   : > { %1303 = vmatmul.mubr.bf16.gmra.mrb[24].mxu0 %v2004_v58  ;;  %v2008_v58 = vcombine.low %v376_v46, %v380_v47 }
  0x64   : > { %1400 = vmatmul.mubr.bf16.gmra.mrb[24].mxu1 %v2006_v59  ;;  %1310 = vmatprep.mubr.bf16.mxu0 %v2013_v60  ;;  %v2010_v59 = vcombine.low %v377_v48, %v381_v49  ;;  %v2017_v60 = vcombine.high %v384_v54, %v388_v55 }
  0x65   : > { %1407 = vmatprep.mubr.bf16.mxu1 %v2015_v61  ;;  %v2019_v61 = vcombine.high %v385_v56, %v389_v57 }
  0x6b   : > { %1311 = vmatmul.mubr.bf16.gmra.mrb[28].mxu0 %v2012_v2 }
  0x6c   : > { %1408 = vmatmul.mubr.bf16.gmra.mrb[28].mxu1 %v2014_v3  ;;  %1448 = vmatprep.mubr.bf16.mxu0 %v1961_v4 }
  0x6d   : > { %1545 = vmatprep.mubr.bf16.mxu1 %v1963_v5 }
  0x73   : > { %1449 = vmatmul.mubr.bf16.vlgmr.msra.gmra.mrb[32].mxu0 %v1960_v10 }
  0x74   : > { %1546 = vmatmul.mubr.bf16.vlgmr.msra.gmra.mrb[32].mxu1 %v1962_v11  ;;  %1456 = vmatprep.mubr.bf16.mxu0 %v1969_v12 }
  0x75   : > { %1553 = vmatprep.mubr.bf16.mxu1 %v1971_v13 }
  0x7b   : > { %1457 = vmatmul.mubr.bf16.gmra.mrb[36].mxu0 %v1968_v18 }
  0x7c   : > { %1554 = vmatmul.mubr.bf16.gmra.mrb[36].mxu1 %v1970_v19  ;;  %1464 = vmatprep.mubr.bf16.mxu0 %v1977_v20 }
  0x7d   : > { %1561 = vmatprep.mubr.bf16.mxu1 %v1979_v21 }
  0x83   : > { %1465 = vmatmul.mubr.bf16.gmra.mrb[40].mxu0 %v1976_v26 }
  0x84   : > { %1562 = vmatmul.mubr.bf16.gmra.mrb[40].mxu1 %v1978_v27  ;;  %1472 = vmatprep.mubr.bf16.mxu0 %v1985_v28 }
  0x85   : > { %1569 = vmatprep.mubr.bf16.mxu1 %v1987_v29 }
  0x8b   : > { %1473 = vmatmul.mubr.bf16.gmra.mrb[44].mxu0 %v1984_v34 }
  0x8c   : > { %1570 = vmatmul.mubr.bf16.gmra.mrb[44].mxu1 %v1986_v35  ;;  %1480 = vmatprep.mubr.bf16.mxu0 %v1993_v36 }
  0x8d   : > { %1577 = vmatprep.mubr.bf16.mxu1 %v1995_v37 }
  0x93   : > { %1481 = vmatmul.mubr.bf16.gmra.mrb[48].mxu0 %v1992_v42 }
  0x94   : > { %1578 = vmatmul.mubr.bf16.gmra.mrb[48].mxu1 %v1994_v43  ;;  %1488 = vmatprep.mubr.bf16.mxu0 %v2001_v44 }
  0x95   : > { %1585 = vmatprep.mubr.bf16.mxu1 %v2003_v45 }
  0x9b   : > { %1489 = vmatmul.mubr.bf16.gmra.mrb[52].mxu0 %v2000_v50 }
  0x9c   : > { %1586 = vmatmul.mubr.bf16.gmra.mrb[52].mxu1 %v2002_v51  ;;  %1496 = vmatprep.mubr.bf16.mxu0 %v2009_v52 }
  0x9d   : > { %1593 = vmatprep.mubr.bf16.mxu1 %v2011_v53 }
  0xa3   : > { %1497 = vmatmul.mubr.bf16.gmra.mrb[56].mxu0 %v2008_v58 }
  0xa4   : > { %1594 = vmatmul.mubr.bf16.gmra.mrb[56].mxu1 %v2010_v59  ;;  %1504 = vmatprep.mubr.bf16.mxu0 %v2017_v60 }
  0xa5   : > { %1601 = vmatprep.mubr.bf16.mxu1 %v2019_v61 }
  0xab   : > { %1505 = vmatmul.mubr.bf16.gmra.mrb[60].mxu0 %v2016_v62 }
  0xac   : > { %1602 = vmatmul.mubr.bf16.gmra.mrb[60].mxu1 %v2018_v63 }
 0x106   : > { %v2184_v0 = vpop.f32.mrb[0].mxu0 }
 0x107   : > { %v2248_v1 = vpop.f32.mrb[0].mxu1  ;;  %v2185_v2 = vpop.f32.mrb[1].mxu0 }
 0x108   : > { %v2186_v3 = vadd.f32 %v2185_v2, %v2184_v0  ;;  %v2249_v4 = vpop.f32.mrb[1].mxu1  ;;  %v2187_v5 = vpop.f32.mrb[2].mxu0 }
 0x109   : > { %v2250_v6 = vadd.f32 %v2249_v4, %v2248_v1  ;;  %v2251_v7 = vpop.f32.mrb[2].mxu1  ;;  %v2188_v8 = vpop.f32.mrb[3].mxu0 }
 0x10a   : > { %v2189_v10 = vadd.f32 %v2188_v8, %v2187_v5  ;;  %v2252_v11 = vpop.f32.mrb[3].mxu1 }
 0x10b   : > { %v2740_v12 = vadd.f32 %v2250_v6, %v2186_v3  ;;  %v2253_v13 = vadd.f32 %v2252_v11, %v2251_v7 }
 0x10d   : > { %v2742_v14 = vadd.f32 %v2253_v13, %v2189_v10 }
 0x10e   : > { %v2190_v15 = vpop.f32.mrb[4].mxu0 }
 0x10f   : > { %v2254_v16 = vpop.f32.mrb[4].mxu1  ;;  %v2191_v17 = vpop.f32.mrb[5].mxu0 }
 0x110   : > { %v2192_v18 = vadd.f32 %v2191_v17, %v2190_v15  ;;  %v2255_v19 = vpop.f32.mrb[5].mxu1  ;;  %v2193_v20 = vpop.f32.mrb[6].mxu0 }
 0x111   : > { %v2256_v21 = vadd.f32 %v2255_v19, %v2254_v16  ;;  %v2257_v22 = vpop.f32.mrb[6].mxu1  ;;  %v2194_v23 = vpop.f32.mrb[7].mxu0 }
 0x112   : > { %v2195_v24 = vadd.f32 %v2194_v23, %v2193_v20  ;;  %v2258_v25 = vpop.f32.mrb[7].mxu1 }
 0x113   : > { %v2744_v26 = vadd.f32 %v2256_v21, %v2192_v18  ;;  %v2259_v27 = vadd.f32 %v2258_v25, %v2257_v22 }
 0x115   : > { %v2746_v28 = vadd.f32 %v2259_v27, %v2195_v24 }
 0x116   : > { %v2196_v29 = vpop.f32.mrb[8].mxu0 }
 0x117   : > { %v2260_v30 = vpop.f32.mrb[8].mxu1  ;;  %v2197_v31 = vpop.f32.mrb[9].mxu0 }
 0x118   : > { %v2198_v32 = vadd.f32 %v2197_v31, %v2196_v29  ;;  %v2261_v33 = vpop.f32.mrb[9].mxu1  ;;  %v2199_v34 = vpop.f32.mrb[10].mxu0 }
 0x119   : > { %v2262_v35 = vadd.f32 %v2261_v33, %v2260_v30  ;;  %v2263_v36 = vpop.f32.mrb[10].mxu1  ;;  %v2200_v37 = vpop.f32.mrb[11].mxu0 }
 0x11a   : > { %v2201_v38 = vadd.f32 %v2200_v37, %v2199_v34  ;;  %v2264_v39 = vpop.f32.mrb[11].mxu1 }
 0x11b   : > { %v2748_v40 = vadd.f32 %v2262_v35, %v2198_v32  ;;  %v2265_v41 = vadd.f32 %v2264_v39, %v2263_v36 }
 0x11d   : > { %v2750_v42 = vadd.f32 %v2265_v41, %v2201_v38 }
 0x11e   : > { %v2202_v43 = vpop.f32.mrb[12].mxu0 }
 0x11f   : > { %v2266_v44 = vpop.f32.mrb[12].mxu1  ;;  %v2203_v45 = vpop.f32.mrb[13].mxu0 }
 0x120   : > { %v2204_v46 = vadd.f32 %v2203_v45, %v2202_v43  ;;  %v2267_v47 = vpop.f32.mrb[13].mxu1  ;;  %v2205_v48 = vpop.f32.mrb[14].mxu0 }
 0x121   : > { %v2268_v49 = vadd.f32 %v2267_v47, %v2266_v44  ;;  %v2269_v50 = vpop.f32.mrb[14].mxu1  ;;  %v2206_v51 = vpop.f32.mrb[15].mxu0 }
 0x122   : > { %v2207_v52 = vadd.f32 %v2206_v51, %v2205_v48  ;;  %v2270_v53 = vpop.f32.mrb[15].mxu1 }
 0x123   : > { %v2752_v54 = vadd.f32 %v2268_v49, %v2204_v46  ;;  %v2271_v55 = vadd.f32 %v2270_v53, %v2269_v50 }
 0x125   : > { %v2754_v56 = vadd.f32 %v2271_v55, %v2207_v52 }
 0x126   : > { %v2208_v57 = vpop.f32.mrb[16].mxu0 }
 0x127   : > { %v2272_v58 = vpop.f32.mrb[16].mxu1  ;;  %v2209_v59 = vpop.f32.mrb[17].mxu0 }
 0x128   : > { %v2210_v60 = vadd.f32 %v2209_v59, %v2208_v57  ;;  %v2273_v61 = vpop.f32.mrb[17].mxu1  ;;  %v2211_v62 = vpop.f32.mrb[18].mxu0 }
 0x129   : > { %v2274_v63 = vadd.f32 %v2273_v61, %v2272_v58  ;;  %v2275_v0 = vpop.f32.mrb[18].mxu1  ;;  %v2212_v1 = vpop.f32.mrb[19].mxu0 }
 0x12a   : > { %v2213_v2 = vadd.f32 %v2212_v1, %v2211_v62  ;;  %v2276_v3 = vpop.f32.mrb[19].mxu1 }
 0x12b   : > { %v2756_v4 = vadd.f32 %v2274_v63, %v2210_v60  ;;  %v2277_v5 = vadd.f32 %v2276_v3, %v2275_v0 }
 0x12d   : > { %v2758_v6 = vadd.f32 %v2277_v5, %v2213_v2 }
 0x12e   : > { %v2214_v7 = vpop.f32.mrb[20].mxu0 }
 0x12f   : > { %v2278_v8 = vpop.f32.mrb[20].mxu1  ;;  %v2215_v9 = vpop.f32.mrb[21].mxu0 }
 0x130   : > { %v2216_v10 = vadd.f32 %v2215_v9, %v2214_v7  ;;  %v2279_v11 = vpop.f32.mrb[21].mxu1  ;;  %v2217_v13 = vpop.f32.mrb[22].mxu0 }
 0x131   : > { %v2280_v15 = vadd.f32 %v2279_v11, %v2278_v8  ;;  %v2281_v16 = vpop.f32.mrb[22].mxu1  ;;  %v2218_v17 = vpop.f32.mrb[23].mxu0 }
 0x132   : > { %v2219_v18 = vadd.f32 %v2218_v17, %v2217_v13  ;;  %v2282_v19 = vpop.f32.mrb[23].mxu1 }
 0x133   : > { %v2760_v20 = vadd.f32 %v2280_v15, %v2216_v10  ;;  %v2283_v21 = vadd.f32 %v2282_v19, %v2281_v16 }
 0x135   : > { %v2762_v22 = vadd.f32 %v2283_v21, %v2219_v18 }
 0x136   : > { %v2220_v23 = vpop.f32.mrb[24].mxu0 }
 0x137   : > { %v2284_v24 = vpop.f32.mrb[24].mxu1  ;;  %v2221_v25 = vpop.f32.mrb[25].mxu0 }
 0x138   : > { %v2222_v27 = vadd.f32 %v2221_v25, %v2220_v23  ;;  %v2285_v29 = vpop.f32.mrb[25].mxu1  ;;  %v2223_v30 = vpop.f32.mrb[26].mxu0 }
 0x139   : > { %v2286_v31 = vadd.f32 %v2285_v29, %v2284_v24  ;;  %v2287_v32 = vpop.f32.mrb[26].mxu1  ;;  %v2224_v33 = vpop.f32.mrb[27].mxu0 }
 0x13a   : > { %v2225_v34 = vadd.f32 %v2224_v33, %v2223_v30  ;;  %v2288_v35 = vpop.f32.mrb[27].mxu1 }
 0x13b   : > { %v2764_v36 = vadd.f32 %v2286_v31, %v2222_v27  ;;  %v2289_v37 = vadd.f32 %v2288_v35, %v2287_v32 }
 0x13d   : > { %v2766_v38 = vadd.f32 %v2289_v37, %v2225_v34 }
 0x13e   : > { %v2226_v39 = vpop.f32.mrb[28].mxu0 }
 0x13f   : > { %v2290_v41 = vpop.f32.mrb[28].mxu1  ;;  %v2227_v43 = vpop.f32.mrb[29].mxu0 }
 0x140   : > { %v2228_v44 = vadd.f32 %v2227_v43, %v2226_v39  ;;  %v2291_v45 = vpop.f32.mrb[29].mxu1  ;;  %v2229_v46 = vpop.f32.mrb[30].mxu0 }
 0x141   : > { %v2292_v47 = vadd.f32 %v2291_v45, %v2290_v41  ;;  %v2293_v48 = vpop.f32.mrb[30].mxu1  ;;  %v2230_v49 = vpop.f32.mrb[31].mxu0 }
 0x142   : > { %v2231_v50 = vadd.f32 %v2230_v49, %v2229_v46  ;;  %v2294_v51 = vpop.f32.mrb[31].mxu1 }
 0x143   : > { %v2768_v52 = vadd.f32 %v2292_v47, %v2228_v44  ;;  %v2295_v53 = vadd.f32 %v2294_v51, %v2293_v48 }
 0x145   : > { %v2770_v55 = vadd.f32 %v2295_v53, %v2231_v50 }
 0x146   : > { %v2312_v57 = vpop.f32.mrb[32].mxu0 }
 0x147   : > { %v2376_v58 = vpop.f32.mrb[32].mxu1  ;;  %v2313_v59 = vpop.f32.mrb[33].mxu0 }
 0x148   : > { %v2314_v60 = vadd.f32 %v2313_v59, %v2312_v57  ;;  %v2377_v61 = vpop.f32.mrb[33].mxu1  ;;  %v2315_v62 = vpop.f32.mrb[34].mxu0 }
 0x149   : > { %v2378_v63 = vadd.f32 %v2377_v61, %v2376_v58  ;;  %v2379_v0 = vpop.f32.mrb[34].mxu1  ;;  %v2316_v1 = vpop.f32.mrb[35].mxu0 }
 0x14a   : > { %v1451_v2 = vadd.f32 %v2314_v60, %v2740_v12  ;;  %v2317_v3 = vadd.f32 %v2316_v1, %v2315_v62  ;;  %v2380_v5 = vpop.f32.mrb[35].mxu1 }
 0x14b   : > { %v2381_v7 = vadd.f32 %v2380_v5, %v2379_v0 }
 0x14c   : > { %v1548_v8 = vadd.f32 %v2378_v63, %v1451_v2  ;;  %v1454_v9 = vadd.f32 %v2317_v3, %v2742_v14 }
 0x14e   : > { %v1551_v10 = vadd.f32 %v2381_v7, %v1454_v9  ;;  %v2318_v11 = vpop.f32.mrb[36].mxu0  ;;  %v1715_v13 = vmul.f32 %v1548_v8, %v1548_v8 }
 0x14f   : > { %v2382_v15 = vpop.f32.mrb[36].mxu1  ;;  %v2319_v16 = vpop.f32.mrb[37].mxu0 }
 0x150   : > { %v2124_v17 = vpack.c.bf16 %v1551_v10, %v1548_v8  ;;  %v1691_v12 = vadd.f32 %v1551_v10, %v1548_v8  ;;  %v1716_v18 = vmul.f32 %v1551_v10, %v1551_v10  ;;  %v2320_v19 = vadd.f32 %v2319_v16, %v2318_v11  ;;  %v2383_v21 = vpop.f32.mrb[37].mxu1  ;;  %v2321_v23 = vpop.f32.mrb[38].mxu0 }
 0x151   : > { %v2384_v24 = vadd.f32 %v2383_v21, %v2382_v15  ;;  %v2385_v14 = vpop.f32.mrb[38].mxu1  ;;  %v2322_v25 = vpop.f32.mrb[39].mxu0 }
 0x152   : > { %2125 = vst [vmem:[%s2778_s9] sm:$0xff] %v2124_v17   ;;  %v1731_v27 = vadd.f32 %v1716_v18, %v1715_v13  ;;  %v1459_v29 = vadd.f32 %v2320_v19, %v2744_v26  ;;  %v2323_v30 = vadd.f32 %v2322_v25, %v2321_v23  ;;  %v2386_v31 = vpop.f32.mrb[39].mxu1 }
 0x153   : > { %v2387_v32 = vadd.f32 %v2386_v31, %v2385_v14 }
 0x154   : > { %v1556_v33 = vadd.f32 %v2384_v24, %v1459_v29  ;;  %v1462_v34 = vadd.f32 %v2323_v30, %v2746_v28 }
 0x156   : > { %v1692_v35 = vadd.f32 %v1691_v12, %v1556_v33  ;;  %v1717_v37 = vmul.f32 %v1556_v33, %v1556_v33  ;;  %v1559_v39 = vadd.f32 %v2387_v32, %v1462_v34  ;;  %v2324_v41 = vpop.f32.mrb[40].mxu0 }
 0x157   : > { %v2388_v43 = vpop.f32.mrb[40].mxu1  ;;  %v2325_v44 = vpop.f32.mrb[41].mxu0 }
 0x158   : > { %v1732_v45 = vadd.f32 %v1731_v27, %v1717_v37  ;;  %v2129_v46 = vpack.c.bf16 %v1559_v39, %v1556_v33  ;;  %v1693_v47 = vadd.f32 %v1692_v35, %v1559_v39  ;;  %v1718_v48 = vmul.f32 %v1559_v39, %v1559_v39  ;;  %v2389_v49 = vpop.f32.mrb[41].mxu1  ;;  %v2327_v50 = vpop.f32.mrb[42].mxu0 }
 0x159   : > { %v2326_v26 = vadd.f32 %v2325_v44, %v2324_v41  ;;  %v2390_v51 = vadd.f32 %v2389_v49, %v2388_v43  ;;  %v2391_v53 = vpop.f32.mrb[42].mxu1  ;;  %v2328_v57 = vpop.f32.mrb[43].mxu0 }
 0x15a   : > { %2161 = vst [vmem:[%s2778_s9 + $0x8] sm:$0xff] %v2129_v46   ;;  %v1733_v58 = vadd.f32 %v1732_v45, %v1718_v48  ;;  %v2329_v28 = vadd.f32 %v2328_v57, %v2327_v50  ;;  %v2392_v59 = vpop.f32.mrb[43].mxu1 }
 0x15b   : > { %v1467_v60 = vadd.f32 %v2326_v26, %v2748_v40  ;;  %v2393_v61 = vadd.f32 %v2392_v59, %v2391_v53 }
 0x15c   : > { %v1470_v62 = vadd.f32 %v2329_v28, %v2750_v42 }
 0x15d   : > { %v1564_v63 = vadd.f32 %v2390_v51, %v1467_v60 }
 0x15e   : > { %v1567_v0 = vadd.f32 %v2393_v61, %v1470_v62  ;;  %v2330_v1 = vpop.f32.mrb[44].mxu0 }
 0x15f   : > { %v1694_v2 = vadd.f32 %v1693_v47, %v1564_v63  ;;  %v1719_v3 = vmul.f32 %v1564_v63, %v1564_v63  ;;  %v2394_v5 = vpop.f32.mrb[44].mxu1  ;;  %v2331_v7 = vpop.f32.mrb[45].mxu0 }
 0x160   : > { %v2134_v8 = vpack.c.bf16 %v1567_v0, %v1564_v63  ;;  %v1720_v9 = vmul.f32 %v1567_v0, %v1567_v0  ;;  %v2332_v10 = vadd.f32 %v2331_v7, %v2330_v1  ;;  %v2395_v11 = vpop.f32.mrb[45].mxu1  ;;  %v2333_v13 = vpop.f32.mrb[46].mxu0 }
 0x161   : > { %v1734_v15 = vadd.f32 %v1733_v58, %v1719_v3  ;;  %v1695_v16 = vadd.f32 %v1694_v2, %v1567_v0  ;;  %v2396_v17 = vadd.f32 %v2395_v11, %v2394_v5  ;;  %v2397_v40 = vpop.f32.mrb[46].mxu1  ;;  %v2334_v12 = vpop.f32.mrb[47].mxu0 }
 0x162   : > { %2162 = vst [vmem:[%s2778_s9 + $0x10] sm:$0xff] %v2134_v8   ;;  %v1475_v42 = vadd.f32 %v2332_v10, %v2752_v54  ;;  %v2335_v18 = vadd.f32 %v2334_v12, %v2333_v13  ;;  %v2398_v19 = vpop.f32.mrb[47].mxu1 }
 0x163   : > { %v1735_v21 = vadd.f32 %v1734_v15, %v1720_v9  ;;  %v2399_v23 = vadd.f32 %v2398_v19, %v2397_v40 }
 0x164   : > { %v1572_v24 = vadd.f32 %v2396_v17, %v1475_v42  ;;  %v1478_v14 = vadd.f32 %v2335_v18, %v2754_v56 }
 0x166   : > { %v1696_v25 = vadd.f32 %v1695_v16, %v1572_v24  ;;  %v1721_v27 = vmul.f32 %v1572_v24, %v1572_v24  ;;  %v1575_v29 = vadd.f32 %v2399_v23, %v1478_v14  ;;  %v2336_v30 = vpop.f32.mrb[48].mxu0 }
 0x167   : > { %v2400_v31 = vpop.f32.mrb[48].mxu1  ;;  %v2337_v32 = vpop.f32.mrb[49].mxu0 }
 0x168   : > { %v1736_v33 = vadd.f32 %v1735_v21, %v1721_v27  ;;  %v2139_v34 = vpack.c.bf16 %v1575_v29, %v1572_v24  ;;  %v1697_v35 = vadd.f32 %v1696_v25, %v1575_v29  ;;  %v1722_v37 = vmul.f32 %v1575_v29, %v1575_v29  ;;  %v2401_v39 = vpop.f32.mrb[49].mxu1  ;;  %v2339_v54 = vpop.f32.mrb[50].mxu0 }
 0x169   : > { %v2338_v41 = vadd.f32 %v2337_v32, %v2336_v30  ;;  %v2402_v43 = vadd.f32 %v2401_v39, %v2400_v31  ;;  %v2403_v44 = vpop.f32.mrb[50].mxu1  ;;  %v2340_v45 = vpop.f32.mrb[51].mxu0 }
 0x16a   : > { %2163 = vst [vmem:[%s2778_s9 + $0x18] sm:$0xff] %v2139_v34   ;;  %v1737_v46 = vadd.f32 %v1736_v33, %v1722_v37  ;;  %v2341_v56 = vadd.f32 %v2340_v45, %v2339_v54  ;;  %v2404_v47 = vpop.f32.mrb[51].mxu1 }
 0x16b   : > { %v1483_v48 = vadd.f32 %v2338_v41, %v2756_v4  ;;  %v2405_v49 = vadd.f32 %v2404_v47, %v2403_v44 }
 0x16c   : > { %v1486_v50 = vadd.f32 %v2341_v56, %v2758_v6 }
 0x16d   : > { %v1580_v26 = vadd.f32 %v2402_v43, %v1483_v48 }
 0x16e   : > { %v1583_v51 = vadd.f32 %v2405_v49, %v1486_v50  ;;  %v2342_v53 = vpop.f32.mrb[52].mxu0 }
 0x16f   : > { %v1698_v57 = vadd.f32 %v1697_v35, %v1580_v26  ;;  %v1723_v58 = vmul.f32 %v1580_v26, %v1580_v26  ;;  %v2406_v28 = vpop.f32.mrb[52].mxu1  ;;  %v2343_v59 = vpop.f32.mrb[53].mxu0 }
 0x170   : > { %v2144_v60 = vpack.c.bf16 %v1583_v51, %v1580_v26  ;;  %v1724_v61 = vmul.f32 %v1583_v51, %v1583_v51  ;;  %v2344_v62 = vadd.f32 %v2343_v59, %v2342_v53  ;;  %v2407_v63 = vpop.f32.mrb[53].mxu1  ;;  %v2345_v0 = vpop.f32.mrb[54].mxu0 }
 0x171   : > { %v1738_v1 = vadd.f32 %v1737_v46, %v1723_v58  ;;  %v1699_v2 = vadd.f32 %v1698_v57, %v1583_v51  ;;  %v2408_v3 = vadd.f32 %v2407_v63, %v2406_v28  ;;  %v2409_v4 = vpop.f32.mrb[54].mxu1  ;;  %v2346_v5 = vpop.f32.mrb[55].mxu0 }
 0x172   : > { %2164 = vst [vmem:[%s2778_s9 + $0x20] sm:$0xff] %v2144_v60   ;;  %v1491_v6 = vadd.f32 %v2344_v62, %v2760_v20  ;;  %v2347_v7 = vadd.f32 %v2346_v5, %v2345_v0  ;;  %v2410_v8 = vpop.f32.mrb[55].mxu1 }
 0x173   : > { %v1739_v9 = vadd.f32 %v1738_v1, %v1724_v61  ;;  %v2411_v10 = vadd.f32 %v2410_v8, %v2409_v4 }
 0x174   : > { %v1588_v11 = vadd.f32 %v2408_v3, %v1491_v6  ;;  %v1494_v13 = vadd.f32 %v2347_v7, %v2762_v22 }
 0x176   : > { %v1700_v15 = vadd.f32 %v1699_v2, %v1588_v11  ;;  %v1725_v16 = vmul.f32 %v1588_v11, %v1588_v11  ;;  %v1591_v17 = vadd.f32 %v2411_v10, %v1494_v13  ;;  %v2348_v40 = vpop.f32.mrb[56].mxu0  ;;  %v1690_v13 = vld [vmem:[%s2730_s28] sm:$0x1] }
 0x177   : > { %v2412_v12 = vpop.f32.mrb[56].mxu1  ;;  %v2349_v42 = vpop.f32.mrb[57].mxu0 }
 0x178   : > { %v1740_v18 = vadd.f32 %v1739_v9, %v1725_v16  ;;  %v2149_v19 = vpack.c.bf16 %v1591_v17, %v1588_v11  ;;  %v1701_v21 = vadd.f32 %v1700_v15, %v1591_v17  ;;  %v1726_v23 = vmul.f32 %v1591_v17, %v1591_v17  ;;  %v2413_v24 = vpop.f32.mrb[57].mxu1  ;;  %v2351_v20 = vpop.f32.mrb[58].mxu0  ;;  %v1714_v17 = vld [vmem:[%s2736_s5] sm:$0x1] }
 0x179   : > { %v2350_v14 = vadd.f32 %v2349_v42, %v2348_v40  ;;  %v2414_v25 = vadd.f32 %v2413_v24, %v2412_v12  ;;  %v2415_v27 = vpop.f32.mrb[58].mxu1  ;;  %v2352_v29 = vpop.f32.mrb[59].mxu0 }
 0x17a   : > { %2165 = vst [vmem:[%s2778_s9 + $0x28] sm:$0xff] %v2149_v19   ;;  %v1741_v30 = vadd.f32 %v1740_v18, %v1726_v23  ;;  %v2353_v22 = vadd.f32 %v2352_v29, %v2351_v20  ;;  %v2416_v31 = vpop.f32.mrb[59].mxu1 }
 0x17b   : > { %v1499_v32 = vadd.f32 %v2350_v14, %v2764_v36  ;;  %v2417_v33 = vadd.f32 %v2416_v31, %v2415_v27 }
 0x17c   : > { %v1502_v34 = vadd.f32 %v2353_v22, %v2766_v38 }
 0x17d   : > { %v1596_v35 = vadd.f32 %v2414_v25, %v1499_v32 }
 0x17e   : > { %v1599_v37 = vadd.f32 %v2417_v33, %v1502_v34  ;;  %v2354_v39 = vpop.f32.mrb[60].mxu0 }
 0x17f   : > { %v1702_v54 = vadd.f32 %v1701_v21, %v1596_v35  ;;  %v1727_v41 = vmul.f32 %v1596_v35, %v1596_v35  ;;  %v2418_v43 = vpop.f32.mrb[60].mxu1  ;;  %v2355_v44 = vpop.f32.mrb[61].mxu0 }
 0x180   : > { %v2154_v45 = vpack.c.bf16 %v1599_v37, %v1596_v35  ;;  %v1728_v46 = vmul.f32 %v1599_v37, %v1599_v37  ;;  %v2356_v56 = vadd.f32 %v2355_v44, %v2354_v39  ;;  %v2419_v47 = vpop.f32.mrb[61].mxu1  ;;  %v2357_v48 = vpop.f32.mrb[62].mxu0 }
 0x181   : > { %v1742_v49 = vadd.f32 %v1741_v30, %v1727_v41  ;;  %v1703_v50 = vadd.f32 %v1702_v54, %v1599_v37  ;;  %v2420_v26 = vadd.f32 %v2419_v47, %v2418_v43  ;;  %v2421_v36 = vpop.f32.mrb[62].mxu1  ;;  %v2358_v51 = vpop.f32.mrb[63].mxu0 }
 0x182   : > { %2166 = vst [vmem:[%s2778_s9 + $0x30] sm:$0xff] %v2154_v45   ;;  %v1507_v38 = vadd.f32 %v2356_v56, %v2768_v52  ;;  %v2359_v53 = vadd.f32 %v2358_v51, %v2357_v48  ;;  %v2422_v57 = vpop.f32.mrb[63].mxu1 }
 0x183   : > { %v1743_v58 = vadd.f32 %v1742_v49, %v1728_v46  ;;  %v2423_v28 = vadd.f32 %v2422_v57, %v2421_v36 }
 0x184   : > { %v1604_v59 = vadd.f32 %v2420_v26, %v1507_v38  ;;  %v1510_v60 = vadd.f32 %v2359_v53, %v2770_v55 }
 0x186   : > { %v1704_v61 = vadd.f32 %v1703_v50, %v1604_v59  ;;  %v1729_v62 = vmul.f32 %v1604_v59, %v1604_v59  ;;  %v1607_v63 = vadd.f32 %v2423_v28, %v1510_v60 }
 0x188   : > { %v1744_v0 = vadd.f32 %v1743_v58, %v1729_v62  ;;  %v2159_v1 = vpack.c.bf16 %v1607_v63, %v1604_v59  ;;  %v1705_v2 = vadd.f32 %v1704_v61, %v1607_v63  ;;  %v1730_v3 = vmul.f32 %v1607_v63, %v1607_v63 }
 0x18a   : > { %2167 = vst [vmem:[%s2778_s9 + $0x38] sm:$0xff] %v2159_v1   ;;  %v1706_v4 = vrot.slane %v1705_v2, 4  ;;  %v1745_v52 = vadd.f32 %v1744_v0, %v1730_v3 }
 0x18c   : > { %v1707_v5 = vadd.f32 %v1706_v4, %v1705_v2  ;;  %v1746_v6 = vrot.slane %v1745_v52, 4 }
 0x18e   : > { %v1708_v7 = vrot.slane %v1707_v5, 2  ;;  %v1747_v8 = vadd.f32 %v1746_v6, %v1745_v52 }
 0x190   : > { %v1709_v9 = vadd.f32 %v1708_v7, %v1707_v5  ;;  %v1748_v55 = vrot.slane %v1747_v8, 2 }
 0x192   : > { %v1710_v10 = vrot.slane %v1709_v9, 1  ;;  %v1749_v11 = vadd.f32 %v1748_v55, %v1747_v8 }
 0x194   : > { %v1711_v15 = vadd.f32 %v1710_v10, %v1709_v9  ;;  %v1750_v16 = vrot.slane %v1749_v11, 1 }
 0x196   : > { %v1712_v40 = vadd.f32 %v1711_v15, %v1690_v13  ;;  %v1751_v12 = vadd.f32 %v1750_v16, %v1749_v11 }
 0x198   : > { %1713 = vst [vmem:[%s2730_s28] sm:$0x1] %v1712_v40  ;;  %v1752_v42 = vadd.f32 %v1751_v12, %v1714_v17 }
 0x19a   : > { %1753 = vst [vmem:[%s2736_s5] sm:$0x1] %v1752_v42 }
 0x19b PF: > { %s15_s17 = sadd.s32 1, %s2535_s17   ;;  %s2820_s15 = smov %s2531_s16 }
 0x19c   : > { %p12_p5 = scmp.ge.s32.totalorder %s15_s17, 6   ;;  %s2821_s16 = smov %s2823_s18 }
 0x19e   :  { %14 = sbr.rel (!%p12_p5) target bundleno = 2 (0x2), region = 89 }

// kernel: generator_forward.15
= control target key start
LH: loop header
LB: loop body
LE: loop exit
PB: predicated region body
PF: predicated region fallthrough
CT: control target
= control target key end

     0   :  { %s3507_s15 = smov 0   ;;  %s3509_s16 = smov 0   ;;  %s3799_s0 = inlined_call_operand.vmem [shape: bf16[4,512,512], index: 0, kind: input, shape index: {}]   ;;  %s3800_s1 = inlined_call_operand.vmem [shape: bf16[4,512,128], index: 1, kind: input, shape index: {}]   ;;  %s3801_s2 = inlined_call_operand.vmem [shape: bf16[4,512,128], index: 2, kind: output, shape index: {0}]   ;;  %s3802_s3 = inlined_call_operand.vmem [shape: f32[4,1,128], index: 3, kind: output, shape index: {1}]   ;;  %s3803_s4 = inlined_call_operand.vmem [shape: f32[4,1,128], index: 4, kind: output, shape index: {2}]  }
   0x1   :  { %s3511_s17 = smov 0  }
   0x2 LB: > { %s34_s18 = sadd.s32 1, %s3474_s16  ;;  %p2651_p0 = scmp.ge.s32.totalorder %s3478_s17, 1  ;;  %s3478_s17 = sphi %s3511_s17, %s15_s17   ;;  %s3474_s16 = sphi %s3509_s16, %s3805_s16   ;;  %s3470_s15 = sphi %s3507_s15, %s3804_s15  }
   0x3   : > { %p36_p1 = scmp.ge.s32.totalorder %s34_s18, 4  ;;  %p217_p2 = scmp.lt.s32.totalorder %s3478_s17, 5 }
   0x5   : > { %s3807_s18 = smov (%p36_p1, %s34_s18), 0  ;;  %p218_p3 = pnand %p2651_p0, %p217_p2 }
   0x6   : > { %p276_p4 = scmp.lt.s32.totalorder (!%p218_p3), %s3470_s15, 3  ;;  %v3480_v0 = vmov (!%p218_p3), 0  }
   0x7   : > { %221 = sbr.rel (%p218_p3) target bundleno = 565 (0x235), region = 28  ;;  %1350 = vmatprep.subr.bf16.mxu1 (!%p218_p3), %v3480_v0  ;;  %1639 = vmatprep.subr.bf16.mxu0 (!%p218_p3), %v3480_v0 }
   0xe   : > { %s3809_s15 = smov (!%p276_p4, %s3470_s15), 3 }
   0xf   : > { %s2885_s19 = sshll.u32 %s3809_s15, 8  ;;  %s2884_s23 = sshll.u32 %s3809_s15, 10 }
  0x10   : > { %s3535_s22 = scalar_lea.vmem %s3800_s1, %s2885_s19  ;;  %s3571_s26 = scalar_lea.vmem %s3799_s0, %s2884_s23 }
  0x11   : > { %v3232_v1 = vld [vmem:[%s3535_s22] sm:$0xff]   ;;  %v3234_v3 = vld [vmem:[%s3535_s22 + $0x8] sm:$0xff]   ;;  %v3236_v5 = vld [vmem:[%s3535_s22 + $0x10] sm:$0xff]   ;;  %s3724_s29 = scalar_lea.vmem %s3801_s2, %s2885_s19  ;;  %s3759_s6 = scalar_lea.vmem %s3802_s3, %s3809_s15 }
  0x12   : > { %v3233_v2 = vld [vmem:[%s3535_s22 + $0x80] sm:$0xff]   ;;  %1351 = vmatpush1.bf16.msra.mxu1 %v3232_v1  ;;  %v3235_v4 = vld [vmem:[%s3535_s22 + $0x88] sm:$0xff]   ;;  %v3237_v6 = vld [vmem:[%s3535_s22 + $0x90] sm:$0xff]   ;;  %s3765_s9 = scalar_lea.vmem %s3803_s4, %s3809_s15 }
  0x13   : > { %1640 = vmatpush1.bf16.msra.mxu0 %v3233_v2  ;;  %1352 = vmatprep.subr.bf16.mxu1 %v3480_v0  ;;  %v3238_v7 = vld [vmem:[%s3535_s22 + $0x18] sm:$0xff]   ;;  %v3240_v9 = vld [vmem:[%s3535_s22 + $0x20] sm:$0xff]   ;;  %v3242_v11 = vld [vmem:[%s3535_s22 + $0x28] sm:$0xff]  }
  0x14   : > { %1641 = vmatprep.subr.bf16.mxu0 %v3480_v0  ;;  %v3239_v8 = vld [vmem:[%s3535_s22 + $0x98] sm:$0xff]   ;;  %v3241_v10 = vld [vmem:[%s3535_s22 + $0xa0] sm:$0xff]   ;;  %v3243_v12 = vld [vmem:[%s3535_s22 + $0xa8] sm:$0xff]  }
  0x15   : > { %v3244_v13 = vld [vmem:[%s3535_s22 + $0x30] sm:$0xff]   ;;  %v3246_v15 = vld [vmem:[%s3535_s22 + $0x38] sm:$0xff]   ;;  %v3248_v17 = vld [vmem:[%s3535_s22 + $0x40] sm:$0xff]  }
  0x16   : > { %1353 = vmatpush1.bf16.msra.mxu1 %v3234_v3  ;;  %v3245_v14 = vld [vmem:[%s3535_s22 + $0xb0] sm:$0xff]   ;;  %v3247_v16 = vld [vmem:[%s3535_s22 + $0xb8] sm:$0xff]   ;;  %v3249_v18 = vld [vmem:[%s3535_s22 + $0xc0] sm:$0xff]  }
  0x17   : > { %1642 = vmatpush1.bf16.msra.mxu0 %v3235_v4  ;;  %1354 = vmatprep.subr.bf16.mxu1 %v3480_v0  ;;  %v3266_v19 = vld [vmem:[%s3571_s26 + $0x4] ss:$16 sps:$4 sm:$0xff]   ;;  %v3250_v20 = vld [vmem:[%s3535_s22 + $0x48] sm:$0xff]   ;;  %v3254_v25 = vld [vmem:[%s3535_s22 + $0x58] sm:$0xff]  }
  0x18   : > { %1643 = vmatprep.subr.bf16.mxu0 %v3480_v0  ;;  %v3269_v21 = vld [vmem:[%s3571_s26 + $0xc] ss:$16 sps:$4 sm:$0xff]   ;;  %1382 = vmatprep.mubr.bf16.mxu1 %v3266_v19  ;;  %v3252_v23 = vld [vmem:[%s3535_s22 + $0x50] sm:$0xff]   ;;  %v3256_v27 = vld [vmem:[%s3535_s22 + $0x60] sm:$0xff]  }
  0x19   : > { %v3251_v22 = vld [vmem:[%s3535_s22 + $0xc8] sm:$0xff]   ;;  %1671 = vmatprep.mubr.bf16.mxu0 %v3269_v21  ;;  %v3253_v24 = vld [vmem:[%s3535_s22 + $0xd0] sm:$0xff]   ;;  %v3255_v26 = vld [vmem:[%s3535_s22 + $0xd8] sm:$0xff]  }
  0x1a   : > { %1355 = vmatpush1.bf16.msra.mxu1 %v3236_v5  ;;  %v3257_v28 = vld [vmem:[%s3535_s22 + $0xe0] sm:$0xff]   ;;  %v3258_v29 = vld [vmem:[%s3535_s22 + $0x68] sm:$0xff]   ;;  %v3260_v31 = vld [vmem:[%s3535_s22 + $0x70] sm:$0xff]  }
  0x1b   : > { %1644 = vmatpush1.bf16.msra.mxu0 %v3237_v6  ;;  %1356 = vmatprep.subr.bf16.mxu1 %v3480_v0  ;;  %v3259_v30 = vld [vmem:[%s3535_s22 + $0xe8] sm:$0xff]   ;;  %v3261_v32 = vld [vmem:[%s3535_s22 + $0xf0] sm:$0xff]   ;;  %v3262_v33 = vld [vmem:[%s3535_s22 + $0x78] sm:$0xff]  }
  0x1c   : > { %1645 = vmatprep.subr.bf16.mxu0 %v3480_v0  ;;  %v3263_v34 = vld [vmem:[%s3535_s22 + $0xf8] sm:$0xff]   ;;  %v3264_v35 = vld [vmem:[%s3571_s26] ss:$16 sps:$4 sm:$0xff]   ;;  %v3270_v37 = vld [vmem:[%s3571_s26 + $0x24] ss:$16 sps:$4 sm:$0xff]  }
  0x1d   : > { %v3267_v36 = vld [vmem:[%s3571_s26 + $0x8] ss:$16 sps:$4 sm:$0xff]   ;;  %v3272_v38 = vld [vmem:[%s3571_s26 + $0x2c] ss:$16 sps:$4 sm:$0xff]   ;;  %v3274_v39 = vld [vmem:[%s3571_s26 + $0x20] ss:$16 sps:$4 sm:$0xff]  }
  0x1e   : > { %1357 = vmatpush1.bf16.msra.mxu1 %v3238_v7  ;;  %v3275_v40 = vld [vmem:[%s3571_s26 + $0x28] ss:$16 sps:$4 sm:$0xff]   ;;  %v3276_v41 = vld [vmem:[%s3571_s26 + $0x44] ss:$16 sps:$4 sm:$0xff]   ;;  %v3278_v42 = vld [vmem:[%s3571_s26 + $0x4c] ss:$16 sps:$4 sm:$0xff]  }
  0x1f   : > { %1646 = vmatpush1.bf16.msra.mxu0 %v3239_v8  ;;  %1358 = vmatprep.subr.bf16.mxu1 %v3480_v0  ;;  %v3280_v43 = vld [vmem:[%s3571_s26 + $0x40] ss:$16 sps:$4 sm:$0xff]   ;;  %v3281_v44 = vld [vmem:[%s3571_s26 + $0x48] ss:$16 sps:$4 sm:$0xff]   ;;  %v3282_v45 = vld [vmem:[%s3571_s26 + $0x64] ss:$16 sps:$4 sm:$0xff]  }
  0x20   : > { %1647 = vmatprep.subr.bf16.mxu0 %v3480_v0  ;;  %v3284_v46 = vld [vmem:[%s3571_s26 + $0x6c] ss:$16 sps:$4 sm:$0xff]   ;;  %v3286_v47 = vld [vmem:[%s3571_s26 + $0x60] ss:$16 sps:$4 sm:$0xff]   ;;  %v3287_v48 = vld [vmem:[%s3571_s26 + $0x68] ss:$16 sps:$4 sm:$0xff]  }
  0x21   : > { %v3288_v49 = vld [vmem:[%s3571_s26 + $0x84] ss:$16 sps:$4 sm:$0xff]   ;;  %v3290_v50 = vld [vmem:[%s3571_s26 + $0x8c] ss:$16 sps:$4 sm:$0xff]   ;;  %v3292_v51 = vld [vmem:[%s3571_s26 + $0x80] ss:$16 sps:$4 sm:$0xff]  }
  0x22   : > { %1359 = vmatpush1.bf16.msra.mxu1 %v3240_v9  ;;  %v3293_v52 = vld [vmem:[%s3571_s26 + $0x88] ss:$16 sps:$4 sm:$0xff]   ;;  %v3294_v53 = vld [vmem:[%s3571_s26 + $0xa4] ss:$16 sps:$4 sm:$0xff]   ;;  %v3296_v54 = vld [vmem:[%s3571_s26 + $0xac] ss:$16 sps:$4 sm:$0xff]  }
  0x23   : > { %1648 = vmatpush1.bf16.msra.mxu0 %v3241_v10  ;;  %1360 = vmatprep.subr.bf16.mxu1 %v3480_v0  ;;  %v3298_v55 = vld [vmem:[%s3571_s26 + $0xa0] ss:$16 sps:$4 sm:$0xff]   ;;  %v3299_v56 = vld [vmem:[%s3571_s26 + $0xa8] ss:$16 sps:$4 sm:$0xff]   ;;  %v3300_v57 = vld [vmem:[%s3571_s26 + $0xc4] ss:$16 sps:$4 sm:$0xff]  }
  0x24   : > { %1649 = vmatprep.subr.bf16.mxu0 %v3480_v0  ;;  %v3302_v58 = vld [vmem:[%s3571_s26 + $0xcc] ss:$16 sps:$4 sm:$0xff]   ;;  %v3304_v59 = vld [vmem:[%s3571_s26 + $0xc0] ss:$16 sps:$4 sm:$0xff]   ;;  %v3305_v60 = vld [vmem:[%s3571_s26 + $0xc8] ss:$16 sps:$4 sm:$0xff]  }
  0x25   : > { %v3306_v61 = vld [vmem:[%s3571_s26 + $0xe4] ss:$16 sps:$4 sm:$0xff]   ;;  %v3308_v62 = vld [vmem:[%s3571_s26 + $0xec] ss:$16 sps:$4 sm:$0xff]   ;;  %v3310_v63 = vld [vmem:[%s3571_s26 + $0xe0] ss:$16 sps:$4 sm:$0xff]  }
  0x26   : > { %1361 = vmatpush1.bf16.msra.mxu1 %v3242_v11  ;;  %v3312_v1 = vld [vmem:[%s3571_s26 + $0x104] ss:$16 sps:$4 sm:$0xff]   ;;  %v3314_v2 = vld [vmem:[%s3571_s26 + $0x10c] ss:$16 sps:$4 sm:$0xff]   ;;  %v3316_v3 = vld [vmem:[%s3571_s26 + $0x100] ss:$16 sps:$4 sm:$0xff]  }
  0x27   : > { %1650 = vmatpush1.bf16.msra.mxu0 %v3243_v12  ;;  %1362 = vmatprep.subr.bf16.mxu1 %v3480_v0  ;;  %v3317_v4 = vld [vmem:[%s3571_s26 + $0x108] ss:$16 sps:$4 sm:$0xff]   ;;  %v3318_v5 = vld [vmem:[%s3571_s26 + $0x124] ss:$16 sps:$4 sm:$0xff]   ;;  %v3320_v6 = vld [vmem:[%s3571_s26 + $0x12c] ss:$16 sps:$4 sm:$0xff]  }
  0x28   : > { %1651 = vmatprep.subr.bf16.mxu0 %v3480_v0  ;;  %v3322_v7 = vld [vmem:[%s3571_s26 + $0x120] ss:$16 sps:$4 sm:$0xff]   ;;  %v3323_v8 = vld [vmem:[%s3571_s26 + $0x128] ss:$16 sps:$4 sm:$0xff]   ;;  %v3324_v9 = vld [vmem:[%s3571_s26 + $0x144] ss:$16 sps:$4 sm:$0xff]  }
  0x29   : > { %v3326_v10 = vld [vmem:[%s3571_s26 + $0x14c] ss:$16 sps:$4 sm:$0xff]   ;;  %v3328_v11 = vld [vmem:[%s3571_s26 + $0x140] ss:$16 sps:$4 sm:$0xff]   ;;  %v3329_v12 = vld [vmem:[%s3571_s26 + $0x148] ss:$16 sps:$4 sm:$0xff]  }
  0x2a   : > { %1363 = vmatpush1.bf16.msra.mxu1 %v3244_v13  ;;  %v3330_v13 = vld [vmem:[%s3571_s26 + $0x164] ss:$16 sps:$4 sm:$0xff]   ;;  %v3340_v19 = vld [vmem:[%s3571_s26 + $0x180] ss:$16 sps:$4 sm:$0xff]  }
  0x2b   : > { %1652 = vmatpush1.bf16.msra.mxu0 %v3245_v14  ;;  %1364 = vmatprep.subr.bf16.mxu1 %v3480_v0  ;;  %v3332_v14 = vld [vmem:[%s3571_s26 + $0x16c] ss:$16 sps:$4 sm:$0xff]   ;;  %v3342_v21 = vld [vmem:[%s3571_s26 + $0x1a4] ss:$16 sps:$4 sm:$0xff]  }
  0x2c   : > { %1653 = vmatprep.subr.bf16.mxu0 %v3480_v0 }
  0x2e   : > { %1365 = vmatpush1.bf16.msra.mxu1 %v3246_v15  ;;  %v3334_v15 = vld [vmem:[%s3571_s26 + $0x160] ss:$16 sps:$4 sm:$0xff]  }
  0x2f   : > { %1654 = vmatpush1.bf16.msra.mxu0 %v3247_v16  ;;  %1366 = vmatprep.subr.bf16.mxu1 %v3480_v0  ;;  %v3335_v16 = vld [vmem:[%s3571_s26 + $0x168] ss:$16 sps:$4 sm:$0xff]  }
  0x30   : > { %1655 = vmatprep.subr.bf16.mxu0 %v3480_v0 }
  0x32   : > { %1367 = vmatpush1.bf16.msra.mxu1 %v3248_v17  ;;  %v3336_v17 = vld [vmem:[%s3571_s26 + $0x184] ss:$16 sps:$4 sm:$0xff]  }
  0x33   : > { %1656 = vmatpush1.bf16.msra.mxu0 %v3249_v18  ;;  %1368 = vmatprep.subr.bf16.mxu1 %v3480_v0  ;;  %v3338_v18 = vld [vmem:[%s3571_s26 + $0x18c] ss:$16 sps:$4 sm:$0xff]  }
  0x34   : > { %1657 = vmatprep.subr.bf16.mxu0 %v3480_v0 }
  0x36   : > { %1369 = vmatpush1.bf16.msra.mxu1 %v3250_v20  ;;  %v3341_v20 = vld [vmem:[%s3571_s26 + $0x188] ss:$16 sps:$4 sm:$0xff]  }
  0x37   : > { %1658 = vmatpush1.bf16.msra.mxu0 %v3251_v22  ;;  %1370 = vmatprep.subr.bf16.mxu1 %v3480_v0  ;;  %v3344_v22 = vld [vmem:[%s3571_s26 + $0x1ac] ss:$16 sps:$4 sm:$0xff]  }
  0x38   : > { %1659 = vmatprep.subr.bf16.mxu0 %v3480_v0 }
  0x3a   : > { %1371 = vmatpush1.bf16.msra.mxu1 %v3252_v23  ;;  %v3346_v23 = vld [vmem:[%s3571_s26 + $0x1a0] ss:$16 sps:$4 sm:$0xff]  }
  0x3b   : > { %1660 = vmatpush1.bf16.msra.mxu0 %v3253_v24  ;;  %1372 = vmatprep.subr.bf16.mxu1 %v3480_v0  ;;  %v3347_v24 = vld [vmem:[%s3571_s26 + $0x1a8] ss:$16 sps:$4 sm:$0xff]  }
  0x3c   : > { %1661 = vmatprep.subr.bf16.mxu0 %v3480_v0 }
  0x3e   : > { %1373 = vmatpush1.bf16.msra.mxu1 %v3254_v25  ;;  %v3348_v25 = vld [vmem:[%s3571_s26 + $0x1c4] ss:$16 sps:$4 sm:$0xff]  }
  0x3f   : > { %1662 = vmatpush1.bf16.msra.mxu0 %v3255_v26  ;;  %1374 = vmatprep.subr.bf16.mxu1 %v3480_v0  ;;  %v3350_v26 = vld [vmem:[%s3571_s26 + $0x1cc] ss:$16 sps:$4 sm:$0xff]  }
  0x40   : > { %1663 = vmatprep.subr.bf16.mxu0 %v3480_v0 }
  0x42   : > { %1375 = vmatpush1.bf16.msra.mxu1 %v3256_v27  ;;  %v3352_v27 = vld [vmem:[%s3571_s26 + $0x1c0] ss:$16 sps:$4 sm:$0xff]  }
  0x43   : > { %1664 = vmatpush1.bf16.msra.mxu0 %v3257_v28  ;;  %1376 = vmatprep.subr.bf16.mxu1 %v3480_v0  ;;  %v3353_v28 = vld [vmem:[%s3571_s26 + $0x1c8] ss:$16 sps:$4 sm:$0xff]  }
  0x44   : > { %1665 = vmatprep.subr.bf16.mxu0 %v3480_v0 }
  0x46   : > { %1377 = vmatpush1.bf16.msra.mxu1 %v3258_v29  ;;  %v3354_v29 = vld [vmem:[%s3571_s26 + $0x1e4] ss:$16 sps:$4 sm:$0xff]  }
  0x47   : > { %1666 = vmatpush1.bf16.msra.mxu0 %v3259_v30  ;;  %1378 = vmatprep.subr.bf16.mxu1 %v3480_v0  ;;  %v3356_v30 = vld [vmem:[%s3571_s26 + $0x1ec] ss:$16 sps:$4 sm:$0xff]  }
  0x48   : > { %1667 = vmatprep.subr.bf16.mxu0 %v3480_v0 }
  0x4a   : > { %1379 = vmatpush1.bf16.msra.mxu1 %v3260_v31  ;;  %v3358_v31 = vld [vmem:[%s3571_s26 + $0x1e0] ss:$16 sps:$4 sm:$0xff]  }
  0x4b   : > { %1668 = vmatpush1.bf16.msra.mxu0 %v3261_v32  ;;  %1380 = vmatprep.subr.bf16.mxu1 %v3480_v0  ;;  %v3359_v32 = vld [vmem:[%s3571_s26 + $0x1e8] ss:$16 sps:$4 sm:$0xff]  }
  0x4c   : > { %1669 = vmatprep.subr.bf16.mxu0 %v3480_v0  ;;  %v3311_v0 = vld [vmem:[%s3571_s26 + $0xe8] ss:$16 sps:$4 sm:$0xff]  }
  0x4e   : > { %1381 = vmatpush1.bf16.msra.mxu1 %v3262_v33  ;;  %v3360_v33 = vld [vmem:[%s3571_s26 + $0x204] ss:$16 sps:$4 sm:$0xff]  }
  0x4f   : > { %1670 = vmatpush1.bf16.msra.mxu0 %v3263_v34  ;;  %v3362_v34 = vld [vmem:[%s3571_s26 + $0x20c] ss:$16 sps:$4 sm:$0xff]  }
  0x51   : > { %1383 = vmatmul.mubr.bf16.vlgmr.msra.gmra.mrb[0].mxu1 %v3264_v35  ;;  %v3364_v35 = vld [vmem:[%s3571_s26 + $0x200] ss:$16 sps:$4 sm:$0xff]  }
  0x52   : > { %1672 = vmatmul.mubr.bf16.vlgmr.msra.gmra.mrb[0].mxu0 %v3267_v36  ;;  %1390 = vmatprep.mubr.bf16.mxu1 %v3270_v37  ;;  %v3365_v36 = vld [vmem:[%s3571_s26 + $0x208] ss:$16 sps:$4 sm:$0xff]   ;;  %v3366_v37 = vld [vmem:[%s3571_s26 + $0x224] ss:$16 sps:$4 sm:$0xff]  }
  0x53   : > { %1679 = vmatprep.mubr.bf16.mxu0 %v3272_v38  ;;  %v3368_v38 = vld [vmem:[%s3571_s26 + $0x22c] ss:$16 sps:$4 sm:$0xff]  }
  0x59   : > { %1391 = vmatmul.mubr.bf16.gmra.mrb[4].mxu1 %v3274_v39  ;;  %v3370_v39 = vld [vmem:[%s3571_s26 + $0x220] ss:$16 sps:$4 sm:$0xff]  }
  0x5a   : > { %1680 = vmatmul.mubr.bf16.gmra.mrb[4].mxu0 %v3275_v40  ;;  %1398 = vmatprep.mubr.bf16.mxu1 %v3276_v41  ;;  %v3371_v40 = vld [vmem:[%s3571_s26 + $0x228] ss:$16 sps:$4 sm:$0xff]   ;;  %v3372_v41 = vld [vmem:[%s3571_s26 + $0x244] ss:$16 sps:$4 sm:$0xff]  }
  0x5b   : > { %1687 = vmatprep.mubr.bf16.mxu0 %v3278_v42  ;;  %v3374_v42 = vld [vmem:[%s3571_s26 + $0x24c] ss:$16 sps:$4 sm:$0xff]  }
  0x61   : > { %1399 = vmatmul.mubr.bf16.gmra.mrb[8].mxu1 %v3280_v43  ;;  %v3376_v43 = vld [vmem:[%s3571_s26 + $0x240] ss:$16 sps:$4 sm:$0xff]  }
  0x62   : > { %1688 = vmatmul.mubr.bf16.gmra.mrb[8].mxu0 %v3281_v44  ;;  %1406 = vmatprep.mubr.bf16.mxu1 %v3282_v45  ;;  %v3377_v44 = vld [vmem:[%s3571_s26 + $0x248] ss:$16 sps:$4 sm:$0xff]   ;;  %v3378_v45 = vld [vmem:[%s3571_s26 + $0x264] ss:$16 sps:$4 sm:$0xff]  }
  0x63   : > { %1695 = vmatprep.mubr.bf16.mxu0 %v3284_v46  ;;  %v3380_v46 = vld [vmem:[%s3571_s26 + $0x26c] ss:$16 sps:$4 sm:$0xff]  }
  0x69   : > { %1407 = vmatmul.mubr.bf16.gmra.mrb[12].mxu1 %v3286_v47  ;;  %v3382_v47 = vld [vmem:[%s3571_s26 + $0x260] ss:$16 sps:$4 sm:$0xff]  }
  0x6a   : > { %1696 = vmatmul.mubr.bf16.gmra.mrb[12].mxu0 %v3287_v48  ;;  %1414 = vmatprep.mubr.bf16.mxu1 %v3288_v49  ;;  %v3383_v48 = vld [vmem:[%s3571_s26 + $0x268] ss:$16 sps:$4 sm:$0xff]   ;;  %v3384_v49 = vld [vmem:[%s3571_s26 + $0x284] ss:$16 sps:$4 sm:$0xff]  }
  0x6b   : > { %1703 = vmatprep.mubr.bf16.mxu0 %v3290_v50  ;;  %v3386_v50 = vld [vmem:[%s3571_s26 + $0x28c] ss:$16 sps:$4 sm:$0xff]  }
  0x71   : > { %1415 = vmatmul.mubr.bf16.gmra.mrb[16].mxu1 %v3292_v51  ;;  %v3388_v51 = vld [vmem:[%s3571_s26 + $0x280] ss:$16 sps:$4 sm:$0xff]  }
  0x72   : > { %1704 = vmatmul.mubr.bf16.gmra.mrb[16].mxu0 %v3293_v52  ;;  %1422 = vmatprep.mubr.bf16.mxu1 %v3294_v53  ;;  %v3389_v52 = vld [vmem:[%s3571_s26 + $0x288] ss:$16 sps:$4 sm:$0xff]   ;;  %v3390_v53 = vld [vmem:[%s3571_s26 + $0x2a4] ss:$16 sps:$4 sm:$0xff]  }
  0x73   : > { %1711 = vmatprep.mubr.bf16.mxu0 %v3296_v54  ;;  %v3392_v54 = vld [vmem:[%s3571_s26 + $0x2ac] ss:$16 sps:$4 sm:$0xff]  }
  0x79   : > { %1423 = vmatmul.mubr.bf16.gmra.mrb[20].mxu1 %v3298_v55  ;;  %v3394_v55 = vld [vmem:[%s3571_s26 + $0x2a0] ss:$16 sps:$4 sm:$0xff]  }
  0x7a   : > { %1712 = vmatmul.mubr.bf16.gmra.mrb[20].mxu0 %v3299_v56  ;;  %1430 = vmatprep.mubr.bf16.mxu1 %v3300_v57  ;;  %v3395_v56 = vld [vmem:[%s3571_s26 + $0x2a8] ss:$16 sps:$4 sm:$0xff]   ;;  %v3396_v57 = vld [vmem:[%s3571_s26 + $0x2c4] ss:$16 sps:$4 sm:$0xff]  }
  0x7b   : > { %1719 = vmatprep.mubr.bf16.mxu0 %v3302_v58  ;;  %v3398_v58 = vld [vmem:[%s3571_s26 + $0x2cc] ss:$16 sps:$4 sm:$0xff]  }
  0x81   : > { %1431 = vmatmul.mubr.bf16.gmra.mrb[24].mxu1 %v3304_v59  ;;  %v3400_v59 = vld [vmem:[%s3571_s26 + $0x2c0] ss:$16 sps:$4 sm:$0xff]  }
  0x82   : > { %1720 = vmatmul.mubr.bf16.gmra.mrb[24].mxu0 %v3305_v60  ;;  %1438 = vmatprep.mubr.bf16.mxu1 %v3306_v61  ;;  %v3401_v60 = vld [vmem:[%s3571_s26 + $0x2c8] ss:$16 sps:$4 sm:$0xff]   ;;  %v3402_v61 = vld [vmem:[%s3571_s26 + $0x2e4] ss:$16 sps:$4 sm:$0xff]  }
  0x83   : > { %1727 = vmatprep.mubr.bf16.mxu0 %v3308_v62  ;;  %v3404_v62 = vld [vmem:[%s3571_s26 + $0x2ec] ss:$16 sps:$4 sm:$0xff]  }
  0x89   : > { %1439 = vmatmul.mubr.bf16.gmra.mrb[28].mxu1 %v3310_v63  ;;  %v3406_v63 = vld [vmem:[%s3571_s26 + $0x2e0] ss:$16 sps:$4 sm:$0xff]  }
  0x8a   : > { %1728 = vmatmul.mubr.bf16.gmra.mrb[28].mxu0 %v3311_v0  ;;  %1446 = vmatprep.mubr.bf16.mxu1 %v3312_v1  ;;  %v3407_v0 = vld [vmem:[%s3571_s26 + $0x2e8] ss:$16 sps:$4 sm:$0xff]   ;;  %v3408_v1 = vld [vmem:[%s3571_s26 + $0x304] ss:$16 sps:$4 sm:$0xff]  }
  0x8b   : > { %1735 = vmatprep.mubr.bf16.mxu0 %v3314_v2  ;;  %v3410_v2 = vld [vmem:[%s3571_s26 + $0x30c] ss:$16 sps:$4 sm:$0xff]  }
  0x91   : > { %1447 = vmatmul.mubr.bf16.gmra.mrb[32].mxu1 %v3316_v3  ;;  %v3412_v3 = vld [vmem:[%s3571_s26 + $0x300] ss:$16 sps:$4 sm:$0xff]  }
  0x92   : > { %1736 = vmatmul.mubr.bf16.gmra.mrb[32].mxu0 %v3317_v4  ;;  %1454 = vmatprep.mubr.bf16.mxu1 %v3318_v5  ;;  %v3413_v4 = vld [vmem:[%s3571_s26 + $0x308] ss:$16 sps:$4 sm:$0xff]   ;;  %v3414_v5 = vld [vmem:[%s3571_s26 + $0x324] ss:$16 sps:$4 sm:$0xff]  }
  0x93   : > { %1743 = vmatprep.mubr.bf16.mxu0 %v3320_v6  ;;  %v3416_v6 = vld [vmem:[%s3571_s26 + $0x32c] ss:$16 sps:$4 sm:$0xff]  }
  0x99   : > { %1455 = vmatmul.mubr.bf16.gmra.mrb[36].mxu1 %v3322_v7  ;;  %v3418_v7 = vld [vmem:[%s3571_s26 + $0x320] ss:$16 sps:$4 sm:$0xff]  }
  0x9a   : > { %1744 = vmatmul.mubr.bf16.gmra.mrb[36].mxu0 %v3323_v8  ;;  %1462 = vmatprep.mubr.bf16.mxu1 %v3324_v9  ;;  %v3419_v8 = vld [vmem:[%s3571_s26 + $0x328] ss:$16 sps:$4 sm:$0xff]   ;;  %v3420_v9 = vld [vmem:[%s3571_s26 + $0x344] ss:$16 sps:$4 sm:$0xff]  }
  0x9b   : > { %1751 = vmatprep.mubr.bf16.mxu0 %v3326_v10  ;;  %v3422_v10 = vld [vmem:[%s3571_s26 + $0x34c] ss:$16 sps:$4 sm:$0xff]  }
  0xa1   : > { %1463 = vmatmul.mubr.bf16.gmra.mrb[40].mxu1 %v3328_v11  ;;  %v3424_v11 = vld [vmem:[%s3571_s26 + $0x340] ss:$16 sps:$4 sm:$0xff]  }
  0xa2   : > { %1752 = vmatmul.mubr.bf16.gmra.mrb[40].mxu0 %v3329_v12  ;;  %1470 = vmatprep.mubr.bf16.mxu1 %v3330_v13  ;;  %v3425_v12 = vld [vmem:[%s3571_s26 + $0x348] ss:$16 sps:$4 sm:$0xff]   ;;  %v3426_v13 = vld [vmem:[%s3571_s26 + $0x364] ss:$16 sps:$4 sm:$0xff]  }
  0xa3   : > { %1759 = vmatprep.mubr.bf16.mxu0 %v3332_v14  ;;  %v3428_v14 = vld [vmem:[%s3571_s26 + $0x36c] ss:$16 sps:$4 sm:$0xff]  }
  0xa9   : > { %1471 = vmatmul.mubr.bf16.gmra.mrb[44].mxu1 %v3334_v15 }
  0xaa   : > { %1760 = vmatmul.mubr.bf16.gmra.mrb[44].mxu0 %v3335_v16  ;;  %1478 = vmatprep.mubr.bf16.mxu1 %v3336_v17 }
  0xab   : > { %1767 = vmatprep.mubr.bf16.mxu0 %v3338_v18  ;;  %v3430_v18 = vld [vmem:[%s3571_s26 + $0x360] ss:$16 sps:$4 sm:$0xff]  }
  0xb1   : > { %1479 = vmatmul.mubr.bf16.gmra.mrb[48].mxu1 %v3340_v19 }
  0xb2   : > { %1768 = vmatmul.mubr.bf16.gmra.mrb[48].mxu0 %v3341_v20  ;;  %1486 = vmatprep.mubr.bf16.mxu1 %v3342_v21 }
  0xb3   : > { %1775 = vmatprep.mubr.bf16.mxu0 %v3344_v22  ;;  %v3431_v22 = vld [vmem:[%s3571_s26 + $0x368] ss:$16 sps:$4 sm:$0xff]  }
  0xb9   : > { %1487 = vmatmul.mubr.bf16.gmra.mrb[52].mxu1 %v3346_v23  ;;  %v3432_v23 = vld [vmem:[%s3571_s26 + $0x384] ss:$16 sps:$4 sm:$0xff]  }
  0xba   : > { %1776 = vmatmul.mubr.bf16.gmra.mrb[52].mxu0 %v3347_v24  ;;  %1494 = vmatprep.mubr.bf16.mxu1 %v3348_v25 }
  0xbb   : > { %1783 = vmatprep.mubr.bf16.mxu0 %v3350_v26  ;;  %v3434_v26 = vld [vmem:[%s3571_s26 + $0x38c] ss:$16 sps:$4 sm:$0xff]  }
  0xc1   : > { %1495 = vmatmul.mubr.bf16.gmra.mrb[56].mxu1 %v3352_v27 }
  0xc2   : > { %1784 = vmatmul.mubr.bf16.gmra.mrb[56].mxu0 %v3353_v28  ;;  %1502 = vmatprep.mubr.bf16.mxu1 %v3354_v29 }
  0xc3   : > { %1791 = vmatprep.mubr.bf16.mxu0 %v3356_v30 }
  0xc9   : > { %1503 = vmatmul.mubr.bf16.gmra.mrb[60].mxu1 %v3358_v31 }
  0xca   : > { %1792 = vmatmul.mubr.bf16.gmra.mrb[60].mxu0 %v3359_v32  ;;  %1510 = vmatprep.mubr.bf16.mxu1 %v3360_v33 }
  0xcb   : > { %1799 = vmatprep.mubr.bf16.mxu0 %v3362_v34 }
  0xd1   : > { %1511 = vmatmul.mubr.bf16.gmra.mrb[64].mxu1 %v3364_v35 }
  0xd2   : > { %1800 = vmatmul.mubr.bf16.gmra.mrb[64].mxu0 %v3365_v36  ;;  %1518 = vmatprep.mubr.bf16.mxu1 %v3366_v37  ;;  %v3436_v37 = vld [vmem:[%s3571_s26 + $0x380] ss:$16 sps:$4 sm:$0xff]  }
  0xd3   : > { %1807 = vmatprep.mubr.bf16.mxu0 %v3368_v38 }
  0xd9   : > { %1519 = vmatmul.mubr.bf16.gmra.mrb[68].mxu1 %v3370_v39 }
  0xda   : > { %1808 = vmatmul.mubr.bf16.gmra.mrb[68].mxu0 %v3371_v40  ;;  %1526 = vmatprep.mubr.bf16.mxu1 %v3372_v41  ;;  %v3437_v41 = vld [vmem:[%s3571_s26 + $0x388] ss:$16 sps:$4 sm:$0xff]  }
  0xdb   : > { %1815 = vmatprep.mubr.bf16.mxu0 %v3374_v42 }
  0xe1   : > { %1527 = vmatmul.mubr.bf16.gmra.mrb[72].mxu1 %v3376_v43 }
  0xe2   : > { %1816 = vmatmul.mubr.bf16.gmra.mrb[72].mxu0 %v3377_v44  ;;  %1534 = vmatprep.mubr.bf16.mxu1 %v3378_v45  ;;  %v3438_v44 = vld [vmem:[%s3571_s26 + $0x3a4] ss:$16 sps:$4 sm:$0xff]   ;;  %v3440_v45 = vld [vmem:[%s3571_s26 + $0x3ac] ss:$16 sps:$4 sm:$0xff]  }
  0xe3   : > { %1823 = vmatprep.mubr.bf16.mxu0 %v3380_v46 }
  0xe9   : > { %1535 = vmatmul.mubr.bf16.gmra.mrb[76].mxu1 %v3382_v47 }
  0xea   : > { %1824 = vmatmul.mubr.bf16.gmra.mrb[76].mxu0 %v3383_v48  ;;  %1542 = vmatprep.mubr.bf16.mxu1 %v3384_v49 }
  0xeb   : > { %1831 = vmatprep.mubr.bf16.mxu0 %v3386_v50 }
  0xf1   : > { %1543 = vmatmul.mubr.bf16.gmra.mrb[80].mxu1 %v3388_v51 }
  0xf2   : > { %1832 = vmatmul.mubr.bf16.gmra.mrb[80].mxu0 %v3389_v52  ;;  %1550 = vmatprep.mubr.bf16.mxu1 %v3390_v53 }
  0xf3   : > { %1839 = vmatprep.mubr.bf16.mxu0 %v3392_v54 }
  0xf9   : > { %1551 = vmatmul.mubr.bf16.gmra.mrb[84].mxu1 %v3394_v55 }
  0xfa   : > { %1840 = vmatmul.mubr.bf16.gmra.mrb[84].mxu0 %v3395_v56  ;;  %1558 = vmatprep.mubr.bf16.mxu1 %v3396_v57 }
  0xfb   : > { %1847 = vmatprep.mubr.bf16.mxu0 %v3398_v58  ;;  %v3442_v58 = vld [vmem:[%s3571_s26 + $0x3a0] ss:$16 sps:$4 sm:$0xff]  }
 0x101   : > { %1559 = vmatmul.mubr.bf16.gmra.mrb[88].mxu1 %v3400_v59 }
 0x102   : > { %1848 = vmatmul.mubr.bf16.gmra.mrb[88].mxu0 %v3401_v60  ;;  %1566 = vmatprep.mubr.bf16.mxu1 %v3402_v61 }
 0x103   : > { %1855 = vmatprep.mubr.bf16.mxu0 %v3404_v62  ;;  %v3443_v62 = vld [vmem:[%s3571_s26 + $0x3a8] ss:$16 sps:$4 sm:$0xff]  }
 0x109   : > { %1567 = vmatmul.mubr.bf16.gmra.mrb[92].mxu1 %v3406_v63 }
 0x10a   : > { %1856 = vmatmul.mubr.bf16.gmra.mrb[92].mxu0 %v3407_v0  ;;  %1574 = vmatprep.mubr.bf16.mxu1 %v3408_v1  ;;  %v3444_v1 = vld [vmem:[%s3571_s26 + $0x3c4] ss:$16 sps:$4 sm:$0xff]  }
 0x10b   : > { %1863 = vmatprep.mubr.bf16.mxu0 %v3410_v2  ;;  %v3446_v2 = vld [vmem:[%s3571_s26 + $0x3cc] ss:$16 sps:$4 sm:$0xff]  }
 0x111   : > { %1575 = vmatmul.mubr.bf16.gmra.mrb[96].mxu1 %v3412_v3 }
 0x112   : > { %1864 = vmatmul.mubr.bf16.gmra.mrb[96].mxu0 %v3413_v4  ;;  %1582 = vmatprep.mubr.bf16.mxu1 %v3414_v5 }
 0x113   : > { %1871 = vmatprep.mubr.bf16.mxu0 %v3416_v6 }
 0x119   : > { %1583 = vmatmul.mubr.bf16.gmra.mrb[100].mxu1 %v3418_v7 }
 0x11a   : > { %1872 = vmatmul.mubr.bf16.gmra.mrb[100].mxu0 %v3419_v8  ;;  %1590 = vmatprep.mubr.bf16.mxu1 %v3420_v9 }
 0x11b   : > { %1879 = vmatprep.mubr.bf16.mxu0 %v3422_v10 }
 0x121   : > { %1591 = vmatmul.mubr.bf16.gmra.mrb[104].mxu1 %v3424_v11 }
 0x122   : > { %1880 = vmatmul.mubr.bf16.gmra.mrb[104].mxu0 %v3425_v12  ;;  %1598 = vmatprep.mubr.bf16.mxu1 %v3426_v13 }
 0x123   : > { %1887 = vmatprep.mubr.bf16.mxu0 %v3428_v14 }
 0x124   : > { %v1384_v15 = vpop.f32.mrb[0].mxu1 }
 0x125   : > { %v1673_v16 = vpop.f32.mrb[0].mxu0  ;;  %v1386_v17 = vpop.f32.mrb[1].mxu1 }
 0x126   : > { %v1674_v19 = vadd.f32 %v1673_v16, %v1384_v15  ;;  %v1675_v20 = vpop.f32.mrb[1].mxu0  ;;  %v1387_v21 = vpop.f32.mrb[2].mxu1  ;;  %v3448_v15 = vld [vmem:[%s3571_s26 + $0x3c0] ss:$16 sps:$4 sm:$0xff]  }
 0x127   : > { %v1676_v24 = vpop.f32.mrb[2].mxu0  ;;  %v1389_v25 = vpop.f32.mrb[3].mxu1 }
 0x128   : > { %v1677_v27 = vadd.f32 %v1676_v24, %v1387_v21  ;;  %v1678_v28 = vpop.f32.mrb[3].mxu0  ;;  %v2321_v29 = vmul.f32 %v1674_v19, %v1674_v19 }
 0x129   : > { %1599 = vmatmul.mubr.bf16.gmra.mrb[108].mxu1 %v3430_v18 }
 0x12a   : > { %v2954_v30 = vpack.c.bf16 %v1677_v27, %v1674_v19  ;;  %v2249_v31 = vadd.f32 %v1677_v27, %v1674_v19  ;;  %v2322_v32 = vmul.f32 %v1677_v27, %v1677_v27  ;;  %1888 = vmatmul.mubr.bf16.gmra.mrb[108].mxu0 %v3431_v22  ;;  %1606 = vmatprep.mubr.bf16.mxu1 %v3432_v23  ;;  %v3449_v19 = vld [vmem:[%s3571_s26 + $0x3c8] ss:$16 sps:$4 sm:$0xff]   ;;  %v3450_v22 = vld [vmem:[%s3571_s26 + $0x3e4] ss:$16 sps:$4 sm:$0xff]   ;;  %v3452_v23 = vld [vmem:[%s3571_s26 + $0x3ec] ss:$16 sps:$4 sm:$0xff]  }
 0x12b   : > { %1895 = vmatprep.mubr.bf16.mxu0 %v3434_v26 }
 0x12c   : > { %2955 = vst [vmem:[%s3724_s29] sm:$0xff] %v2954_v30   ;;  %v2385_v33 = vadd.f32 %v2322_v32, %v2321_v29  ;;  %v1392_v34 = vpop.f32.mrb[4].mxu1 }
 0x12d   : > { %v1681_v35 = vpop.f32.mrb[4].mxu0  ;;  %v1394_v36 = vpop.f32.mrb[5].mxu1 }
 0x12e   : > { %v1682_v38 = vadd.f32 %v1681_v35, %v1392_v34  ;;  %v1683_v39 = vpop.f32.mrb[5].mxu0  ;;  %v1395_v40 = vpop.f32.mrb[6].mxu1  ;;  %v3454_v36 = vld [vmem:[%s3571_s26 + $0x3e0] ss:$16 sps:$4 sm:$0xff]  }
 0x12f   : > { %v1684_v42 = vpop.f32.mrb[6].mxu0  ;;  %v1397_v43 = vpop.f32.mrb[7].mxu1 }
 0x130   : > { %v2250_v46 = vadd.f32 %v2249_v31, %v1682_v38  ;;  %v2323_v47 = vmul.f32 %v1682_v38, %v1682_v38  ;;  %v1685_v48 = vadd.f32 %v1684_v42, %v1395_v40  ;;  %v1686_v49 = vpop.f32.mrb[7].mxu0  ;;  %v3455_v40 = vld [vmem:[%s3571_s26 + $0x3e8] ss:$16 sps:$4 sm:$0xff]  }
 0x131   : > { %1607 = vmatmul.mubr.bf16.gmra.mrb[112].mxu1 %v3436_v37 }
 0x132   : > { %v2386_v50 = vadd.f32 %v2385_v33, %v2323_v47  ;;  %v2959_v51 = vpack.c.bf16 %v1685_v48, %v1682_v38  ;;  %v2251_v52 = vadd.f32 %v2250_v46, %v1685_v48  ;;  %v2324_v53 = vmul.f32 %v1685_v48, %v1685_v48  ;;  %1896 = vmatmul.mubr.bf16.gmra.mrb[112].mxu0 %v3437_v41 }
 0x133   : > { %1614 = vmatprep.mubr.bf16.mxu1 %v3438_v44  ;;  %1903 = vmatprep.mubr.bf16.mxu0 %v3440_v45 }
 0x134   : > { %3111 = vst [vmem:[%s3724_s29 + $0x8] sm:$0xff] %v2959_v51   ;;  %v2387_v54 = vadd.f32 %v2386_v50, %v2324_v53  ;;  %v1400_v55 = vpop.f32.mrb[8].mxu1 }
 0x135   : > { %v1689_v56 = vpop.f32.mrb[8].mxu0  ;;  %v1402_v57 = vpop.f32.mrb[9].mxu1 }
 0x136   : > { %v1690_v59 = vadd.f32 %v1689_v56, %v1400_v55  ;;  %v1691_v60 = vpop.f32.mrb[9].mxu0  ;;  %v1403_v61 = vpop.f32.mrb[10].mxu1 }
 0x137   : > { %v1692_v63 = vpop.f32.mrb[10].mxu0  ;;  %v1405_v0 = vpop.f32.mrb[11].mxu1 }
 0x138   : > { %v2252_v3 = vadd.f32 %v2251_v52, %v1690_v59  ;;  %v2325_v4 = vmul.f32 %v1690_v59, %v1690_v59  ;;  %v1693_v5 = vadd.f32 %v1692_v63, %v1403_v61  ;;  %v1694_v6 = vpop.f32.mrb[11].mxu0 }
 0x139   : > { %1615 = vmatmul.mubr.bf16.gmra.mrb[116].mxu1 %v3442_v58 }
 0x13a   : > { %v2388_v7 = vadd.f32 %v2387_v54, %v2325_v4  ;;  %v2964_v8 = vpack.c.bf16 %v1693_v5, %v1690_v59  ;;  %v2253_v9 = vadd.f32 %v2252_v3, %v1693_v5  ;;  %v2326_v10 = vmul.f32 %v1693_v5, %v1693_v5  ;;  %1904 = vmatmul.mubr.bf16.gmra.mrb[116].mxu0 %v3443_v62 }
 0x13b   : > { %1622 = vmatprep.mubr.bf16.mxu1 %v3444_v1  ;;  %1911 = vmatprep.mubr.bf16.mxu0 %v3446_v2 }
 0x13c   : > { %3112 = vst [vmem:[%s3724_s29 + $0x10] sm:$0xff] %v2964_v8   ;;  %v2389_v11 = vadd.f32 %v2388_v7, %v2326_v10  ;;  %v1408_v12 = vpop.f32.mrb[12].mxu1 }
 0x13d   : > { %v1697_v13 = vpop.f32.mrb[12].mxu0  ;;  %v1410_v14 = vpop.f32.mrb[13].mxu1 }
 0x13e   : > { %v1698_v16 = vadd.f32 %v1697_v13, %v1408_v12  ;;  %v1699_v17 = vpop.f32.mrb[13].mxu0  ;;  %v1411_v18 = vpop.f32.mrb[14].mxu1 }
 0x13f   : > { %v1700_v20 = vpop.f32.mrb[14].mxu0  ;;  %v1413_v21 = vpop.f32.mrb[15].mxu1 }
 0x140   : > { %v2254_v24 = vadd.f32 %v2253_v9, %v1698_v16  ;;  %v2327_v25 = vmul.f32 %v1698_v16, %v1698_v16  ;;  %v1701_v26 = vadd.f32 %v1700_v20, %v1411_v18  ;;  %v1702_v27 = vpop.f32.mrb[15].mxu0 }
 0x141   : > { %1623 = vmatmul.mubr.bf16.gmra.mrb[120].mxu1 %v3448_v15 }
 0x142   : > { %v2390_v28 = vadd.f32 %v2389_v11, %v2327_v25  ;;  %v2969_v29 = vpack.c.bf16 %v1701_v26, %v1698_v16  ;;  %v2255_v30 = vadd.f32 %v2254_v24, %v1701_v26  ;;  %v2328_v31 = vmul.f32 %v1701_v26, %v1701_v26  ;;  %1912 = vmatmul.mubr.bf16.gmra.mrb[120].mxu0 %v3449_v19 }
 0x143   : > { %1630 = vmatprep.mubr.bf16.mxu1 %v3450_v22  ;;  %1919 = vmatprep.mubr.bf16.mxu0 %v3452_v23 }
 0x144   : > { %3113 = vst [vmem:[%s3724_s29 + $0x18] sm:$0xff] %v2969_v29   ;;  %v2391_v32 = vadd.f32 %v2390_v28, %v2328_v31  ;;  %v1416_v33 = vpop.f32.mrb[16].mxu1 }
 0x145   : > { %v1705_v34 = vpop.f32.mrb[16].mxu0  ;;  %v1418_v35 = vpop.f32.mrb[17].mxu1 }
 0x146   : > { %v1706_v37 = vadd.f32 %v1705_v34, %v1416_v33  ;;  %v1707_v38 = vpop.f32.mrb[17].mxu0  ;;  %v1419_v39 = vpop.f32.mrb[18].mxu1 }
 0x147   : > { %v1708_v41 = vpop.f32.mrb[18].mxu0  ;;  %v1421_v42 = vpop.f32.mrb[19].mxu1 }
 0x148   : > { %v2256_v43 = vadd.f32 %v2255_v30, %v1706_v37  ;;  %v2329_v44 = vmul.f32 %v1706_v37, %v1706_v37  ;;  %v1709_v45 = vadd.f32 %v1708_v41, %v1419_v39  ;;  %v1710_v46 = vpop.f32.mrb[19].mxu0 }
 0x149   : > { %1631 = vmatmul.mubr.bf16.gmra.mrb[124].mxu1 %v3454_v36 }
 0x14a   : > { %v2392_v47 = vadd.f32 %v2391_v32, %v2329_v44  ;;  %v2974_v48 = vpack.c.bf16 %v1709_v45, %v1706_v37  ;;  %v2257_v49 = vadd.f32 %v2256_v43, %v1709_v45  ;;  %v2330_v50 = vmul.f32 %v1709_v45, %v1709_v45  ;;  %1920 = vmatmul.mubr.bf16.gmra.mrb[124].mxu0 %v3455_v40 }
 0x14c   : > { %3114 = vst [vmem:[%s3724_s29 + $0x20] sm:$0xff] %v2974_v48   ;;  %v2393_v51 = vadd.f32 %v2392_v47, %v2330_v50  ;;  %v1424_v52 = vpop.f32.mrb[20].mxu1 }
 0x14d   : > { %v1713_v53 = vpop.f32.mrb[20].mxu0  ;;  %v1426_v54 = vpop.f32.mrb[21].mxu1 }
 0x14e   : > { %v1714_v55 = vadd.f32 %v1713_v53, %v1424_v52  ;;  %v1715_v56 = vpop.f32.mrb[21].mxu0  ;;  %v1427_v57 = vpop.f32.mrb[22].mxu1 }
 0x14f   : > { %v1716_v58 = vpop.f32.mrb[22].mxu0  ;;  %v1429_v59 = vpop.f32.mrb[23].mxu1 }
 0x150   : > { %v2258_v60 = vadd.f32 %v2257_v49, %v1714_v55  ;;  %v2331_v61 = vmul.f32 %v1714_v55, %v1714_v55  ;;  %v1717_v62 = vadd.f32 %v1716_v58, %v1427_v57  ;;  %v1718_v63 = vpop.f32.mrb[23].mxu0 }
 0x152   : > { %v2394_v0 = vadd.f32 %v2393_v51, %v2331_v61  ;;  %v2979_v1 = vpack.c.bf16 %v1717_v62, %v1714_v55  ;;  %v2259_v2 = vadd.f32 %v2258_v60, %v1717_v62  ;;  %v2332_v3 = vmul.f32 %v1717_v62, %v1717_v62 }
 0x154   : > { %3115 = vst [vmem:[%s3724_s29 + $0x28] sm:$0xff] %v2979_v1   ;;  %v2395_v4 = vadd.f32 %v2394_v0, %v2332_v3  ;;  %v1432_v5 = vpop.f32.mrb[24].mxu1 }
 0x155   : > { %v1721_v6 = vpop.f32.mrb[24].mxu0  ;;  %v1434_v7 = vpop.f32.mrb[25].mxu1 }
 0x156   : > { %v1722_v8 = vadd.f32 %v1721_v6, %v1432_v5  ;;  %v1723_v9 = vpop.f32.mrb[25].mxu0  ;;  %v1435_v10 = vpop.f32.mrb[26].mxu1 }
 0x157   : > { %v1724_v11 = vpop.f32.mrb[26].mxu0  ;;  %v1437_v12 = vpop.f32.mrb[27].mxu1 }
 0x158   : > { %v2260_v13 = vadd.f32 %v2259_v2, %v1722_v8  ;;  %v2333_v14 = vmul.f32 %v1722_v8, %v1722_v8  ;;  %v1725_v15 = vadd.f32 %v1724_v11, %v1435_v10  ;;  %v1726_v16 = vpop.f32.mrb[27].mxu0 }
 0x15a   : > { %v2396_v17 = vadd.f32 %v2395_v4, %v2333_v14  ;;  %v2984_v18 = vpack.c.bf16 %v1725_v15, %v1722_v8  ;;  %v2261_v19 = vadd.f32 %v2260_v13, %v1725_v15  ;;  %v2334_v20 = vmul.f32 %v1725_v15, %v1725_v15 }
 0x15c   : > { %3116 = vst [vmem:[%s3724_s29 + $0x30] sm:$0xff] %v2984_v18   ;;  %v2397_v21 = vadd.f32 %v2396_v17, %v2334_v20  ;;  %v1440_v22 = vpop.f32.mrb[28].mxu1 }
 0x15d   : > { %v1729_v23 = vpop.f32.mrb[28].mxu0  ;;  %v1442_v24 = vpop.f32.mrb[29].mxu1 }
 0x15e   : > { %v1730_v25 = vadd.f32 %v1729_v23, %v1440_v22  ;;  %v1731_v26 = vpop.f32.mrb[29].mxu0  ;;  %v1443_v27 = vpop.f32.mrb[30].mxu1 }
 0x15f   : > { %v1732_v28 = vpop.f32.mrb[30].mxu0  ;;  %v1445_v29 = vpop.f32.mrb[31].mxu1 }
 0x160   : > { %v2262_v30 = vadd.f32 %v2261_v19, %v1730_v25  ;;  %v2335_v31 = vmul.f32 %v1730_v25, %v1730_v25  ;;  %v1733_v32 = vadd.f32 %v1732_v28, %v1443_v27  ;;  %v1734_v33 = vpop.f32.mrb[31].mxu0 }
 0x162   : > { %v2398_v34 = vadd.f32 %v2397_v21, %v2335_v31  ;;  %v2989_v35 = vpack.c.bf16 %v1733_v32, %v1730_v25  ;;  %v2263_v36 = vadd.f32 %v2262_v30, %v1733_v32  ;;  %v2336_v37 = vmul.f32 %v1733_v32, %v1733_v32 }
 0x164   : > { %3117 = vst [vmem:[%s3724_s29 + $0x38] sm:$0xff] %v2989_v35   ;;  %v2399_v38 = vadd.f32 %v2398_v34, %v2336_v37  ;;  %v1448_v39 = vpop.f32.mrb[32].mxu1 }
 0x165   : > { %v1737_v40 = vpop.f32.mrb[32].mxu0  ;;  %v1450_v41 = vpop.f32.mrb[33].mxu1 }
 0x166   : > { %v1738_v42 = vadd.f32 %v1737_v40, %v1448_v39  ;;  %v1739_v43 = vpop.f32.mrb[33].mxu0  ;;  %v1451_v44 = vpop.f32.mrb[34].mxu1 }
 0x167   : > { %v1740_v45 = vpop.f32.mrb[34].mxu0  ;;  %v1453_v46 = vpop.f32.mrb[35].mxu1 }
 0x168   : > { %v2264_v47 = vadd.f32 %v2263_v36, %v1738_v42  ;;  %v2337_v48 = vmul.f32 %v1738_v42, %v1738_v42  ;;  %v1741_v49 = vadd.f32 %v1740_v45, %v1451_v44  ;;  %v1742_v50 = vpop.f32.mrb[35].mxu0 }
 0x16a   : > { %v2400_v51 = vadd.f32 %v2399_v38, %v2337_v48  ;;  %v2994_v52 = vpack.c.bf16 %v1741_v49, %v1738_v42  ;;  %v2265_v53 = vadd.f32 %v2264_v47, %v1741_v49  ;;  %v2338_v54 = vmul.f32 %v1741_v49, %v1741_v49 }
 0x16c   : > { %3118 = vst [vmem:[%s3724_s29 + $0x40] sm:$0xff] %v2994_v52   ;;  %v2401_v55 = vadd.f32 %v2400_v51, %v2338_v54  ;;  %v1456_v56 = vpop.f32.mrb[36].mxu1 }
 0x16d   : > { %v1745_v57 = vpop.f32.mrb[36].mxu0  ;;  %v1458_v58 = vpop.f32.mrb[37].mxu1 }
 0x16e   : > { %v1746_v59 = vadd.f32 %v1745_v57, %v1456_v56  ;;  %v1747_v60 = vpop.f32.mrb[37].mxu0  ;;  %v1459_v61 = vpop.f32.mrb[38].mxu1 }
 0x16f   : > { %v1748_v62 = vpop.f32.mrb[38].mxu0  ;;  %v1461_v63 = vpop.f32.mrb[39].mxu1 }
 0x170   : > { %v2266_v0 = vadd.f32 %v2265_v53, %v1746_v59  ;;  %v2339_v1 = vmul.f32 %v1746_v59, %v1746_v59  ;;  %v1749_v2 = vadd.f32 %v1748_v62, %v1459_v61  ;;  %v1750_v3 = vpop.f32.mrb[39].mxu0 }
 0x172   : > { %v2402_v4 = vadd.f32 %v2401_v55, %v2339_v1  ;;  %v2999_v5 = vpack.c.bf16 %v1749_v2, %v1746_v59  ;;  %v2267_v6 = vadd.f32 %v2266_v0, %v1749_v2  ;;  %v2340_v7 = vmul.f32 %v1749_v2, %v1749_v2 }
 0x174   : > { %3119 = vst [vmem:[%s3724_s29 + $0x48] sm:$0xff] %v2999_v5   ;;  %v2403_v8 = vadd.f32 %v2402_v4, %v2340_v7  ;;  %v1464_v9 = vpop.f32.mrb[40].mxu1 }
 0x175   : > { %v1753_v10 = vpop.f32.mrb[40].mxu0  ;;  %v1466_v11 = vpop.f32.mrb[41].mxu1 }
 0x176   : > { %v1754_v12 = vadd.f32 %v1753_v10, %v1464_v9  ;;  %v1755_v13 = vpop.f32.mrb[41].mxu0  ;;  %v1467_v14 = vpop.f32.mrb[42].mxu1 }
 0x177   : > { %v1756_v15 = vpop.f32.mrb[42].mxu0  ;;  %v1469_v16 = vpop.f32.mrb[43].mxu1 }
 0x178   : > { %v2268_v17 = vadd.f32 %v2267_v6, %v1754_v12  ;;  %v2341_v18 = vmul.f32 %v1754_v12, %v1754_v12  ;;  %v1757_v19 = vadd.f32 %v1756_v15, %v1467_v14  ;;  %v1758_v20 = vpop.f32.mrb[43].mxu0 }
 0x17a   : > { %v2404_v21 = vadd.f32 %v2403_v8, %v2341_v18  ;;  %v3004_v22 = vpack.c.bf16 %v1757_v19, %v1754_v12  ;;  %v2269_v23 = vadd.f32 %v2268_v17, %v1757_v19  ;;  %v2342_v24 = vmul.f32 %v1757_v19, %v1757_v19 }
 0x17c   : > { %3120 = vst [vmem:[%s3724_s29 + $0x50] sm:$0xff] %v3004_v22   ;;  %v2405_v25 = vadd.f32 %v2404_v21, %v2342_v24  ;;  %v1472_v26 = vpop.f32.mrb[44].mxu1 }
 0x17d   : > { %v1761_v27 = vpop.f32.mrb[44].mxu0  ;;  %v1474_v28 = vpop.f32.mrb[45].mxu1 }
 0x17e   : > { %v1762_v29 = vadd.f32 %v1761_v27, %v1472_v26  ;;  %v1763_v30 = vpop.f32.mrb[45].mxu0  ;;  %v1475_v31 = vpop.f32.mrb[46].mxu1 }
 0x17f   : > { %v1764_v32 = vpop.f32.mrb[46].mxu0  ;;  %v1477_v33 = vpop.f32.mrb[47].mxu1 }
 0x180   : > { %v2270_v34 = vadd.f32 %v2269_v23, %v1762_v29  ;;  %v2343_v35 = vmul.f32 %v1762_v29, %v1762_v29  ;;  %v1765_v36 = vadd.f32 %v1764_v32, %v1475_v31  ;;  %v1766_v37 = vpop.f32.mrb[47].mxu0 }
 0x182   : > { %v2406_v38 = vadd.f32 %v2405_v25, %v2343_v35  ;;  %v3009_v39 = vpack.c.bf16 %v1765_v36, %v1762_v29  ;;  %v2271_v40 = vadd.f32 %v2270_v34, %v1765_v36  ;;  %v2344_v41 = vmul.f32 %v1765_v36, %v1765_v36 }
 0x184   : > { %3121 = vst [vmem:[%s3724_s29 + $0x58] sm:$0xff] %v3009_v39   ;;  %v2407_v42 = vadd.f32 %v2406_v38, %v2344_v41  ;;  %v1480_v43 = vpop.f32.mrb[48].mxu1 }
 0x185   : > { %v1769_v44 = vpop.f32.mrb[48].mxu0  ;;  %v1482_v45 = vpop.f32.mrb[49].mxu1 }
 0x186   : > { %v1770_v46 = vadd.f32 %v1769_v44, %v1480_v43  ;;  %v1771_v47 = vpop.f32.mrb[49].mxu0  ;;  %v1483_v48 = vpop.f32.mrb[50].mxu1 }
 0x187   : > { %v1772_v49 = vpop.f32.mrb[50].mxu0  ;;  %v1485_v50 = vpop.f32.mrb[51].mxu1 }
 0x188   : > { %v2272_v51 = vadd.f32 %v2271_v40, %v1770_v46  ;;  %v2345_v52 = vmul.f32 %v1770_v46, %v1770_v46  ;;  %v1773_v53 = vadd.f32 %v1772_v49, %v1483_v48  ;;  %v1774_v54 = vpop.f32.mrb[51].mxu0  ;;  %v3481_v48 = vmov 0.0  }
 0x189   : > { %324 = vst [vmem:[%s3759_s6] sm:$0x1] %v3481_v48  ;;  %325 = vst [vmem:[%s3765_s9] sm:$0x1] %v3481_v48 }
 0x18a   : > { %v2408_v55 = vadd.f32 %v2407_v42, %v2345_v52  ;;  %v3014_v56 = vpack.c.bf16 %v1773_v53, %v1770_v46  ;;  %v2273_v57 = vadd.f32 %v2272_v51, %v1773_v53  ;;  %v2346_v58 = vmul.f32 %v1773_v53, %v1773_v53 }
 0x18c   : > { %3122 = vst [vmem:[%s3724_s29 + $0x60] sm:$0xff] %v3014_v56   ;;  %v2409_v59 = vadd.f32 %v2408_v55, %v2346_v58  ;;  %v1488_v60 = vpop.f32.mrb[52].mxu1 }
 0x18d   : > { %v1777_v61 = vpop.f32.mrb[52].mxu0  ;;  %v1490_v62 = vpop.f32.mrb[53].mxu1 }
 0x18e   : > { %v1778_v63 = vadd.f32 %v1777_v61, %v1488_v60  ;;  %v1779_v0 = vpop.f32.mrb[53].mxu0  ;;  %v1491_v1 = vpop.f32.mrb[54].mxu1 }
 0x18f   : > { %v1780_v2 = vpop.f32.mrb[54].mxu0  ;;  %v1493_v3 = vpop.f32.mrb[55].mxu1 }
 0x190   : > { %v2274_v4 = vadd.f32 %v2273_v57, %v1778_v63  ;;  %v2347_v5 = vmul.f32 %v1778_v63, %v1778_v63  ;;  %v1781_v6 = vadd.f32 %v1780_v2, %v1491_v1  ;;  %v1782_v7 = vpop.f32.mrb[55].mxu0 }
 0x192   : > { %v2410_v8 = vadd.f32 %v2409_v59, %v2347_v5  ;;  %v3019_v9 = vpack.c.bf16 %v1781_v6, %v1778_v63  ;;  %v2275_v10 = vadd.f32 %v2274_v4, %v1781_v6  ;;  %v2348_v11 = vmul.f32 %v1781_v6, %v1781_v6 }
 0x194   : > { %3123 = vst [vmem:[%s3724_s29 + $0x68] sm:$0xff] %v3019_v9   ;;  %v2411_v12 = vadd.f32 %v2410_v8, %v2348_v11  ;;  %v1496_v13 = vpop.f32.mrb[56].mxu1 }
 0x195   : > { %v1785_v14 = vpop.f32.mrb[56].mxu0  ;;  %v1498_v15 = vpop.f32.mrb[57].mxu1 }
 0x196   : > { %v1786_v16 = vadd.f32 %v1785_v14, %v1496_v13  ;;  %v1787_v17 = vpop.f32.mrb[57].mxu0  ;;  %v1499_v18 = vpop.f32.mrb[58].mxu1 }
 0x197   : > { %v1788_v19 = vpop.f32.mrb[58].mxu0  ;;  %v1501_v20 = vpop.f32.mrb[59].mxu1 }
 0x198   : > { %v2276_v21 = vadd.f32 %v2275_v10, %v1786_v16  ;;  %v2349_v22 = vmul.f32 %v1786_v16, %v1786_v16  ;;  %v1789_v23 = vadd.f32 %v1788_v19, %v1499_v18  ;;  %v1790_v24 = vpop.f32.mrb[59].mxu0 }
 0x19a   : > { %v2412_v25 = vadd.f32 %v2411_v12, %v2349_v22  ;;  %v3024_v26 = vpack.c.bf16 %v1789_v23, %v1786_v16  ;;  %v2277_v27 = vadd.f32 %v2276_v21, %v1789_v23  ;;  %v2350_v28 = vmul.f32 %v1789_v23, %v1789_v23 }
 0x19c   : > { %3124 = vst [vmem:[%s3724_s29 + $0x70] sm:$0xff] %v3024_v26   ;;  %v2413_v29 = vadd.f32 %v2412_v25, %v2350_v28  ;;  %v1504_v30 = vpop.f32.mrb[60].mxu1 }
 0x19d   : > { %v1793_v31 = vpop.f32.mrb[60].mxu0  ;;  %v1506_v32 = vpop.f32.mrb[61].mxu1 }
 0x19e   : > { %v1794_v33 = vadd.f32 %v1793_v31, %v1504_v30  ;;  %v1795_v34 = vpop.f32.mrb[61].mxu0  ;;  %v1507_v35 = vpop.f32.mrb[62].mxu1 }
 0x19f   : > { %v1796_v36 = vpop.f32.mrb[62].mxu0  ;;  %v1509_v37 = vpop.f32.mrb[63].mxu1 }
 0x1a0   : > { %v2278_v38 = vadd.f32 %v2277_v27, %v1794_v33  ;;  %v2351_v39 = vmul.f32 %v1794_v33, %v1794_v33  ;;  %v1797_v40 = vadd.f32 %v1796_v36, %v1507_v35  ;;  %v1798_v41 = vpop.f32.mrb[63].mxu0 }
 0x1a2   : > { %v2414_v42 = vadd.f32 %v2413_v29, %v2351_v39  ;;  %v3029_v43 = vpack.c.bf16 %v1797_v40, %v1794_v33  ;;  %v2279_v44 = vadd.f32 %v2278_v38, %v1797_v40  ;;  %v2352_v45 = vmul.f32 %v1797_v40, %v1797_v40 }
 0x1a4   : > { %3125 = vst [vmem:[%s3724_s29 + $0x78] sm:$0xff] %v3029_v43   ;;  %v2415_v46 = vadd.f32 %v2414_v42, %v2352_v45  ;;  %v1512_v47 = vpop.f32.mrb[64].mxu1 }
 0x1a5   : > { %v1801_v49 = vpop.f32.mrb[64].mxu0  ;;  %v1514_v50 = vpop.f32.mrb[65].mxu1 }
 0x1a6   : > { %v1802_v51 = vadd.f32 %v1801_v49, %v1512_v47  ;;  %v1803_v52 = vpop.f32.mrb[65].mxu0  ;;  %v1515_v53 = vpop.f32.mrb[66].mxu1 }
 0x1a7   : > { %v1804_v54 = vpop.f32.mrb[66].mxu0  ;;  %v1517_v55 = vpop.f32.mrb[67].mxu1 }
 0x1a8   : > { %v2280_v56 = vadd.f32 %v2279_v44, %v1802_v51  ;;  %v2353_v57 = vmul.f32 %v1802_v51, %v1802_v51  ;;  %v1805_v58 = vadd.f32 %v1804_v54, %v1515_v53  ;;  %v1806_v59 = vpop.f32.mrb[67].mxu0 }
 0x1aa   : > { %v2416_v60 = vadd.f32 %v2415_v46, %v2353_v57  ;;  %v3034_v61 = vpack.c.bf16 %v1805_v58, %v1802_v51  ;;  %v2281_v62 = vadd.f32 %v2280_v56, %v1805_v58  ;;  %v2354_v63 = vmul.f32 %v1805_v58, %v1805_v58 }
 0x1ac   : > { %3126 = vst [vmem:[%s3724_s29 + $0x80] sm:$0xff] %v3034_v61   ;;  %v2417_v0 = vadd.f32 %v2416_v60, %v2354_v63  ;;  %v1520_v1 = vpop.f32.mrb[68].mxu1 }
 0x1ad   : > { %v1809_v2 = vpop.f32.mrb[68].mxu0  ;;  %v1522_v3 = vpop.f32.mrb[69].mxu1 }
 0x1ae   : > { %v1810_v4 = vadd.f32 %v1809_v2, %v1520_v1  ;;  %v1811_v5 = vpop.f32.mrb[69].mxu0  ;;  %v1523_v6 = vpop.f32.mrb[70].mxu1 }
 0x1af   : > { %v1812_v7 = vpop.f32.mrb[70].mxu0  ;;  %v1525_v8 = vpop.f32.mrb[71].mxu1 }
 0x1b0   : > { %v2282_v9 = vadd.f32 %v2281_v62, %v1810_v4  ;;  %v2355_v10 = vmul.f32 %v1810_v4, %v1810_v4  ;;  %v1813_v11 = vadd.f32 %v1812_v7, %v1523_v6  ;;  %v1814_v12 = vpop.f32.mrb[71].mxu0 }
 0x1b2   : > { %v2418_v13 = vadd.f32 %v2417_v0, %v2355_v10  ;;  %v3039_v14 = vpack.c.bf16 %v1813_v11, %v1810_v4  ;;  %v2283_v15 = vadd.f32 %v2282_v9, %v1813_v11  ;;  %v2356_v16 = vmul.f32 %v1813_v11, %v1813_v11 }
 0x1b4   : > { %3127 = vst [vmem:[%s3724_s29 + $0x88] sm:$0xff] %v3039_v14   ;;  %v2419_v17 = vadd.f32 %v2418_v13, %v2356_v16  ;;  %v1528_v18 = vpop.f32.mrb[72].mxu1 }
 0x1b5   : > { %v1817_v19 = vpop.f32.mrb[72].mxu0  ;;  %v1530_v20 = vpop.f32.mrb[73].mxu1 }
 0x1b6   : > { %v1818_v21 = vadd.f32 %v1817_v19, %v1528_v18  ;;  %v1819_v22 = vpop.f32.mrb[73].mxu0  ;;  %v1531_v23 = vpop.f32.mrb[74].mxu1 }
 0x1b7   : > { %v1820_v24 = vpop.f32.mrb[74].mxu0  ;;  %v1533_v25 = vpop.f32.mrb[75].mxu1 }
 0x1b8   : > { %v2284_v26 = vadd.f32 %v2283_v15, %v1818_v21  ;;  %v2357_v27 = vmul.f32 %v1818_v21, %v1818_v21  ;;  %v1821_v28 = vadd.f32 %v1820_v24, %v1531_v23  ;;  %v1822_v29 = vpop.f32.mrb[75].mxu0 }
 0x1ba   : > { %v2420_v30 = vadd.f32 %v2419_v17, %v2357_v27  ;;  %v3044_v31 = vpack.c.bf16 %v1821_v28, %v1818_v21  ;;  %v2285_v32 = vadd.f32 %v2284_v26, %v1821_v28  ;;  %v2358_v33 = vmul.f32 %v1821_v28, %v1821_v28 }
 0x1bc   : > { %3128 = vst [vmem:[%s3724_s29 + $0x90] sm:$0xff] %v3044_v31   ;;  %v2421_v34 = vadd.f32 %v2420_v30, %v2358_v33  ;;  %v1536_v35 = vpop.f32.mrb[76].mxu1 }
 0x1bd   : > { %v1825_v36 = vpop.f32.mrb[76].mxu0  ;;  %v1538_v37 = vpop.f32.mrb[77].mxu1 }
 0x1be   : > { %v1826_v38 = vadd.f32 %v1825_v36, %v1536_v35  ;;  %v1827_v39 = vpop.f32.mrb[77].mxu0  ;;  %v1539_v40 = vpop.f32.mrb[78].mxu1 }
 0x1bf   : > { %v1828_v41 = vpop.f32.mrb[78].mxu0  ;;  %v1541_v42 = vpop.f32.mrb[79].mxu1 }
 0x1c0   : > { %v2286_v43 = vadd.f32 %v2285_v32, %v1826_v38  ;;  %v2359_v44 = vmul.f32 %v1826_v38, %v1826_v38  ;;  %v1829_v45 = vadd.f32 %v1828_v41, %v1539_v40  ;;  %v1830_v46 = vpop.f32.mrb[79].mxu0 }
 0x1c2   : > { %v2422_v47 = vadd.f32 %v2421_v34, %v2359_v44  ;;  %v3049_v48 = vpack.c.bf16 %v1829_v45, %v1826_v38  ;;  %v2287_v49 = vadd.f32 %v2286_v43, %v1829_v45  ;;  %v2360_v50 = vmul.f32 %v1829_v45, %v1829_v45 }
 0x1c4   : > { %3129 = vst [vmem:[%s3724_s29 + $0x98] sm:$0xff] %v3049_v48   ;;  %v2423_v51 = vadd.f32 %v2422_v47, %v2360_v50  ;;  %v1544_v52 = vpop.f32.mrb[80].mxu1 }
 0x1c5   : > { %v1833_v53 = vpop.f32.mrb[80].mxu0  ;;  %v1546_v54 = vpop.f32.mrb[81].mxu1 }
 0x1c6   : > { %v1834_v55 = vadd.f32 %v1833_v53, %v1544_v52  ;;  %v1835_v56 = vpop.f32.mrb[81].mxu0  ;;  %v1547_v57 = vpop.f32.mrb[82].mxu1 }
 0x1c7   : > { %v1836_v58 = vpop.f32.mrb[82].mxu0  ;;  %v1549_v59 = vpop.f32.mrb[83].mxu1 }
 0x1c8   : > { %v2288_v60 = vadd.f32 %v2287_v49, %v1834_v55  ;;  %v2361_v61 = vmul.f32 %v1834_v55, %v1834_v55  ;;  %v1837_v62 = vadd.f32 %v1836_v58, %v1547_v57  ;;  %v1838_v63 = vpop.f32.mrb[83].mxu0 }
 0x1ca   : > { %v2424_v0 = vadd.f32 %v2423_v51, %v2361_v61  ;;  %v3054_v1 = vpack.c.bf16 %v1837_v62, %v1834_v55  ;;  %v2289_v2 = vadd.f32 %v2288_v60, %v1837_v62  ;;  %v2362_v3 = vmul.f32 %v1837_v62, %v1837_v62 }
 0x1cc   : > { %3130 = vst [vmem:[%s3724_s29 + $0xa0] sm:$0xff] %v3054_v1   ;;  %v2425_v4 = vadd.f32 %v2424_v0, %v2362_v3  ;;  %v1552_v5 = vpop.f32.mrb[84].mxu1 }
 0x1cd   : > { %v1841_v6 = vpop.f32.mrb[84].mxu0  ;;  %v1554_v7 = vpop.f32.mrb[85].mxu1 }
 0x1ce   : > { %v1842_v8 = vadd.f32 %v1841_v6, %v1552_v5  ;;  %v1843_v9 = vpop.f32.mrb[85].mxu0  ;;  %v1555_v10 = vpop.f32.mrb[86].mxu1 }
 0x1cf   : > { %v1844_v11 = vpop.f32.mrb[86].mxu0  ;;  %v1557_v12 = vpop.f32.mrb[87].mxu1 }
 0x1d0   : > { %v2290_v13 = vadd.f32 %v2289_v2, %v1842_v8  ;;  %v2363_v14 = vmul.f32 %v1842_v8, %v1842_v8  ;;  %v1845_v15 = vadd.f32 %v1844_v11, %v1555_v10  ;;  %v1846_v16 = vpop.f32.mrb[87].mxu0 }
 0x1d2   : > { %v2426_v17 = vadd.f32 %v2425_v4, %v2363_v14  ;;  %v3059_v18 = vpack.c.bf16 %v1845_v15, %v1842_v8  ;;  %v2291_v19 = vadd.f32 %v2290_v13, %v1845_v15  ;;  %v2364_v20 = vmul.f32 %v1845_v15, %v1845_v15 }
 0x1d4   : > { %3131 = vst [vmem:[%s3724_s29 + $0xa8] sm:$0xff] %v3059_v18   ;;  %v2427_v21 = vadd.f32 %v2426_v17, %v2364_v20  ;;  %v1560_v22 = vpop.f32.mrb[88].mxu1 }
 0x1d5   : > { %v1849_v23 = vpop.f32.mrb[88].mxu0  ;;  %v1562_v24 = vpop.f32.mrb[89].mxu1 }
 0x1d6   : > { %v1850_v25 = vadd.f32 %v1849_v23, %v1560_v22  ;;  %v1851_v26 = vpop.f32.mrb[89].mxu0  ;;  %v1563_v27 = vpop.f32.mrb[90].mxu1 }
 0x1d7   : > { %v1852_v28 = vpop.f32.mrb[90].mxu0  ;;  %v1565_v29 = vpop.f32.mrb[91].mxu1 }
 0x1d8   : > { %v2292_v30 = vadd.f32 %v2291_v19, %v1850_v25  ;;  %v2365_v31 = vmul.f32 %v1850_v25, %v1850_v25  ;;  %v1853_v32 = vadd.f32 %v1852_v28, %v1563_v27  ;;  %v1854_v33 = vpop.f32.mrb[91].mxu0 }
 0x1da   : > { %v2428_v34 = vadd.f32 %v2427_v21, %v2365_v31  ;;  %v3064_v35 = vpack.c.bf16 %v1853_v32, %v1850_v25  ;;  %v2293_v36 = vadd.f32 %v2292_v30, %v1853_v32  ;;  %v2366_v37 = vmul.f32 %v1853_v32, %v1853_v32 }
 0x1dc   : > { %3132 = vst [vmem:[%s3724_s29 + $0xb0] sm:$0xff] %v3064_v35   ;;  %v2429_v38 = vadd.f32 %v2428_v34, %v2366_v37  ;;  %v1568_v39 = vpop.f32.mrb[92].mxu1 }
 0x1dd   : > { %v1857_v40 = vpop.f32.mrb[92].mxu0  ;;  %v1570_v41 = vpop.f32.mrb[93].mxu1 }
 0x1de   : > { %v1858_v42 = vadd.f32 %v1857_v40, %v1568_v39  ;;  %v1859_v43 = vpop.f32.mrb[93].mxu0  ;;  %v1571_v44 = vpop.f32.mrb[94].mxu1 }
 0x1df   : > { %v1860_v45 = vpop.f32.mrb[94].mxu0  ;;  %v1573_v46 = vpop.f32.mrb[95].mxu1 }
 0x1e0   : > { %v2294_v47 = vadd.f32 %v2293_v36, %v1858_v42  ;;  %v2367_v48 = vmul.f32 %v1858_v42, %v1858_v42  ;;  %v1861_v49 = vadd.f32 %v1860_v45, %v1571_v44  ;;  %v1862_v50 = vpop.f32.mrb[95].mxu0 }
 0x1e2   : > { %v2430_v51 = vadd.f32 %v2429_v38, %v2367_v48  ;;  %v3069_v52 = vpack.c.bf16 %v1861_v49, %v1858_v42  ;;  %v2295_v53 = vadd.f32 %v2294_v47, %v1861_v49  ;;  %v2368_v54 = vmul.f32 %v1861_v49, %v1861_v49 }
 0x1e4   : > { %3133 = vst [vmem:[%s3724_s29 + $0xb8] sm:$0xff] %v3069_v52   ;;  %v2431_v55 = vadd.f32 %v2430_v51, %v2368_v54  ;;  %v1576_v56 = vpop.f32.mrb[96].mxu1 }
 0x1e5   : > { %v1865_v57 = vpop.f32.mrb[96].mxu0  ;;  %v1578_v58 = vpop.f32.mrb[97].mxu1 }
 0x1e6   : > { %v1866_v59 = vadd.f32 %v1865_v57, %v1576_v56  ;;  %v1867_v60 = vpop.f32.mrb[97].mxu0  ;;  %v1579_v61 = vpop.f32.mrb[98].mxu1 }
 0x1e7   : > { %v1868_v62 = vpop.f32.mrb[98].mxu0  ;;  %v1581_v63 = vpop.f32.mrb[99].mxu1 }
 0x1e8   : > { %v2296_v0 = vadd.f32 %v2295_v53, %v1866_v59  ;;  %v2369_v1 = vmul.f32 %v1866_v59, %v1866_v59  ;;  %v1869_v2 = vadd.f32 %v1868_v62, %v1579_v61  ;;  %v1870_v3 = vpop.f32.mrb[99].mxu0 }
 0x1ea   : > { %v2432_v4 = vadd.f32 %v2431_v55, %v2369_v1  ;;  %v3074_v5 = vpack.c.bf16 %v1869_v2, %v1866_v59  ;;  %v2297_v6 = vadd.f32 %v2296_v0, %v1869_v2  ;;  %v2370_v7 = vmul.f32 %v1869_v2, %v1869_v2 }
 0x1ec   : > { %3134 = vst [vmem:[%s3724_s29 + $0xc0] sm:$0xff] %v3074_v5   ;;  %v2433_v8 = vadd.f32 %v2432_v4, %v2370_v7  ;;  %v1584_v9 = vpop.f32.mrb[100].mxu1 }
 0x1ed   : > { %v1873_v10 = vpop.f32.mrb[100].mxu0  ;;  %v1586_v11 = vpop.f32.mrb[101].mxu1 }
 0x1ee   : > { %v1874_v12 = vadd.f32 %v1873_v10, %v1584_v9  ;;  %v1875_v13 = vpop.f32.mrb[101].mxu0  ;;  %v1587_v14 = vpop.f32.mrb[102].mxu1 }
 0x1ef   : > { %v1876_v15 = vpop.f32.mrb[102].mxu0  ;;  %v1589_v16 = vpop.f32.mrb[103].mxu1 }
 0x1f0   : > { %v2298_v17 = vadd.f32 %v2297_v6, %v1874_v12  ;;  %v2371_v18 = vmul.f32 %v1874_v12, %v1874_v12  ;;  %v1877_v19 = vadd.f32 %v1876_v15, %v1587_v14  ;;  %v1878_v20 = vpop.f32.mrb[103].mxu0 }
 0x1f2   : > { %v2434_v21 = vadd.f32 %v2433_v8, %v2371_v18  ;;  %v3079_v22 = vpack.c.bf16 %v1877_v19, %v1874_v12  ;;  %v2299_v23 = vadd.f32 %v2298_v17, %v1877_v19  ;;  %v2372_v24 = vmul.f32 %v1877_v19, %v1877_v19 }
 0x1f4   : > { %3135 = vst [vmem:[%s3724_s29 + $0xc8] sm:$0xff] %v3079_v22   ;;  %v2435_v25 = vadd.f32 %v2434_v21, %v2372_v24  ;;  %v1592_v26 = vpop.f32.mrb[104].mxu1 }
 0x1f5   : > { %v1881_v27 = vpop.f32.mrb[104].mxu0  ;;  %v1594_v28 = vpop.f32.mrb[105].mxu1 }
 0x1f6   : > { %v1882_v29 = vadd.f32 %v1881_v27, %v1592_v26  ;;  %v1883_v30 = vpop.f32.mrb[105].mxu0  ;;  %v1595_v31 = vpop.f32.mrb[106].mxu1 }
 0x1f7   : > { %v1884_v32 = vpop.f32.mrb[106].mxu0  ;;  %v1597_v33 = vpop.f32.mrb[107].mxu1 }
 0x1f8   : > { %v2300_v34 = vadd.f32 %v2299_v23, %v1882_v29  ;;  %v2373_v35 = vmul.f32 %v1882_v29, %v1882_v29  ;;  %v1885_v36 = vadd.f32 %v1884_v32, %v1595_v31  ;;  %v1886_v37 = vpop.f32.mrb[107].mxu0 }
 0x1fa   : > { %v2436_v38 = vadd.f32 %v2435_v25, %v2373_v35  ;;  %v3084_v39 = vpack.c.bf16 %v1885_v36, %v1882_v29  ;;  %v2301_v40 = vadd.f32 %v2300_v34, %v1885_v36  ;;  %v2374_v41 = vmul.f32 %v1885_v36, %v1885_v36 }
 0x1fc   : > { %3136 = vst [vmem:[%s3724_s29 + $0xd0] sm:$0xff] %v3084_v39   ;;  %v2437_v42 = vadd.f32 %v2436_v38, %v2374_v41  ;;  %v1600_v43 = vpop.f32.mrb[108].mxu1 }
 0x1fd   : > { %v1889_v44 = vpop.f32.mrb[108].mxu0  ;;  %v1602_v45 = vpop.f32.mrb[109].mxu1 }
 0x1fe   : > { %v1890_v46 = vadd.f32 %v1889_v44, %v1600_v43  ;;  %v1891_v47 = vpop.f32.mrb[109].mxu0  ;;  %v1603_v48 = vpop.f32.mrb[110].mxu1 }
 0x1ff   : > { %v1892_v49 = vpop.f32.mrb[110].mxu0  ;;  %v1605_v50 = vpop.f32.mrb[111].mxu1 }
 0x200   : > { %v2302_v51 = vadd.f32 %v2301_v40, %v1890_v46  ;;  %v2375_v52 = vmul.f32 %v1890_v46, %v1890_v46  ;;  %v1893_v53 = vadd.f32 %v1892_v49, %v1603_v48  ;;  %v1894_v54 = vpop.f32.mrb[111].mxu0 }
 0x202   : > { %v2438_v55 = vadd.f32 %v2437_v42, %v2375_v52  ;;  %v3089_v56 = vpack.c.bf16 %v1893_v53, %v1890_v46  ;;  %v2303_v57 = vadd.f32 %v2302_v51, %v1893_v53  ;;  %v2376_v58 = vmul.f32 %v1893_v53, %v1893_v53 }
 0x204   : > { %3137 = vst [vmem:[%s3724_s29 + $0xd8] sm:$0xff] %v3089_v56   ;;  %v2439_v59 = vadd.f32 %v2438_v55, %v2376_v58  ;;  %v1608_v60 = vpop.f32.mrb[112].mxu1 }
 0x205   : > { %v1897_v61 = vpop.f32.mrb[112].mxu0  ;;  %v1610_v62 = vpop.f32.mrb[113].mxu1 }
 0x206   : > { %v1898_v63 = vadd.f32 %v1897_v61, %v1608_v60  ;;  %v1899_v0 = vpop.f32.mrb[113].mxu0  ;;  %v1611_v1 = vpop.f32.mrb[114].mxu1 }
 0x207   : > { %v1900_v2 = vpop.f32.mrb[114].mxu0  ;;  %v1613_v3 = vpop.f32.mrb[115].mxu1 }
 0x208   : > { %v2304_v4 = vadd.f32 %v2303_v57, %v1898_v63  ;;  %v2377_v5 = vmul.f32 %v1898_v63, %v1898_v63  ;;  %v1901_v6 = vadd.f32 %v1900_v2, %v1611_v1  ;;  %v1902_v7 = vpop.f32.mrb[115].mxu0 }
 0x20a   : > { %v2440_v8 = vadd.f32 %v2439_v59, %v2377_v5  ;;  %v3094_v9 = vpack.c.bf16 %v1901_v6, %v1898_v63  ;;  %v2305_v10 = vadd.f32 %v2304_v4, %v1901_v6  ;;  %v2378_v11 = vmul.f32 %v1901_v6, %v1901_v6 }
 0x20c   : > { %3138 = vst [vmem:[%s3724_s29 + $0xe0] sm:$0xff] %v3094_v9   ;;  %v2441_v12 = vadd.f32 %v2440_v8, %v2378_v11  ;;  %v1616_v13 = vpop.f32.mrb[116].mxu1  ;;  %v2248_v9 = vld [vmem:[%s3759_s6] sm:$0x1] }
 0x20d   : > { %v1905_v14 = vpop.f32.mrb[116].mxu0  ;;  %v1618_v15 = vpop.f32.mrb[117].mxu1 }
 0x20e   : > { %v1906_v16 = vadd.f32 %v1905_v14, %v1616_v13  ;;  %v1907_v17 = vpop.f32.mrb[117].mxu0  ;;  %v1619_v18 = vpop.f32.mrb[118].mxu1 }
 0x20f   : > { %v1908_v19 = vpop.f32.mrb[118].mxu0  ;;  %v1621_v20 = vpop.f32.mrb[119].mxu1 }
 0x210   : > { %v2306_v21 = vadd.f32 %v2305_v10, %v1906_v16  ;;  %v2379_v22 = vmul.f32 %v1906_v16, %v1906_v16  ;;  %v1909_v23 = vadd.f32 %v1908_v19, %v1619_v18  ;;  %v1910_v24 = vpop.f32.mrb[119].mxu0 }
 0x212   : > { %v2442_v25 = vadd.f32 %v2441_v12, %v2379_v22  ;;  %v3099_v26 = vpack.c.bf16 %v1909_v23, %v1906_v16  ;;  %v2307_v27 = vadd.f32 %v2306_v21, %v1909_v23  ;;  %v2380_v28 = vmul.f32 %v1909_v23, %v1909_v23  ;;  %v2320_v12 = vld [vmem:[%s3765_s9] sm:$0x1] }
 0x214   : > { %3139 = vst [vmem:[%s3724_s29 + $0xe8] sm:$0xff] %v3099_v26   ;;  %v2443_v29 = vadd.f32 %v2442_v25, %v2380_v28  ;;  %v1624_v30 = vpop.f32.mrb[120].mxu1 }
 0x215   : > { %v1913_v31 = vpop.f32.mrb[120].mxu0  ;;  %v1626_v32 = vpop.f32.mrb[121].mxu1 }
 0x216   : > { %v1914_v33 = vadd.f32 %v1913_v31, %v1624_v30  ;;  %v1915_v34 = vpop.f32.mrb[121].mxu0  ;;  %v1627_v35 = vpop.f32.mrb[122].mxu1 }
 0x217   : > { %v1916_v36 = vpop.f32.mrb[122].mxu0  ;;  %v1629_v37 = vpop.f32.mrb[123].mxu1 }
 0x218   : > { %v2308_v38 = vadd.f32 %v2307_v27, %v1914_v33  ;;  %v2381_v39 = vmul.f32 %v1914_v33, %v1914_v33  ;;  %v1917_v40 = vadd.f32 %v1916_v36, %v1627_v35  ;;  %v1918_v41 = vpop.f32.mrb[123].mxu0 }
 0x21a   : > { %v2444_v42 = vadd.f32 %v2443_v29, %v2381_v39  ;;  %v3104_v43 = vpack.c.bf16 %v1917_v40, %v1914_v33  ;;  %v2309_v44 = vadd.f32 %v2308_v38, %v1917_v40  ;;  %v2382_v45 = vmul.f32 %v1917_v40, %v1917_v40 }
 0x21c   : > { %3140 = vst [vmem:[%s3724_s29 + $0xf0] sm:$0xff] %v3104_v43   ;;  %v2445_v46 = vadd.f32 %v2444_v42, %v2382_v45  ;;  %v1632_v47 = vpop.f32.mrb[124].mxu1 }
 0x21d   : > { %v1921_v48 = vpop.f32.mrb[124].mxu0  ;;  %v1634_v49 = vpop.f32.mrb[125].mxu1 }
 0x21e   : > { %v1922_v50 = vadd.f32 %v1921_v48, %v1632_v47  ;;  %v1923_v51 = vpop.f32.mrb[125].mxu0  ;;  %v1635_v52 = vpop.f32.mrb[126].mxu1 }
 0x21f   : > { %v1924_v53 = vpop.f32.mrb[126].mxu0  ;;  %v1637_v54 = vpop.f32.mrb[127].mxu1 }
 0x220   : > { %v2310_v55 = vadd.f32 %v2309_v44, %v1922_v50  ;;  %v2383_v56 = vmul.f32 %v1922_v50, %v1922_v50  ;;  %v1925_v57 = vadd.f32 %v1924_v53, %v1635_v52  ;;  %v1926_v58 = vpop.f32.mrb[127].mxu0 }
 0x222   : > { %v2446_v59 = vadd.f32 %v2445_v46, %v2383_v56  ;;  %v3109_v60 = vpack.c.bf16 %v1925_v57, %v1922_v50  ;;  %v2311_v61 = vadd.f32 %v2310_v55, %v1925_v57  ;;  %v2384_v62 = vmul.f32 %v1925_v57, %v1925_v57 }
 0x224   : > { %3141 = vst [vmem:[%s3724_s29 + $0xf8] sm:$0xff] %v3109_v60   ;;  %v2312_v63 = vrot.slane %v2311_v61, 4  ;;  %v2447_v0 = vadd.f32 %v2446_v59, %v2384_v62 }
 0x226   : > { %v2313_v1 = vadd.f32 %v2312_v63, %v2311_v61  ;;  %v2448_v2 = vrot.slane %v2447_v0, 4 }
 0x228   : > { %v2314_v3 = vrot.slane %v2313_v1, 2  ;;  %v2449_v4 = vadd.f32 %v2448_v2, %v2447_v0 }
 0x22a   : > { %v2315_v5 = vadd.f32 %v2314_v3, %v2313_v1  ;;  %v2450_v6 = vrot.slane %v2449_v4, 2 }
 0x22c   : > { %v2316_v7 = vrot.slane %v2315_v5, 1  ;;  %v2451_v8 = vadd.f32 %v2450_v6, %v2449_v4 }
 0x22e   : > { %v2317_v10 = vadd.f32 %v2316_v7, %v2315_v5  ;;  %v2452_v11 = vrot.slane %v2451_v8, 1 }
 0x230   : > { %v2318_v13 = vadd.f32 %v2317_v10, %v2248_v9  ;;  %v2453_v14 = vadd.f32 %v2452_v11, %v2451_v8 }
 0x232   : > { %2319 = vst [vmem:[%s3759_s6] sm:$0x1] %v2318_v13  ;;  %v2454_v15 = vadd.f32 %v2453_v14, %v2320_v12 }
 0x234   : > { %2455 = vst [vmem:[%s3765_s9] sm:$0x1] %v2454_v15 }
 0x235 PF: > { %s15_s17 = sadd.s32 1, %s3478_s17   ;;  %s3804_s15 = smov %s3474_s16 }
 0x236   : > { %p12_p5 = scmp.ge.s32.totalorder %s15_s17, 6   ;;  %s3805_s16 = smov %s3807_s18 }
 0x238   :  { %14 = sbr.rel (!%p12_p5) target bundleno = 2 (0x2), region = 89 }

// kernel: generator_forward.16
= control target key start
LH: loop header
LB: loop body
LE: loop exit
PB: predicated region body
PF: predicated region fallthrough
CT: control target
= control target key end

     0   :  { %s2672_s12 = smov 0   ;;  %s2674_s13 = smov 0   ;;  %s3120_s0 = inlined_call_operand.vmem [shape: bf16[2048,128], index: 0, kind: input, shape index: {}]   ;;  %s3121_s1 = inlined_call_operand.vmem [shape: f32[1,128], index: 1, kind: input, shape index: {}]   ;;  %s3122_s2 = inlined_call_operand.vmem [shape: f32[1,128], index: 2, kind: input, shape index: {}]   ;;  %s3123_s3 = inlined_call_operand.vmem [shape: bf16[2048,128], index: 3, kind: output, shape index: {}]  }
   0x1   :  { %s2676_s14 = smov 0  }
   0x2 LB: > { %s25_s15 = sadd.s32 1, %s2646_s13  ;;  %p1635_p0 = scmp.ge.s32.totalorder %s2650_s14, 1  ;;  %s2650_s14 = sphi %s2676_s14, %s13_s14   ;;  %s2646_s13 = sphi %s2674_s13, %s3125_s13   ;;  %s2642_s12 = sphi %s2672_s12, %s3124_s12  }
   0x3   : > { %p27_p1 = scmp.ge.s32.totalorder %s25_s15, 2  ;;  %p173_p2 = scmp.lt.s32.totalorder %s2650_s14, 3 }
   0x5   : > { %s3127_s15 = smov (%p27_p1, %s25_s15), 0  ;;  %p174_p3 = pnand %p1635_p0, %p173_p2 }
   0x6   : > { %s1636_s16 = sshll.u32 (!%p174_p3), %s2642_s12, 7  ;;  %v2703_v0 = vld [vmem:[%s3121_s1] ss:$0 sm:$0xff] (!%p174_p3) }
   0x7   : > { %177 = sbr.rel (%p174_p3) target bundleno = 168 (0xa8), region = 32  ;;  %p210_p4 = scmp.lt.s32.totalorder (!%p174_p3), %s1636_s16, 255  ;;  %v2712_v9 = vld [vmem:[%s3122_s2] ss:$0 sm:$0xff] (!%p174_p3) }
   0xe   : > { %s3129_s16 = smov (!%p210_p4, %s1636_s16), 255 }
   0xf   : > { %s1637_s17 = sshll.u32 %s3129_s16, 2 }
  0x10   : > { %s2698_s20 = scalar_lea.vmem %s3120_s0, %s1637_s17  ;;  %s2737_s27 = scalar_lea.vmem %s3123_s3, %s1637_s17 }
  0x11   : > { %v1901_v1 = vld [vmem:[%s2698_s20] sm:$0xff]   ;;  %v2476_v2 = vld [vmem:[%s2698_s20 + $0x8] sm:$0xff]   ;;  %v2477_v3 = vld [vmem:[%s2698_s20 + $0x10] sm:$0xff]  }
  0x12   : > { %v1902_v4 = vunpack.c.l.bf16 %v1901_v1  ;;  %v1903_v5 = vunpack.c.h.bf16 %v1901_v1  ;;  %v1906_v6 = vunpack.c.l.bf16 %v2476_v2  ;;  %v1907_v7 = vunpack.c.h.bf16 %v2476_v2  ;;  %v2478_v8 = vld [vmem:[%s2698_s20 + $0x18] sm:$0xff]   ;;  %v2479_v30 = vld [vmem:[%s2698_s20 + $0x20] sm:$0xff]   ;;  %v2480_v35 = vld [vmem:[%s2698_s20 + $0x28] sm:$0xff]  }
  0x13   : > { %v1910_v10 = vunpack.c.l.bf16 %v2477_v3  ;;  %v1911_v11 = vunpack.c.h.bf16 %v2477_v3  ;;  %v1914_v12 = vunpack.c.l.bf16 %v2478_v8  ;;  %v1915_v13 = vunpack.c.h.bf16 %v2478_v8  ;;  %v2481_v40 = vld [vmem:[%s2698_s20 + $0x30] sm:$0xff]   ;;  %v2482_v45 = vld [vmem:[%s2698_s20 + $0x38] sm:$0xff]   ;;  %v2483_v3 = vld [vmem:[%s2698_s20 + $0x40] sm:$0xff]  }
  0x14   : > { %v496_v14 = vmul.f32 %v1902_v4, %v2703_v0  ;;  %v497_v15 = vmul.f32 %v1903_v5, %v2703_v0  ;;  %v498_v16 = vmul.f32 %v1906_v6, %v2703_v0  ;;  %v499_v17 = vmul.f32 %v1907_v7, %v2703_v0 }
  0x15   : > { %v500_v18 = vmul.f32 %v1910_v10, %v2703_v0  ;;  %v501_v19 = vmul.f32 %v1911_v11, %v2703_v0  ;;  %v502_v20 = vmul.f32 %v1914_v12, %v2703_v0  ;;  %v503_v21 = vmul.f32 %v1915_v13, %v2703_v0  ;;  %v2484_v13 = vld [vmem:[%s2698_s20 + $0x48] sm:$0xff]  }
  0x16   : > { %v631_v22 = vadd.f32 %v2712_v9, %v496_v14  ;;  %v632_v23 = vadd.f32 %v2712_v9, %v497_v15  ;;  %v633_v24 = vadd.f32 %v2712_v9, %v498_v16  ;;  %v634_v25 = vadd.f32 %v2712_v9, %v499_v17 }
  0x17   : > { %v635_v26 = vadd.f32 %v2712_v9, %v500_v18  ;;  %v636_v27 = vadd.f32 %v2712_v9, %v501_v19  ;;  %v637_v28 = vadd.f32 %v2712_v9, %v502_v20  ;;  %v638_v29 = vadd.f32 %v2712_v9, %v503_v21  ;;  %v2485_v18 = vld [vmem:[%s2698_s20 + $0x50] sm:$0xff]  }
  0x18   : > { %v759_v31 = vmax.f32 %v631_v22, 0.0  ;;  %v760_v32 = vmax.f32 %v632_v23, 0.0  ;;  %v761_v33 = vmax.f32 %v633_v24, 0.0  ;;  %v762_v34 = vmax.f32 %v634_v25, 0.0  ;;  %v2486_v23 = vld [vmem:[%s2698_s20 + $0x58] sm:$0xff]  }
  0x19   : > { %v763_v36 = vmax.f32 %v635_v26, 0.0  ;;  %v764_v37 = vmax.f32 %v636_v27, 0.0  ;;  %v765_v38 = vmax.f32 %v637_v28, 0.0  ;;  %v766_v39 = vmax.f32 %v638_v29, 0.0 }
  0x1a   : > { %v2159_v41 = vpack.c.bf16 %v760_v32, %v759_v31  ;;  %v2164_v42 = vpack.c.bf16 %v762_v34, %v761_v33  ;;  %v1918_v43 = vunpack.c.l.bf16 %v2479_v30  ;;  %v1919_v44 = vunpack.c.h.bf16 %v2479_v30 }
  0x1b   : > { %v2169_v46 = vpack.c.bf16 %v764_v37, %v763_v36  ;;  %v2174_v47 = vpack.c.bf16 %v766_v39, %v765_v38  ;;  %v1922_v48 = vunpack.c.l.bf16 %v2480_v35  ;;  %v1923_v49 = vunpack.c.h.bf16 %v2480_v35 }
  0x1c   : > { %2160 = vst [vmem:[%s2737_s27] sm:$0xff] %v2159_v41   ;;  %2539 = vst [vmem:[%s2737_s27 + $0x8] sm:$0xff] %v2164_v42   ;;  %v504_v50 = vmul.f32 %v1918_v43, %v2703_v0  ;;  %v505_v51 = vmul.f32 %v1919_v44, %v2703_v0  ;;  %v1926_v52 = vunpack.c.l.bf16 %v2481_v40  ;;  %v1927_v53 = vunpack.c.h.bf16 %v2481_v40  ;;  %v2487_v40 = vld [vmem:[%s2698_s20 + $0x60] sm:$0xff]  }
  0x1d   : > { %2540 = vst [vmem:[%s2737_s27 + $0x10] sm:$0xff] %v2169_v46   ;;  %2541 = vst [vmem:[%s2737_s27 + $0x18] sm:$0xff] %v2174_v47   ;;  %v506_v54 = vmul.f32 %v1922_v48, %v2703_v0  ;;  %v507_v55 = vmul.f32 %v1923_v49, %v2703_v0  ;;  %v1930_v56 = vunpack.c.l.bf16 %v2482_v45  ;;  %v1931_v57 = vunpack.c.h.bf16 %v2482_v45 }
  0x1e   : > { %v639_v58 = vadd.f32 %v2712_v9, %v504_v50  ;;  %v640_v59 = vadd.f32 %v2712_v9, %v505_v51  ;;  %v508_v60 = vmul.f32 %v1926_v52, %v2703_v0  ;;  %v509_v61 = vmul.f32 %v1927_v53, %v2703_v0  ;;  %v2488_v53 = vld [vmem:[%s2698_s20 + $0x68] sm:$0xff]  }
  0x1f   : > { %v641_v62 = vadd.f32 %v2712_v9, %v506_v54  ;;  %v642_v63 = vadd.f32 %v2712_v9, %v507_v55  ;;  %v510_v1 = vmul.f32 %v1930_v56, %v2703_v0  ;;  %v511_v2 = vmul.f32 %v1931_v57, %v2703_v0 }
  0x20   : > { %v767_v4 = vmax.f32 %v639_v58, 0.0  ;;  %v768_v5 = vmax.f32 %v640_v59, 0.0  ;;  %v643_v6 = vadd.f32 %v2712_v9, %v508_v60  ;;  %v644_v7 = vadd.f32 %v2712_v9, %v509_v61  ;;  %v2489_v58 = vld [vmem:[%s2698_s20 + $0x70] sm:$0xff]  }
  0x21   : > { %v769_v8 = vmax.f32 %v641_v62, 0.0  ;;  %v770_v10 = vmax.f32 %v642_v63, 0.0  ;;  %v645_v11 = vadd.f32 %v2712_v9, %v510_v1  ;;  %v646_v12 = vadd.f32 %v2712_v9, %v511_v2  ;;  %v2490_v63 = vld [vmem:[%s2698_s20 + $0x78] sm:$0xff]  }
  0x22   : > { %v2179_v14 = vpack.c.bf16 %v768_v5, %v767_v4  ;;  %v771_v15 = vmax.f32 %v643_v6, 0.0  ;;  %v772_v16 = vmax.f32 %v644_v7, 0.0  ;;  %v1934_v17 = vunpack.c.l.bf16 %v2483_v3 }
  0x23   : > { %v2184_v19 = vpack.c.bf16 %v770_v10, %v769_v8  ;;  %v773_v20 = vmax.f32 %v645_v11, 0.0  ;;  %v774_v21 = vmax.f32 %v646_v12, 0.0  ;;  %v1935_v22 = vunpack.c.h.bf16 %v2483_v3 }
  0x24   : > { %2542 = vst [vmem:[%s2737_s27 + $0x20] sm:$0xff] %v2179_v14   ;;  %v2189_v24 = vpack.c.bf16 %v772_v16, %v771_v15  ;;  %v512_v25 = vmul.f32 %v1934_v17, %v2703_v0  ;;  %v1938_v26 = vunpack.c.l.bf16 %v2484_v13  ;;  %v1939_v27 = vunpack.c.h.bf16 %v2484_v13  ;;  %v2491_v14 = vld [vmem:[%s2698_s20 + $0x80] sm:$0xff]  }
  0x25   : > { %2543 = vst [vmem:[%s2737_s27 + $0x28] sm:$0xff] %v2184_v19   ;;  %v2194_v28 = vpack.c.bf16 %v774_v21, %v773_v20  ;;  %v513_v29 = vmul.f32 %v1935_v22, %v2703_v0  ;;  %v1942_v30 = vunpack.c.l.bf16 %v2485_v18  ;;  %v1943_v31 = vunpack.c.h.bf16 %v2485_v18 }
  0x26   : > { %2544 = vst [vmem:[%s2737_s27 + $0x30] sm:$0xff] %v2189_v24   ;;  %v647_v32 = vadd.f32 %v2712_v9, %v512_v25  ;;  %v514_v33 = vmul.f32 %v1938_v26, %v2703_v0  ;;  %v515_v34 = vmul.f32 %v1939_v27, %v2703_v0  ;;  %v1946_v35 = vunpack.c.l.bf16 %v2486_v23 }
  0x27   : > { %2545 = vst [vmem:[%s2737_s27 + $0x38] sm:$0xff] %v2194_v28   ;;  %v648_v36 = vadd.f32 %v2712_v9, %v513_v29  ;;  %v516_v37 = vmul.f32 %v1942_v30, %v2703_v0  ;;  %v517_v38 = vmul.f32 %v1943_v31, %v2703_v0  ;;  %v1947_v39 = vunpack.c.h.bf16 %v2486_v23  ;;  %v2492_v31 = vld [vmem:[%s2698_s20 + $0x88] sm:$0xff]  }
  0x28   : > { %v775_v41 = vmax.f32 %v647_v32, 0.0  ;;  %v649_v42 = vadd.f32 %v2712_v9, %v514_v33  ;;  %v650_v43 = vadd.f32 %v2712_v9, %v515_v34  ;;  %v518_v44 = vmul.f32 %v1946_v35, %v2703_v0 }
  0x29   : > { %v776_v45 = vmax.f32 %v648_v36, 0.0  ;;  %v651_v46 = vadd.f32 %v2712_v9, %v516_v37  ;;  %v652_v47 = vadd.f32 %v2712_v9, %v517_v38  ;;  %v519_v48 = vmul.f32 %v1947_v39, %v2703_v0  ;;  %v2493_v36 = vld [vmem:[%s2698_s20 + $0x90] sm:$0xff]  }
  0x2a   : > { %v777_v49 = vmax.f32 %v649_v42, 0.0  ;;  %v778_v50 = vmax.f32 %v650_v43, 0.0  ;;  %v653_v51 = vadd.f32 %v2712_v9, %v518_v44  ;;  %v1950_v52 = vunpack.c.l.bf16 %v2487_v40 }
  0x2b   : > { %v2199_v54 = vpack.c.bf16 %v776_v45, %v775_v41  ;;  %v779_v55 = vmax.f32 %v651_v46, 0.0  ;;  %v780_v56 = vmax.f32 %v652_v47, 0.0  ;;  %v654_v57 = vadd.f32 %v2712_v9, %v519_v48  ;;  %v2494_v41 = vld [vmem:[%s2698_s20 + $0x98] sm:$0xff]  }
  0x2c   : > { %v2204_v59 = vpack.c.bf16 %v778_v50, %v777_v49  ;;  %v781_v60 = vmax.f32 %v653_v51, 0.0  ;;  %v1951_v61 = vunpack.c.h.bf16 %v2487_v40  ;;  %v520_v62 = vmul.f32 %v1950_v52, %v2703_v0 }
  0x2d   : > { %2546 = vst [vmem:[%s2737_s27 + $0x40] sm:$0xff] %v2199_v54   ;;  %v2209_v1 = vpack.c.bf16 %v780_v56, %v779_v55  ;;  %v782_v2 = vmax.f32 %v654_v57, 0.0  ;;  %v1954_v3 = vunpack.c.l.bf16 %v2488_v53  ;;  %v1955_v4 = vunpack.c.h.bf16 %v2488_v53  ;;  %v2495_v54 = vld [vmem:[%s2698_s20 + $0xa0] sm:$0xff]  }
  0x2e   : > { %2547 = vst [vmem:[%s2737_s27 + $0x48] sm:$0xff] %v2204_v59   ;;  %v521_v5 = vmul.f32 %v1951_v61, %v2703_v0  ;;  %v655_v6 = vadd.f32 %v2712_v9, %v520_v62  ;;  %v1958_v7 = vunpack.c.l.bf16 %v2489_v58  ;;  %v1959_v8 = vunpack.c.h.bf16 %v2489_v58 }
  0x2f   : > { %2548 = vst [vmem:[%s2737_s27 + $0x50] sm:$0xff] %v2209_v1   ;;  %v2214_v10 = vpack.c.bf16 %v782_v2, %v781_v60  ;;  %v522_v11 = vmul.f32 %v1954_v3, %v2703_v0  ;;  %v523_v12 = vmul.f32 %v1955_v4, %v2703_v0  ;;  %v1962_v13 = vunpack.c.l.bf16 %v2490_v63  ;;  %v2496_v4 = vld [vmem:[%s2698_s20 + $0xa8] sm:$0xff]  }
  0x30   : > { %v656_v15 = vadd.f32 %v2712_v9, %v521_v5  ;;  %v783_v16 = vmax.f32 %v655_v6, 0.0  ;;  %v524_v17 = vmul.f32 %v1958_v7, %v2703_v0  ;;  %v525_v18 = vmul.f32 %v1959_v8, %v2703_v0 }
  0x31   : > { %2549 = vst [vmem:[%s2737_s27 + $0x58] sm:$0xff] %v2214_v10   ;;  %v657_v19 = vadd.f32 %v2712_v9, %v522_v11  ;;  %v658_v20 = vadd.f32 %v2712_v9, %v523_v12  ;;  %v1963_v21 = vunpack.c.h.bf16 %v2490_v63  ;;  %v526_v22 = vmul.f32 %v1962_v13, %v2703_v0 }
  0x32   : > { %v784_v23 = vmax.f32 %v656_v15, 0.0  ;;  %v659_v24 = vadd.f32 %v2712_v9, %v524_v17  ;;  %v660_v25 = vadd.f32 %v2712_v9, %v525_v18  ;;  %v1966_v26 = vunpack.c.l.bf16 %v2491_v14 }
  0x33   : > { %v785_v27 = vmax.f32 %v657_v19, 0.0  ;;  %v786_v28 = vmax.f32 %v658_v20, 0.0  ;;  %v527_v29 = vmul.f32 %v1963_v21, %v2703_v0  ;;  %v661_v30 = vadd.f32 %v2712_v9, %v526_v22  ;;  %v2498_v19 = vld [vmem:[%s2698_s20 + $0xb8] sm:$0xff]  }
  0x34   : > { %v2219_v32 = vpack.c.bf16 %v784_v23, %v783_v16  ;;  %v787_v33 = vmax.f32 %v659_v24, 0.0  ;;  %v788_v34 = vmax.f32 %v660_v25, 0.0  ;;  %v1967_v35 = vunpack.c.h.bf16 %v2491_v14  ;;  %v2497_v14 = vld [vmem:[%s2698_s20 + $0xb0] sm:$0xff]  }
  0x35   : > { %v2224_v37 = vpack.c.bf16 %v786_v28, %v785_v27  ;;  %v662_v38 = vadd.f32 %v2712_v9, %v527_v29  ;;  %v789_v39 = vmax.f32 %v661_v30, 0.0  ;;  %v528_v40 = vmul.f32 %v1966_v26, %v2703_v0 }
  0x36   : > { %2550 = vst [vmem:[%s2737_s27 + $0x60] sm:$0xff] %v2219_v32   ;;  %v2229_v42 = vpack.c.bf16 %v788_v34, %v787_v33  ;;  %v529_v43 = vmul.f32 %v1967_v35, %v2703_v0  ;;  %v1970_v44 = vunpack.c.l.bf16 %v2492_v31  ;;  %v1971_v45 = vunpack.c.h.bf16 %v2492_v31  ;;  %v2499_v32 = vld [vmem:[%s2698_s20 + $0xc0] sm:$0xff]  }
  0x37   : > { %2551 = vst [vmem:[%s2737_s27 + $0x68] sm:$0xff] %v2224_v37   ;;  %v790_v46 = vmax.f32 %v662_v38, 0.0  ;;  %v663_v47 = vadd.f32 %v2712_v9, %v528_v40  ;;  %v1974_v48 = vunpack.c.l.bf16 %v2493_v36  ;;  %v1975_v49 = vunpack.c.h.bf16 %v2493_v36 }
  0x38   : > { %2552 = vst [vmem:[%s2737_s27 + $0x70] sm:$0xff] %v2229_v42   ;;  %v664_v50 = vadd.f32 %v2712_v9, %v529_v43  ;;  %v530_v51 = vmul.f32 %v1970_v44, %v2703_v0  ;;  %v531_v52 = vmul.f32 %v1971_v45, %v2703_v0  ;;  %v1978_v53 = vunpack.c.l.bf16 %v2494_v41  ;;  %v2500_v45 = vld [vmem:[%s2698_s20 + $0xc8] sm:$0xff]  }
  0x39   : > { %v2234_v55 = vpack.c.bf16 %v790_v46, %v789_v39  ;;  %v791_v56 = vmax.f32 %v663_v47, 0.0  ;;  %v532_v57 = vmul.f32 %v1974_v48, %v2703_v0  ;;  %v533_v58 = vmul.f32 %v1975_v49, %v2703_v0 }
  0x3a   : > { %v792_v59 = vmax.f32 %v664_v50, 0.0  ;;  %v665_v60 = vadd.f32 %v2712_v9, %v530_v51  ;;  %v666_v61 = vadd.f32 %v2712_v9, %v531_v52  ;;  %v1979_v62 = vunpack.c.h.bf16 %v2494_v41 }
  0x3b   : > { %2553 = vst [vmem:[%s2737_s27 + $0x78] sm:$0xff] %v2234_v55   ;;  %v667_v63 = vadd.f32 %v2712_v9, %v532_v57  ;;  %v668_v1 = vadd.f32 %v2712_v9, %v533_v58  ;;  %v534_v2 = vmul.f32 %v1978_v53, %v2703_v0  ;;  %v1982_v3 = vunpack.c.l.bf16 %v2495_v54 }
  0x3c   : > { %v2239_v5 = vpack.c.bf16 %v792_v59, %v791_v56  ;;  %v793_v6 = vmax.f32 %v665_v60, 0.0  ;;  %v794_v7 = vmax.f32 %v666_v61, 0.0  ;;  %v535_v8 = vmul.f32 %v1979_v62, %v2703_v0 }
  0x3d   : > { %v795_v10 = vmax.f32 %v667_v63, 0.0  ;;  %v796_v11 = vmax.f32 %v668_v1, 0.0  ;;  %v669_v12 = vadd.f32 %v2712_v9, %v534_v2  ;;  %v1983_v13 = vunpack.c.h.bf16 %v2495_v54  ;;  %v2501_v54 = vld [vmem:[%s2698_s20 + $0xd0] sm:$0xff]   ;;  %v2502_v63 = vld [vmem:[%s2698_s20 + $0xd8] sm:$0xff]  }
  0x3e   : > { %2554 = vst [vmem:[%s2737_s27 + $0x80] sm:$0xff] %v2239_v5   ;;  %v2244_v15 = vpack.c.bf16 %v794_v7, %v793_v6  ;;  %v670_v16 = vadd.f32 %v2712_v9, %v535_v8  ;;  %v536_v17 = vmul.f32 %v1982_v3, %v2703_v0  ;;  %v1986_v18 = vunpack.c.l.bf16 %v2496_v4 }
  0x3f   : > { %v2249_v20 = vpack.c.bf16 %v796_v11, %v795_v10  ;;  %v797_v21 = vmax.f32 %v669_v12, 0.0  ;;  %v537_v22 = vmul.f32 %v1983_v13, %v2703_v0  ;;  %v1987_v23 = vunpack.c.h.bf16 %v2496_v4  ;;  %v2503_v10 = vld [vmem:[%s2698_s20 + $0xe0] sm:$0xff]  }
  0x40   : > { %2555 = vst [vmem:[%s2737_s27 + $0x88] sm:$0xff] %v2244_v15   ;;  %v798_v24 = vmax.f32 %v670_v16, 0.0  ;;  %v671_v25 = vadd.f32 %v2712_v9, %v536_v17  ;;  %v538_v26 = vmul.f32 %v1986_v18, %v2703_v0  ;;  %v1990_v27 = vunpack.c.l.bf16 %v2497_v14 }
  0x41   : > { %2556 = vst [vmem:[%s2737_s27 + $0x90] sm:$0xff] %v2249_v20   ;;  %v672_v28 = vadd.f32 %v2712_v9, %v537_v22  ;;  %v539_v29 = vmul.f32 %v1987_v23, %v2703_v0  ;;  %v1991_v30 = vunpack.c.h.bf16 %v2497_v14  ;;  %v1994_v31 = vunpack.c.l.bf16 %v2498_v19  ;;  %v2504_v23 = vld [vmem:[%s2698_s20 + $0xe8] sm:$0xff]  }
  0x42   : > { %v2254_v33 = vpack.c.bf16 %v798_v24, %v797_v21  ;;  %v799_v34 = vmax.f32 %v671_v25, 0.0  ;;  %v673_v35 = vadd.f32 %v2712_v9, %v538_v26  ;;  %v540_v36 = vmul.f32 %v1990_v27, %v2703_v0 }
  0x43   : > { %v800_v37 = vmax.f32 %v672_v28, 0.0  ;;  %v674_v38 = vadd.f32 %v2712_v9, %v539_v29  ;;  %v541_v39 = vmul.f32 %v1991_v30, %v2703_v0  ;;  %v1995_v40 = vunpack.c.h.bf16 %v2498_v19 }
  0x44   : > { %2557 = vst [vmem:[%s2737_s27 + $0x98] sm:$0xff] %v2254_v33   ;;  %v801_v41 = vmax.f32 %v673_v35, 0.0  ;;  %v675_v42 = vadd.f32 %v2712_v9, %v540_v36  ;;  %v542_v43 = vmul.f32 %v1994_v31, %v2703_v0  ;;  %v1998_v44 = vunpack.c.l.bf16 %v2499_v32 }
  0x45   : > { %v2259_v46 = vpack.c.bf16 %v800_v37, %v799_v34  ;;  %v802_v47 = vmax.f32 %v674_v38, 0.0  ;;  %v676_v48 = vadd.f32 %v2712_v9, %v541_v39  ;;  %v543_v49 = vmul.f32 %v1995_v40, %v2703_v0 }
  0x46   : > { %v803_v50 = vmax.f32 %v675_v42, 0.0  ;;  %v677_v51 = vadd.f32 %v2712_v9, %v542_v43  ;;  %v1999_v52 = vunpack.c.h.bf16 %v2499_v32  ;;  %v544_v53 = vmul.f32 %v1998_v44, %v2703_v0  ;;  %v2505_v32 = vld [vmem:[%s2698_s20 + $0xf0] sm:$0xff]  }
  0x47   : > { %2558 = vst [vmem:[%s2737_s27 + $0xa0] sm:$0xff] %v2259_v46   ;;  %v2264_v55 = vpack.c.bf16 %v802_v47, %v801_v41  ;;  %v804_v56 = vmax.f32 %v676_v48, 0.0  ;;  %v678_v57 = vadd.f32 %v2712_v9, %v543_v49  ;;  %v2002_v58 = vunpack.c.l.bf16 %v2500_v45  ;;  %v2506_v41 = vld [vmem:[%s2698_s20 + $0xf8] sm:$0xff]  }
  0x48   : > { %v805_v59 = vmax.f32 %v677_v51, 0.0  ;;  %v545_v60 = vmul.f32 %v1999_v52, %v2703_v0  ;;  %v679_v61 = vadd.f32 %v2712_v9, %v544_v53  ;;  %v2003_v62 = vunpack.c.h.bf16 %v2500_v45 }
  0x49   : > { %2559 = vst [vmem:[%s2737_s27 + $0xa8] sm:$0xff] %v2264_v55   ;;  %v2269_v1 = vpack.c.bf16 %v804_v56, %v803_v50  ;;  %v806_v2 = vmax.f32 %v678_v57, 0.0  ;;  %v546_v3 = vmul.f32 %v2002_v58, %v2703_v0  ;;  %v2006_v4 = vunpack.c.l.bf16 %v2501_v54  ;;  %v2507_v50 = vld [vmem:[%s2698_s20 + $0x100] sm:$0xff]  }
  0x4a   : > { %v680_v5 = vadd.f32 %v2712_v9, %v545_v60  ;;  %v807_v6 = vmax.f32 %v679_v61, 0.0  ;;  %v547_v7 = vmul.f32 %v2003_v62, %v2703_v0  ;;  %v2007_v8 = vunpack.c.h.bf16 %v2501_v54 }
  0x4b   : > { %2560 = vst [vmem:[%s2737_s27 + $0xb0] sm:$0xff] %v2269_v1   ;;  %v2274_v11 = vpack.c.bf16 %v806_v2, %v805_v59  ;;  %v681_v12 = vadd.f32 %v2712_v9, %v546_v3  ;;  %v548_v13 = vmul.f32 %v2006_v4, %v2703_v0  ;;  %v2010_v14 = vunpack.c.l.bf16 %v2502_v63 }
  0x4c   : > { %v808_v15 = vmax.f32 %v680_v5, 0.0  ;;  %v682_v16 = vadd.f32 %v2712_v9, %v547_v7  ;;  %v549_v17 = vmul.f32 %v2007_v8, %v2703_v0  ;;  %v2011_v18 = vunpack.c.h.bf16 %v2502_v63  ;;  %v2508_v63 = vld [vmem:[%s2698_s20 + $0x108] sm:$0xff]  }
  0x4d   : > { %2561 = vst [vmem:[%s2737_s27 + $0xb8] sm:$0xff] %v2274_v11   ;;  %v809_v19 = vmax.f32 %v681_v12, 0.0  ;;  %v683_v20 = vadd.f32 %v2712_v9, %v548_v13  ;;  %v550_v21 = vmul.f32 %v2010_v14, %v2703_v0  ;;  %v2014_v22 = vunpack.c.l.bf16 %v2503_v10 }
  0x4e   : > { %v2279_v24 = vpack.c.bf16 %v808_v15, %v807_v6  ;;  %v810_v25 = vmax.f32 %v682_v16, 0.0  ;;  %v684_v26 = vadd.f32 %v2712_v9, %v549_v17  ;;  %v551_v27 = vmul.f32 %v2011_v18, %v2703_v0 }
  0x4f   : > { %v811_v28 = vmax.f32 %v683_v20, 0.0  ;;  %v685_v29 = vadd.f32 %v2712_v9, %v550_v21  ;;  %v2015_v30 = vunpack.c.h.bf16 %v2503_v10  ;;  %v552_v31 = vmul.f32 %v2014_v22, %v2703_v0  ;;  %v2509_v10 = vld [vmem:[%s2698_s20 + $0x110] sm:$0xff]  }
  0x50   : > { %2562 = vst [vmem:[%s2737_s27 + $0xc0] sm:$0xff] %v2279_v24   ;;  %v2284_v33 = vpack.c.bf16 %v810_v25, %v809_v19  ;;  %v812_v34 = vmax.f32 %v684_v26, 0.0  ;;  %v686_v35 = vadd.f32 %v2712_v9, %v551_v27  ;;  %v2018_v36 = vunpack.c.l.bf16 %v2504_v23  ;;  %v2510_v19 = vld [vmem:[%s2698_s20 + $0x118] sm:$0xff]  }
  0x51   : > { %v813_v37 = vmax.f32 %v685_v29, 0.0  ;;  %v553_v38 = vmul.f32 %v2015_v30, %v2703_v0  ;;  %v687_v39 = vadd.f32 %v2712_v9, %v552_v31  ;;  %v2019_v40 = vunpack.c.h.bf16 %v2504_v23 }
  0x52   : > { %2563 = vst [vmem:[%s2737_s27 + $0xc8] sm:$0xff] %v2284_v33   ;;  %v2289_v42 = vpack.c.bf16 %v812_v34, %v811_v28  ;;  %v814_v43 = vmax.f32 %v686_v35, 0.0  ;;  %v554_v44 = vmul.f32 %v2018_v36, %v2703_v0  ;;  %v2022_v45 = vunpack.c.l.bf16 %v2505_v32  ;;  %v2511_v28 = vld [vmem:[%s2698_s20 + $0x120] sm:$0xff]  }
  0x53   : > { %v688_v46 = vadd.f32 %v2712_v9, %v553_v38  ;;  %v815_v47 = vmax.f32 %v687_v39, 0.0  ;;  %v555_v48 = vmul.f32 %v2019_v40, %v2703_v0  ;;  %v2023_v49 = vunpack.c.h.bf16 %v2505_v32 }
  0x54   : > { %2564 = vst [vmem:[%s2737_s27 + $0xd0] sm:$0xff] %v2289_v42   ;;  %v2294_v51 = vpack.c.bf16 %v814_v43, %v813_v37  ;;  %v689_v52 = vadd.f32 %v2712_v9, %v554_v44  ;;  %v556_v53 = vmul.f32 %v2022_v45, %v2703_v0  ;;  %v2026_v54 = vunpack.c.l.bf16 %v2506_v41 }
  0x55   : > { %v816_v55 = vmax.f32 %v688_v46, 0.0  ;;  %v690_v56 = vadd.f32 %v2712_v9, %v555_v48  ;;  %v557_v57 = vmul.f32 %v2023_v49, %v2703_v0  ;;  %v2027_v58 = vunpack.c.h.bf16 %v2506_v41  ;;  %v2512_v41 = vld [vmem:[%s2698_s20 + $0x128] sm:$0xff]  }
  0x56   : > { %2565 = vst [vmem:[%s2737_s27 + $0xd8] sm:$0xff] %v2294_v51   ;;  %v817_v59 = vmax.f32 %v689_v52, 0.0  ;;  %v691_v60 = vadd.f32 %v2712_v9, %v556_v53  ;;  %v558_v61 = vmul.f32 %v2026_v54, %v2703_v0  ;;  %v2030_v62 = vunpack.c.l.bf16 %v2507_v50 }
  0x57   : > { %v2299_v1 = vpack.c.bf16 %v816_v55, %v815_v47  ;;  %v818_v2 = vmax.f32 %v690_v56, 0.0  ;;  %v692_v3 = vadd.f32 %v2712_v9, %v557_v57  ;;  %v559_v4 = vmul.f32 %v2027_v58, %v2703_v0 }
  0x58   : > { %v819_v5 = vmax.f32 %v691_v60, 0.0  ;;  %v693_v6 = vadd.f32 %v2712_v9, %v558_v61  ;;  %v2031_v7 = vunpack.c.h.bf16 %v2507_v50  ;;  %v560_v8 = vmul.f32 %v2030_v62, %v2703_v0  ;;  %v2513_v50 = vld [vmem:[%s2698_s20 + $0x130] sm:$0xff]  }
  0x59   : > { %2566 = vst [vmem:[%s2737_s27 + $0xe0] sm:$0xff] %v2299_v1   ;;  %v2304_v11 = vpack.c.bf16 %v818_v2, %v817_v59  ;;  %v820_v12 = vmax.f32 %v692_v3, 0.0  ;;  %v694_v13 = vadd.f32 %v2712_v9, %v559_v4  ;;  %v2034_v14 = vunpack.c.l.bf16 %v2508_v63  ;;  %v2514_v59 = vld [vmem:[%s2698_s20 + $0x138] sm:$0xff]  }
  0x5a   : > { %v821_v15 = vmax.f32 %v693_v6, 0.0  ;;  %v561_v16 = vmul.f32 %v2031_v7, %v2703_v0  ;;  %v695_v17 = vadd.f32 %v2712_v9, %v560_v8  ;;  %v2035_v18 = vunpack.c.h.bf16 %v2508_v63 }
  0x5b   : > { %2567 = vst [vmem:[%s2737_s27 + $0xe8] sm:$0xff] %v2304_v11   ;;  %v2309_v20 = vpack.c.bf16 %v820_v12, %v819_v5  ;;  %v822_v21 = vmax.f32 %v694_v13, 0.0  ;;  %v562_v22 = vmul.f32 %v2034_v14, %v2703_v0  ;;  %v2038_v23 = vunpack.c.l.bf16 %v2509_v10  ;;  %v2515_v5 = vld [vmem:[%s2698_s20 + $0x140] sm:$0xff]  }
  0x5c   : > { %v696_v24 = vadd.f32 %v2712_v9, %v561_v16  ;;  %v823_v25 = vmax.f32 %v695_v17, 0.0  ;;  %v563_v26 = vmul.f32 %v2035_v18, %v2703_v0  ;;  %v2039_v27 = vunpack.c.h.bf16 %v2509_v10 }
  0x5d   : > { %2568 = vst [vmem:[%s2737_s27 + $0xf0] sm:$0xff] %v2309_v20   ;;  %v2314_v29 = vpack.c.bf16 %v822_v21, %v821_v15  ;;  %v697_v30 = vadd.f32 %v2712_v9, %v562_v22  ;;  %v564_v31 = vmul.f32 %v2038_v23, %v2703_v0  ;;  %v2042_v32 = vunpack.c.l.bf16 %v2510_v19 }
  0x5e   : > { %v824_v33 = vmax.f32 %v696_v24, 0.0  ;;  %v698_v34 = vadd.f32 %v2712_v9, %v563_v26  ;;  %v565_v35 = vmul.f32 %v2039_v27, %v2703_v0  ;;  %v2043_v36 = vunpack.c.h.bf16 %v2510_v19  ;;  %v2516_v19 = vld [vmem:[%s2698_s20 + $0x148] sm:$0xff]  }
  0x5f   : > { %2569 = vst [vmem:[%s2737_s27 + $0xf8] sm:$0xff] %v2314_v29   ;;  %v825_v37 = vmax.f32 %v697_v30, 0.0  ;;  %v699_v38 = vadd.f32 %v2712_v9, %v564_v31  ;;  %v566_v39 = vmul.f32 %v2042_v32, %v2703_v0  ;;  %v2046_v40 = vunpack.c.l.bf16 %v2511_v28 }
  0x60   : > { %v2319_v42 = vpack.c.bf16 %v824_v33, %v823_v25  ;;  %v826_v43 = vmax.f32 %v698_v34, 0.0  ;;  %v700_v44 = vadd.f32 %v2712_v9, %v565_v35  ;;  %v567_v45 = vmul.f32 %v2043_v36, %v2703_v0 }
  0x61   : > { %v827_v46 = vmax.f32 %v699_v38, 0.0  ;;  %v701_v47 = vadd.f32 %v2712_v9, %v566_v39  ;;  %v2047_v48 = vunpack.c.h.bf16 %v2511_v28  ;;  %v568_v49 = vmul.f32 %v2046_v40, %v2703_v0  ;;  %v2517_v28 = vld [vmem:[%s2698_s20 + $0x150] sm:$0xff]  }
  0x62   : > { %2570 = vst [vmem:[%s2737_s27 + $0x100] sm:$0xff] %v2319_v42   ;;  %v2324_v51 = vpack.c.bf16 %v826_v43, %v825_v37  ;;  %v828_v52 = vmax.f32 %v700_v44, 0.0  ;;  %v702_v53 = vadd.f32 %v2712_v9, %v567_v45  ;;  %v2050_v54 = vunpack.c.l.bf16 %v2512_v41  ;;  %v2518_v37 = vld [vmem:[%s2698_s20 + $0x158] sm:$0xff]  }
  0x63   : > { %v829_v55 = vmax.f32 %v701_v47, 0.0  ;;  %v569_v56 = vmul.f32 %v2047_v48, %v2703_v0  ;;  %v703_v57 = vadd.f32 %v2712_v9, %v568_v49  ;;  %v2051_v58 = vunpack.c.h.bf16 %v2512_v41 }
  0x64   : > { %2571 = vst [vmem:[%s2737_s27 + $0x108] sm:$0xff] %v2324_v51   ;;  %v2329_v60 = vpack.c.bf16 %v828_v52, %v827_v46  ;;  %v830_v61 = vmax.f32 %v702_v53, 0.0  ;;  %v570_v62 = vmul.f32 %v2050_v54, %v2703_v0  ;;  %v2054_v63 = vunpack.c.l.bf16 %v2513_v50  ;;  %v2519_v46 = vld [vmem:[%s2698_s20 + $0x160] sm:$0xff]  }
  0x65   : > { %v704_v1 = vadd.f32 %v2712_v9, %v569_v56  ;;  %v831_v2 = vmax.f32 %v703_v57, 0.0  ;;  %v571_v3 = vmul.f32 %v2051_v58, %v2703_v0  ;;  %v2055_v4 = vunpack.c.h.bf16 %v2513_v50 }
  0x66   : > { %2572 = vst [vmem:[%s2737_s27 + $0x110] sm:$0xff] %v2329_v60   ;;  %v2334_v6 = vpack.c.bf16 %v830_v61, %v829_v55  ;;  %v705_v7 = vadd.f32 %v2712_v9, %v570_v62  ;;  %v572_v8 = vmul.f32 %v2054_v63, %v2703_v0  ;;  %v2058_v10 = vunpack.c.l.bf16 %v2514_v59 }
  0x67   : > { %v832_v11 = vmax.f32 %v704_v1, 0.0  ;;  %v706_v12 = vadd.f32 %v2712_v9, %v571_v3  ;;  %v573_v13 = vmul.f32 %v2055_v4, %v2703_v0  ;;  %v2059_v14 = vunpack.c.h.bf16 %v2514_v59  ;;  %v2520_v59 = vld [vmem:[%s2698_s20 + $0x168] sm:$0xff]  }
  0x68   : > { %2573 = vst [vmem:[%s2737_s27 + $0x118] sm:$0xff] %v2334_v6   ;;  %v833_v15 = vmax.f32 %v705_v7, 0.0  ;;  %v707_v16 = vadd.f32 %v2712_v9, %v572_v8  ;;  %v574_v17 = vmul.f32 %v2058_v10, %v2703_v0  ;;  %v2062_v18 = vunpack.c.l.bf16 %v2515_v5 }
  0x69   : > { %v2339_v20 = vpack.c.bf16 %v832_v11, %v831_v2  ;;  %v834_v21 = vmax.f32 %v706_v12, 0.0  ;;  %v708_v22 = vadd.f32 %v2712_v9, %v573_v13  ;;  %v575_v23 = vmul.f32 %v2059_v14, %v2703_v0 }
  0x6a   : > { %v835_v24 = vmax.f32 %v707_v16, 0.0  ;;  %v709_v25 = vadd.f32 %v2712_v9, %v574_v17  ;;  %v2063_v26 = vunpack.c.h.bf16 %v2515_v5  ;;  %v576_v27 = vmul.f32 %v2062_v18, %v2703_v0  ;;  %v2521_v5 = vld [vmem:[%s2698_s20 + $0x170] sm:$0xff]  }
  0x6b   : > { %2574 = vst [vmem:[%s2737_s27 + $0x120] sm:$0xff] %v2339_v20   ;;  %v2344_v29 = vpack.c.bf16 %v834_v21, %v833_v15  ;;  %v836_v30 = vmax.f32 %v708_v22, 0.0  ;;  %v710_v31 = vadd.f32 %v2712_v9, %v575_v23  ;;  %v2066_v32 = vunpack.c.l.bf16 %v2516_v19  ;;  %v2522_v15 = vld [vmem:[%s2698_s20 + $0x178] sm:$0xff]  }
  0x6c   : > { %v837_v33 = vmax.f32 %v709_v25, 0.0  ;;  %v577_v34 = vmul.f32 %v2063_v26, %v2703_v0  ;;  %v711_v35 = vadd.f32 %v2712_v9, %v576_v27  ;;  %v2067_v36 = vunpack.c.h.bf16 %v2516_v19 }
  0x6d   : > { %2575 = vst [vmem:[%s2737_s27 + $0x128] sm:$0xff] %v2344_v29   ;;  %v2349_v38 = vpack.c.bf16 %v836_v30, %v835_v24  ;;  %v838_v39 = vmax.f32 %v710_v31, 0.0  ;;  %v578_v40 = vmul.f32 %v2066_v32, %v2703_v0  ;;  %v2070_v41 = vunpack.c.l.bf16 %v2517_v28  ;;  %v2523_v24 = vld [vmem:[%s2698_s20 + $0x180] sm:$0xff]  }
  0x6e   : > { %v712_v42 = vadd.f32 %v2712_v9, %v577_v34  ;;  %v839_v43 = vmax.f32 %v711_v35, 0.0  ;;  %v579_v44 = vmul.f32 %v2067_v36, %v2703_v0  ;;  %v2071_v45 = vunpack.c.h.bf16 %v2517_v28  ;;  %v3000_v35 = vld [vmem:[%s3121_s1] ss:$0 sm:$0xff] }
  0x6f   : > { %2576 = vst [vmem:[%s2737_s27 + $0x130] sm:$0xff] %v2349_v38   ;;  %v2354_v47 = vpack.c.bf16 %v838_v39, %v837_v33  ;;  %v713_v48 = vadd.f32 %v2712_v9, %v578_v40  ;;  %v580_v49 = vmul.f32 %v2070_v41, %v2703_v0  ;;  %v2074_v50 = vunpack.c.l.bf16 %v2518_v37  ;;  %v2524_v38 = vld [vmem:[%s2698_s20 + $0x188] sm:$0xff]  }
  0x70   : > { %v840_v51 = vmax.f32 %v712_v42, 0.0  ;;  %v714_v52 = vadd.f32 %v2712_v9, %v579_v44  ;;  %v581_v53 = vmul.f32 %v2071_v45, %v2703_v0  ;;  %v2075_v54 = vunpack.c.h.bf16 %v2518_v37 }
  0x71   : > { %2577 = vst [vmem:[%s2737_s27 + $0x138] sm:$0xff] %v2354_v47   ;;  %v841_v55 = vmax.f32 %v713_v48, 0.0  ;;  %v715_v56 = vadd.f32 %v2712_v9, %v580_v49  ;;  %v582_v57 = vmul.f32 %v2074_v50, %v2703_v0  ;;  %v2078_v58 = vunpack.c.l.bf16 %v2519_v46  ;;  %v2525_v47 = vld [vmem:[%s2698_s20 + $0x190] sm:$0xff]  }
  0x72   : > { %v2359_v60 = vpack.c.bf16 %v840_v51, %v839_v43  ;;  %v842_v61 = vmax.f32 %v714_v52, 0.0  ;;  %v716_v62 = vadd.f32 %v2712_v9, %v581_v53  ;;  %v583_v63 = vmul.f32 %v2075_v54, %v2703_v0  ;;  %v3009_v43 = vld [vmem:[%s3122_s2] ss:$0 sm:$0xff] }
  0x73   : > { %v843_v1 = vmax.f32 %v715_v56, 0.0  ;;  %v717_v2 = vadd.f32 %v2712_v9, %v582_v57  ;;  %v2079_v3 = vunpack.c.h.bf16 %v2519_v46  ;;  %v584_v4 = vmul.f32 %v2078_v58, %v2703_v0 }
  0x74   : > { %2578 = vst [vmem:[%s2737_s27 + $0x140] sm:$0xff] %v2359_v60   ;;  %v2364_v6 = vpack.c.bf16 %v842_v61, %v841_v55  ;;  %v844_v7 = vmax.f32 %v716_v62, 0.0  ;;  %v718_v8 = vadd.f32 %v2712_v9, %v583_v63  ;;  %v2082_v10 = vunpack.c.l.bf16 %v2520_v59  ;;  %v2526_v55 = vld [vmem:[%s2698_s20 + $0x198] sm:$0xff]  }
  0x75   : > { %v845_v11 = vmax.f32 %v717_v2, 0.0  ;;  %v585_v12 = vmul.f32 %v2079_v3, %v2703_v0  ;;  %v719_v13 = vadd.f32 %v2712_v9, %v584_v4  ;;  %v2083_v14 = vunpack.c.h.bf16 %v2520_v59 }
  0x76   : > { %2579 = vst [vmem:[%s2737_s27 + $0x148] sm:$0xff] %v2364_v6   ;;  %v2369_v16 = vpack.c.bf16 %v844_v7, %v843_v1  ;;  %v846_v17 = vmax.f32 %v718_v8, 0.0  ;;  %v586_v18 = vmul.f32 %v2082_v10, %v2703_v0  ;;  %v2086_v19 = vunpack.c.l.bf16 %v2521_v5  ;;  %v2527_v1 = vld [vmem:[%s2698_s20 + $0x1a0] sm:$0xff]  }
  0x77   : > { %v720_v20 = vadd.f32 %v2712_v9, %v585_v12  ;;  %v847_v21 = vmax.f32 %v719_v13, 0.0  ;;  %v587_v22 = vmul.f32 %v2083_v14, %v2703_v0  ;;  %v2087_v23 = vunpack.c.h.bf16 %v2521_v5 }
  0x78   : > { %2580 = vst [vmem:[%s2737_s27 + $0x150] sm:$0xff] %v2369_v16   ;;  %v2374_v25 = vpack.c.bf16 %v846_v17, %v845_v11  ;;  %v721_v26 = vadd.f32 %v2712_v9, %v586_v18  ;;  %v588_v27 = vmul.f32 %v2086_v19, %v2703_v0  ;;  %v2090_v28 = vunpack.c.l.bf16 %v2522_v15 }
  0x79   : > { %v848_v29 = vmax.f32 %v720_v20, 0.0  ;;  %v722_v30 = vadd.f32 %v2712_v9, %v587_v22  ;;  %v589_v31 = vmul.f32 %v2087_v23, %v2703_v0  ;;  %v2091_v32 = vunpack.c.h.bf16 %v2522_v15  ;;  %v2528_v15 = vld [vmem:[%s2698_s20 + $0x1a8] sm:$0xff]  }
  0x7a   : > { %2581 = vst [vmem:[%s2737_s27 + $0x158] sm:$0xff] %v2374_v25   ;;  %v849_v33 = vmax.f32 %v721_v26, 0.0  ;;  %v723_v34 = vadd.f32 %v2712_v9, %v588_v27  ;;  %v590_v36 = vmul.f32 %v3000_v35, %v2090_v28  ;;  %v2094_v37 = vunpack.c.l.bf16 %v2523_v24 }
  0x7b   : > { %v2379_v39 = vpack.c.bf16 %v848_v29, %v847_v21  ;;  %v850_v40 = vmax.f32 %v722_v30, 0.0  ;;  %v724_v0 = vadd.f32 %v2712_v9, %v589_v31  ;;  %v591_v41 = vmul.f32 %v3000_v35, %v2091_v32 }
  0x7c   : > { %v851_v42 = vmax.f32 %v723_v34, 0.0  ;;  %v725_v44 = vadd.f32 %v3009_v43, %v590_v36  ;;  %v2095_v45 = vunpack.c.h.bf16 %v2523_v24  ;;  %v592_v46 = vmul.f32 %v3000_v35, %v2094_v37  ;;  %v2529_v24 = vld [vmem:[%s2698_s20 + $0x1b0] sm:$0xff]  }
  0x7d   : > { %2582 = vst [vmem:[%s2737_s27 + $0x160] sm:$0xff] %v2379_v39   ;;  %v2384_v48 = vpack.c.bf16 %v850_v40, %v849_v33  ;;  %v852_v49 = vmax.f32 %v724_v0, 0.0  ;;  %v726_v9 = vadd.f32 %v3009_v43, %v591_v41  ;;  %v2098_v50 = vunpack.c.l.bf16 %v2524_v38  ;;  %v2530_v33 = vld [vmem:[%s2698_s20 + $0x1b8] sm:$0xff]  }
  0x7e   : > { %v853_v51 = vmax.f32 %v725_v44, 0.0  ;;  %v593_v52 = vmul.f32 %v3000_v35, %v2095_v45  ;;  %v727_v53 = vadd.f32 %v3009_v43, %v592_v46  ;;  %v2099_v54 = vunpack.c.h.bf16 %v2524_v38 }
  0x7f   : > { %2583 = vst [vmem:[%s2737_s27 + $0x168] sm:$0xff] %v2384_v48   ;;  %v2389_v56 = vpack.c.bf16 %v852_v49, %v851_v42  ;;  %v854_v57 = vmax.f32 %v726_v9, 0.0  ;;  %v594_v58 = vmul.f32 %v3000_v35, %v2098_v50  ;;  %v2102_v59 = vunpack.c.l.bf16 %v2525_v47  ;;  %v2531_v42 = vld [vmem:[%s2698_s20 + $0x1c0] sm:$0xff]  }
  0x80   : > { %v728_v60 = vadd.f32 %v3009_v43, %v593_v52  ;;  %v855_v61 = vmax.f32 %v727_v53, 0.0  ;;  %v595_v62 = vmul.f32 %v3000_v35, %v2099_v54  ;;  %v2103_v63 = vunpack.c.h.bf16 %v2525_v47 }
  0x81   : > { %2584 = vst [vmem:[%s2737_s27 + $0x170] sm:$0xff] %v2389_v56   ;;  %v2394_v2 = vpack.c.bf16 %v854_v57, %v853_v51  ;;  %v729_v3 = vadd.f32 %v3009_v43, %v594_v58  ;;  %v596_v4 = vmul.f32 %v3000_v35, %v2102_v59  ;;  %v2106_v5 = vunpack.c.l.bf16 %v2526_v55 }
  0x82   : > { %v856_v6 = vmax.f32 %v728_v60, 0.0  ;;  %v730_v7 = vadd.f32 %v3009_v43, %v595_v62  ;;  %v597_v8 = vmul.f32 %v3000_v35, %v2103_v63  ;;  %v2107_v10 = vunpack.c.h.bf16 %v2526_v55  ;;  %v2532_v55 = vld [vmem:[%s2698_s20 + $0x1c8] sm:$0xff]  }
  0x83   : > { %2585 = vst [vmem:[%s2737_s27 + $0x178] sm:$0xff] %v2394_v2   ;;  %v857_v11 = vmax.f32 %v729_v3, 0.0  ;;  %v731_v12 = vadd.f32 %v3009_v43, %v596_v4  ;;  %v598_v13 = vmul.f32 %v3000_v35, %v2106_v5  ;;  %v2110_v14 = vunpack.c.l.bf16 %v2527_v1 }
  0x84   : > { %v2399_v16 = vpack.c.bf16 %v856_v6, %v855_v61  ;;  %v858_v17 = vmax.f32 %v730_v7, 0.0  ;;  %v732_v18 = vadd.f32 %v3009_v43, %v597_v8  ;;  %v599_v19 = vmul.f32 %v3000_v35, %v2107_v10 }
  0x85   : > { %v859_v20 = vmax.f32 %v731_v12, 0.0  ;;  %v733_v21 = vadd.f32 %v3009_v43, %v598_v13  ;;  %v2111_v22 = vunpack.c.h.bf16 %v2527_v1  ;;  %v600_v23 = vmul.f32 %v3000_v35, %v2110_v14  ;;  %v2533_v1 = vld [vmem:[%s2698_s20 + $0x1d0] sm:$0xff]  }
  0x86   : > { %2586 = vst [vmem:[%s2737_s27 + $0x180] sm:$0xff] %v2399_v16   ;;  %v2404_v25 = vpack.c.bf16 %v858_v17, %v857_v11  ;;  %v860_v26 = vmax.f32 %v732_v18, 0.0  ;;  %v734_v27 = vadd.f32 %v3009_v43, %v599_v19  ;;  %v2114_v28 = vunpack.c.l.bf16 %v2528_v15  ;;  %v2534_v11 = vld [vmem:[%s2698_s20 + $0x1d8] sm:$0xff]  }
  0x87   : > { %v861_v29 = vmax.f32 %v733_v21, 0.0  ;;  %v601_v30 = vmul.f32 %v3000_v35, %v2111_v22  ;;  %v735_v31 = vadd.f32 %v3009_v43, %v600_v23  ;;  %v2115_v32 = vunpack.c.h.bf16 %v2528_v15 }
  0x88   : > { %2587 = vst [vmem:[%s2737_s27 + $0x188] sm:$0xff] %v2404_v25   ;;  %v2409_v34 = vpack.c.bf16 %v860_v26, %v859_v20  ;;  %v862_v36 = vmax.f32 %v734_v27, 0.0  ;;  %v602_v37 = vmul.f32 %v3000_v35, %v2114_v28  ;;  %v2118_v38 = vunpack.c.l.bf16 %v2529_v24  ;;  %v2535_v20 = vld [vmem:[%s2698_s20 + $0x1e0] sm:$0xff]  }
  0x89   : > { %v736_v39 = vadd.f32 %v3009_v43, %v601_v30  ;;  %v863_v40 = vmax.f32 %v735_v31, 0.0  ;;  %v603_v0 = vmul.f32 %v3000_v35, %v2115_v32  ;;  %v2119_v41 = vunpack.c.h.bf16 %v2529_v24 }
  0x8a   : > { %2588 = vst [vmem:[%s2737_s27 + $0x190] sm:$0xff] %v2409_v34   ;;  %v2414_v44 = vpack.c.bf16 %v862_v36, %v861_v29  ;;  %v737_v45 = vadd.f32 %v3009_v43, %v602_v37  ;;  %v604_v46 = vmul.f32 %v3000_v35, %v2118_v38  ;;  %v2122_v47 = vunpack.c.l.bf16 %v2530_v33 }
  0x8b   : > { %v864_v48 = vmax.f32 %v736_v39, 0.0  ;;  %v738_v49 = vadd.f32 %v3009_v43, %v603_v0  ;;  %v605_v9 = vmul.f32 %v3000_v35, %v2119_v41  ;;  %v2123_v50 = vunpack.c.h.bf16 %v2530_v33  ;;  %v2536_v33 = vld [vmem:[%s2698_s20 + $0x1e8] sm:$0xff]  }
  0x8c   : > { %2589 = vst [vmem:[%s2737_s27 + $0x198] sm:$0xff] %v2414_v44   ;;  %v865_v51 = vmax.f32 %v737_v45, 0.0  ;;  %v739_v52 = vadd.f32 %v3009_v43, %v604_v46  ;;  %v606_v53 = vmul.f32 %v3000_v35, %v2122_v47  ;;  %v2126_v54 = vunpack.c.l.bf16 %v2531_v42 }
  0x8d   : > { %v2419_v56 = vpack.c.bf16 %v864_v48, %v863_v40  ;;  %v866_v57 = vmax.f32 %v738_v49, 0.0  ;;  %v740_v58 = vadd.f32 %v3009_v43, %v605_v9  ;;  %v607_v59 = vmul.f32 %v3000_v35, %v2123_v50 }
  0x8e   : > { %v867_v60 = vmax.f32 %v739_v52, 0.0  ;;  %v741_v61 = vadd.f32 %v3009_v43, %v606_v53  ;;  %v2127_v62 = vunpack.c.h.bf16 %v2531_v42  ;;  %v608_v63 = vmul.f32 %v3000_v35, %v2126_v54  ;;  %v2537_v42 = vld [vmem:[%s2698_s20 + $0x1f0] sm:$0xff]  }
  0x8f   : > { %2590 = vst [vmem:[%s2737_s27 + $0x1a0] sm:$0xff] %v2419_v56   ;;  %v2424_v2 = vpack.c.bf16 %v866_v57, %v865_v51  ;;  %v868_v3 = vmax.f32 %v740_v58, 0.0  ;;  %v742_v4 = vadd.f32 %v3009_v43, %v607_v59  ;;  %v2130_v5 = vunpack.c.l.bf16 %v2532_v55  ;;  %v2538_v51 = vld [vmem:[%s2698_s20 + $0x1f8] sm:$0xff]  }
  0x90   : > { %v869_v6 = vmax.f32 %v741_v61, 0.0  ;;  %v609_v7 = vmul.f32 %v3000_v35, %v2127_v62  ;;  %v743_v8 = vadd.f32 %v3009_v43, %v608_v63  ;;  %v2131_v10 = vunpack.c.h.bf16 %v2532_v55 }
  0x91   : > { %2591 = vst [vmem:[%s2737_s27 + $0x1a8] sm:$0xff] %v2424_v2   ;;  %v2429_v12 = vpack.c.bf16 %v868_v3, %v867_v60  ;;  %v870_v13 = vmax.f32 %v742_v4, 0.0  ;;  %v610_v14 = vmul.f32 %v3000_v35, %v2130_v5  ;;  %v2134_v15 = vunpack.c.l.bf16 %v2533_v1 }
  0x92   : > { %v744_v16 = vadd.f32 %v3009_v43, %v609_v7  ;;  %v871_v17 = vmax.f32 %v743_v8, 0.0  ;;  %v611_v18 = vmul.f32 %v3000_v35, %v2131_v10  ;;  %v2135_v19 = vunpack.c.h.bf16 %v2533_v1 }
  0x93   : > { %2592 = vst [vmem:[%s2737_s27 + $0x1b0] sm:$0xff] %v2429_v12   ;;  %v2434_v21 = vpack.c.bf16 %v870_v13, %v869_v6  ;;  %v745_v22 = vadd.f32 %v3009_v43, %v610_v14  ;;  %v612_v23 = vmul.f32 %v3000_v35, %v2134_v15  ;;  %v2138_v24 = vunpack.c.l.bf16 %v2534_v11 }
  0x94   : > { %v872_v25 = vmax.f32 %v744_v16, 0.0  ;;  %v746_v26 = vadd.f32 %v3009_v43, %v611_v18  ;;  %v613_v27 = vmul.f32 %v3000_v35, %v2135_v19  ;;  %v2139_v28 = vunpack.c.h.bf16 %v2534_v11 }
  0x95   : > { %2593 = vst [vmem:[%s2737_s27 + $0x1b8] sm:$0xff] %v2434_v21   ;;  %v873_v29 = vmax.f32 %v745_v22, 0.0  ;;  %v747_v30 = vadd.f32 %v3009_v43, %v612_v23  ;;  %v614_v31 = vmul.f32 %v3000_v35, %v2138_v24  ;;  %v2142_v32 = vunpack.c.l.bf16 %v2535_v20 }
  0x96   : > { %v2439_v34 = vpack.c.bf16 %v872_v25, %v871_v17  ;;  %v874_v36 = vmax.f32 %v746_v26, 0.0  ;;  %v748_v37 = vadd.f32 %v3009_v43, %v613_v27  ;;  %v615_v38 = vmul.f32 %v3000_v35, %v2139_v28 }
  0x97   : > { %v875_v39 = vmax.f32 %v747_v30, 0.0  ;;  %v749_v40 = vadd.f32 %v3009_v43, %v614_v31  ;;  %v2143_v0 = vunpack.c.h.bf16 %v2535_v20  ;;  %v616_v41 = vmul.f32 %v3000_v35, %v2142_v32 }
  0x98   : > { %2594 = vst [vmem:[%s2737_s27 + $0x1c0] sm:$0xff] %v2439_v34   ;;  %v2444_v44 = vpack.c.bf16 %v874_v36, %v873_v29  ;;  %v876_v45 = vmax.f32 %v748_v37, 0.0  ;;  %v750_v46 = vadd.f32 %v3009_v43, %v615_v38  ;;  %v2146_v47 = vunpack.c.l.bf16 %v2536_v33 }
  0x99   : > { %v877_v48 = vmax.f32 %v749_v40, 0.0  ;;  %v617_v49 = vmul.f32 %v3000_v35, %v2143_v0  ;;  %v751_v9 = vadd.f32 %v3009_v43, %v616_v41  ;;  %v2147_v50 = vunpack.c.h.bf16 %v2536_v33 }
  0x9a   : > { %2595 = vst [vmem:[%s2737_s27 + $0x1c8] sm:$0xff] %v2444_v44   ;;  %v2449_v52 = vpack.c.bf16 %v876_v45, %v875_v39  ;;  %v878_v53 = vmax.f32 %v750_v46, 0.0  ;;  %v618_v54 = vmul.f32 %v3000_v35, %v2146_v47  ;;  %v2150_v55 = vunpack.c.l.bf16 %v2537_v42 }
  0x9b   : > { %v752_v56 = vadd.f32 %v3009_v43, %v617_v49  ;;  %v879_v57 = vmax.f32 %v751_v9, 0.0  ;;  %v619_v58 = vmul.f32 %v3000_v35, %v2147_v50  ;;  %v2151_v59 = vunpack.c.h.bf16 %v2537_v42 }
  0x9c   : > { %2596 = vst [vmem:[%s2737_s27 + $0x1d0] sm:$0xff] %v2449_v52   ;;  %v2454_v60 = vpack.c.bf16 %v878_v53, %v877_v48  ;;  %v753_v61 = vadd.f32 %v3009_v43, %v618_v54  ;;  %v620_v62 = vmul.f32 %v3000_v35, %v2150_v55  ;;  %v2154_v63 = vunpack.c.l.bf16 %v2538_v51 }
  0x9d   : > { %v880_v1 = vmax.f32 %v752_v56, 0.0  ;;  %v754_v2 = vadd.f32 %v3009_v43, %v619_v58  ;;  %v621_v3 = vmul.f32 %v3000_v35, %v2151_v59  ;;  %v2155_v4 = vunpack.c.h.bf16 %v2538_v51 }
  0x9e   : > { %2597 = vst [vmem:[%s2737_s27 + $0x1d8] sm:$0xff] %v2454_v60   ;;  %v881_v5 = vmax.f32 %v753_v61, 0.0  ;;  %v755_v6 = vadd.f32 %v3009_v43, %v620_v62  ;;  %v622_v7 = vmul.f32 %v3000_v35, %v2154_v63 }
  0x9f   : > { %v2459_v8 = vpack.c.bf16 %v880_v1, %v879_v57  ;;  %v882_v10 = vmax.f32 %v754_v2, 0.0  ;;  %v756_v11 = vadd.f32 %v3009_v43, %v621_v3  ;;  %v623_v12 = vmul.f32 %v3000_v35, %v2155_v4 }
  0xa0   : > { %v883_v13 = vmax.f32 %v755_v6, 0.0  ;;  %v757_v14 = vadd.f32 %v3009_v43, %v622_v7 }
  0xa1   : > { %2598 = vst [vmem:[%s2737_s27 + $0x1e0] sm:$0xff] %v2459_v8   ;;  %v2464_v15 = vpack.c.bf16 %v882_v10, %v881_v5  ;;  %v884_v16 = vmax.f32 %v756_v11, 0.0  ;;  %v758_v17 = vadd.f32 %v3009_v43, %v623_v12 }
  0xa2   : > { %v885_v18 = vmax.f32 %v757_v14, 0.0 }
  0xa3   : > { %2599 = vst [vmem:[%s2737_s27 + $0x1e8] sm:$0xff] %v2464_v15   ;;  %v2469_v19 = vpack.c.bf16 %v884_v16, %v883_v13  ;;  %v886_v20 = vmax.f32 %v758_v17, 0.0 }
  0xa5   : > { %2600 = vst [vmem:[%s2737_s27 + $0x1f0] sm:$0xff] %v2469_v19   ;;  %v2474_v21 = vpack.c.bf16 %v886_v20, %v885_v18 }
  0xa7   : > { %2601 = vst [vmem:[%s2737_s27 + $0x1f8] sm:$0xff] %v2474_v21  }
  0xa8 PF: > { %s13_s14 = sadd.s32 1, %s2650_s14   ;;  %s3124_s12 = smov %s2646_s13 }
  0xa9   : > { %p10_p5 = scmp.ge.s32.totalorder %s13_s14, 4   ;;  %s3125_s13 = smov %s3127_s15 }
  0xab   :  { %12 = sbr.rel (!%p10_p5) target bundleno = 2 (0x2), region = 68 }

// kernel: generator_forward.17
= control target key start
LH: loop header
LB: loop body
LE: loop exit
PB: predicated region body
PF: predicated region fallthrough
CT: control target
= control target key end

     0   :  { %s2734_s9 = smov 0   ;;  %s2736_s10 = smov 0   ;;  %s3089_s0 = inlined_call_operand.vmem [shape: bf16[4,16,256], index: 0, kind: input, shape index: {}]   ;;  %s3090_s1 = inlined_call_operand.vmem [shape: bf16[4,256,2048], index: 1, kind: input, shape index: {}]   ;;  %s3091_s2 = inlined_call_operand.vmem [shape: f32[4,16,2048], index: 2, kind: output, shape index: {}]  }
   0x1   :  { %s2738_s11 = smov 0  }
   0x2 LB: > { %s31_s12 = sadd.s32 1, %s2713_s10  ;;  %p2332_p0 = scmp.ge.s32.totalorder %s2717_s11, 1  ;;  %s2717_s11 = sphi %s2738_s11, %s12_s11   ;;  %s2713_s10 = sphi %s2736_s10, %s3093_s10   ;;  %s2709_s9 = sphi %s2734_s9, %s3092_s9  }
   0x3   : > { %p33_p1 = scmp.ge.s32.totalorder %s31_s12, 4  ;;  %p160_p2 = scmp.lt.s32.totalorder %s2717_s11, 5 }
   0x5   : > { %s3095_s12 = smov (%p33_p1, %s31_s12), 0  ;;  %p161_p3 = pnand %p2332_p0, %p160_p2 }
   0x6   : > { %p206_p4 = scmp.lt.s32.totalorder (!%p161_p3), %s2709_s9, 3 }
   0x7   : > { %164 = sbr.rel (%p161_p3) target bundleno = 508 (0x1fc), region = 28 }
   0xe   : > { %s3097_s9 = smov (!%p206_p4, %s2709_s9), 3 }
   0xf   : > { %s2600_s13 = sshll.u32 %s3097_s9, 11  ;;  %s2599_s17 = sshll.u32 %s3097_s9, 4 }
  0x10   : > { %s2758_s16 = scalar_lea.vmem %s3090_s1, %s2600_s13  ;;  %s2792_s20 = scalar_lea.vmem %s3089_s0, %s2599_s17 }
  0x11   : > { %v244_v0 = vld [vmem:[%s2758_s16] sm:$0xff]  ;;  %v245_v2 = vld [vmem:[%s2758_s16 + $0x8] sm:$0xff]  ;;  %s2601_s21 = sshll.u32 %s3097_s9, 8 }
  0x12   : > { %v252_v1 = vld [vmem:[%s2758_s16 + $0x40] sm:$0xff]  ;;  %v253_v4 = vld [vmem:[%s2758_s16 + $0x48] sm:$0xff]  ;;  %s3046_s24 = scalar_lea.vmem %s3091_s2, %s2601_s21 }
  0x13   : > { %v2342_v3 = vcombine.high %v244_v0, %v252_v1  ;;  %v2341_v5 = vcombine.low %v244_v0, %v252_v1  ;;  %v260_v6 = vld [vmem:[%s2758_s16 + $0x80] sm:$0xff]  ;;  %v2344_v8 = vcombine.high %v245_v2, %v253_v4  ;;  %v2343_v9 = vcombine.low %v245_v2, %v253_v4  ;;  %v261_v11 = vld [vmem:[%s2758_s16 + $0x88] sm:$0xff] }
  0x14   : > { %v268_v7 = vld [vmem:[%s2758_s16 + $0xc0] sm:$0xff]  ;;  %v269_v12 = vld [vmem:[%s2758_s16 + $0xc8] sm:$0xff] }
  0x15   : > { %v2358_v10 = vcombine.high %v260_v6, %v268_v7  ;;  %v276_v13 = vld [vmem:[%s2758_s16 + $0x100] sm:$0xff]  ;;  %1790 = vmatprep.subr.bf16.mxu0 %v2342_v3  ;;  %v2360_v14 = vcombine.high %v261_v11, %v269_v12  ;;  %v277_v16 = vld [vmem:[%s2758_s16 + $0x108] sm:$0xff]  ;;  %1833 = vmatprep.subr.bf16.mxu1 %v2344_v8  ;;  %v2357_v18 = vcombine.low %v260_v6, %v268_v7 }
  0x16   : > { %v284_v15 = vld [vmem:[%s2758_s16 + $0x140] sm:$0xff]  ;;  %v285_v17 = vld [vmem:[%s2758_s16 + $0x148] sm:$0xff]  ;;  %1791 = vmatpush1.bf16.msra.mxu0 %v2341_v5  ;;  %1834 = vmatpush1.bf16.msra.mxu1 %v2343_v9  ;;  %v2359_v19 = vcombine.low %v261_v11, %v269_v12 }
  0x17   : > { %1792 = vmatprep.subr.bf16.mxu0 %v2358_v10  ;;  %v2374_v20 = vcombine.high %v276_v13, %v284_v15  ;;  %1835 = vmatprep.subr.bf16.mxu1 %v2360_v14  ;;  %v2376_v21 = vcombine.high %v277_v16, %v285_v17  ;;  %v292_v22 = vld [vmem:[%s2758_s16 + $0x180] sm:$0xff]  ;;  %v293_v24 = vld [vmem:[%s2758_s16 + $0x188] sm:$0xff]  ;;  %v2373_v26 = vcombine.low %v276_v13, %v284_v15 }
  0x18   : > { %v300_v23 = vld [vmem:[%s2758_s16 + $0x1c0] sm:$0xff]  ;;  %v301_v25 = vld [vmem:[%s2758_s16 + $0x1c8] sm:$0xff]  ;;  %v2375_v27 = vcombine.low %v277_v16, %v285_v17 }
  0x19   : > { %v2390_v28 = vcombine.high %v292_v22, %v300_v23  ;;  %v2392_v29 = vcombine.high %v293_v24, %v301_v25  ;;  %v308_v30 = vld [vmem:[%s2758_s16 + $0x200] sm:$0xff]  ;;  %v309_v32 = vld [vmem:[%s2758_s16 + $0x208] sm:$0xff]  ;;  %v2389_v34 = vcombine.low %v292_v22, %v300_v23  ;;  %v2391_v35 = vcombine.low %v293_v24, %v301_v25 }
  0x1a   : > { %1793 = vmatpush1.bf16.msra.mxu0 %v2357_v18  ;;  %1836 = vmatpush1.bf16.msra.mxu1 %v2359_v19  ;;  %v316_v31 = vld [vmem:[%s2758_s16 + $0x240] sm:$0xff]  ;;  %v317_v33 = vld [vmem:[%s2758_s16 + $0x248] sm:$0xff] }
  0x1b   : > { %1794 = vmatprep.subr.bf16.mxu0 %v2374_v20  ;;  %1837 = vmatprep.subr.bf16.mxu1 %v2376_v21  ;;  %v2406_v36 = vcombine.high %v308_v30, %v316_v31  ;;  %v2408_v37 = vcombine.high %v309_v32, %v317_v33  ;;  %v324_v38 = vld [vmem:[%s2758_s16 + $0x280] sm:$0xff]  ;;  %v325_v40 = vld [vmem:[%s2758_s16 + $0x288] sm:$0xff]  ;;  %v2405_v42 = vcombine.low %v308_v30, %v316_v31 }
  0x1c   : > { %v332_v39 = vld [vmem:[%s2758_s16 + $0x2c0] sm:$0xff]  ;;  %v333_v41 = vld [vmem:[%s2758_s16 + $0x2c8] sm:$0xff]  ;;  %v2407_v43 = vcombine.low %v309_v32, %v317_v33 }
  0x1d   : > { %v2422_v44 = vcombine.high %v324_v38, %v332_v39  ;;  %v2424_v45 = vcombine.high %v325_v40, %v333_v41  ;;  %v340_v46 = vld [vmem:[%s2758_s16 + $0x300] sm:$0xff]  ;;  %v341_v48 = vld [vmem:[%s2758_s16 + $0x308] sm:$0xff]  ;;  %v2421_v50 = vcombine.low %v324_v38, %v332_v39  ;;  %v2423_v51 = vcombine.low %v325_v40, %v333_v41 }
  0x1e   : > { %1795 = vmatpush1.bf16.msra.mxu0 %v2373_v26  ;;  %1838 = vmatpush1.bf16.msra.mxu1 %v2375_v27  ;;  %v348_v47 = vld [vmem:[%s2758_s16 + $0x340] sm:$0xff]  ;;  %v349_v49 = vld [vmem:[%s2758_s16 + $0x348] sm:$0xff] }
  0x1f   : > { %1796 = vmatprep.subr.bf16.mxu0 %v2390_v28  ;;  %1839 = vmatprep.subr.bf16.mxu1 %v2392_v29  ;;  %v2438_v52 = vcombine.high %v340_v46, %v348_v47  ;;  %v2440_v53 = vcombine.high %v341_v48, %v349_v49  ;;  %v356_v54 = vld [vmem:[%s2758_s16 + $0x380] sm:$0xff]  ;;  %v357_v57 = vld [vmem:[%s2758_s16 + $0x388] sm:$0xff]  ;;  %v2437_v59 = vcombine.low %v340_v46, %v348_v47 }
  0x20   : > { %v364_v55 = vld [vmem:[%s2758_s16 + $0x3c0] sm:$0xff]  ;;  %v365_v58 = vld [vmem:[%s2758_s16 + $0x3c8] sm:$0xff]  ;;  %v2439_v60 = vcombine.low %v341_v48, %v349_v49 }
  0x21   : > { %v2797_v56 = vld [vmem:[%s2792_s20 + $0x4] ss:$8 sps:$4 sm:$0xff]   ;;  %v2454_v61 = vcombine.high %v356_v54, %v364_v55  ;;  %v2456_v62 = vcombine.high %v357_v57, %v365_v58  ;;  %v2453_v3 = vcombine.low %v356_v54, %v364_v55  ;;  %v2455_v4 = vcombine.low %v357_v57, %v365_v58 }
  0x22   : > { %1797 = vmatpush1.bf16.msra.mxu0 %v2389_v34  ;;  %1840 = vmatpush1.bf16.msra.mxu1 %v2391_v35  ;;  %v372_v63 = vld [vmem:[%s2758_s16 + $0x400] sm:$0xff]  ;;  %v373_v1 = vld [vmem:[%s2758_s16 + $0x408] sm:$0xff] }
  0x23   : > { %1798 = vmatprep.subr.bf16.mxu0 %v2406_v36  ;;  %1841 = vmatprep.subr.bf16.mxu1 %v2408_v37  ;;  %v380_v0 = vld [vmem:[%s2758_s16 + $0x440] sm:$0xff]  ;;  %v381_v2 = vld [vmem:[%s2758_s16 + $0x448] sm:$0xff] }
  0x24   : > { %1822 = vmatprep.mubr.bf16.mxu0 %v2797_v56  ;;  %1865 = vmatprep.mubr.bf16.mxu1 %v2797_v56  ;;  %v2470_v5 = vcombine.high %v372_v63, %v380_v0  ;;  %v2472_v6 = vcombine.high %v373_v1, %v381_v2  ;;  %v388_v7 = vld [vmem:[%s2758_s16 + $0x480] sm:$0xff]  ;;  %v389_v9 = vld [vmem:[%s2758_s16 + $0x488] sm:$0xff]  ;;  %v2469_v11 = vcombine.low %v372_v63, %v380_v0  ;;  %v246_v0 = vld [vmem:[%s2758_s16 + $0x10] sm:$0xff] }
  0x25   : > { %v396_v8 = vld [vmem:[%s2758_s16 + $0x4c0] sm:$0xff]  ;;  %v397_v10 = vld [vmem:[%s2758_s16 + $0x4c8] sm:$0xff]  ;;  %v2471_v12 = vcombine.low %v373_v1, %v381_v2  ;;  %v254_v1 = vld [vmem:[%s2758_s16 + $0x50] sm:$0xff] }
  0x26   : > { %1799 = vmatpush1.bf16.msra.mxu0 %v2405_v42  ;;  %1842 = vmatpush1.bf16.msra.mxu1 %v2407_v43  ;;  %v2486_v13 = vcombine.high %v388_v7, %v396_v8  ;;  %v2488_v14 = vcombine.high %v389_v9, %v397_v10  ;;  %v404_v15 = vld [vmem:[%s2758_s16 + $0x500] sm:$0xff]  ;;  %v405_v17 = vld [vmem:[%s2758_s16 + $0x508] sm:$0xff]  ;;  %v2485_v19 = vcombine.low %v388_v7, %v396_v8  ;;  %v247_v2 = vld [vmem:[%s2758_s16 + $0x18] sm:$0xff] }
  0x27   : > { %1800 = vmatprep.subr.bf16.mxu0 %v2422_v44  ;;  %1843 = vmatprep.subr.bf16.mxu1 %v2424_v45  ;;  %v412_v16 = vld [vmem:[%s2758_s16 + $0x540] sm:$0xff]  ;;  %v413_v18 = vld [vmem:[%s2758_s16 + $0x548] sm:$0xff]  ;;  %v2487_v20 = vcombine.low %v389_v9, %v397_v10  ;;  %v262_v8 = vld [vmem:[%s2758_s16 + $0x90] sm:$0xff] }
  0x28   : > { %v2502_v21 = vcombine.high %v404_v15, %v412_v16  ;;  %v2504_v22 = vcombine.high %v405_v17, %v413_v18  ;;  %v420_v23 = vld [vmem:[%s2758_s16 + $0x580] sm:$0xff]  ;;  %v421_v25 = vld [vmem:[%s2758_s16 + $0x588] sm:$0xff]  ;;  %v2501_v27 = vcombine.low %v404_v15, %v412_v16  ;;  %v2503_v28 = vcombine.low %v405_v17, %v413_v18  ;;  %v270_v9 = vld [vmem:[%s2758_s16 + $0xd0] sm:$0xff] }
  0x29   : > { %v428_v24 = vld [vmem:[%s2758_s16 + $0x5c0] sm:$0xff]  ;;  %v429_v26 = vld [vmem:[%s2758_s16 + $0x5c8] sm:$0xff]  ;;  %v2362_v15 = vcombine.high %v262_v8, %v270_v9  ;;  %v278_v17 = vld [vmem:[%s2758_s16 + $0x110] sm:$0xff] }
  0x2a   : > { %1801 = vmatpush1.bf16.msra.mxu0 %v2421_v50  ;;  %1844 = vmatpush1.bf16.msra.mxu1 %v2423_v51  ;;  %v2518_v29 = vcombine.high %v420_v23, %v428_v24  ;;  %v2520_v30 = vcombine.high %v421_v25, %v429_v26  ;;  %v436_v31 = vld [vmem:[%s2758_s16 + $0x600] sm:$0xff]  ;;  %v437_v33 = vld [vmem:[%s2758_s16 + $0x608] sm:$0xff]  ;;  %v2517_v35 = vcombine.low %v420_v23, %v428_v24  ;;  %v286_v18 = vld [vmem:[%s2758_s16 + $0x150] sm:$0xff] }
  0x2b   : > { %1802 = vmatprep.subr.bf16.mxu0 %v2438_v52  ;;  %1845 = vmatprep.subr.bf16.mxu1 %v2440_v53  ;;  %v444_v32 = vld [vmem:[%s2758_s16 + $0x640] sm:$0xff]  ;;  %v445_v34 = vld [vmem:[%s2758_s16 + $0x648] sm:$0xff]  ;;  %v2519_v36 = vcombine.low %v421_v25, %v429_v26  ;;  %v2378_v23 = vcombine.high %v278_v17, %v286_v18  ;;  %v294_v25 = vld [vmem:[%s2758_s16 + $0x190] sm:$0xff] }
  0x2c   : > { %v2534_v37 = vcombine.high %v436_v31, %v444_v32  ;;  %v2536_v38 = vcombine.high %v437_v33, %v445_v34  ;;  %v452_v39 = vld [vmem:[%s2758_s16 + $0x680] sm:$0xff]  ;;  %v453_v41 = vld [vmem:[%s2758_s16 + $0x688] sm:$0xff]  ;;  %v2533_v43 = vcombine.low %v436_v31, %v444_v32  ;;  %v2535_v44 = vcombine.low %v437_v33, %v445_v34  ;;  %v302_v26 = vld [vmem:[%s2758_s16 + $0x1d0] sm:$0xff] }
  0x2d   : > { %v460_v40 = vld [vmem:[%s2758_s16 + $0x6c0] sm:$0xff]  ;;  %v461_v42 = vld [vmem:[%s2758_s16 + $0x6c8] sm:$0xff]  ;;  %v2394_v31 = vcombine.high %v294_v25, %v302_v26  ;;  %v310_v33 = vld [vmem:[%s2758_s16 + $0x210] sm:$0xff] }
  0x2e   : > { %1803 = vmatpush1.bf16.msra.mxu0 %v2437_v59  ;;  %1846 = vmatpush1.bf16.msra.mxu1 %v2439_v60  ;;  %v2550_v45 = vcombine.high %v452_v39, %v460_v40  ;;  %v2552_v46 = vcombine.high %v453_v41, %v461_v42  ;;  %v468_v47 = vld [vmem:[%s2758_s16 + $0x700] sm:$0xff]  ;;  %v469_v49 = vld [vmem:[%s2758_s16 + $0x708] sm:$0xff]  ;;  %v2549_v51 = vcombine.low %v452_v39, %v460_v40  ;;  %v318_v34 = vld [vmem:[%s2758_s16 + $0x250] sm:$0xff] }
  0x2f   : > { %1804 = vmatprep.subr.bf16.mxu0 %v2454_v61  ;;  %1847 = vmatprep.subr.bf16.mxu1 %v2456_v62  ;;  %v476_v48 = vld [vmem:[%s2758_s16 + $0x740] sm:$0xff]  ;;  %v477_v50 = vld [vmem:[%s2758_s16 + $0x748] sm:$0xff]  ;;  %v2551_v52 = vcombine.low %v453_v41, %v461_v42  ;;  %v2410_v39 = vcombine.high %v310_v33, %v318_v34  ;;  %v326_v41 = vld [vmem:[%s2758_s16 + $0x290] sm:$0xff] }
  0x30   : > { %v2566_v53 = vcombine.high %v468_v47, %v476_v48  ;;  %v2568_v54 = vcombine.high %v469_v49, %v477_v50  ;;  %v484_v55 = vld [vmem:[%s2758_s16 + $0x780] sm:$0xff]  ;;  %v485_v58 = vld [vmem:[%s2758_s16 + $0x788] sm:$0xff]  ;;  %v2565_v60 = vcombine.low %v468_v47, %v476_v48  ;;  %v2567_v61 = vcombine.low %v469_v49, %v477_v50  ;;  %v334_v42 = vld [vmem:[%s2758_s16 + $0x2d0] sm:$0xff] }
  0x31   : > { %v492_v57 = vld [vmem:[%s2758_s16 + $0x7c0] sm:$0xff]  ;;  %v493_v59 = vld [vmem:[%s2758_s16 + $0x7c8] sm:$0xff]  ;;  %v2426_v47 = vcombine.high %v326_v41, %v334_v42  ;;  %v342_v49 = vld [vmem:[%s2758_s16 + $0x310] sm:$0xff] }
  0x32   : > { %1805 = vmatpush1.bf16.msra.mxu0 %v2453_v3  ;;  %1848 = vmatpush1.bf16.msra.mxu1 %v2455_v4  ;;  %v2582_v62 = vcombine.high %v484_v55, %v492_v57  ;;  %v2584_v63 = vcombine.high %v485_v58, %v493_v59  ;;  %v255_v3 = vld [vmem:[%s2758_s16 + $0x58] sm:$0xff]  ;;  %v2581_v4 = vcombine.low %v484_v55, %v492_v57  ;;  %v2842_v10 = vld [vmem:[%s2792_s20] ss:$8 sps:$4 sm:$0xff]   ;;  %v350_v50 = vld [vmem:[%s2758_s16 + $0x350] sm:$0xff] }
  0x33   : > { %1806 = vmatprep.subr.bf16.mxu0 %v2470_v5  ;;  %1849 = vmatprep.subr.bf16.mxu1 %v2472_v6  ;;  %v2583_v5 = vcombine.low %v485_v58, %v493_v59  ;;  %v2346_v6 = vcombine.high %v246_v0, %v254_v1  ;;  %v2348_v7 = vcombine.high %v247_v2, %v255_v3  ;;  %v358_v58 = vld [vmem:[%s2758_s16 + $0x390] sm:$0xff] }
  0x34   : > { %v2442_v55 = vcombine.high %v342_v49, %v350_v50  ;;  %v366_v59 = vld [vmem:[%s2758_s16 + $0x3d0] sm:$0xff] }
  0x36   : > { %1807 = vmatpush1.bf16.msra.mxu0 %v2469_v11  ;;  %1850 = vmatpush1.bf16.msra.mxu1 %v2471_v12  ;;  %v263_v11 = vld [vmem:[%s2758_s16 + $0x98] sm:$0xff] }
  0x37   : > { %1808 = vmatprep.subr.bf16.mxu0 %v2486_v13  ;;  %1851 = vmatprep.subr.bf16.mxu1 %v2488_v14  ;;  %v271_v12 = vld [vmem:[%s2758_s16 + $0xd8] sm:$0xff]  ;;  %v2345_v13 = vcombine.low %v246_v0, %v254_v1  ;;  %v2347_v14 = vcombine.low %v247_v2, %v255_v3  ;;  %v2458_v0 = vcombine.high %v358_v58, %v366_v59  ;;  %v374_v2 = vld [vmem:[%s2758_s16 + $0x410] sm:$0xff] }
  0x38   : > { %v2364_v16 = vcombine.high %v263_v11, %v271_v12  ;;  %v382_v3 = vld [vmem:[%s2758_s16 + $0x450] sm:$0xff] }
  0x3a   : > { %1809 = vmatpush1.bf16.msra.mxu0 %v2485_v19  ;;  %1852 = vmatpush1.bf16.msra.mxu1 %v2487_v20  ;;  %v279_v19 = vld [vmem:[%s2758_s16 + $0x118] sm:$0xff] }
  0x3b   : > { %1810 = vmatprep.subr.bf16.mxu0 %v2502_v21  ;;  %1853 = vmatprep.subr.bf16.mxu1 %v2504_v22  ;;  %v287_v20 = vld [vmem:[%s2758_s16 + $0x158] sm:$0xff]  ;;  %v2361_v21 = vcombine.low %v262_v8, %v270_v9  ;;  %v2363_v22 = vcombine.low %v263_v11, %v271_v12  ;;  %v2474_v8 = vcombine.high %v374_v2, %v382_v3  ;;  %v390_v11 = vld [vmem:[%s2758_s16 + $0x490] sm:$0xff] }
  0x3c   : > { %v2380_v24 = vcombine.high %v279_v19, %v287_v20  ;;  %v398_v12 = vld [vmem:[%s2758_s16 + $0x4d0] sm:$0xff] }
  0x3e   : > { %1811 = vmatpush1.bf16.msra.mxu0 %v2501_v27  ;;  %1854 = vmatpush1.bf16.msra.mxu1 %v2503_v28  ;;  %v295_v27 = vld [vmem:[%s2758_s16 + $0x198] sm:$0xff] }
  0x3f   : > { %1812 = vmatprep.subr.bf16.mxu0 %v2518_v29  ;;  %1855 = vmatprep.subr.bf16.mxu1 %v2520_v30  ;;  %v303_v28 = vld [vmem:[%s2758_s16 + $0x1d8] sm:$0xff]  ;;  %v2377_v29 = vcombine.low %v278_v17, %v286_v18  ;;  %v2379_v30 = vcombine.low %v279_v19, %v287_v20  ;;  %v2490_v17 = vcombine.high %v390_v11, %v398_v12  ;;  %v406_v19 = vld [vmem:[%s2758_s16 + $0x510] sm:$0xff] }
  0x40   : > { %v2396_v32 = vcombine.high %v295_v27, %v303_v28  ;;  %v414_v20 = vld [vmem:[%s2758_s16 + $0x550] sm:$0xff] }
  0x42   : > { %1813 = vmatpush1.bf16.msra.mxu0 %v2517_v35  ;;  %1856 = vmatpush1.bf16.msra.mxu1 %v2519_v36  ;;  %v311_v35 = vld [vmem:[%s2758_s16 + $0x218] sm:$0xff] }
  0x43   : > { %1814 = vmatprep.subr.bf16.mxu0 %v2534_v37  ;;  %1857 = vmatprep.subr.bf16.mxu1 %v2536_v38  ;;  %v319_v36 = vld [vmem:[%s2758_s16 + $0x258] sm:$0xff]  ;;  %v2393_v37 = vcombine.low %v294_v25, %v302_v26  ;;  %v2395_v38 = vcombine.low %v295_v27, %v303_v28  ;;  %v2506_v25 = vcombine.high %v406_v19, %v414_v20  ;;  %v422_v27 = vld [vmem:[%s2758_s16 + $0x590] sm:$0xff] }
  0x44   : > { %v2412_v40 = vcombine.high %v311_v35, %v319_v36  ;;  %v430_v28 = vld [vmem:[%s2758_s16 + $0x5d0] sm:$0xff] }
  0x46   : > { %1815 = vmatpush1.bf16.msra.mxu0 %v2533_v43  ;;  %1858 = vmatpush1.bf16.msra.mxu1 %v2535_v44  ;;  %v327_v43 = vld [vmem:[%s2758_s16 + $0x298] sm:$0xff] }
  0x47   : > { %1816 = vmatprep.subr.bf16.mxu0 %v2550_v45  ;;  %1859 = vmatprep.subr.bf16.mxu1 %v2552_v46  ;;  %v335_v44 = vld [vmem:[%s2758_s16 + $0x2d8] sm:$0xff]  ;;  %v2409_v45 = vcombine.low %v310_v33, %v318_v34  ;;  %v2411_v46 = vcombine.low %v311_v35, %v319_v36  ;;  %v2522_v33 = vcombine.high %v422_v27, %v430_v28  ;;  %v438_v35 = vld [vmem:[%s2758_s16 + $0x610] sm:$0xff] }
  0x48   : > { %v2428_v48 = vcombine.high %v327_v43, %v335_v44  ;;  %v446_v36 = vld [vmem:[%s2758_s16 + $0x650] sm:$0xff] }
  0x4a   : > { %1817 = vmatpush1.bf16.msra.mxu0 %v2549_v51  ;;  %1860 = vmatpush1.bf16.msra.mxu1 %v2551_v52  ;;  %v343_v51 = vld [vmem:[%s2758_s16 + $0x318] sm:$0xff] }
  0x4b   : > { %1818 = vmatprep.subr.bf16.mxu0 %v2566_v53  ;;  %1861 = vmatprep.subr.bf16.mxu1 %v2568_v54  ;;  %v351_v52 = vld [vmem:[%s2758_s16 + $0x358] sm:$0xff]  ;;  %v2425_v53 = vcombine.low %v326_v41, %v334_v42  ;;  %v2427_v54 = vcombine.low %v327_v43, %v335_v44  ;;  %v2538_v41 = vcombine.high %v438_v35, %v446_v36  ;;  %v454_v43 = vld [vmem:[%s2758_s16 + $0x690] sm:$0xff] }
  0x4c   : > { %v2444_v57 = vcombine.high %v343_v51, %v351_v52  ;;  %v462_v44 = vld [vmem:[%s2758_s16 + $0x6d0] sm:$0xff] }
  0x4e   : > { %1819 = vmatpush1.bf16.msra.mxu0 %v2565_v60  ;;  %1862 = vmatpush1.bf16.msra.mxu1 %v2567_v61  ;;  %v359_v60 = vld [vmem:[%s2758_s16 + $0x398] sm:$0xff] }
  0x4f   : > { %1820 = vmatprep.subr.bf16.mxu0 %v2582_v62  ;;  %1863 = vmatprep.subr.bf16.mxu1 %v2584_v63  ;;  %v367_v61 = vld [vmem:[%s2758_s16 + $0x3d8] sm:$0xff]  ;;  %v2441_v62 = vcombine.low %v342_v49, %v350_v50  ;;  %v2443_v63 = vcombine.low %v343_v51, %v351_v52  ;;  %v2554_v49 = vcombine.high %v454_v43, %v462_v44  ;;  %v470_v51 = vld [vmem:[%s2758_s16 + $0x710] sm:$0xff] }
  0x50   : > { %v2460_v1 = vcombine.high %v359_v60, %v367_v61  ;;  %v478_v52 = vld [vmem:[%s2758_s16 + $0x750] sm:$0xff] }
  0x52   : > { %1821 = vmatpush1.bf16.msra.mxu0 %v2581_v4  ;;  %1864 = vmatpush1.bf16.msra.mxu1 %v2583_v5  ;;  %v375_v4 = vld [vmem:[%s2758_s16 + $0x418] sm:$0xff] }
  0x53   : > { %1876 = vmatprep.subr.bf16.mxu0 %v2346_v6  ;;  %1919 = vmatprep.subr.bf16.mxu1 %v2348_v7  ;;  %v383_v5 = vld [vmem:[%s2758_s16 + $0x458] sm:$0xff]  ;;  %v2457_v6 = vcombine.low %v358_v58, %v366_v59  ;;  %v2459_v7 = vcombine.low %v359_v60, %v367_v61  ;;  %v2570_v58 = vcombine.high %v470_v51, %v478_v52  ;;  %v486_v60 = vld [vmem:[%s2758_s16 + $0x790] sm:$0xff] }
  0x54   : > { %v2476_v9 = vcombine.high %v375_v4, %v383_v5  ;;  %v494_v61 = vld [vmem:[%s2758_s16 + $0x7d0] sm:$0xff] }
  0x55   : > { %1823 = vmatmul.mubr.bf16.vlgmr.msra.gmra.mrb[0].mxu0 %v2842_v10  ;;  %1866 = vmatmul.mubr.bf16.vlgmr.msra.gmra.mrb[0].mxu1 %v2842_v10 }
  0x56   : > { %1877 = vmatpush1.bf16.msra.mxu0 %v2345_v13  ;;  %1920 = vmatpush1.bf16.msra.mxu1 %v2347_v14  ;;  %v391_v13 = vld [vmem:[%s2758_s16 + $0x498] sm:$0xff] }
  0x57   : > { %1878 = vmatprep.subr.bf16.mxu0 %v2362_v15  ;;  %1921 = vmatprep.subr.bf16.mxu1 %v2364_v16  ;;  %v399_v14 = vld [vmem:[%s2758_s16 + $0x4d8] sm:$0xff]  ;;  %v2473_v15 = vcombine.low %v374_v2, %v382_v3  ;;  %v2475_v16 = vcombine.low %v375_v4, %v383_v5  ;;  %v2586_v2 = vcombine.high %v486_v60, %v494_v61  ;;  %v248_v4 = vld [vmem:[%s2758_s16 + $0x20] sm:$0xff] }
  0x58   : > { %1908 = vmatprep.mubr.bf16.mxu0 %v2797_v56  ;;  %1951 = vmatprep.mubr.bf16.mxu1 %v2797_v56  ;;  %v2492_v18 = vcombine.high %v391_v13, %v399_v14  ;;  %v256_v5 = vld [vmem:[%s2758_s16 + $0x60] sm:$0xff] }
  0x5a   : > { %1879 = vmatpush1.bf16.msra.mxu0 %v2361_v21  ;;  %1922 = vmatpush1.bf16.msra.mxu1 %v2363_v22  ;;  %v407_v21 = vld [vmem:[%s2758_s16 + $0x518] sm:$0xff] }
  0x5b   : > { %1880 = vmatprep.subr.bf16.mxu0 %v2378_v23  ;;  %1923 = vmatprep.subr.bf16.mxu1 %v2380_v24  ;;  %v415_v22 = vld [vmem:[%s2758_s16 + $0x558] sm:$0xff]  ;;  %v2489_v23 = vcombine.low %v390_v11, %v398_v12  ;;  %v2491_v24 = vcombine.low %v391_v13, %v399_v14  ;;  %v2350_v11 = vcombine.high %v248_v4, %v256_v5  ;;  %v264_v13 = vld [vmem:[%s2758_s16 + $0xa0] sm:$0xff] }
  0x5c   : > { %v2508_v26 = vcombine.high %v407_v21, %v415_v22  ;;  %v272_v14 = vld [vmem:[%s2758_s16 + $0xe0] sm:$0xff] }
  0x5e   : > { %1881 = vmatpush1.bf16.msra.mxu0 %v2377_v29  ;;  %1924 = vmatpush1.bf16.msra.mxu1 %v2379_v30  ;;  %v423_v29 = vld [vmem:[%s2758_s16 + $0x598] sm:$0xff] }
  0x5f   : > { %1882 = vmatprep.subr.bf16.mxu0 %v2394_v31  ;;  %1925 = vmatprep.subr.bf16.mxu1 %v2396_v32  ;;  %v431_v30 = vld [vmem:[%s2758_s16 + $0x5d8] sm:$0xff]  ;;  %v2505_v31 = vcombine.low %v406_v19, %v414_v20  ;;  %v2507_v32 = vcombine.low %v407_v21, %v415_v22  ;;  %v2366_v19 = vcombine.high %v264_v13, %v272_v14  ;;  %v280_v21 = vld [vmem:[%s2758_s16 + $0x120] sm:$0xff] }
  0x60   : > { %v2524_v34 = vcombine.high %v423_v29, %v431_v30  ;;  %v288_v22 = vld [vmem:[%s2758_s16 + $0x160] sm:$0xff] }
  0x62   : > { %1883 = vmatpush1.bf16.msra.mxu0 %v2393_v37  ;;  %1926 = vmatpush1.bf16.msra.mxu1 %v2395_v38  ;;  %v439_v37 = vld [vmem:[%s2758_s16 + $0x618] sm:$0xff] }
  0x63   : > { %1884 = vmatprep.subr.bf16.mxu0 %v2410_v39  ;;  %1927 = vmatprep.subr.bf16.mxu1 %v2412_v40  ;;  %v447_v38 = vld [vmem:[%s2758_s16 + $0x658] sm:$0xff]  ;;  %v2521_v39 = vcombine.low %v422_v27, %v430_v28  ;;  %v2523_v40 = vcombine.low %v423_v29, %v431_v30  ;;  %v2382_v27 = vcombine.high %v280_v21, %v288_v22  ;;  %v296_v29 = vld [vmem:[%s2758_s16 + $0x1a0] sm:$0xff] }
  0x64   : > { %v2540_v42 = vcombine.high %v439_v37, %v447_v38  ;;  %v304_v30 = vld [vmem:[%s2758_s16 + $0x1e0] sm:$0xff] }
  0x66   : > { %1885 = vmatpush1.bf16.msra.mxu0 %v2409_v45  ;;  %1928 = vmatpush1.bf16.msra.mxu1 %v2411_v46  ;;  %v455_v45 = vld [vmem:[%s2758_s16 + $0x698] sm:$0xff] }
  0x67   : > { %1886 = vmatprep.subr.bf16.mxu0 %v2426_v47  ;;  %1929 = vmatprep.subr.bf16.mxu1 %v2428_v48  ;;  %v463_v46 = vld [vmem:[%s2758_s16 + $0x6d8] sm:$0xff]  ;;  %v2537_v47 = vcombine.low %v438_v35, %v446_v36  ;;  %v2539_v48 = vcombine.low %v439_v37, %v447_v38  ;;  %v2398_v35 = vcombine.high %v296_v29, %v304_v30  ;;  %v312_v37 = vld [vmem:[%s2758_s16 + $0x220] sm:$0xff] }
  0x68   : > { %v2556_v50 = vcombine.high %v455_v45, %v463_v46  ;;  %v320_v38 = vld [vmem:[%s2758_s16 + $0x260] sm:$0xff] }
  0x6a   : > { %1887 = vmatpush1.bf16.msra.mxu0 %v2425_v53  ;;  %1930 = vmatpush1.bf16.msra.mxu1 %v2427_v54  ;;  %v471_v53 = vld [vmem:[%s2758_s16 + $0x718] sm:$0xff] }
  0x6b   : > { %1888 = vmatprep.subr.bf16.mxu0 %v2442_v55  ;;  %1931 = vmatprep.subr.bf16.mxu1 %v2444_v57  ;;  %v479_v54 = vld [vmem:[%s2758_s16 + $0x758] sm:$0xff]  ;;  %v2553_v55 = vcombine.low %v454_v43, %v462_v44  ;;  %v2555_v57 = vcombine.low %v455_v45, %v463_v46  ;;  %v328_v44 = vld [vmem:[%s2758_s16 + $0x2a0] sm:$0xff]  ;;  %v329_v46 = vld [vmem:[%s2758_s16 + $0x2a8] sm:$0xff] }
  0x6c   : > { %v2572_v59 = vcombine.high %v471_v53, %v479_v54  ;;  %v336_v45 = vld [vmem:[%s2758_s16 + $0x2e0] sm:$0xff] }
  0x6e   : > { %1889 = vmatpush1.bf16.msra.mxu0 %v2441_v62  ;;  %1932 = vmatpush1.bf16.msra.mxu1 %v2443_v63  ;;  %v487_v62 = vld [vmem:[%s2758_s16 + $0x798] sm:$0xff] }
  0x6f   : > { %1890 = vmatprep.subr.bf16.mxu0 %v2458_v0  ;;  %1933 = vmatprep.subr.bf16.mxu1 %v2460_v1  ;;  %v495_v63 = vld [vmem:[%s2758_s16 + $0x7d8] sm:$0xff]  ;;  %v2569_v0 = vcombine.low %v470_v51, %v478_v52  ;;  %v2571_v1 = vcombine.low %v471_v53, %v479_v54  ;;  %v344_v52 = vld [vmem:[%s2758_s16 + $0x320] sm:$0xff]  ;;  %v345_v54 = vld [vmem:[%s2758_s16 + $0x328] sm:$0xff] }
  0x70   : > { %v2588_v3 = vcombine.high %v487_v62, %v495_v63  ;;  %v352_v53 = vld [vmem:[%s2758_s16 + $0x360] sm:$0xff] }
  0x72   : > { %1891 = vmatpush1.bf16.msra.mxu0 %v2457_v6  ;;  %1934 = vmatpush1.bf16.msra.mxu1 %v2459_v7  ;;  %v249_v6 = vld [vmem:[%s2758_s16 + $0x28] sm:$0xff] }
  0x73   : > { %1892 = vmatprep.subr.bf16.mxu0 %v2474_v8  ;;  %1935 = vmatprep.subr.bf16.mxu1 %v2476_v9  ;;  %v257_v7 = vld [vmem:[%s2758_s16 + $0x68] sm:$0xff]  ;;  %v2585_v8 = vcombine.low %v486_v60, %v494_v61  ;;  %v2587_v9 = vcombine.low %v487_v62, %v495_v63  ;;  %v360_v61 = vld [vmem:[%s2758_s16 + $0x3a0] sm:$0xff] }
  0x74   : > { %v2352_v12 = vcombine.high %v249_v6, %v257_v7  ;;  %v368_v62 = vld [vmem:[%s2758_s16 + $0x3e0] sm:$0xff]  ;;  %v361_v63 = vld [vmem:[%s2758_s16 + $0x3a8] sm:$0xff] }
  0x76   : > { %1893 = vmatpush1.bf16.msra.mxu0 %v2473_v15  ;;  %1936 = vmatpush1.bf16.msra.mxu1 %v2475_v16  ;;  %v265_v15 = vld [vmem:[%s2758_s16 + $0xa8] sm:$0xff] }
  0x77   : > { %1894 = vmatprep.subr.bf16.mxu0 %v2490_v17  ;;  %1937 = vmatprep.subr.bf16.mxu1 %v2492_v18  ;;  %v273_v16 = vld [vmem:[%s2758_s16 + $0xe8] sm:$0xff]  ;;  %v2349_v17 = vcombine.low %v248_v4, %v256_v5  ;;  %v2351_v18 = vcombine.low %v249_v6, %v257_v7  ;;  %v376_v5 = vld [vmem:[%s2758_s16 + $0x420] sm:$0xff] }
  0x78   : > { %v2368_v20 = vcombine.high %v265_v15, %v273_v16  ;;  %v384_v6 = vld [vmem:[%s2758_s16 + $0x460] sm:$0xff]  ;;  %v377_v7 = vld [vmem:[%s2758_s16 + $0x428] sm:$0xff] }
  0x7a   : > { %1895 = vmatpush1.bf16.msra.mxu0 %v2489_v23  ;;  %1938 = vmatpush1.bf16.msra.mxu1 %v2491_v24  ;;  %v281_v23 = vld [vmem:[%s2758_s16 + $0x128] sm:$0xff] }
  0x7b   : > { %1896 = vmatprep.subr.bf16.mxu0 %v2506_v25  ;;  %1939 = vmatprep.subr.bf16.mxu1 %v2508_v26  ;;  %v289_v24 = vld [vmem:[%s2758_s16 + $0x168] sm:$0xff]  ;;  %v2365_v25 = vcombine.low %v264_v13, %v272_v14  ;;  %v2367_v26 = vcombine.low %v265_v15, %v273_v16  ;;  %v392_v14 = vld [vmem:[%s2758_s16 + $0x4a0] sm:$0xff] }
  0x7c   : > { %v2384_v28 = vcombine.high %v281_v23, %v289_v24  ;;  %v400_v15 = vld [vmem:[%s2758_s16 + $0x4e0] sm:$0xff]  ;;  %v393_v16 = vld [vmem:[%s2758_s16 + $0x4a8] sm:$0xff] }
  0x7e   : > { %1897 = vmatpush1.bf16.msra.mxu0 %v2505_v31  ;;  %1940 = vmatpush1.bf16.msra.mxu1 %v2507_v32  ;;  %v297_v31 = vld [vmem:[%s2758_s16 + $0x1a8] sm:$0xff] }
  0x7f   : > { %1898 = vmatprep.subr.bf16.mxu0 %v2522_v33  ;;  %1941 = vmatprep.subr.bf16.mxu1 %v2524_v34  ;;  %v305_v32 = vld [vmem:[%s2758_s16 + $0x1e8] sm:$0xff]  ;;  %v2381_v33 = vcombine.low %v280_v21, %v288_v22  ;;  %v2383_v34 = vcombine.low %v281_v23, %v289_v24  ;;  %v408_v22 = vld [vmem:[%s2758_s16 + $0x520] sm:$0xff] }
  0x80   : > { %v2400_v36 = vcombine.high %v297_v31, %v305_v32  ;;  %v416_v23 = vld [vmem:[%s2758_s16 + $0x560] sm:$0xff]  ;;  %v409_v24 = vld [vmem:[%s2758_s16 + $0x528] sm:$0xff] }
  0x82   : > { %1899 = vmatpush1.bf16.msra.mxu0 %v2521_v39  ;;  %1942 = vmatpush1.bf16.msra.mxu1 %v2523_v40  ;;  %v313_v39 = vld [vmem:[%s2758_s16 + $0x228] sm:$0xff] }
  0x83   : > { %1900 = vmatprep.subr.bf16.mxu0 %v2538_v41  ;;  %1943 = vmatprep.subr.bf16.mxu1 %v2540_v42  ;;  %v321_v40 = vld [vmem:[%s2758_s16 + $0x268] sm:$0xff]  ;;  %v2397_v41 = vcombine.low %v296_v29, %v304_v30  ;;  %v2414_v42 = vcombine.high %v312_v37, %v320_v38  ;;  %v424_v30 = vld [vmem:[%s2758_s16 + $0x5a0] sm:$0xff] }
  0x84   : > { %v2416_v43 = vcombine.high %v313_v39, %v321_v40 }
  0x86   : > { %1901 = vmatpush1.bf16.msra.mxu0 %v2537_v47  ;;  %1944 = vmatpush1.bf16.msra.mxu1 %v2539_v48  ;;  %v337_v47 = vld [vmem:[%s2758_s16 + $0x2e8] sm:$0xff]  ;;  %v2413_v48 = vcombine.low %v312_v37, %v320_v38  ;;  %v440_v38 = vld [vmem:[%s2758_s16 + $0x620] sm:$0xff] }
  0x87   : > { %1902 = vmatprep.subr.bf16.mxu0 %v2554_v49  ;;  %1945 = vmatprep.subr.bf16.mxu1 %v2556_v50  ;;  %v2415_v49 = vcombine.low %v313_v39, %v321_v40  ;;  %v2430_v50 = vcombine.high %v328_v44, %v336_v45  ;;  %v2432_v51 = vcombine.high %v329_v46, %v337_v47  ;;  %v448_v39 = vld [vmem:[%s2758_s16 + $0x660] sm:$0xff]  ;;  %v441_v40 = vld [vmem:[%s2758_s16 + $0x628] sm:$0xff] }
  0x8a   : > { %1903 = vmatpush1.bf16.msra.mxu0 %v2553_v55  ;;  %1946 = vmatpush1.bf16.msra.mxu1 %v2555_v57  ;;  %v353_v55 = vld [vmem:[%s2758_s16 + $0x368] sm:$0xff]  ;;  %v2429_v57 = vcombine.low %v328_v44, %v336_v45  ;;  %v456_v45 = vld [vmem:[%s2758_s16 + $0x6a0] sm:$0xff] }
  0x8b   : > { %1904 = vmatprep.subr.bf16.mxu0 %v2570_v58  ;;  %1947 = vmatprep.subr.bf16.mxu1 %v2572_v59  ;;  %v2431_v58 = vcombine.low %v329_v46, %v337_v47  ;;  %v2446_v59 = vcombine.high %v344_v52, %v352_v53  ;;  %v2448_v60 = vcombine.high %v345_v54, %v353_v55  ;;  %v464_v46 = vld [vmem:[%s2758_s16 + $0x6e0] sm:$0xff]  ;;  %v457_v47 = vld [vmem:[%s2758_s16 + $0x6a8] sm:$0xff] }
  0x8e   : > { %1905 = vmatpush1.bf16.msra.mxu0 %v2569_v0  ;;  %1948 = vmatpush1.bf16.msra.mxu1 %v2571_v1  ;;  %v369_v0 = vld [vmem:[%s2758_s16 + $0x3e8] sm:$0xff]  ;;  %v2445_v1 = vcombine.low %v344_v52, %v352_v53  ;;  %v472_v53 = vld [vmem:[%s2758_s16 + $0x720] sm:$0xff] }
  0x8f   : > { %1906 = vmatprep.subr.bf16.mxu0 %v2586_v2  ;;  %1949 = vmatprep.subr.bf16.mxu1 %v2588_v3  ;;  %v2447_v2 = vcombine.low %v345_v54, %v353_v55  ;;  %v2462_v3 = vcombine.high %v360_v61, %v368_v62  ;;  %v2464_v4 = vcombine.high %v361_v63, %v369_v0  ;;  %v480_v54 = vld [vmem:[%s2758_s16 + $0x760] sm:$0xff]  ;;  %v473_v55 = vld [vmem:[%s2758_s16 + $0x728] sm:$0xff] }
  0x92   : > { %1907 = vmatpush1.bf16.msra.mxu0 %v2585_v8  ;;  %1950 = vmatpush1.bf16.msra.mxu1 %v2587_v9  ;;  %v385_v8 = vld [vmem:[%s2758_s16 + $0x468] sm:$0xff]  ;;  %v2461_v9 = vcombine.low %v360_v61, %v368_v62  ;;  %v488_v62 = vld [vmem:[%s2758_s16 + $0x7a0] sm:$0xff] }
  0x93   : > { %1962 = vmatprep.subr.bf16.mxu0 %v2350_v11  ;;  %2005 = vmatprep.subr.bf16.mxu1 %v2352_v12  ;;  %v2463_v11 = vcombine.low %v361_v63, %v369_v0  ;;  %v2478_v12 = vcombine.high %v376_v5, %v384_v6  ;;  %v2480_v13 = vcombine.high %v377_v7, %v385_v8  ;;  %v496_v63 = vld [vmem:[%s2758_s16 + $0x7e0] sm:$0xff]  ;;  %v489_v0 = vld [vmem:[%s2758_s16 + $0x7a8] sm:$0xff] }
  0x95   : > { %1909 = vmatmul.mubr.bf16.vlgmr.msra.gmra.mrb[4].mxu0 %v2842_v10  ;;  %1952 = vmatmul.mubr.bf16.vlgmr.msra.gmra.mrb[4].mxu1 %v2842_v10 }
  0x96   : > { %1963 = vmatpush1.bf16.msra.mxu0 %v2349_v17  ;;  %2006 = vmatpush1.bf16.msra.mxu1 %v2351_v18  ;;  %v401_v17 = vld [vmem:[%s2758_s16 + $0x4e8] sm:$0xff]  ;;  %v2477_v18 = vcombine.low %v376_v5, %v384_v6  ;;  %v250_v6 = vld [vmem:[%s2758_s16 + $0x30] sm:$0xff] }
  0x97   : > { %1964 = vmatprep.subr.bf16.mxu0 %v2366_v19  ;;  %2007 = vmatprep.subr.bf16.mxu1 %v2368_v20  ;;  %v2479_v19 = vcombine.low %v377_v7, %v385_v8  ;;  %v2494_v20 = vcombine.high %v392_v14, %v400_v15  ;;  %v2496_v21 = vcombine.high %v393_v16, %v401_v17  ;;  %v258_v7 = vld [vmem:[%s2758_s16 + $0x70] sm:$0xff]  ;;  %v251_v8 = vld [vmem:[%s2758_s16 + $0x38] sm:$0xff] }
  0x98   : > { %1994 = vmatprep.mubr.bf16.mxu0 %v2797_v56  ;;  %2037 = vmatprep.mubr.bf16.mxu1 %v2797_v56  ;;  %v2399_v56 = vcombine.low %v297_v31, %v305_v32  ;;  %v432_v31 = vld [vmem:[%s2758_s16 + $0x5e0] sm:$0xff]  ;;  %v425_v32 = vld [vmem:[%s2758_s16 + $0x5a8] sm:$0xff] }
  0x9a   : > { %1965 = vmatpush1.bf16.msra.mxu0 %v2365_v25  ;;  %2008 = vmatpush1.bf16.msra.mxu1 %v2367_v26  ;;  %v417_v25 = vld [vmem:[%s2758_s16 + $0x568] sm:$0xff]  ;;  %v2493_v26 = vcombine.low %v392_v14, %v400_v15  ;;  %v266_v15 = vld [vmem:[%s2758_s16 + $0xb0] sm:$0xff] }
  0x9b   : > { %1966 = vmatprep.subr.bf16.mxu0 %v2382_v27  ;;  %2009 = vmatprep.subr.bf16.mxu1 %v2384_v28  ;;  %v2495_v27 = vcombine.low %v393_v16, %v401_v17  ;;  %v2510_v28 = vcombine.high %v408_v22, %v416_v23  ;;  %v2512_v29 = vcombine.high %v409_v24, %v417_v25  ;;  %v274_v16 = vld [vmem:[%s2758_s16 + $0xf0] sm:$0xff]  ;;  %v267_v17 = vld [vmem:[%s2758_s16 + $0xb8] sm:$0xff] }
  0x9e   : > { %1967 = vmatpush1.bf16.msra.mxu0 %v2381_v33  ;;  %2010 = vmatpush1.bf16.msra.mxu1 %v2383_v34  ;;  %v433_v33 = vld [vmem:[%s2758_s16 + $0x5e8] sm:$0xff]  ;;  %v2509_v34 = vcombine.low %v408_v22, %v416_v23  ;;  %v282_v23 = vld [vmem:[%s2758_s16 + $0x130] sm:$0xff] }
  0x9f   : > { %1968 = vmatprep.subr.bf16.mxu0 %v2398_v35  ;;  %2011 = vmatprep.subr.bf16.mxu1 %v2400_v36  ;;  %v2511_v35 = vcombine.low %v409_v24, %v417_v25  ;;  %v2526_v36 = vcombine.high %v424_v30, %v432_v31  ;;  %v2528_v37 = vcombine.high %v425_v32, %v433_v33  ;;  %v290_v24 = vld [vmem:[%s2758_s16 + $0x170] sm:$0xff]  ;;  %v283_v25 = vld [vmem:[%s2758_s16 + $0x138] sm:$0xff] }
  0xa2   : > { %1969 = vmatpush1.bf16.msra.mxu0 %v2397_v41  ;;  %2012 = vmatpush1.bf16.msra.mxu1 %v2399_v56  ;;  %v449_v41 = vld [vmem:[%s2758_s16 + $0x668] sm:$0xff]  ;;  %v2525_v56 = vcombine.low %v424_v30, %v432_v31  ;;  %v298_v31 = vld [vmem:[%s2758_s16 + $0x1b0] sm:$0xff] }
  0xa3   : > { %1970 = vmatprep.subr.bf16.mxu0 %v2414_v42  ;;  %2013 = vmatprep.subr.bf16.mxu1 %v2416_v43  ;;  %v2527_v42 = vcombine.low %v425_v32, %v433_v33  ;;  %v2542_v43 = vcombine.high %v440_v38, %v448_v39  ;;  %v2544_v44 = vcombine.high %v441_v40, %v449_v41  ;;  %v306_v32 = vld [vmem:[%s2758_s16 + $0x1f0] sm:$0xff]  ;;  %v2693_v33 = vld [vmem:[%s2792_s20 + $0x4] ss:$8 sps:$4 sm:$0xff]  }
  0xa6   : > { %1971 = vmatpush1.bf16.msra.mxu0 %v2413_v48  ;;  %2014 = vmatpush1.bf16.msra.mxu1 %v2415_v49  ;;  %v465_v48 = vld [vmem:[%s2758_s16 + $0x6e8] sm:$0xff]  ;;  %v2541_v49 = vcombine.low %v440_v38, %v448_v39  ;;  %v314_v39 = vld [vmem:[%s2758_s16 + $0x230] sm:$0xff] }
  0xa7   : > { %1972 = vmatprep.subr.bf16.mxu0 %v2430_v50  ;;  %2015 = vmatprep.subr.bf16.mxu1 %v2432_v51  ;;  %v2543_v50 = vcombine.low %v441_v40, %v449_v41  ;;  %v2558_v51 = vcombine.high %v456_v45, %v464_v46  ;;  %v2560_v52 = vcombine.high %v457_v47, %v465_v48  ;;  %v322_v40 = vld [vmem:[%s2758_s16 + $0x270] sm:$0xff]  ;;  %v315_v41 = vld [vmem:[%s2758_s16 + $0x238] sm:$0xff] }
  0xaa   : > { %1973 = vmatpush1.bf16.msra.mxu0 %v2429_v57  ;;  %2016 = vmatpush1.bf16.msra.mxu1 %v2431_v58  ;;  %v481_v57 = vld [vmem:[%s2758_s16 + $0x768] sm:$0xff]  ;;  %v2557_v58 = vcombine.low %v456_v45, %v464_v46  ;;  %v330_v46 = vld [vmem:[%s2758_s16 + $0x2b0] sm:$0xff] }
  0xab   : > { %1974 = vmatprep.subr.bf16.mxu0 %v2446_v59  ;;  %2017 = vmatprep.subr.bf16.mxu1 %v2448_v60  ;;  %v2559_v59 = vcombine.low %v457_v47, %v465_v48  ;;  %v2574_v60 = vcombine.high %v472_v53, %v480_v54  ;;  %v2576_v61 = vcombine.high %v473_v55, %v481_v57  ;;  %v338_v47 = vld [vmem:[%s2758_s16 + $0x2f0] sm:$0xff]  ;;  %v331_v48 = vld [vmem:[%s2758_s16 + $0x2b8] sm:$0xff] }
  0xae   : > { %1975 = vmatpush1.bf16.msra.mxu0 %v2445_v1  ;;  %2018 = vmatpush1.bf16.msra.mxu1 %v2447_v2  ;;  %v497_v1 = vld [vmem:[%s2758_s16 + $0x7e8] sm:$0xff]  ;;  %v2573_v2 = vcombine.low %v472_v53, %v480_v54  ;;  %v346_v54 = vld [vmem:[%s2758_s16 + $0x330] sm:$0xff] }
  0xaf   : > { %1976 = vmatprep.subr.bf16.mxu0 %v2462_v3  ;;  %2019 = vmatprep.subr.bf16.mxu1 %v2464_v4  ;;  %v2575_v3 = vcombine.low %v473_v55, %v481_v57  ;;  %v2590_v4 = vcombine.high %v488_v62, %v496_v63  ;;  %v2592_v5 = vcombine.high %v489_v0, %v497_v1  ;;  %v354_v55 = vld [vmem:[%s2758_s16 + $0x370] sm:$0xff]  ;;  %v347_v57 = vld [vmem:[%s2758_s16 + $0x338] sm:$0xff] }
  0xb2   : > { %1977 = vmatpush1.bf16.msra.mxu0 %v2461_v9  ;;  %2020 = vmatpush1.bf16.msra.mxu1 %v2463_v11  ;;  %v259_v9 = vld [vmem:[%s2758_s16 + $0x78] sm:$0xff]  ;;  %v2589_v11 = vcombine.low %v488_v62, %v496_v63  ;;  %v362_v63 = vld [vmem:[%s2758_s16 + $0x3b0] sm:$0xff] }
  0xb3   : > { %1978 = vmatprep.subr.bf16.mxu0 %v2478_v12  ;;  %2021 = vmatprep.subr.bf16.mxu1 %v2480_v13  ;;  %v2591_v12 = vcombine.low %v489_v0, %v497_v1  ;;  %v2354_v13 = vcombine.high %v250_v6, %v258_v7  ;;  %v2356_v14 = vcombine.high %v251_v8, %v259_v9  ;;  %v370_v0 = vld [vmem:[%s2758_s16 + $0x3f0] sm:$0xff]  ;;  %v363_v1 = vld [vmem:[%s2758_s16 + $0x3b8] sm:$0xff] }
  0xb6   : > { %1979 = vmatpush1.bf16.msra.mxu0 %v2477_v18  ;;  %2022 = vmatpush1.bf16.msra.mxu1 %v2479_v19  ;;  %v275_v18 = vld [vmem:[%s2758_s16 + $0xf8] sm:$0xff]  ;;  %v2353_v19 = vcombine.low %v250_v6, %v258_v7  ;;  %v378_v7 = vld [vmem:[%s2758_s16 + $0x430] sm:$0xff] }
  0xb7   : > { %1980 = vmatprep.subr.bf16.mxu0 %v2494_v20  ;;  %2023 = vmatprep.subr.bf16.mxu1 %v2496_v21  ;;  %v2355_v20 = vcombine.low %v251_v8, %v259_v9  ;;  %v2370_v21 = vcombine.high %v266_v15, %v274_v16  ;;  %v2372_v22 = vcombine.high %v267_v17, %v275_v18  ;;  %v386_v8 = vld [vmem:[%s2758_s16 + $0x470] sm:$0xff]  ;;  %v379_v9 = vld [vmem:[%s2758_s16 + $0x438] sm:$0xff] }
  0xba   : > { %1981 = vmatpush1.bf16.msra.mxu0 %v2493_v26  ;;  %2024 = vmatpush1.bf16.msra.mxu1 %v2495_v27  ;;  %v291_v26 = vld [vmem:[%s2758_s16 + $0x178] sm:$0xff]  ;;  %v2369_v27 = vcombine.low %v266_v15, %v274_v16  ;;  %v394_v16 = vld [vmem:[%s2758_s16 + $0x4b0] sm:$0xff] }
  0xbb   : > { %1982 = vmatprep.subr.bf16.mxu0 %v2510_v28  ;;  %2025 = vmatprep.subr.bf16.mxu1 %v2512_v29  ;;  %v2371_v28 = vcombine.low %v267_v17, %v275_v18  ;;  %v2386_v29 = vcombine.high %v282_v23, %v290_v24  ;;  %v2388_v30 = vcombine.high %v283_v25, %v291_v26  ;;  %v402_v17 = vld [vmem:[%s2758_s16 + $0x4f0] sm:$0xff]  ;;  %v395_v18 = vld [vmem:[%s2758_s16 + $0x4b8] sm:$0xff] }
  0xbe   : > { %1983 = vmatpush1.bf16.msra.mxu0 %v2509_v34  ;;  %2026 = vmatpush1.bf16.msra.mxu1 %v2511_v35  ;;  %v299_v34 = vld [vmem:[%s2758_s16 + $0x1b8] sm:$0xff] }
  0xbf   : > { %1984 = vmatprep.subr.bf16.mxu0 %v2526_v36  ;;  %2027 = vmatprep.subr.bf16.mxu1 %v2528_v37  ;;  %v307_v35 = vld [vmem:[%s2758_s16 + $0x1f8] sm:$0xff]  ;;  %v2387_v36 = vcombine.low %v283_v25, %v291_v26  ;;  %v2402_v37 = vcombine.high %v298_v31, %v306_v32  ;;  %v418_v25 = vld [vmem:[%s2758_s16 + $0x570] sm:$0xff] }
  0xc0   : > { %v2404_v38 = vcombine.high %v299_v34, %v307_v35  ;;  %v411_v26 = vld [vmem:[%s2758_s16 + $0x538] sm:$0xff] }
  0xc2   : > { %1985 = vmatpush1.bf16.msra.mxu0 %v2525_v56  ;;  %2028 = vmatpush1.bf16.msra.mxu1 %v2527_v42  ;;  %v323_v56 = vld [vmem:[%s2758_s16 + $0x278] sm:$0xff]  ;;  %v2401_v42 = vcombine.low %v298_v31, %v306_v32  ;;  %v426_v32 = vld [vmem:[%s2758_s16 + $0x5b0] sm:$0xff] }
  0xc3   : > { %1986 = vmatprep.subr.bf16.mxu0 %v2542_v43  ;;  %2029 = vmatprep.subr.bf16.mxu1 %v2544_v44  ;;  %v2403_v43 = vcombine.low %v299_v34, %v307_v35  ;;  %v2418_v44 = vcombine.high %v314_v39, %v322_v40  ;;  %v2420_v45 = vcombine.high %v315_v41, %v323_v56  ;;  %v427_v34 = vld [vmem:[%s2758_s16 + $0x5b8] sm:$0xff] }
  0xc4   : > { %v435_v35 = vld [vmem:[%s2758_s16 + $0x5f8] sm:$0xff] }
  0xc6   : > { %1987 = vmatpush1.bf16.msra.mxu0 %v2541_v49  ;;  %2030 = vmatpush1.bf16.msra.mxu1 %v2543_v50  ;;  %v339_v49 = vld [vmem:[%s2758_s16 + $0x2f8] sm:$0xff]  ;;  %v2417_v50 = vcombine.low %v314_v39, %v322_v40  ;;  %v442_v39 = vld [vmem:[%s2758_s16 + $0x630] sm:$0xff] }
  0xc7   : > { %1988 = vmatprep.subr.bf16.mxu0 %v2558_v51  ;;  %2031 = vmatprep.subr.bf16.mxu1 %v2560_v52  ;;  %v2419_v51 = vcombine.low %v315_v41, %v323_v56  ;;  %v2434_v52 = vcombine.high %v330_v46, %v338_v47  ;;  %v2436_v53 = vcombine.high %v331_v48, %v339_v49  ;;  %v450_v40 = vld [vmem:[%s2758_s16 + $0x670] sm:$0xff]  ;;  %v443_v41 = vld [vmem:[%s2758_s16 + $0x638] sm:$0xff] }
  0xc8   : > { %v451_v56 = vld [vmem:[%s2758_s16 + $0x678] sm:$0xff] }
  0xca   : > { %1989 = vmatpush1.bf16.msra.mxu0 %v2557_v58  ;;  %2032 = vmatpush1.bf16.msra.mxu1 %v2559_v59  ;;  %v355_v58 = vld [vmem:[%s2758_s16 + $0x378] sm:$0xff]  ;;  %v2433_v59 = vcombine.low %v330_v46, %v338_v47  ;;  %v458_v46 = vld [vmem:[%s2758_s16 + $0x6b0] sm:$0xff] }
  0xcb   : > { %1990 = vmatprep.subr.bf16.mxu0 %v2574_v60  ;;  %2033 = vmatprep.subr.bf16.mxu1 %v2576_v61  ;;  %v2435_v60 = vcombine.low %v331_v48, %v339_v49  ;;  %v2450_v61 = vcombine.high %v346_v54, %v354_v55  ;;  %v2452_v62 = vcombine.high %v347_v57, %v355_v58  ;;  %v466_v47 = vld [vmem:[%s2758_s16 + $0x6f0] sm:$0xff]  ;;  %v459_v48 = vld [vmem:[%s2758_s16 + $0x6b8] sm:$0xff] }
  0xcc   : > { %v467_v49 = vld [vmem:[%s2758_s16 + $0x6f8] sm:$0xff] }
  0xce   : > { %1991 = vmatpush1.bf16.msra.mxu0 %v2573_v2  ;;  %2034 = vmatpush1.bf16.msra.mxu1 %v2575_v3  ;;  %v371_v2 = vld [vmem:[%s2758_s16 + $0x3f8] sm:$0xff]  ;;  %v2449_v3 = vcombine.low %v346_v54, %v354_v55  ;;  %v474_v54 = vld [vmem:[%s2758_s16 + $0x730] sm:$0xff] }
  0xcf   : > { %1992 = vmatprep.subr.bf16.mxu0 %v2590_v4  ;;  %2035 = vmatprep.subr.bf16.mxu1 %v2592_v5  ;;  %v2451_v4 = vcombine.low %v347_v57, %v355_v58  ;;  %v2466_v5 = vcombine.high %v362_v63, %v370_v0  ;;  %v2468_v6 = vcombine.high %v363_v1, %v371_v2  ;;  %v482_v55 = vld [vmem:[%s2758_s16 + $0x770] sm:$0xff]  ;;  %v475_v57 = vld [vmem:[%s2758_s16 + $0x738] sm:$0xff] }
  0xd0   : > { %v483_v58 = vld [vmem:[%s2758_s16 + $0x778] sm:$0xff] }
  0xd2   : > { %1993 = vmatpush1.bf16.msra.mxu0 %v2589_v11  ;;  %2036 = vmatpush1.bf16.msra.mxu1 %v2591_v12  ;;  %v387_v11 = vld [vmem:[%s2758_s16 + $0x478] sm:$0xff]  ;;  %v2465_v12 = vcombine.low %v362_v63, %v370_v0  ;;  %v490_v63 = vld [vmem:[%s2758_s16 + $0x7b0] sm:$0xff] }
  0xd3   : > { %2048 = vmatprep.subr.bf16.mxu0 %v2354_v13  ;;  %2091 = vmatprep.subr.bf16.mxu1 %v2356_v14  ;;  %v2467_v13 = vcombine.low %v363_v1, %v371_v2  ;;  %v2482_v14 = vcombine.high %v378_v7, %v386_v8  ;;  %v2484_v15 = vcombine.high %v379_v9, %v387_v11  ;;  %v498_v0 = vld [vmem:[%s2758_s16 + $0x7f0] sm:$0xff]  ;;  %v491_v1 = vld [vmem:[%s2758_s16 + $0x7b8] sm:$0xff] }
  0xd4   : > { %v499_v2 = vld [vmem:[%s2758_s16 + $0x7f8] sm:$0xff] }
  0xd5   : > { %1995 = vmatmul.mubr.bf16.vlgmr.msra.gmra.mrb[8].mxu0 %v2842_v10  ;;  %2038 = vmatmul.mubr.bf16.vlgmr.msra.gmra.mrb[8].mxu1 %v2842_v10  ;;  %v2385_v10 = vcombine.low %v282_v23, %v290_v24  ;;  %v410_v24 = vld [vmem:[%s2758_s16 + $0x530] sm:$0xff] }
  0xd6   : > { %2049 = vmatpush1.bf16.msra.mxu0 %v2353_v19  ;;  %2092 = vmatpush1.bf16.msra.mxu1 %v2355_v20  ;;  %v403_v19 = vld [vmem:[%s2758_s16 + $0x4f8] sm:$0xff]  ;;  %v2481_v20 = vcombine.low %v378_v7, %v386_v8  ;;  %v2593_v7 = vcombine.low %v490_v63, %v498_v0  ;;  %v2595_v8 = vcombine.low %v491_v1, %v499_v2 }
  0xd7   : > { %2050 = vmatprep.subr.bf16.mxu0 %v2370_v21  ;;  %2093 = vmatprep.subr.bf16.mxu1 %v2372_v22  ;;  %v2483_v21 = vcombine.low %v379_v9, %v387_v11  ;;  %v2498_v22 = vcombine.high %v394_v16, %v402_v17  ;;  %v2500_v23 = vcombine.high %v395_v18, %v403_v19  ;;  %v2694_v9 = vld [vmem:[%s2792_s20] ss:$8 sps:$4 sm:$0xff]  }
  0xd8   : > { %2080 = vmatprep.mubr.bf16.mxu0 %v2693_v33  ;;  %2123 = vmatprep.mubr.bf16.mxu1 %v2693_v33  ;;  %v434_v33 = vld [vmem:[%s2758_s16 + $0x5f0] sm:$0xff] }
  0xda   : > { %2051 = vmatpush1.bf16.msra.mxu0 %v2369_v27  ;;  %2094 = vmatpush1.bf16.msra.mxu1 %v2371_v28  ;;  %v419_v27 = vld [vmem:[%s2758_s16 + $0x578] sm:$0xff]  ;;  %v2497_v28 = vcombine.low %v394_v16, %v402_v17 }
  0xdb   : > { %2052 = vmatprep.subr.bf16.mxu0 %v2386_v29  ;;  %2095 = vmatprep.subr.bf16.mxu1 %v2388_v30  ;;  %v2499_v29 = vcombine.low %v395_v18, %v403_v19  ;;  %v2514_v30 = vcombine.high %v410_v24, %v418_v25  ;;  %v2516_v31 = vcombine.high %v411_v26, %v419_v27 }
  0xde   : > { %2053 = vmatpush1.bf16.msra.mxu0 %v2385_v10  ;;  %2096 = vmatpush1.bf16.msra.mxu1 %v2387_v36  ;;  %v2513_v10 = vcombine.low %v410_v24, %v418_v25  ;;  %v2515_v36 = vcombine.low %v411_v26, %v419_v27 }
  0xdf   : > { %2054 = vmatprep.subr.bf16.mxu0 %v2402_v37  ;;  %2097 = vmatprep.subr.bf16.mxu1 %v2404_v38  ;;  %v2530_v37 = vcombine.high %v426_v32, %v434_v33  ;;  %v2532_v38 = vcombine.high %v427_v34, %v435_v35 }
  0xe2   : > { %2055 = vmatpush1.bf16.msra.mxu0 %v2401_v42  ;;  %2098 = vmatpush1.bf16.msra.mxu1 %v2403_v43  ;;  %v2529_v42 = vcombine.low %v426_v32, %v434_v33  ;;  %v2531_v43 = vcombine.low %v427_v34, %v435_v35 }
  0xe3   : > { %2056 = vmatprep.subr.bf16.mxu0 %v2418_v44  ;;  %2099 = vmatprep.subr.bf16.mxu1 %v2420_v45  ;;  %v2546_v44 = vcombine.high %v442_v39, %v450_v40  ;;  %v2548_v45 = vcombine.high %v443_v41, %v451_v56 }
  0xe6   : > { %2057 = vmatpush1.bf16.msra.mxu0 %v2417_v50  ;;  %2100 = vmatpush1.bf16.msra.mxu1 %v2419_v51  ;;  %v2545_v50 = vcombine.low %v442_v39, %v450_v40  ;;  %v2547_v51 = vcombine.low %v443_v41, %v451_v56 }
  0xe7   : > { %2058 = vmatprep.subr.bf16.mxu0 %v2434_v52  ;;  %2101 = vmatprep.subr.bf16.mxu1 %v2436_v53  ;;  %v2562_v52 = vcombine.high %v458_v46, %v466_v47  ;;  %v2564_v53 = vcombine.high %v459_v48, %v467_v49 }
  0xea   : > { %2059 = vmatpush1.bf16.msra.mxu0 %v2433_v59  ;;  %2102 = vmatpush1.bf16.msra.mxu1 %v2435_v60  ;;  %v2561_v59 = vcombine.low %v458_v46, %v466_v47  ;;  %v2563_v60 = vcombine.low %v459_v48, %v467_v49 }
  0xeb   : > { %2060 = vmatprep.subr.bf16.mxu0 %v2450_v61  ;;  %2103 = vmatprep.subr.bf16.mxu1 %v2452_v62  ;;  %v2578_v61 = vcombine.high %v474_v54, %v482_v55  ;;  %v2580_v62 = vcombine.high %v475_v57, %v483_v58 }
  0xee   : > { %2061 = vmatpush1.bf16.msra.mxu0 %v2449_v3  ;;  %2104 = vmatpush1.bf16.msra.mxu1 %v2451_v4  ;;  %v2577_v3 = vcombine.low %v474_v54, %v482_v55  ;;  %v2579_v4 = vcombine.low %v475_v57, %v483_v58 }
  0xef   : > { %2062 = vmatprep.subr.bf16.mxu0 %v2466_v5  ;;  %2105 = vmatprep.subr.bf16.mxu1 %v2468_v6  ;;  %v2594_v5 = vcombine.high %v490_v63, %v498_v0  ;;  %v2596_v6 = vcombine.high %v491_v1, %v499_v2 }
  0xf2   : > { %2063 = vmatpush1.bf16.msra.mxu0 %v2465_v12  ;;  %2106 = vmatpush1.bf16.msra.mxu1 %v2467_v13 }
  0xf3   : > { %2064 = vmatprep.subr.bf16.mxu0 %v2482_v14  ;;  %2107 = vmatprep.subr.bf16.mxu1 %v2484_v15 }
  0xf6   : > { %2065 = vmatpush1.bf16.msra.mxu0 %v2481_v20  ;;  %2108 = vmatpush1.bf16.msra.mxu1 %v2483_v21 }
  0xf7   : > { %2066 = vmatprep.subr.bf16.mxu0 %v2498_v22  ;;  %2109 = vmatprep.subr.bf16.mxu1 %v2500_v23 }
  0xfa   : > { %2067 = vmatpush1.bf16.msra.mxu0 %v2497_v28  ;;  %2110 = vmatpush1.bf16.msra.mxu1 %v2499_v29 }
  0xfb   : > { %2068 = vmatprep.subr.bf16.mxu0 %v2514_v30  ;;  %2111 = vmatprep.subr.bf16.mxu1 %v2516_v31 }
  0xfe   : > { %2069 = vmatpush1.bf16.msra.mxu0 %v2513_v10  ;;  %2112 = vmatpush1.bf16.msra.mxu1 %v2515_v36 }
  0xff   : > { %2070 = vmatprep.subr.bf16.mxu0 %v2530_v37  ;;  %2113 = vmatprep.subr.bf16.mxu1 %v2532_v38 }
 0x102   : > { %2071 = vmatpush1.bf16.msra.mxu0 %v2529_v42  ;;  %2114 = vmatpush1.bf16.msra.mxu1 %v2531_v43 }
 0x103   : > { %2072 = vmatprep.subr.bf16.mxu0 %v2546_v44  ;;  %2115 = vmatprep.subr.bf16.mxu1 %v2548_v45 }
 0x106   : > { %2073 = vmatpush1.bf16.msra.mxu0 %v2545_v50  ;;  %2116 = vmatpush1.bf16.msra.mxu1 %v2547_v51 }
 0x107   : > { %2074 = vmatprep.subr.bf16.mxu0 %v2562_v52  ;;  %2117 = vmatprep.subr.bf16.mxu1 %v2564_v53 }
 0x10a   : > { %2075 = vmatpush1.bf16.msra.mxu0 %v2561_v59  ;;  %2118 = vmatpush1.bf16.msra.mxu1 %v2563_v60 }
 0x10b   : > { %2076 = vmatprep.subr.bf16.mxu0 %v2578_v61  ;;  %2119 = vmatprep.subr.bf16.mxu1 %v2580_v62 }
 0x10e   : > { %2077 = vmatpush1.bf16.msra.mxu0 %v2577_v3  ;;  %2120 = vmatpush1.bf16.msra.mxu1 %v2579_v4 }
 0x10f   : > { %2078 = vmatprep.subr.bf16.mxu0 %v2594_v5  ;;  %2121 = vmatprep.subr.bf16.mxu1 %v2596_v6 }
 0x112   : > { %2079 = vmatpush1.bf16.msra.mxu0 %v2593_v7  ;;  %2122 = vmatpush1.bf16.msra.mxu1 %v2595_v8 }
 0x115   : > { %2081 = vmatmul.mubr.bf16.vlgmr.msra.gmra.mrb[12].mxu0 %v2694_v9  ;;  %2124 = vmatmul.mubr.bf16.vlgmr.msra.gmra.mrb[12].mxu1 %v2694_v9 }
 0x128   : > { %v1824_v11 = vpop.f32.mrb[0].mxu0  ;;  %v1867_v12 = vpop.f32.mrb[0].mxu1 }
 0x129   : > { %2629 = vtanh.f32 %v1824_v11  ;;  %v1826_v13 = vpop.f32.mrb[1].mxu0  ;;  %v1869_v14 = vpop.f32.mrb[1].mxu1 }
 0x12a   : > { %2631 = vtanh.f32 %v1867_v12  ;;  %v1828_v15 = vpop.f32.mrb[2].mxu0  ;;  %v1871_v16 = vpop.f32.mrb[2].mxu1 }
 0x12b   : > { %2633 = vtanh.f32 %v1826_v13  ;;  %v1830_v17 = vpop.f32.mrb[3].mxu0  ;;  %v1873_v18 = vpop.f32.mrb[3].mxu1 }
 0x12c   : > { %2635 = vtanh.f32 %v1869_v14 }
 0x12d   : > { %2637 = vtanh.f32 %v1828_v15 }
 0x12e   : > { %2639 = vtanh.f32 %v1871_v16 }
 0x12f   : > { %2641 = vtanh.f32 %v1830_v17 }
 0x130   : > { %2643 = vtanh.f32 %v1873_v18 }
 0x133   : > { %v2630_v19 = vpop.eup %2629 }
 0x134   : > { %v2632_v20 = vpop.eup %2631  ;;  %2166 = vst [vmem:[%s3046_s24] sm:$0xff] %v2630_v19 }
 0x135   : > { %v2634_v21 = vpop.eup %2633  ;;  %2168 = vst [vmem:[%s3046_s24 + $0x10] sm:$0xff] %v2632_v20 }
 0x136   : > { %v2636_v22 = vpop.eup %2635  ;;  %2167 = vst [vmem:[%s3046_s24 + $0x8] sm:$0xff] %v2634_v21 }
 0x137   : > { %v2638_v23 = vpop.eup %2637  ;;  %2169 = vst [vmem:[%s3046_s24 + $0x18] sm:$0xff] %v2636_v22 }
 0x138   : > { %v2640_v24 = vpop.eup %2639  ;;  %2182 = vst [vmem:[%s3046_s24 + $0x80] sm:$0xff] %v2638_v23 }
 0x139   : > { %v2642_v25 = vpop.eup %2641  ;;  %2184 = vst [vmem:[%s3046_s24 + $0x90] sm:$0xff] %v2640_v24 }
 0x13a   : > { %v2644_v26 = vpop.eup %2643  ;;  %2183 = vst [vmem:[%s3046_s24 + $0x88] sm:$0xff] %v2642_v25 }
 0x13b   : > { %2185 = vst [vmem:[%s3046_s24 + $0x98] sm:$0xff] %v2644_v26 }
 0x168   : > { %v1910_v27 = vpop.f32.mrb[4].mxu0  ;;  %v1953_v28 = vpop.f32.mrb[4].mxu1 }
 0x169   : > { %2645 = vtanh.f32 %v1910_v27  ;;  %v1912_v29 = vpop.f32.mrb[5].mxu0  ;;  %v1955_v30 = vpop.f32.mrb[5].mxu1 }
 0x16a   : > { %2647 = vtanh.f32 %v1953_v28  ;;  %v1914_v31 = vpop.f32.mrb[6].mxu0  ;;  %v1957_v32 = vpop.f32.mrb[6].mxu1 }
 0x16b   : > { %2649 = vtanh.f32 %v1912_v29  ;;  %v1916_v33 = vpop.f32.mrb[7].mxu0  ;;  %v1959_v34 = vpop.f32.mrb[7].mxu1 }
 0x16c   : > { %2651 = vtanh.f32 %v1955_v30 }
 0x16d   : > { %2653 = vtanh.f32 %v1914_v31 }
 0x16e   : > { %2655 = vtanh.f32 %v1957_v32 }
 0x16f   : > { %2657 = vtanh.f32 %v1916_v33 }
 0x170   : > { %2659 = vtanh.f32 %v1959_v34 }
 0x173   : > { %v2646_v35 = vpop.eup %2645 }
 0x174   : > { %v2648_v10 = vpop.eup %2647  ;;  %2170 = vst [vmem:[%s3046_s24 + $0x20] sm:$0xff] %v2646_v35 }
 0x175   : > { %v2650_v36 = vpop.eup %2649  ;;  %2172 = vst [vmem:[%s3046_s24 + $0x30] sm:$0xff] %v2648_v10 }
 0x176   : > { %v2652_v37 = vpop.eup %2651  ;;  %2171 = vst [vmem:[%s3046_s24 + $0x28] sm:$0xff] %v2650_v36 }
 0x177   : > { %v2654_v38 = vpop.eup %2653  ;;  %2173 = vst [vmem:[%s3046_s24 + $0x38] sm:$0xff] %v2652_v37 }
 0x178   : > { %v2656_v39 = vpop.eup %2655  ;;  %2186 = vst [vmem:[%s3046_s24 + $0xa0] sm:$0xff] %v2654_v38 }
 0x179   : > { %v2658_v40 = vpop.eup %2657  ;;  %2188 = vst [vmem:[%s3046_s24 + $0xb0] sm:$0xff] %v2656_v39 }
 0x17a   : > { %v2660_v41 = vpop.eup %2659  ;;  %2187 = vst [vmem:[%s3046_s24 + $0xa8] sm:$0xff] %v2658_v40 }
 0x17b   : > { %2189 = vst [vmem:[%s3046_s24 + $0xb8] sm:$0xff] %v2660_v41 }
 0x1a8   : > { %v1996_v56 = vpop.f32.mrb[8].mxu0  ;;  %v2039_v42 = vpop.f32.mrb[8].mxu1 }
 0x1a9   : > { %2661 = vtanh.f32 %v1996_v56  ;;  %v1998_v43 = vpop.f32.mrb[9].mxu0  ;;  %v2041_v44 = vpop.f32.mrb[9].mxu1 }
 0x1aa   : > { %2663 = vtanh.f32 %v2039_v42  ;;  %v2000_v45 = vpop.f32.mrb[10].mxu0  ;;  %v2043_v46 = vpop.f32.mrb[10].mxu1 }
 0x1ab   : > { %2665 = vtanh.f32 %v1998_v43  ;;  %v2002_v47 = vpop.f32.mrb[11].mxu0  ;;  %v2045_v48 = vpop.f32.mrb[11].mxu1 }
 0x1ac   : > { %2667 = vtanh.f32 %v2041_v44 }
 0x1ad   : > { %2669 = vtanh.f32 %v2000_v45 }
 0x1ae   : > { %2671 = vtanh.f32 %v2043_v46 }
 0x1af   : > { %2673 = vtanh.f32 %v2002_v47 }
 0x1b0   : > { %2675 = vtanh.f32 %v2045_v48 }
 0x1b3   : > { %v2662_v49 = vpop.eup %2661 }
 0x1b4   : > { %v2664_v50 = vpop.eup %2663  ;;  %2174 = vst [vmem:[%s3046_s24 + $0x40] sm:$0xff] %v2662_v49 }
 0x1b5   : > { %v2666_v51 = vpop.eup %2665  ;;  %2176 = vst [vmem:[%s3046_s24 + $0x50] sm:$0xff] %v2664_v50 }
 0x1b6   : > { %v2668_v52 = vpop.eup %2667  ;;  %2175 = vst [vmem:[%s3046_s24 + $0x48] sm:$0xff] %v2666_v51 }
 0x1b7   : > { %v2670_v53 = vpop.eup %2669  ;;  %2177 = vst [vmem:[%s3046_s24 + $0x58] sm:$0xff] %v2668_v52 }
 0x1b8   : > { %v2672_v54 = vpop.eup %2671  ;;  %2190 = vst [vmem:[%s3046_s24 + $0xc0] sm:$0xff] %v2670_v53 }
 0x1b9   : > { %v2674_v55 = vpop.eup %2673  ;;  %2192 = vst [vmem:[%s3046_s24 + $0xd0] sm:$0xff] %v2672_v54 }
 0x1ba   : > { %v2676_v57 = vpop.eup %2675  ;;  %2191 = vst [vmem:[%s3046_s24 + $0xc8] sm:$0xff] %v2674_v55 }
 0x1bb   : > { %2193 = vst [vmem:[%s3046_s24 + $0xd8] sm:$0xff] %v2676_v57 }
 0x1e8   : > { %v2082_v58 = vpop.f32.mrb[12].mxu0  ;;  %v2125_v59 = vpop.f32.mrb[12].mxu1 }
 0x1e9   : > { %2677 = vtanh.f32 %v2082_v58  ;;  %v2084_v60 = vpop.f32.mrb[13].mxu0  ;;  %v2127_v61 = vpop.f32.mrb[13].mxu1 }
 0x1ea   : > { %2679 = vtanh.f32 %v2125_v59  ;;  %v2086_v62 = vpop.f32.mrb[14].mxu0  ;;  %v2129_v63 = vpop.f32.mrb[14].mxu1 }
 0x1eb   : > { %2681 = vtanh.f32 %v2084_v60  ;;  %v2088_v0 = vpop.f32.mrb[15].mxu0  ;;  %v2131_v1 = vpop.f32.mrb[15].mxu1 }
 0x1ec   : > { %2683 = vtanh.f32 %v2127_v61 }
 0x1ed   : > { %2685 = vtanh.f32 %v2086_v62 }
 0x1ee   : > { %2687 = vtanh.f32 %v2129_v63 }
 0x1ef   : > { %2689 = vtanh.f32 %v2088_v0 }
 0x1f0   : > { %2691 = vtanh.f32 %v2131_v1 }
 0x1f3   : > { %v2678_v2 = vpop.eup %2677 }
 0x1f4   : > { %v2680_v3 = vpop.eup %2679  ;;  %2178 = vst [vmem:[%s3046_s24 + $0x60] sm:$0xff] %v2678_v2 }
 0x1f5   : > { %v2682_v4 = vpop.eup %2681  ;;  %2180 = vst [vmem:[%s3046_s24 + $0x70] sm:$0xff] %v2680_v3 }
 0x1f6   : > { %v2684_v5 = vpop.eup %2683  ;;  %2179 = vst [vmem:[%s3046_s24 + $0x68] sm:$0xff] %v2682_v4 }
 0x1f7   : > { %v2686_v6 = vpop.eup %2685  ;;  %2181 = vst [vmem:[%s3046_s24 + $0x78] sm:$0xff] %v2684_v5 }
 0x1f8   : > { %v2688_v7 = vpop.eup %2687  ;;  %2194 = vst [vmem:[%s3046_s24 + $0xe0] sm:$0xff] %v2686_v6 }
 0x1f9   : > { %v2690_v8 = vpop.eup %2689  ;;  %2196 = vst [vmem:[%s3046_s24 + $0xf0] sm:$0xff] %v2688_v7 }
 0x1fa   : > { %v2692_v9 = vpop.eup %2691  ;;  %2195 = vst [vmem:[%s3046_s24 + $0xe8] sm:$0xff] %v2690_v8 }
 0x1fb   : > { %2197 = vst [vmem:[%s3046_s24 + $0xf8] sm:$0xff] %v2692_v9 }
 0x1fc PF: > { %s12_s11 = sadd.s32 1, %s2717_s11   ;;  %s3092_s9 = smov %s2713_s10 }
 0x1fd   : > { %p9_p5 = scmp.ge.s32.totalorder %s12_s11, 6   ;;  %s3093_s10 = smov %s3095_s12 }
 0x1ff   :  { %11 = sbr.rel (!%p9_p5) target bundleno = 2 (0x2), region = 61 }

</bundles_post_ra>
